<compile_context>
chip_gen: v6e
topology: v6e:2x2x1
jax: 0.10.0
libtpu: 0.0.40
codegen_flags: <defaults>
</compile_context>

<pallas_src>
import functools

import jax
import jax.numpy as jnp
import numpy as np
from jax.experimental import pallas as pl
from jax.experimental.pallas import tpu as pltpu

_LANE = 128
_VMEM_LIMIT = 32 * 1024 * 1024     # safe on v5e/v6e (128 MiB) and v7x (64 MiB)
_DATA_DIM = 22                     # fixed by the spec: nn.Linear(22, 512)


# ---------------------------------------------------------------------------
# Kernel 1: conv1 (8x8/s4, stride-folded to a 2x2/s1 conv) + bias + ReLU.
# One MXU dot with M = mb*Ho*Wo, K = 4 taps * 16*Cin (im2col built in VMEM).
# ---------------------------------------------------------------------------
def _conv1_kernel(x_ref, w_ref, b_ref, o_ref, lhs_ref):
    mb, hin, win, kin = x_ref.shape
    _, ho, wo, cout = o_ref.shape
    kh, kw = hin - ho + 1, win - wo + 1          # 2 x 2 folded taps
    m = mb * ho * wo
    # im2col into a VMEM scratch: taps folded into the K (lane) dimension.
    for ki in range(kh):
        for kj in range(kw):
            t = ki * kw + kj
            lhs_ref[:, t * kin:(t + 1) * kin] = (
                x_ref[:, ki:ki + ho, kj:kj + wo, :].reshape(m, kin))
    acc = jnp.dot(lhs_ref[...], w_ref[...], preferred_element_type=jnp.float32)
    act = jnp.maximum(acc + b_ref[...], 0.0)
    o_ref[...] = act.reshape(mb, ho, wo, cout).astype(o_ref.dtype)


def _conv1(x, w, b, *, block_b):
    B, Hin, Win, Kin = x.shape
    Ktot, Cout = w.shape
    assert Ktot == 4 * Kin
    Ho, Wo = Hin - 1, Win - 1
    return pl.pallas_call(
        _conv1_kernel,
        grid=(B // block_b,),
        in_specs=[
            pl.BlockSpec((block_b, Hin, Win, Kin), lambda i: (i, 0, 0, 0)),
            pl.BlockSpec((Ktot, Cout), lambda i: (0, 0)),
            pl.BlockSpec((1, Cout), lambda i: (0, 0)),
        ],
        out_specs=pl.BlockSpec((block_b, Ho, Wo, Cout), lambda i: (i, 0, 0, 0)),
        out_shape=jax.ShapeDtypeStruct((B, Ho, Wo, Cout), jnp.bfloat16),
        scratch_shapes=[pltpu.VMEM((block_b * Ho * Wo, Ktot), jnp.bfloat16)],
        compiler_params=pltpu.CompilerParams(
            dimension_semantics=("parallel",),
            vmem_limit_bytes=_VMEM_LIMIT),
    )(x, w, b)


# ---------------------------------------------------------------------------
# Kernel 2: conv2 (folded 2x2/s1, K=512) + conv3 (3x3/s1, K=576) + flatten +
# linear_stack(22->512->512) + (virtual) concat + Linear(..,512)+ReLU+Linear.
# All matmuls are single large-M / large-K MXU dots.
# ---------------------------------------------------------------------------
def _fused_kernel(y_ref, d_ref,
                  w2_ref, b2_ref, w3_ref, b3_ref,
                  wl1_ref, bl1_ref, wl2_ref, bl2_ref,
                  w1a_ref, w1b_ref, b1_ref, wout_ref, bout_ref,
                  o_ref, lhs2_ref, a2_ref, lhs3_ref, x1_ref):
    mb, hf, wf, cf = y_ref.shape
    ho2, wo2 = hf - 1, wf - 1                    # conv2 output (folded 2x2/s1)
    h3n, w3n = ho2 - 2, wo2 - 2                  # conv3 output (3x3/s1)
    c2n = b2_ref.shape[1]                        # 64
    m2 = mb * ho2 * wo2
    m3 = mb * h3n * w3n

    # ---- conv2: im2col into VMEM scratch (K = 4 * 128 = 512), one dot ----
    for ki in range(2):
        for kj in range(2):
            t = ki * 2 + kj
            lhs2_ref[:, t * cf:(t + 1) * cf] = (
                y_ref[:, ki:ki + ho2, kj:kj + wo2, :].reshape(m2, cf))
    a2 = jnp.dot(lhs2_ref[...], w2_ref[...], preferred_element_type=jnp.float32)
    a2 = jnp.maximum(a2 + b2_ref[...], 0.0)
    a2_ref[...] = a2.reshape(mb, ho2, wo2, c2n).astype(a2_ref.dtype)

    # ---- conv3: im2col (K = 9 * 64 = 576), one dot ----
    for ki in range(3):
        for kj in range(3):
            t = ki * 3 + kj
            lhs3_ref[:, t * c2n:(t + 1) * c2n] = (
                a2_ref[:, ki:ki + h3n, kj:kj + w3n, :].reshape(m3, c2n))
    a3 = jnp.dot(lhs3_ref[...], w3_ref[...], preferred_element_type=jnp.float32)
    a3 = jnp.maximum(a3 + b3_ref[...], 0.0).astype(jnp.bfloat16)   # (m3, 64)

    # ---- flatten conv3 output to (mb, n_flat); the PyTorch NCHW flatten
    #      order is folded into w1a at pack time, so a plain (h,w,c) lane
    #      scatter is all we need here. ----
    p_n = h3n * w3n
    a3 = a3.reshape(mb, p_n, c2n)
    for p_i in range(p_n):
        x1_ref[:, p_i * c2n:(p_i + 1) * c2n] = a3[:, p_i, :]

    # ---- linear_stack(data): Linear(22,512) -> ReLU -> Linear(512,512) ----
    x2 = jnp.dot(d_ref[...], wl1_ref[...], preferred_element_type=jnp.float32)
    x2 = jnp.maximum(x2 + bl1_ref[...], 0.0).astype(jnp.bfloat16)
    x2 = jnp.dot(x2, wl2_ref[...], preferred_element_type=jnp.float32) + bl2_ref[...]

    # ---- l1 over the (virtual) concat [x1 | x2], ReLU, then l2 head ----
    h = (jnp.dot(x1_ref[...], w1a_ref[...], preferred_element_type=jnp.float32)
         + jnp.dot(x2.astype(jnp.bfloat16), w1b_ref[...],
                   preferred_element_type=jnp.float32)
         + b1_ref[...])
    h = jnp.maximum(h, 0.0).astype(jnp.bfloat16)
    # Lane-dense 128-wide f32 output slab (unmasked stores); sliced outside.
    o_ref[...] = (jnp.dot(h, wout_ref[...], preferred_element_type=jnp.float32)
                  + bout_ref[...])


def _fused_tail(y1f, data, p, *, block_b):
    B, Hf, Wf, Cf = y1f.shape
    Ho2, Wo2 = Hf - 1, Wf - 1
    H3, W3 = Ho2 - 2, Wo2 - 2
    n_flat = p["l1_wa"].shape[0]
    n_pad = p["l2_w"].shape[1]
    assert n_flat == 64 * H3 * W3
    assert p["c2_w"].shape[0] == 4 * Cf
    assert p["c3_w"].shape[0] == 9 * 64

    def _full(a):
        nd = a.ndim
        return pl.BlockSpec(a.shape, lambda i: (0,) * nd)

    return pl.pallas_call(
        _fused_kernel,
        grid=(B // block_b,),
        in_specs=[
            pl.BlockSpec((block_b, Hf, Wf, Cf), lambda i: (i, 0, 0, 0)),
            pl.BlockSpec((block_b, data.shape[1]), lambda i: (i, 0)),
            _full(p["c2_w"]), _full(p["c2_b"]),
            _full(p["c3_w"]), _full(p["c3_b"]),
            _full(p["ls1_w"]), _full(p["ls1_b"]),
            _full(p["ls2_w"]), _full(p["ls2_b"]),
            _full(p["l1_wa"]), _full(p["l1_wb"]), _full(p["l1_b"]),
            _full(p["l2_w"]), _full(p["l2_b"]),
        ],
        out_specs=pl.BlockSpec((block_b, n_pad), lambda i: (i, 0)),
        out_shape=jax.ShapeDtypeStruct((B, n_pad), jnp.float32),
        scratch_shapes=[
            pltpu.VMEM((block_b * Ho2 * Wo2, 4 * Cf), jnp.bfloat16),   # conv2 im2col
            pltpu.VMEM((block_b, Ho2, Wo2, 64), jnp.bfloat16),         # conv2 output
            pltpu.VMEM((block_b * H3 * W3, 9 * 64), jnp.bfloat16),     # conv3 im2col
            pltpu.VMEM((block_b, n_flat), jnp.bfloat16),               # flattened x1
        ],
        compiler_params=pltpu.CompilerParams(
            dimension_semantics=("parallel",),
            vmem_limit_bytes=_VMEM_LIMIT),
    )(y1f, data,
      p["c2_w"], p["c2_b"], p["c3_w"], p["c3_b"],
      p["ls1_w"], p["ls1_b"], p["ls2_w"], p["ls2_b"],
      p["l1_wa"], p["l1_wb"], p["l1_b"], p["l2_w"], p["l2_b"])


# ---------------------------------------------------------------------------
# Wrapper glue: stride folding (space-to-depth) — single cheap transpose on a
# tiny tensor, no data duplication (unlike HBM-side im2col).
# ---------------------------------------------------------------------------
def _space_to_depth_nchw(x, s):
    B, C, H, W = x.shape
    assert H % s == 0 and W % s == 0
    x = x.reshape(B, C, H // s, s, W // s, s)
    x = jnp.transpose(x, (0, 2, 4, 3, 5, 1))        # (B, Hs, Ws, sh, sw, C)
    return x.reshape(B, H // s, W // s, s * s * C)


def _space_to_depth_nhwc(x, s):
    B, H, W, C = x.shape
    assert H % s == 0 and W % s == 0
    x = x.reshape(B, H // s, s, W // s, s, C)
    x = jnp.transpose(x, (0, 1, 3, 2, 4, 5))        # (B, Hs, Ws, sh, sw, C)
    return x.reshape(B, H // s, W // s, s * s * C)


def _pick_block_b(B):
    """Prefer >=2 grid programs (v7x dual-TC) with sublane-aligned blocks."""
    for bb in (32, 16, 8):
        if B % bb == 0 and B // bb >= 2:
            return bb
    if B % 8 == 0:
        return 8
    return B    # small / odd batches: single full-batch block (always legal)


def nature_cnn_forward(p, observations, data, *, output_dim):
    """observations: (B, C, H, W) f32 NCHW; data: (B, 22) f32."""
    B = observations.shape[0]
    block_b = _pick_block_b(B)
    assert B % block_b == 0

    # conv1: stride-folded (s=4) -> kernel sees a stride-1 2x2 conv, K = 16*C
    x = _space_to_depth_nchw(observations, 4).astype(jnp.bfloat16)
    y1 = _conv1(x, p["c1_w"], p["c1_b"], block_b=block_b)     # (B, Ho1, Wo1, 32)
    # conv2: stride-folded (s=2) in the wrapper -> stride-1 2x2 conv, K = 128/tap
    y1f = _space_to_depth_nhwc(y1, 2)
    # conv2 + conv3 + flatten + linear_stack + concat + head, all in one kernel
    out = _fused_tail(y1f, data.astype(jnp.bfloat16), p, block_b=block_b)
    return out[:, :output_dim]


# ---------------------------------------------------------------------------
# Parameters: PyTorch-layout init (for the reference) + one-time kernel repack
# ---------------------------------------------------------------------------
def _conv_out(n, k, s):
    return (n - k) // s + 1


def _cnn_spatial(n):
    return _conv_out(_conv_out(_conv_out(n, 8, 4), 4, 2), 3, 1)


def _uniform(key, shape, bound):
    return jax.random.uniform(key, shape, jnp.float32, -bound, bound)


def init_params(key, input_shape, output_dim):
    C, H, W = input_shape
    n_flatten = 64 * _cnn_spatial(H) * _cnn_spatial(W)
    ks = jax.random.split(key, 14)

    def conv_p(kw_, kb_, cin, cout, k):
        bound = 1.0 / float(np.sqrt(cin * k * k))
        return _uniform(kw_, (cout, cin, k, k), bound), _uniform(kb_, (cout,), bound)

    def lin_p(kw_, kb_, fan_in, fan_out):
        bound = 1.0 / float(np.sqrt(fan_in))
        return _uniform(kw_, (fan_out, fan_in), bound), _uniform(kb_, (fan_out,), bound)

    c1_w, c1_b = conv_p(ks[0], ks[1], C, 32, 8)
    c2_w, c2_b = conv_p(ks[2], ks[3], 32, 64, 4)
    c3_w, c3_b = conv_p(ks[4], ks[5], 64, 64, 3)
    ls1_w, ls1_b = lin_p(ks[6], ks[7], _DATA_DIM, 512)
    ls2_w, ls2_b = lin_p(ks[8], ks[9], 512, 512)
    l1_w, l1_b = lin_p(ks[10], ks[11], n_flatten + 512, 512)
    l2_w, l2_b = lin_p(ks[12], ks[13], 512, output_dim)
    return dict(c1_w=c1_w, c1_b=c1_b, c2_w=c2_w, c2_b=c2_b, c3_w=c3_w, c3_b=c3_b,
                ls1_w=ls1_w, ls1_b=ls1_b, ls2_w=ls2_w, ls2_b=ls2_b,
                l1_w=l1_w, l1_b=l1_b, l2_w=l2_w, l2_b=l2_b)


def _fold_conv_weight(w, s, kf):
    """(Cout, Cin, kf*s, kf*s) -> (kf*kf * s*s*Cin, Cout), matching the
    space-to-depth channel order and the kernels' K-merged im2col LHS."""
    cout, cin, K, _ = w.shape
    assert K == kf * s
    w = w.reshape(cout, cin, kf, s, kf, s)
    w = jnp.transpose(w, (2, 4, 3, 5, 1, 0))        # (ki, kj, sh, sw, cin, cout)
    return w.reshape(kf * kf * s * s * cin, cout)


def pack_params(params, input_shape, output_dim):
    C, H, W = input_shape
    h3, w3 = _cnn_spatial(H), _cnn_spatial(W)
    n_flat = 64 * h3 * w3
    n_pad = ((max(output_dim, 1) + _LANE - 1) // _LANE) * _LANE
    bf = jnp.bfloat16
    row = lambda b: jnp.asarray(b, jnp.float32).reshape(1, -1)

    # conv weights: stride-fold + tap-merge into the K dimension.
    c1w = _fold_conv_weight(params["c1_w"], 4, 2)            # (4*16*C, 32)
    c2w = _fold_conv_weight(params["c2_w"], 2, 2)            # (512, 64)
    c3w = jnp.transpose(params["c3_w"], (2, 3, 1, 0)).reshape(9 * 64, 64)

    # l1: split the concat halves; fold the NCHW-flatten permutation into W1a
    # so the kernel's (h, w, c) lane-scatter order is correct.
    l1w = params["l1_w"]                                     # (512, n_flat + 512)
    w1a = l1w[:, :n_flat].reshape(512, 64, h3, w3)
    w1a = jnp.transpose(w1a, (2, 3, 1, 0)).reshape(n_flat, 512)
    w1b = jnp.transpose(l1w[:, n_flat:])                     # (512, 512)

    # l2: pad output to a lane-dense 128-wide slab (sliced outside the kernel)
    l2w = jnp.pad(jnp.transpose(params["l2_w"]), ((0, 0), (0, n_pad - output_dim)))
    l2b = jnp.pad(params["l2_b"], (0, n_pad - output_dim))

    return dict(
        c1_w=c1w.astype(bf), c1_b=row(params["c1_b"]),
        c2_w=c2w.astype(bf), c2_b=row(params["c2_b"]),
        c3_w=c3w.astype(bf), c3_b=row(params["c3_b"]),
        ls1_w=jnp.transpose(params["ls1_w"]).astype(bf), ls1_b=row(params["ls1_b"]),
        ls2_w=jnp.transpose(params["ls2_w"]).astype(bf), ls2_b=row(params["ls2_b"]),
        l1_wa=w1a.astype(bf), l1_wb=w1b.astype(bf), l1_b=row(params["l1_b"]),
        l2_w=l2w.astype(bf), l2_b=row(l2b),
    )


# ---------------------------------------------------------------------------
# Pure-JAX f32 reference (for numerical verification)
# ---------------------------------------------------------------------------
def reference_forward(params, obs, data):
    hp = jax.lax.Precision.HIGHEST

    def conv(x, w, b, s):
        y = jax.lax.conv_general_dilated(
            x, w, (s, s), "VALID",
            dimension_numbers=("NCHW", "OIHW", "NCHW"), precision=hp)
        return jax.nn.relu(y + b[None, :, None, None])

    x = conv(obs, params["c1_w"], params["c1_b"], 4)
    x = conv(x, params["c2_w"], params["c2_b"], 2)
    x = conv(x, params["c3_w"], params["c3_b"], 1)
    x1 = x.reshape(x.shape[0], -1)
    x2 = jax.nn.relu(jnp.dot(data, params["ls1_w"].T, precision=hp) + params["ls1_b"])
    x2 = jnp.dot(x2, params["ls2_w"].T, precision=hp) + params["ls2_b"]
    xc = jnp.concatenate([x1, x2], axis=1)
    y = jax.nn.relu(jnp.dot(xc, params["l1_w"].T, precision=hp) + params["l1_b"])
    return jnp.dot(y, params["l2_w"].T, precision=hp) + params["l2_b"]


# ---------------------------------------------------------------------------
if __name__ == "__main__":
    key = jax.random.PRNGKey(0)
    kp, kobs, kdata = jax.random.split(key, 3)

    input_shape = (4, 36, 36)   # small H/W (multiple of 4) surviving the 3 convs
    output_dim = 16
    batch = 16                  # -> block_b = 8, grid = 2 programs (dual-TC ready)

    params = init_params(kp, input_shape, output_dim)
    packed = pack_params(params, input_shape, output_dim)

    observations = jax.random.normal(kobs, (batch,) + input_shape, dtype=jnp.float32)
    data = jax.random.normal(kdata, (batch, _DATA_DIM), dtype=jnp.float32)

    fwd = jax.jit(functools.partial(nature_cnn_forward, output_dim=output_dim))
    out = jax.block_until_ready(fwd(packed, observations, data))
    assert out.shape == (batch, output_dim), out.shape

    ref = jax.block_until_ready(reference_forward(params, observations, data))
    # bf16 MXU inputs with f32 accumulation -> compare at 2e-2.
    np.testing.assert_allclose(np.asarray(out), np.asarray(ref), rtol=2e-2, atol=2e-2)

    print("KERNEL_OK")
</pallas_src>

<mosaic_0001>
module attributes {stable_mosaic.version = 11 : i64} {
  func.func @_conv1_kernel(%arg0: i32, %arg1: memref<8x9x9x64xbf16, #tpu.memory_space<vmem>>, %arg2: memref<256x32xbf16, #tpu.memory_space<vmem>>, %arg3: memref<1x32xf32, #tpu.memory_space<vmem>>, %arg4: memref<8x8x8x32xbf16, #tpu.memory_space<vmem>>, %arg5: memref<512x256xbf16, #tpu.memory_space<vmem>>) attributes {dimension_semantics = [#tpu.dimension_semantics<parallel>], iteration_bounds = array<i64: 2>, scalar_prefetch = 0 : i64, scratch_operands = 1 : i64, tpu.core_type = #tpu.core_type<tc>, window_params = [{transform_indices = @transform_0, window_bounds = array<i64: 8, 9, 9, 64>}, {pipeline_mode = #tpu.pipeline_mode<synchronous>, transform_indices = @transform_1, window_bounds = array<i64: 256, 32>}, {pipeline_mode = #tpu.pipeline_mode<synchronous>, transform_indices = @transform_2, window_bounds = array<i64: 1, 32>}, {transform_indices = @transform_3, window_bounds = array<i64: 8, 8, 8, 32>}]} {
    %c0 = arith.constant 0 : index
    %c0_0 = arith.constant 0 : index
    %c0_1 = arith.constant 0 : index
    %c0_2 = arith.constant 0 : index
    %0 = vector.load %arg1[%c0, %c0_0, %c0_1, %c0_2] : memref<8x9x9x64xbf16, #tpu.memory_space<vmem>>, vector<8x8x8x64xbf16>
    %1 = vector.shape_cast %0 : vector<8x8x8x64xbf16> to vector<512x64xbf16>
    %c0_3 = arith.constant 0 : index
    %c0_4 = arith.constant 0 : index
    %2 = vector.load %arg5[%c0_3, %c0_4] : memref<512x256xbf16, #tpu.memory_space<vmem>>, vector<512x64xbf16>
    tpu.vector_store %arg5[%c0_3, %c0_4], %1 {strides = array<i32>} : memref<512x256xbf16, #tpu.memory_space<vmem>>, vector<512x64xbf16>,
    %c0_5 = arith.constant 0 : index
    %c0_6 = arith.constant 0 : index
    %c1 = arith.constant 1 : index
    %c0_7 = arith.constant 0 : index
    %3 = vector.load %arg1[%c0_5, %c0_6, %c1, %c0_7] : memref<8x9x9x64xbf16, #tpu.memory_space<vmem>>, vector<8x8x8x64xbf16>
    %4 = vector.shape_cast %3 : vector<8x8x8x64xbf16> to vector<512x64xbf16>
    %c0_8 = arith.constant 0 : index
    %c64 = arith.constant 64 : index
    %5 = vector.load %arg5[%c0_8, %c64] : memref<512x256xbf16, #tpu.memory_space<vmem>>, vector<512x64xbf16>
    tpu.vector_store %arg5[%c0_8, %c64], %4 {strides = array<i32>} : memref<512x256xbf16, #tpu.memory_space<vmem>>, vector<512x64xbf16>,
    %c0_9 = arith.constant 0 : index
    %c1_10 = arith.constant 1 : index
    %c0_11 = arith.constant 0 : index
    %c0_12 = arith.constant 0 : index
    %6 = vector.load %arg1[%c0_9, %c1_10, %c0_11, %c0_12] : memref<8x9x9x64xbf16, #tpu.memory_space<vmem>>, vector<8x8x8x64xbf16>
    %7 = vector.shape_cast %6 : vector<8x8x8x64xbf16> to vector<512x64xbf16>
    %c0_13 = arith.constant 0 : index
    %c128 = arith.constant 128 : index
    %8 = vector.load %arg5[%c0_13, %c128] : memref<512x256xbf16, #tpu.memory_space<vmem>>, vector<512x64xbf16>
    tpu.vector_store %arg5[%c0_13, %c128], %7 {strides = array<i32>} : memref<512x256xbf16, #tpu.memory_space<vmem>>, vector<512x64xbf16>,
    %c0_14 = arith.constant 0 : index
    %c1_15 = arith.constant 1 : index
    %c1_16 = arith.constant 1 : index
    %c0_17 = arith.constant 0 : index
    %9 = vector.load %arg1[%c0_14, %c1_15, %c1_16, %c0_17] : memref<8x9x9x64xbf16, #tpu.memory_space<vmem>>, vector<8x8x8x64xbf16>
    %10 = vector.shape_cast %9 : vector<8x8x8x64xbf16> to vector<512x64xbf16>
    %c0_18 = arith.constant 0 : index
    %c192 = arith.constant 192 : index
    %11 = vector.load %arg5[%c0_18, %c192] : memref<512x256xbf16, #tpu.memory_space<vmem>>, vector<512x64xbf16>
    tpu.vector_store %arg5[%c0_18, %c192], %10 {strides = array<i32>} : memref<512x256xbf16, #tpu.memory_space<vmem>>, vector<512x64xbf16>,
    %c0_19 = arith.constant 0 : index
    %c0_20 = arith.constant 0 : index
    %12 = vector.load %arg5[%c0_19, %c0_20] : memref<512x256xbf16, #tpu.memory_space<vmem>>, vector<512x256xbf16>
    %c0_21 = arith.constant 0 : index
    %c0_22 = arith.constant 0 : index
    %13 = vector.load %arg2[%c0_21, %c0_22] : memref<256x32xbf16, #tpu.memory_space<vmem>>, vector<256x32xbf16>
    %cst = arith.constant dense<0.000000e+00> : vector<512x32xf32>
    %14 = tpu.matmul %12, %13, %cst {dimension_numbers = #tpu.dot_dimension_numbers<[1], [0], [0], [1], [0, 0, 1, 1], [], []>} : vector<512x256xbf16>, vector<256x32xbf16>, vector<512x32xf32> -> vector<512x32xf32>
    %c0_23 = arith.constant 0 : index
    %c0_24 = arith.constant 0 : index
    %15 = vector.load %arg3[%c0_23, %c0_24] : memref<1x32xf32, #tpu.memory_space<vmem>>, vector<1x32xf32>
    %16 = vector.broadcast %15 : vector<1x32xf32> to vector<512x32xf32>
    %17 = arith.addf %14, %16 : vector<512x32xf32>
    %cst_25 = arith.constant 0.000000e+00 : f32
    %18 = vector.broadcast %cst_25 : f32 to vector<512x32xf32>
    %19 = arith.maximumf %17, %18 : vector<512x32xf32>
    %20 = vector.shape_cast %19 : vector<512x32xf32> to vector<8x8x8x32xf32>
    %21 = arith.truncf %20 : vector<8x8x8x32xf32> to vector<8x8x8x32xbf16>
    %c0_26 = arith.constant 0 : index
    %c0_27 = arith.constant 0 : index
    %c0_28 = arith.constant 0 : index
    %c0_29 = arith.constant 0 : index
    %22 = vector.load %arg4[%c0_26, %c0_27, %c0_28, %c0_29] : memref<8x8x8x32xbf16, #tpu.memory_space<vmem>>, vector<8x8x8x32xbf16>
    tpu.vector_store %arg4[%c0_26, %c0_27, %c0_28, %c0_29], %21 {strides = array<i32>} : memref<8x8x8x32xbf16, #tpu.memory_space<vmem>>, vector<8x8x8x32xbf16>,
    return
  }
  func.func @transform_0(%arg0: i32) -> (i32, i32, i32, i32) {
    %c0_i32 = arith.constant 0 : i32
    %c0_i32_0 = arith.constant 0 : i32
    %c0_i32_1 = arith.constant 0 : i32
    %c0_i32_2 = arith.constant 0 : i32
    return %arg0, %c0_i32, %c0_i32_0, %c0_i32_1 : i32, i32, i32, i32
  }
  func.func @transform_1(%arg0: i32) -> (i32, i32) {
    %c0_i32 = arith.constant 0 : i32
    %c0_i32_0 = arith.constant 0 : i32
    %c0_i32_1 = arith.constant 0 : i32
    return %c0_i32, %c0_i32_0 : i32, i32
  }
  func.func @transform_2(%arg0: i32) -> (i32, i32) {
    %c0_i32 = arith.constant 0 : i32
    %c0_i32_0 = arith.constant 0 : i32
    %c0_i32_1 = arith.constant 0 : i32
    return %c0_i32, %c0_i32_0 : i32, i32
  }
  func.func @transform_3(%arg0: i32) -> (i32, i32, i32, i32) {
    %c0_i32 = arith.constant 0 : i32
    %c0_i32_0 = arith.constant 0 : i32
    %c0_i32_1 = arith.constant 0 : i32
    %c0_i32_2 = arith.constant 0 : i32
    return %arg0, %c0_i32, %c0_i32_0, %c0_i32_1 : i32, i32, i32, i32
  }
}

module attributes {stable_mosaic.version = 11 : i64} {
  func.func @_fused_kernel(%arg0: i32, %arg1: memref<8x4x4x128xbf16, #tpu.memory_space<vmem>>, %arg2: memref<8x22xbf16, #tpu.memory_space<vmem>>, %arg3: memref<512x64xbf16, #tpu.memory_space<vmem>>, %arg4: memref<1x64xf32, #tpu.memory_space<vmem>>, %arg5: memref<576x64xbf16, #tpu.memory_space<vmem>>, %arg6: memref<1x64xf32, #tpu.memory_space<vmem>>, %arg7: memref<22x512xbf16, #tpu.memory_space<vmem>>, %arg8: memref<1x512xf32, #tpu.memory_space<vmem>>, %arg9: memref<512x512xbf16, #tpu.memory_space<vmem>>, %arg10: memref<1x512xf32, #tpu.memory_space<vmem>>, %arg11: memref<64x512xbf16, #tpu.memory_space<vmem>>, %arg12: memref<512x512xbf16, #tpu.memory_space<vmem>>, %arg13: memref<1x512xf32, #tpu.memory_space<vmem>>, %arg14: memref<512x128xbf16, #tpu.memory_space<vmem>>, %arg15: memref<1x128xf32, #tpu.memory_space<vmem>>, %arg16: memref<8x128xf32, #tpu.memory_space<vmem>>, %arg17: memref<72x512xbf16, #tpu.memory_space<vmem>>, %arg18: memref<8x3x3x64xbf16, #tpu.memory_space<vmem>>, %arg19: memref<8x576xbf16, #tpu.memory_space<vmem>>, %arg20: memref<8x64xbf16, #tpu.memory_space<vmem>>) attributes {dimension_semantics = [#tpu.dimension_semantics<parallel>], iteration_bounds = array<i64: 2>, scalar_prefetch = 0 : i64, scratch_operands = 4 : i64, tpu.core_type = #tpu.core_type<tc>, window_params = [{transform_indices = @transform_0, window_bounds = array<i64: 8, 4, 4, 128>}, {transform_indices = @transform_1, window_bounds = array<i64: 8, 22>}, {pipeline_mode = #tpu.pipeline_mode<synchronous>, transform_indices = @transform_2, window_bounds = array<i64: 512, 64>}, {pipeline_mode = #tpu.pipeline_mode<synchronous>, transform_indices = @transform_3, window_bounds = array<i64: 1, 64>}, {pipeline_mode = #tpu.pipeline_mode<synchronous>, transform_indices = @transform_4, window_bounds = array<i64: 576, 64>}, {pipeline_mode = #tpu.pipeline_mode<synchronous>, transform_indices = @transform_5, window_bounds = array<i64: 1, 64>}, {pipeline_mode = #tpu.pipeline_mode<synchronous>, transform_indices = @transform_6, window_bounds = array<i64: 22, 512>}, {pipeline_mode = #tpu.pipeline_mode<synchronous>, transform_indices = @transform_7, window_bounds = array<i64: 1, 512>}, {pipeline_mode = #tpu.pipeline_mode<synchronous>, transform_indices = @transform_8, window_bounds = array<i64: 512, 512>}, {pipeline_mode = #tpu.pipeline_mode<synchronous>, transform_indices = @transform_9, window_bounds = array<i64: 1, 512>}, {pipeline_mode = #tpu.pipeline_mode<synchronous>, transform_indices = @transform_10, window_bounds = array<i64: 64, 512>}, {pipeline_mode = #tpu.pipeline_mode<synchronous>, transform_indices = @transform_11, window_bounds = array<i64: 512, 512>}, {pipeline_mode = #tpu.pipeline_mode<synchronous>, transform_indices = @transform_12, window_bounds = array<i64: 1, 512>}, {pipeline_mode = #tpu.pipeline_mode<synchronous>, transform_indices = @transform_13, window_bounds = array<i64: 512, 128>}, {pipeline_mode = #tpu.pipeline_mode<synchronous>, transform_indices = @transform_14, window_bounds = array<i64: 1, 128>}, {transform_indices = @transform_15, window_bounds = array<i64: 8, 128>}]} {
    %c0 = arith.constant 0 : index
    %c0_0 = arith.constant 0 : index
    %c0_1 = arith.constant 0 : index
    %c0_2 = arith.constant 0 : index
    %0 = vector.load %arg1[%c0, %c0_0, %c0_1, %c0_2] : memref<8x4x4x128xbf16, #tpu.memory_space<vmem>>, vector<8x3x3x128xbf16>
    %1 = vector.shape_cast %0 : vector<8x3x3x128xbf16> to vector<72x128xbf16>
    %c0_3 = arith.constant 0 : index
    %c0_4 = arith.constant 0 : index
    %2 = vector.load %arg17[%c0_3, %c0_4] : memref<72x512xbf16, #tpu.memory_space<vmem>>, vector<72x128xbf16>
    tpu.vector_store %arg17[%c0_3, %c0_4], %1 {strides = array<i32>} : memref<72x512xbf16, #tpu.memory_space<vmem>>, vector<72x128xbf16>,
    %c0_5 = arith.constant 0 : index
    %c0_6 = arith.constant 0 : index
    %c1 = arith.constant 1 : index
    %c0_7 = arith.constant 0 : index
    %3 = vector.load %arg1[%c0_5, %c0_6, %c1, %c0_7] : memref<8x4x4x128xbf16, #tpu.memory_space<vmem>>, vector<8x3x3x128xbf16>
    %4 = vector.shape_cast %3 : vector<8x3x3x128xbf16> to vector<72x128xbf16>
    %c0_8 = arith.constant 0 : index
    %c128 = arith.constant 128 : index
    %5 = vector.load %arg17[%c0_8, %c128] : memref<72x512xbf16, #tpu.memory_space<vmem>>, vector<72x128xbf16>
    tpu.vector_store %arg17[%c0_8, %c128], %4 {strides = array<i32>} : memref<72x512xbf16, #tpu.memory_space<vmem>>, vector<72x128xbf16>,
    %c0_9 = arith.constant 0 : index
    %c1_10 = arith.constant 1 : index
    %c0_11 = arith.constant 0 : index
    %c0_12 = arith.constant 0 : index
    %6 = vector.load %arg1[%c0_9, %c1_10, %c0_11, %c0_12] : memref<8x4x4x128xbf16, #tpu.memory_space<vmem>>, vector<8x3x3x128xbf16>
    %7 = vector.shape_cast %6 : vector<8x3x3x128xbf16> to vector<72x128xbf16>
    %c0_13 = arith.constant 0 : index
    %c256 = arith.constant 256 : index
    %8 = vector.load %arg17[%c0_13, %c256] : memref<72x512xbf16, #tpu.memory_space<vmem>>, vector<72x128xbf16>
    tpu.vector_store %arg17[%c0_13, %c256], %7 {strides = array<i32>} : memref<72x512xbf16, #tpu.memory_space<vmem>>, vector<72x128xbf16>,
    %c0_14 = arith.constant 0 : index
    %c1_15 = arith.constant 1 : index
    %c1_16 = arith.constant 1 : index
    %c0_17 = arith.constant 0 : index
    %9 = vector.load %arg1[%c0_14, %c1_15, %c1_16, %c0_17] : memref<8x4x4x128xbf16, #tpu.memory_space<vmem>>, vector<8x3x3x128xbf16>
    %10 = vector.shape_cast %9 : vector<8x3x3x128xbf16> to vector<72x128xbf16>
    %c0_18 = arith.constant 0 : index
    %c384 = arith.constant 384 : index
    %11 = vector.load %arg17[%c0_18, %c384] : memref<72x512xbf16, #tpu.memory_space<vmem>>, vector<72x128xbf16>
    tpu.vector_store %arg17[%c0_18, %c384], %10 {strides = array<i32>} : memref<72x512xbf16, #tpu.memory_space<vmem>>, vector<72x128xbf16>,
    %c0_19 = arith.constant 0 : index
    %c0_20 = arith.constant 0 : index
    %12 = vector.load %arg17[%c0_19, %c0_20] : memref<72x512xbf16, #tpu.memory_space<vmem>>, vector<72x512xbf16>
    %c0_21 = arith.constant 0 : index
    %c0_22 = arith.constant 0 : index
    %13 = vector.load %arg3[%c0_21, %c0_22] : memref<512x64xbf16, #tpu.memory_space<vmem>>, vector<512x64xbf16>
    %cst = arith.constant dense<0.000000e+00> : vector<72x64xf32>
    %14 = tpu.matmul %12, %13, %cst {dimension_numbers = #tpu.dot_dimension_numbers<[1], [0], [0], [1], [0, 0, 1, 1], [], []>} : vector<72x512xbf16>, vector<512x64xbf16>, vector<72x64xf32> -> vector<72x64xf32>
    %c0_23 = arith.constant 0 : index
    %c0_24 = arith.constant 0 : index
    %15 = vector.load %arg4[%c0_23, %c0_24] : memref<1x64xf32, #tpu.memory_space<vmem>>, vector<1x64xf32>
    %16 = vector.broadcast %15 : vector<1x64xf32> to vector<72x64xf32>
    %17 = arith.addf %14, %16 : vector<72x64xf32>
    %cst_25 = arith.constant 0.000000e+00 : f32
    %18 = vector.broadcast %cst_25 : f32 to vector<72x64xf32>
    %19 = arith.maximumf %17, %18 : vector<72x64xf32>
    %20 = vector.shape_cast %19 : vector<72x64xf32> to vector<8x3x3x64xf32>
    %21 = arith.truncf %20 : vector<8x3x3x64xf32> to vector<8x3x3x64xbf16>
    %c0_26 = arith.constant 0 : index
    %c0_27 = arith.constant 0 : index
    %c0_28 = arith.constant 0 : index
    %c0_29 = arith.constant 0 : index
    %22 = vector.load %arg18[%c0_26, %c0_27, %c0_28, %c0_29] : memref<8x3x3x64xbf16, #tpu.memory_space<vmem>>, vector<8x3x3x64xbf16>
    tpu.vector_store %arg18[%c0_26, %c0_27, %c0_28, %c0_29], %21 {strides = array<i32>} : memref<8x3x3x64xbf16, #tpu.memory_space<vmem>>, vector<8x3x3x64xbf16>,
    %c0_30 = arith.constant 0 : index
    %c0_31 = arith.constant 0 : index
    %c0_32 = arith.constant 0 : index
    %c0_33 = arith.constant 0 : index
    %23 = vector.load %arg18[%c0_30, %c0_31, %c0_32, %c0_33] : memref<8x3x3x64xbf16, #tpu.memory_space<vmem>>, vector<8x1x1x64xbf16>
    %24 = vector.shape_cast %23 : vector<8x1x1x64xbf16> to vector<8x64xbf16>
    %c0_34 = arith.constant 0 : index
    %c0_35 = arith.constant 0 : index
    %25 = vector.load %arg19[%c0_34, %c0_35] : memref<8x576xbf16, #tpu.memory_space<vmem>>, vector<8x64xbf16>
    tpu.vector_store %arg19[%c0_34, %c0_35], %24 {strides = array<i32>} : memref<8x576xbf16, #tpu.memory_space<vmem>>, vector<8x64xbf16>,
    %c0_36 = arith.constant 0 : index
    %c0_37 = arith.constant 0 : index
    %c1_38 = arith.constant 1 : index
    %c0_39 = arith.constant 0 : index
    %26 = vector.load %arg18[%c0_36, %c0_37, %c1_38, %c0_39] : memref<8x3x3x64xbf16, #tpu.memory_space<vmem>>, vector<8x1x1x64xbf16>
    %27 = vector.shape_cast %26 : vector<8x1x1x64xbf16> to vector<8x64xbf16>
    %c0_40 = arith.constant 0 : index
    %c64 = arith.constant 64 : index
    %28 = vector.load %arg19[%c0_40, %c64] : memref<8x576xbf16, #tpu.memory_space<vmem>>, vector<8x64xbf16>
    tpu.vector_store %arg19[%c0_40, %c64], %27 {strides = array<i32>} : memref<8x576xbf16, #tpu.memory_space<vmem>>, vector<8x64xbf16>,
    %c0_41 = arith.constant 0 : index
    %c0_42 = arith.constant 0 : index
    %c2 = arith.constant 2 : index
    %c0_43 = arith.constant 0 : index
    %29 = vector.load %arg18[%c0_41, %c0_42, %c2, %c0_43] : memref<8x3x3x64xbf16, #tpu.memory_space<vmem>>, vector<8x1x1x64xbf16>
    %30 = vector.shape_cast %29 : vector<8x1x1x64xbf16> to vector<8x64xbf16>
    %c0_44 = arith.constant 0 : index
    %c128_45 = arith.constant 128 : index
    %31 = vector.load %arg19[%c0_44, %c128_45] : memref<8x576xbf16, #tpu.memory_space<vmem>>, vector<8x64xbf16>
    tpu.vector_store %arg19[%c0_44, %c128_45], %30 {strides = array<i32>} : memref<8x576xbf16, #tpu.memory_space<vmem>>, vector<8x64xbf16>,
    %c0_46 = arith.constant 0 : index
    %c1_47 = arith.constant 1 : index
    %c0_48 = arith.constant 0 : index
    %c0_49 = arith.constant 0 : index
    %32 = vector.load %arg18[%c0_46, %c1_47, %c0_48, %c0_49] : memref<8x3x3x64xbf16, #tpu.memory_space<vmem>>, vector<8x1x1x64xbf16>
    %33 = vector.shape_cast %32 : vector<8x1x1x64xbf16> to vector<8x64xbf16>
    %c0_50 = arith.constant 0 : index
    %c192 = arith.constant 192 : index
    %34 = vector.load %arg19[%c0_50, %c192] : memref<8x576xbf16, #tpu.memory_space<vmem>>, vector<8x64xbf16>
    tpu.vector_store %arg19[%c0_50, %c192], %33 {strides = array<i32>} : memref<8x576xbf16, #tpu.memory_space<vmem>>, vector<8x64xbf16>,
    %c0_51 = arith.constant 0 : index
    %c1_52 = arith.constant 1 : index
    %c1_53 = arith.constant 1 : index
    %c0_54 = arith.constant 0 : index
    %35 = vector.load %arg18[%c0_51, %c1_52, %c1_53, %c0_54] : memref<8x3x3x64xbf16, #tpu.memory_space<vmem>>, vector<8x1x1x64xbf16>
    %36 = vector.shape_cast %35 : vector<8x1x1x64xbf16> to vector<8x64xbf16>
    %c0_55 = arith.constant 0 : index
    %c256_56 = arith.constant 256 : index
    %37 = vector.load %arg19[%c0_55, %c256_56] : memref<8x576xbf16, #tpu.memory_space<vmem>>, vector<8x64xbf16>
    tpu.vector_store %arg19[%c0_55, %c256_56], %36 {strides = array<i32>} : memref<8x576xbf16, #tpu.memory_space<vmem>>, vector<8x64xbf16>,
    %c0_57 = arith.constant 0 : index
    %c1_58 = arith.constant 1 : index
    %c2_59 = arith.constant 2 : index
    %c0_60 = arith.constant 0 : index
    %38 = vector.load %arg18[%c0_57, %c1_58, %c2_59, %c0_60] : memref<8x3x3x64xbf16, #tpu.memory_space<vmem>>, vector<8x1x1x64xbf16>
    %39 = vector.shape_cast %38 : vector<8x1x1x64xbf16> to vector<8x64xbf16>
    %c0_61 = arith.constant 0 : index
    %c320 = arith.constant 320 : index
    %40 = vector.load %arg19[%c0_61, %c320] : memref<8x576xbf16, #tpu.memory_space<vmem>>, vector<8x64xbf16>
    tpu.vector_store %arg19[%c0_61, %c320], %39 {strides = array<i32>} : memref<8x576xbf16, #tpu.memory_space<vmem>>, vector<8x64xbf16>,
    %c0_62 = arith.constant 0 : index
    %c2_63 = arith.constant 2 : index
    %c0_64 = arith.constant 0 : index
    %c0_65 = arith.constant 0 : index
    %41 = vector.load %arg18[%c0_62, %c2_63, %c0_64, %c0_65] : memref<8x3x3x64xbf16, #tpu.memory_space<vmem>>, vector<8x1x1x64xbf16>
    %42 = vector.shape_cast %41 : vector<8x1x1x64xbf16> to vector<8x64xbf16>
    %c0_66 = arith.constant 0 : index
    %c384_67 = arith.constant 384 : index
    %43 = vector.load %arg19[%c0_66, %c384_67] : memref<8x576xbf16, #tpu.memory_space<vmem>>, vector<8x64xbf16>
    tpu.vector_store %arg19[%c0_66, %c384_67], %42 {strides = array<i32>} : memref<8x576xbf16, #tpu.memory_space<vmem>>, vector<8x64xbf16>,
    %c0_68 = arith.constant 0 : index
    %c2_69 = arith.constant 2 : index
    %c1_70 = arith.constant 1 : index
    %c0_71 = arith.constant 0 : index
    %44 = vector.load %arg18[%c0_68, %c2_69, %c1_70, %c0_71] : memref<8x3x3x64xbf16, #tpu.memory_space<vmem>>, vector<8x1x1x64xbf16>
    %45 = vector.shape_cast %44 : vector<8x1x1x64xbf16> to vector<8x64xbf16>
    %c0_72 = arith.constant 0 : index
    %c448 = arith.constant 448 : index
    %46 = vector.load %arg19[%c0_72, %c448] : memref<8x576xbf16, #tpu.memory_space<vmem>>, vector<8x64xbf16>
    tpu.vector_store %arg19[%c0_72, %c448], %45 {strides = array<i32>} : memref<8x576xbf16, #tpu.memory_space<vmem>>, vector<8x64xbf16>,
    %c0_73 = arith.constant 0 : index
    %c2_74 = arith.constant 2 : index
    %c2_75 = arith.constant 2 : index
    %c0_76 = arith.constant 0 : index
    %47 = vector.load %arg18[%c0_73, %c2_74, %c2_75, %c0_76] : memref<8x3x3x64xbf16, #tpu.memory_space<vmem>>, vector<8x1x1x64xbf16>
    %48 = vector.shape_cast %47 : vector<8x1x1x64xbf16> to vector<8x64xbf16>
    %c0_77 = arith.constant 0 : index
    %c512 = arith.constant 512 : index
    %49 = vector.load %arg19[%c0_77, %c512] : memref<8x576xbf16, #tpu.memory_space<vmem>>, vector<8x64xbf16>
    tpu.vector_store %arg19[%c0_77, %c512], %48 {strides = array<i32>} : memref<8x576xbf16, #tpu.memory_space<vmem>>, vector<8x64xbf16>,
    %c0_78 = arith.constant 0 : index
    %c0_79 = arith.constant 0 : index
    %50 = vector.load %arg19[%c0_78, %c0_79] : memref<8x576xbf16, #tpu.memory_space<vmem>>, vector<8x576xbf16>
    %c0_80 = arith.constant 0 : index
    %c0_81 = arith.constant 0 : index
    %51 = vector.load %arg5[%c0_80, %c0_81] : memref<576x64xbf16, #tpu.memory_space<vmem>>, vector<576x64xbf16>
    %cst_82 = arith.constant dense<0.000000e+00> : vector<8x64xf32>
    %52 = tpu.matmul %50, %51, %cst_82 {dimension_numbers = #tpu.dot_dimension_numbers<[1], [0], [0], [1], [0, 0, 1, 1], [], []>} : vector<8x576xbf16>, vector<576x64xbf16>, vector<8x64xf32> -> vector<8x64xf32>
    %c0_83 = arith.constant 0 : index
    %c0_84 = arith.constant 0 : index
    %53 = vector.load %arg6[%c0_83, %c0_84] : memref<1x64xf32, #tpu.memory_space<vmem>>, vector<1x64xf32>
    %54 = vector.broadcast %53 : vector<1x64xf32> to vector<8x64xf32>
    %55 = arith.addf %52, %54 : vector<8x64xf32>
    %cst_85 = arith.constant 0.000000e+00 : f32
    %56 = vector.broadcast %cst_85 : f32 to vector<8x64xf32>
    %57 = arith.maximumf %55, %56 : vector<8x64xf32>
    %58 = arith.truncf %57 : vector<8x64xf32> to vector<8x64xbf16>
    %59 = vector.shape_cast %58 : vector<8x64xbf16> to vector<8x1x64xbf16>
    %60 = vector.shape_cast %59 : vector<8x1x64xbf16> to vector<8x64xbf16>
    %c0_86 = arith.constant 0 : index
    %c0_87 = arith.constant 0 : index
    %61 = vector.load %arg20[%c0_86, %c0_87] : memref<8x64xbf16, #tpu.memory_space<vmem>>, vector<8x64xbf16>
    tpu.vector_store %arg20[%c0_86, %c0_87], %60 {strides = array<i32>} : memref<8x64xbf16, #tpu.memory_space<vmem>>, vector<8x64xbf16>,
    %c0_88 = arith.constant 0 : index
    %c0_89 = arith.constant 0 : index
    %62 = vector.load %arg2[%c0_88, %c0_89] : memref<8x22xbf16, #tpu.memory_space<vmem>>, vector<8x22xbf16>
    %c0_90 = arith.constant 0 : index
    %c0_91 = arith.constant 0 : index
    %63 = vector.load %arg7[%c0_90, %c0_91] : memref<22x512xbf16, #tpu.memory_space<vmem>>, vector<22x512xbf16>
    %cst_92 = arith.constant dense<0.000000e+00> : vector<8x512xf32>
    %64 = tpu.matmul %62, %63, %cst_92 {dimension_numbers = #tpu.dot_dimension_numbers<[1], [0], [0], [1], [0, 0, 1, 1], [], []>} : vector<8x22xbf16>, vector<22x512xbf16>, vector<8x512xf32> -> vector<8x512xf32>
    %c0_93 = arith.constant 0 : index
    %c0_94 = arith.constant 0 : index
    %65 = vector.load %arg8[%c0_93, %c0_94] : memref<1x512xf32, #tpu.memory_space<vmem>>, vector<1x512xf32>
    %66 = vector.broadcast %65 : vector<1x512xf32> to vector<8x512xf32>
    %67 = arith.addf %64, %66 : vector<8x512xf32>
    %cst_95 = arith.constant 0.000000e+00 : f32
    %68 = vector.broadcast %cst_95 : f32 to vector<8x512xf32>
    %69 = arith.maximumf %67, %68 : vector<8x512xf32>
    %70 = arith.truncf %69 : vector<8x512xf32> to vector<8x512xbf16>
    %c0_96 = arith.constant 0 : index
    %c0_97 = arith.constant 0 : index
    %71 = vector.load %arg9[%c0_96, %c0_97] : memref<512x512xbf16, #tpu.memory_space<vmem>>, vector<512x512xbf16>
    %cst_98 = arith.constant dense<0.000000e+00> : vector<8x512xf32>
    %72 = tpu.matmul %70, %71, %cst_98 {dimension_numbers = #tpu.dot_dimension_numbers<[1], [0], [0], [1], [0, 0, 1, 1], [], []>} : vector<8x512xbf16>, vector<512x512xbf16>, vector<8x512xf32> -> vector<8x512xf32>
    %c0_99 = arith.constant 0 : index
    %c0_100 = arith.constant 0 : index
    %73 = vector.load %arg10[%c0_99, %c0_100] : memref<1x512xf32, #tpu.memory_space<vmem>>, vector<1x512xf32>
    %74 = vector.broadcast %73 : vector<1x512xf32> to vector<8x512xf32>
    %75 = arith.addf %72, %74 : vector<8x512xf32>
    %c0_101 = arith.constant 0 : index
    %c0_102 = arith.constant 0 : index
    %76 = vector.load %arg20[%c0_101, %c0_102] : memref<8x64xbf16, #tpu.memory_space<vmem>>, vector<8x64xbf16>
    %c0_103 = arith.constant 0 : index
    %c0_104 = arith.constant 0 : index
    %77 = vector.load %arg11[%c0_103, %c0_104] : memref<64x512xbf16, #tpu.memory_space<vmem>>, vector<64x512xbf16>
    %cst_105 = arith.constant dense<0.000000e+00> : vector<8x512xf32>
    %78 = tpu.matmul %76, %77, %cst_105 {dimension_numbers = #tpu.dot_dimension_numbers<[1], [0], [0], [1], [0, 0, 1, 1], [], []>} : vector<8x64xbf16>, vector<64x512xbf16>, vector<8x512xf32> -> vector<8x512xf32>
    %79 = arith.truncf %75 : vector<8x512xf32> to vector<8x512xbf16>
    %c0_106 = arith.constant 0 : index
    %c0_107 = arith.constant 0 : index
    %80 = vector.load %arg12[%c0_106, %c0_107] : memref<512x512xbf16, #tpu.memory_space<vmem>>, vector<512x512xbf16>
    %cst_108 = arith.constant dense<0.000000e+00> : vector<8x512xf32>
    %81 = tpu.matmul %79, %80, %cst_108 {dimension_numbers = #tpu.dot_dimension_numbers<[1], [0], [0], [1], [0, 0, 1, 1], [], []>} : vector<8x512xbf16>, vector<512x512xbf16>, vector<8x512xf32> -> vector<8x512xf32>
    %82 = arith.addf %78, %81 : vector<8x512xf32>
    %c0_109 = arith.constant 0 : index
    %c0_110 = arith.constant 0 : index
    %83 = vector.load %arg13[%c0_109, %c0_110] : memref<1x512xf32, #tpu.memory_space<vmem>>, vector<1x512xf32>
    %84 = vector.broadcast %83 : vector<1x512xf32> to vector<8x512xf32>
    %85 = arith.addf %82, %84 : vector<8x512xf32>
    %cst_111 = arith.constant 0.000000e+00 : f32
    %86 = vector.broadcast %cst_111 : f32 to vector<8x512xf32>
    %87 = arith.maximumf %85, %86 : vector<8x512xf32>
    %88 = arith.truncf %87 : vector<8x512xf32> to vector<8x512xbf16>
    %c0_112 = arith.constant 0 : index
    %c0_113 = arith.constant 0 : index
    %89 = vector.load %arg14[%c0_112, %c0_113] : memref<512x128xbf16, #tpu.memory_space<vmem>>, vector<512x128xbf16>
    %cst_114 = arith.constant dense<0.000000e+00> : vector<8x128xf32>
    %90 = tpu.matmul %88, %89, %cst_114 {dimension_numbers = #tpu.dot_dimension_numbers<[1], [0], [0], [1], [0, 0, 1, 1], [], []>} : vector<8x512xbf16>, vector<512x128xbf16>, vector<8x128xf32> -> vector<8x128xf32>
    %c0_115 = arith.constant 0 : index
    %c0_116 = arith.constant 0 : index
    %91 = vector.load %arg15[%c0_115, %c0_116] : memref<1x128xf32, #tpu.memory_space<vmem>>, vector<1x128xf32>
    %92 = vector.broadcast %91 : vector<1x128xf32> to vector<8x128xf32>
    %93 = arith.addf %90, %92 : vector<8x128xf32>
    %c0_117 = arith.constant 0 : index
    %c0_118 = arith.constant 0 : index
    %94 = vector.load %arg16[%c0_117, %c0_118] : memref<8x128xf32, #tpu.memory_space<vmem>>, vector<8x128xf32>
    tpu.vector_store %arg16[%c0_117, %c0_118], %93 {strides = array<i32>} : memref<8x128xf32, #tpu.memory_space<vmem>>, vector<8x128xf32>,
    return
  }
  func.func @transform_0(%arg0: i32) -> (i32, i32, i32, i32) {
    %c0_i32 = arith.constant 0 : i32
    %c0_i32_0 = arith.constant 0 : i32
    %c0_i32_1 = arith.constant 0 : i32
    %c0_i32_2 = arith.constant 0 : i32
    return %arg0, %c0_i32, %c0_i32_0, %c0_i32_1 : i32, i32, i32, i32
  }
  func.func @transform_1(%arg0: i32) -> (i32, i32) {
    %c0_i32 = arith.constant 0 : i32
    %c0_i32_0 = arith.constant 0 : i32
    return %arg0, %c0_i32 : i32, i32
  }
  func.func @transform_2(%arg0: i32) -> (i32, i32) {
    %c0_i32 = arith.constant 0 : i32
    %c0_i32_0 = arith.constant 0 : i32
    %c0_i32_1 = arith.constant 0 : i32
    return %c0_i32, %c0_i32_0 : i32, i32
  }
  func.func @transform_3(%arg0: i32) -> (i32, i32) {
    %c0_i32 = arith.constant 0 : i32
    %c0_i32_0 = arith.constant 0 : i32
    %c0_i32_1 = arith.constant 0 : i32
    return %c0_i32, %c0_i32_0 : i32, i32
  }
  func.func @transform_4(%arg0: i32) -> (i32, i32) {
    %c0_i32 = arith.constant 0 : i32
    %c0_i32_0 = arith.constant 0 : i32
    %c0_i32_1 = arith.constant 0 : i32
    return %c0_i32, %c0_i32_0 : i32, i32
  }
  func.func @transform_5(%arg0: i32) -> (i32, i32) {
    %c0_i32 = arith.constant 0 : i32
    %c0_i32_0 = arith.constant 0 : i32
    %c0_i32_1 = arith.constant 0 : i32
    return %c0_i32, %c0_i32_0 : i32, i32
  }
  func.func @transform_6(%arg0: i32) -> (i32, i32) {
    %c0_i32 = arith.constant 0 : i32
    %c0_i32_0 = arith.constant 0 : i32
    %c0_i32_1 = arith.constant 0 : i32
    return %c0_i32, %c0_i32_0 : i32, i32
  }
  func.func @transform_7(%arg0: i32) -> (i32, i32) {
    %c0_i32 = arith.constant 0 : i32
    %c0_i32_0 = arith.constant 0 : i32
    %c0_i32_1 = arith.constant 0 : i32
    return %c0_i32, %c0_i32_0 : i32, i32
  }
  func.func @transform_8(%arg0: i32) -> (i32, i32) {
    %c0_i32 = arith.constant 0 : i32
    %c0_i32_0 = arith.constant 0 : i32
    %c0_i32_1 = arith.constant 0 : i32
    return %c0_i32, %c0_i32_0 : i32, i32
  }
  func.func @transform_9(%arg0: i32) -> (i32, i32) {
    %c0_i32 = arith.constant 0 : i32
    %c0_i32_0 = arith.constant 0 : i32
    %c0_i32_1 = arith.constant 0 : i32
    return %c0_i32, %c0_i32_0 : i32, i32
  }
  func.func @transform_10(%arg0: i32) -> (i32, i32) {
    %c0_i32 = arith.constant 0 : i32
    %c0_i32_0 = arith.constant 0 : i32
    %c0_i32_1 = arith.constant 0 : i32
    return %c0_i32, %c0_i32_0 : i32, i32
  }
  func.func @transform_11(%arg0: i32) -> (i32, i32) {
    %c0_i32 = arith.constant 0 : i32
    %c0_i32_0 = arith.constant 0 : i32
    %c0_i32_1 = arith.constant 0 : i32
    return %c0_i32, %c0_i32_0 : i32, i32
  }
  func.func @transform_12(%arg0: i32) -> (i32, i32) {
    %c0_i32 = arith.constant 0 : i32
    %c0_i32_0 = arith.constant 0 : i32
    %c0_i32_1 = arith.constant 0 : i32
    return %c0_i32, %c0_i32_0 : i32, i32
  }
  func.func @transform_13(%arg0: i32) -> (i32, i32) {
    %c0_i32 = arith.constant 0 : i32
    %c0_i32_0 = arith.constant 0 : i32
    %c0_i32_1 = arith.constant 0 : i32
    return %c0_i32, %c0_i32_0 : i32, i32
  }
  func.func @transform_14(%arg0: i32) -> (i32, i32) {
    %c0_i32 = arith.constant 0 : i32
    %c0_i32_0 = arith.constant 0 : i32
    %c0_i32_1 = arith.constant 0 : i32
    return %c0_i32, %c0_i32_0 : i32, i32
  }
  func.func @transform_15(%arg0: i32) -> (i32, i32) {
    %c0_i32 = arith.constant 0 : i32
    %c0_i32_0 = arith.constant 0 : i32
    return %arg0, %c0_i32 : i32, i32
  }
}

</mosaic_0001>

<bundles_post_ra>
// kernel: nature_cnn_forward.2
= control target key start
LH: loop header
LB: loop body
LE: loop exit
PB: predicated region body
PF: predicated region fallthrough
CT: control target
= control target key end

     0   :  { %s4502_s12 = smov 0   ;;  %s5903_s0 = inlined_call_operand.vmem [shape: bf16[16,9,9,64], index: 0, kind: input, shape index: {}]   ;;  %s5904_s1 = inlined_call_operand.vmem [shape: bf16[256,32], index: 1, kind: input, shape index: {}]   ;;  %s5905_s2 = inlined_call_operand.vmem [shape: f32[1,32], index: 2, kind: input, shape index: {}]   ;;  %s5906_s3 = inlined_call_operand.vmem [shape: bf16[16,8,8,32], index: 3, kind: output, shape index: {}]  }
   0x1 LB: > { %s4061_s13 = sadd.s32 4294967295, %s4478_s12   ;;  %p4065_p0 = scmp.ge.s32.totalorder %s4478_s12, 1  ;;  %s4478_s12 = sphi %s4502_s12, %s13_s12  }
   0x2   : > { %p139_p1 = scmp.lt.s32.totalorder %s4478_s12, 3 }
   0x4   : > { %p140_p2 = pnand %p4065_p0, %p139_p1 }
   0x5   : > { %s4066_s14 = sshll.u32 (!%p140_p2), %s4061_s13, 3  ;;  %s4481_s29 = smov (!%p140_p2), 64  }
   0x6   : > { %143 = sbr.rel (%p140_p2) target bundleno = 688 (0x2b0), region = 32  ;;  %p166_p3 = scmp.lt.s32.totalorder (!%p140_p2), %s4066_s14, 15 }
   0xb   : > { %v4480_v0 = vmov 0   ;;  %v4390_v1 = vld [vmem:[%s5904_s1 + $0x38] sm:$0xff]   ;;  %s5910_s14 = smov (!%p166_p3, %s4066_s14), 15  ;;  %vm437_vm0 = vsmask.f32 3328  ;;  %v4391_v2 = vld [vmem:[%s5904_s1 + $0x30] sm:$0xff]  }
   0xc   : > { %3521 = vmatprep.subr.bf16.mxu0 %v4480_v0  ;;  %4347 = vmatprep.subr.bf16.mxu1 %v4480_v0  ;;  %s4379_s19 = smul.u32 72, %s5910_s14  ;;  %vm438_vm1 = vsmask.f32 7440  ;;  %v4392_v3 = vld [vmem:[%s5904_s1 + $0x28] sm:$0xff]   ;;  %v4393_v16 = vld [vmem:[%s5904_s1 + $0x20] sm:$0xff]   ;;  %v4394_v47 = vld [vmem:[%s5904_s1 + $0x18] sm:$0xff]  }
   0xd   : > { %3522 = vmatpush1.bf16.msra.mxu0 %v4390_v1  ;;  %4363 = vmatpush1.bf16.msra.mxu1 %v4390_v1  ;;  %vm4549_vm2 = vmor %vm437_vm0, %vm438_vm1  ;;  %vm244_vm3 = vcmask 519168   ;;  %vm1528_vm4 = vcmask 1043968   ;;  %vm3938_vm5 = vcmask 257024  }
   0xe   : > { %3523 = vmatprep.subr.bf16.mxu0 %v4480_v0  ;;  %4348 = vmatprep.subr.bf16.mxu1 %v4480_v0  ;;  %s4526_s22 = scalar_lea.vmem %s5903_s0, %s4379_s19 }
   0xf   : > { %v373_v4 = vld [vmem:[%s4526_s22 + $0x120] sm:$0xf]  ;;  %v374_v5 = vld [vmem:[%s4526_s22 + $0x124] sm:$0x1]  ;;  %v375_v14 = vld [vmem:[%s4526_s22 + $0x128] sm:$0xf] }
  0x10   : > { %v309_v6 = vld [vmem:[%s4526_s22] sm:$0xf]  ;;  %v889_v7 = vshrl.u32 %v373_v4, 16  ;;  %v892_v8 = vshll.u32 %v373_v4, 16  ;;  %v898_v9 = vshll.u32 %v374_v5, 16  ;;  %v903_v24 = vshrl.u32 %v375_v14, 16 }
  0x11   : > { %3524 = vmatpush1.bf16.msra.mxu0 %v4391_v2  ;;  %4364 = vmatpush1.bf16.msra.mxu1 %v4391_v2  ;;  %v310_v10 = vld [vmem:[%s4526_s22 + $0x4] sm:$0x1]  ;;  %v441_v11 = vshrl.u32 %v309_v6, 16  ;;  %v444_v12 = vshll.u32 %v309_v6, 16  ;;  %v376_v15 = vld [vmem:[%s4526_s22 + $0x12c] sm:$0x1] }
  0x12   : > { %3525 = vmatprep.subr.bf16.mxu0 %v4480_v0  ;;  %4349 = vmatprep.subr.bf16.mxu1 %v4480_v0  ;;  %v450_v13 = vshll.u32 %v310_v10, 16  ;;  %v891_v17 = vrot.slane %v889_v7, 4  ;;  %v894_v18 = vrot.slane %v892_v8, 5  ;;  %v900_v19 = vrot.slane %v898_v9, 5  ;;  %v311_v21 = vld [vmem:[%s4526_s22 + $0x8] sm:$0xf] }
  0x13   : > { %v443_v20 = vrot.slane %v441_v11, 4  ;;  %v446_v22 = vrot.slane %v444_v12, 5  ;;  %v906_v25 = vshll.u32 %v375_v14, 16  ;;  %v312_v26 = vld [vmem:[%s4526_s22 + $0xc] sm:$0x1]  ;;  %v912_v28 = vshll.u32 %v376_v15, 16 }
  0x14   : > { %v452_v23 = vrot.slane %v450_v13, 5  ;;  %v895_v27 = vor.u32 %v894_v18, %v891_v17  ;;  %v455_v29 = vshrl.u32 %v311_v21, 16  ;;  %v458_v30 = vshll.u32 %v311_v21, 16  ;;  %v4137_v31 = vld [vmem:[%s4526_s22 + $0x10] sm:$0xf]  ;;  %v4396_v21 = vld [vmem:[%s5904_s1 + $0x8] sm:$0xff]  }
  0x15   : > { %3526 = vmatpush1.bf16.msra.mxu0 %v4392_v3  ;;  %4365 = vmatpush1.bf16.msra.mxu1 %v4392_v3  ;;  %v447_v33 = vor.u32 %v446_v22, %v443_v20  ;;  %v905_v34 = vrot.slane %v903_v24, 4  ;;  %v908_v35 = vrot.slane %v906_v25, 5  ;;  %v464_v36 = vshll.u32 %v312_v26, 16  ;;  %v4138_v37 = vld [vmem:[%s4526_s22 + $0x14] sm:$0x1] }
  0x16   : > { %3527 = vmatprep.subr.bf16.mxu0 %v4480_v0  ;;  %4350 = vmatprep.subr.bf16.mxu1 %v4480_v0  ;;  %v896_v38 = vrot.slane %v895_v27, 4  ;;  %v914_v39 = vrot.slane %v912_v28, 5  ;;  %v457_v40 = vrot.slane %v455_v29, 4  ;;  %v460_v41 = vrot.slane %v458_v30, 5  ;;  %v4135_v42 = vld [vmem:[%s4526_s22 + $0x8] sm:$0xf] }
  0x17   : > { %v448_v43 = vrot.slane %v447_v33, 4  ;;  %v909_v44 = vor.u32 %v908_v35, %v905_v34  ;;  %v466_v45 = vrot.slane %v464_v36, 5  ;;  %v1865_v46 = vshrl.u32 %v4137_v31, 16  ;;  %v4136_v52 = vld [vmem:[%s4526_s22 + $0xc] sm:$0x1]  ;;  %v4395_v5 = vld [vmem:[%s5904_s1 + $0x10] sm:$0xff]  }
  0x18   : > { %v901_v48 = vsel %vm4549_vm2, %v896_v38, %v900_v19  ;;  %v461_v49 = vor.u32 %v460_v41, %v457_v40  ;;  %v1868_v50 = vshll.u32 %v4137_v31, 16  ;;  %v1874_v51 = vshll.u32 %v4138_v37, 16  ;;  %v4201_v53 = vld [vmem:[%s4526_s22 + $0x130] sm:$0xf]  ;;  %v4202_v58 = vld [vmem:[%s4526_s22 + $0x134] sm:$0x1] }
  0x19   : > { %3528 = vmatpush1.bf16.msra.mxu0 %v4393_v16  ;;  %4366 = vmatpush1.bf16.msra.mxu1 %v4393_v16  ;;  %v453_v54 = vsel %vm4549_vm2, %v448_v43, %v452_v23  ;;  %v910_v55 = vrot.slane %v909_v44, 4  ;;  %v1867_v56 = vrot.slane %v1865_v46, 4  ;;  %v1851_v57 = vshrl.u32 %v4135_v42, 16  ;;  %v4199_v63 = vld [vmem:[%s4526_s22 + $0x128] sm:$0xf]  ;;  %v4397_v43 = vld [vmem:[%s5904_s1] sm:$0xff]  }
  0x1a   : > { %3529 = vmatprep.subr.bf16.mxu0 %v4480_v0  ;;  %4351 = vmatprep.subr.bf16.mxu1 %v4480_v0  ;;  %v462_v59 = vrot.slane %v461_v49, 4  ;;  %v1870_v60 = vrot.slane %v1868_v50, 5  ;;  %v1876_v61 = vrot.slane %v1874_v51, 5  ;;  %v1854_v62 = vshll.u32 %v4135_v42, 16  ;;  %v4200_v10 = vld [vmem:[%s4526_s22 + $0x12c] sm:$0x1] }
  0x1b   : > { %1400 = vrot.lane.b32.xlu1 %v901_v48, %s4481_s29  ;;  %1336 = vrot.lane.b32.xlu0 %v453_v54, %s4481_s29  ;;  %v915_v1 = vsel %vm4549_vm2, %v910_v55, %v914_v39  ;;  %v1853_v2 = vrot.slane %v1851_v57, 4  ;;  %v1860_v3 = vshll.u32 %v4136_v52, 16  ;;  %v2313_v4 = vshrl.u32 %v4201_v53, 16  ;;  %v315_v11 = vld [vmem:[%s4526_s22 + $0x18] sm:$0xf] }
  0x1c   : > { %v467_v6 = vsel %vm4549_vm2, %v462_v59, %v466_v45  ;;  %v1871_v7 = vor.u32 %v1870_v60, %v1867_v56  ;;  %v1856_v8 = vrot.slane %v1854_v62, 5  ;;  %v2316_v9 = vshll.u32 %v4201_v53, 16  ;;  %v316_v20 = vld [vmem:[%s4526_s22 + $0x1c] sm:$0x1]  ;;  %v313_v26 = vld [vmem:[%s4526_s22 + $0x10] sm:$0xf] }
  0x1d   : > { %3530 = vmatpush1.bf16.msra.mxu0 %v4394_v47  ;;  %4367 = vmatpush1.bf16.msra.mxu1 %v4394_v47  ;;  %v1862_v12 = vrot.slane %v1860_v3, 5  ;;  %v2315_v13 = vrot.slane %v2313_v4, 4  ;;  %v2322_v14 = vshll.u32 %v4202_v58, 16  ;;  %v2299_v15 = vshrl.u32 %v4199_v63, 16  ;;  %v314_v31 = vld [vmem:[%s4526_s22 + $0x14] sm:$0x1] }
  0x1e   : > { %3531 = vmatprep.subr.bf16.mxu0 %v4480_v0  ;;  %4352 = vmatprep.subr.bf16.mxu1 %v4480_v0  ;;  %v1872_v16 = vrot.slane %v1871_v7, 4  ;;  %v1857_v17 = vor.u32 %v1856_v8, %v1853_v2  ;;  %v2318_v18 = vrot.slane %v2316_v9, 5  ;;  %v2302_v19 = vshll.u32 %v4199_v63, 16  ;;  %v379_v37 = vld [vmem:[%s4526_s22 + $0x138] sm:$0xf] }
  0x1f   : > { %1402 = vrot.lane.b32.xlu1 %v915_v1, %s4481_s29  ;;  %1338 = vrot.lane.b32.xlu0 %v467_v6, %s4481_s29  ;;  %v2324_v22 = vrot.slane %v2322_v14, 5  ;;  %v2301_v23 = vrot.slane %v2299_v15, 4  ;;  %v2308_v24 = vshll.u32 %v4200_v10, 16  ;;  %v483_v25 = vshrl.u32 %v315_v11, 16  ;;  %v380_v42 = vld [vmem:[%s4526_s22 + $0x13c] sm:$0x1] }
  0x20   : > { %v1877_v27 = vsel %vm4549_vm2, %v1872_v16, %v1876_v61  ;;  %v1858_v28 = vrot.slane %v1857_v17, 4  ;;  %v2319_v29 = vor.u32 %v2318_v18, %v2315_v13  ;;  %v2304_v30 = vrot.slane %v2302_v19, 5  ;;  %v377_v48 = vld [vmem:[%s4526_s22 + $0x130] sm:$0xf]  ;;  %v378_v53 = vld [vmem:[%s4526_s22 + $0x134] sm:$0x1] }
  0x21   : > { %3532 = vmatpush1.bf16.msra.mxu0 %v4395_v5  ;;  %4368 = vmatpush1.bf16.msra.mxu1 %v4395_v5  ;;  %v2310_v33 = vrot.slane %v2308_v24, 5  ;;  %v485_v34 = vrot.slane %v483_v25, 4  ;;  %v486_v35 = vshll.u32 %v315_v11, 16  ;;  %v492_v36 = vshll.u32 %v316_v20, 16  ;;  %v4141_v58 = vld [vmem:[%s4526_s22 + $0x20] sm:$0xf] }
  0x22   : > { %3533 = vmatprep.subr.bf16.mxu0 %v4480_v0  ;;  %4353 = vmatprep.subr.bf16.mxu1 %v4480_v0  ;;  %v1863_v38 = vsel %vm4549_vm2, %v1858_v28, %v1862_v12  ;;  %v2320_v39 = vrot.slane %v2319_v29, 4  ;;  %v2305_v40 = vor.u32 %v2304_v30, %v2301_v23  ;;  %v469_v41 = vshrl.u32 %v313_v26, 16  ;;  %v4142_v4 = vld [vmem:[%s4526_s22 + $0x24] sm:$0x1]  ;;  %v4398_v5 = vld [vmem:[%s5904_s1 + $0x78] sm:$0xff]  }
  0x23   : > { %2748 = vrot.lane.b32.xlu1 %v1877_v27, %s4481_s29  ;;  %2746 = vrot.lane.b32.xlu0 %v1863_v38, %s4481_s29  ;;  %v488_v44 = vrot.slane %v486_v35, 5  ;;  %v494_v45 = vrot.slane %v492_v36, 5  ;;  %v472_v46 = vshll.u32 %v313_v26, 16  ;;  %v478_v47 = vshll.u32 %v314_v31, 16  ;;  %v4139_v10 = vld [vmem:[%s4526_s22 + $0x18] sm:$0xf] }
  0x24   : > { %v2325_v49 = vsel %vm4549_vm2, %v2320_v39, %v2324_v22  ;;  %v2306_v50 = vrot.slane %v2305_v40, 4  ;;  %v471_v51 = vrot.slane %v469_v41, 4  ;;  %v931_v52 = vshrl.u32 %v379_v37, 16  ;;  %v4140_v15 = vld [vmem:[%s4526_s22 + $0x1c] sm:$0x1]  ;;  %v4399_v26 = vld [vmem:[%s5904_s1 + $0x70] sm:$0xff]  }
  0x25   : > { %3534 = vmatpush1.bf16.msra.mxu0 %v4396_v21  ;;  %4369 = vmatpush1.bf16.msra.mxu1 %v4396_v21  ;;  %v489_v54 = vor.u32 %v488_v44, %v485_v34  ;;  %v474_v55 = vrot.slane %v472_v46, 5  ;;  %v480_v56 = vrot.slane %v478_v47, 5  ;;  %v934_v57 = vshll.u32 %v379_v37, 16  ;;  %v4205_v20 = vld [vmem:[%s4526_s22 + $0x140] sm:$0xf]  ;;  %v4400_v47 = vld [vmem:[%s5904_s1 + $0x68] sm:$0xff]  }
  0x26   : > { %3535 = vmatprep.subr.bf16.mxu0 %v4480_v0  ;;  %4354 = vmatprep.subr.bf16.mxu1 %v4480_v0  ;;  %v2311_v59 = vsel %vm4549_vm2, %v2306_v50, %v2310_v33  ;;  %v933_v60 = vrot.slane %v931_v52, 4  ;;  %v940_v61 = vshll.u32 %v380_v42, 16  ;;  %v917_v62 = vshrl.u32 %v377_v48, 16  ;;  %v4206_v25 = vld [vmem:[%s4526_s22 + $0x144] sm:$0x1] }
  0x27   : > { %2812 = vrot.lane.b32.xlu1 %v2325_v49, %s4481_s29  ;;  %2810 = vrot.lane.b32.xlu0 %v2311_v59, %s4481_s29  ;;  %v490_v63 = vrot.slane %v489_v54, 4  ;;  %v475_v1 = vor.u32 %v474_v55, %v471_v51  ;;  %v936_v2 = vrot.slane %v934_v57, 5  ;;  %v920_v3 = vshll.u32 %v377_v48, 16  ;;  %v4203_v31 = vld [vmem:[%s4526_s22 + $0x138] sm:$0xf] }
  0x28   : > { %v942_v6 = vrot.slane %v940_v61, 5  ;;  %v919_v7 = vrot.slane %v917_v62, 4  ;;  %v926_v8 = vshll.u32 %v378_v53, 16  ;;  %v1893_v9 = vshrl.u32 %v4141_v58, 16  ;;  %v4204_v37 = vld [vmem:[%s4526_s22 + $0x13c] sm:$0x1] }
  0x29   : > { %3536 = vmatpush1.bf16.msra.mxu0 %v4397_v43  ;;  %4370 = vmatpush1.bf16.msra.mxu1 %v4397_v43  ;;  %v495_v11 = vsel %vm4549_vm2, %v490_v63, %v494_v45  ;;  %v476_v12 = vrot.slane %v475_v1, 4  ;;  %v937_v13 = vor.u32 %v936_v2, %v933_v60  ;;  %v922_v14 = vrot.slane %v920_v3, 5  ;;  %v319_v42 = vld [vmem:[%s4526_s22 + $0x28] sm:$0xf]  ;;  %v320_v52 = vld [vmem:[%s4526_s22 + $0x2c] sm:$0x1] }
  0x2a   : > { %3537 = vmatprep.subr.bf16.mxu0 %v4480_v0  ;;  %4355 = vmatprep.subr.bf16.mxu1 %v4480_v0  ;;  %v928_v16 = vrot.slane %v926_v8, 5  ;;  %v1895_v17 = vrot.slane %v1893_v9, 4  ;;  %v1896_v18 = vshll.u32 %v4141_v58, 16  ;;  %v1902_v19 = vshll.u32 %v4142_v4, 16  ;;  %v317_v57 = vld [vmem:[%s4526_s22 + $0x20] sm:$0xf] }
  0x2b   : > { %1342 = vrot.lane.b32.xlu1 %v495_v11, %s4481_s29  ;;  %v481_v21 = vsel %vm4549_vm2, %v476_v12, %v480_v56  ;;  %v938_v22 = vrot.slane %v937_v13, 4  ;;  %v923_v23 = vor.u32 %v922_v14, %v919_v7  ;;  %v1879_v24 = vshrl.u32 %v4139_v10, 16  ;;  %v318_v62 = vld [vmem:[%s4526_s22 + $0x24] sm:$0x1]  ;;  %v4091_v32 = vld [vmem:[%s4526_s22 + $0xb8] sm:$0xf] }
  0x2c   : > { %1340 = vrot.lane.b32.xlu0 %v481_v21, %s4481_s29  ;;  %v1898_v27 = vrot.slane %v1896_v18, 5  ;;  %v1904_v28 = vrot.slane %v1902_v19, 5  ;;  %v1882_v29 = vshll.u32 %v4139_v10, 16  ;;  %v1888_v30 = vshll.u32 %v4140_v15, 16  ;;  %v4401_v63 = vld [vmem:[%s5904_s1 + $0x60] sm:$0xff]  }
  0x2d   : > { %3538 = vmatpush2.bf16.msra.mxu0 %v4398_v5  ;;  %v943_v33 = vsel %vm4549_vm2, %v938_v22, %v942_v6  ;;  %v924_v34 = vrot.slane %v923_v23, 4  ;;  %v1881_v35 = vrot.slane %v1879_v24, 4  ;;  %v2341_v36 = vshrl.u32 %v4205_v20, 16  ;;  %4371 = vmatpush2.bf16.msra.mxu1 %v4398_v5  ;;  %v383_v5 = vld [vmem:[%s4526_s22 + $0x148] sm:$0xf] }
  0x2e   : > { %3539 = vmatprep.subr.bf16.mxu0 %v4480_v0  ;;  %v1899_v38 = vor.u32 %v1898_v27, %v1895_v17  ;;  %v1884_v39 = vrot.slane %v1882_v29, 5  ;;  %v1890_v40 = vrot.slane %v1888_v30, 5  ;;  %v2344_v41 = vshll.u32 %v4205_v20, 16  ;;  %4356 = vmatprep.subr.bf16.mxu1 %v4480_v0  ;;  %v384_v10 = vld [vmem:[%s4526_s22 + $0x14c] sm:$0x1] }
  0x2f   : > { %1406 = vrot.lane.b32.xlu1 %v943_v33, %s4481_s29  ;;  %v929_v43 = vsel %vm4549_vm2, %v924_v34, %v928_v16  ;;  %v2343_v44 = vrot.slane %v2341_v36, 4  ;;  %v2350_v45 = vshll.u32 %v4206_v25, 16  ;;  %v2327_v46 = vshrl.u32 %v4203_v31, 16  ;;  %v381_v15 = vld [vmem:[%s4526_s22 + $0x140] sm:$0xf] }
  0x30   : > { %1404 = vrot.lane.b32.xlu0 %v929_v43, %s4481_s29  ;;  %v1900_v48 = vrot.slane %v1899_v38, 4  ;;  %v1885_v49 = vor.u32 %v1884_v39, %v1881_v35  ;;  %v2346_v50 = vrot.slane %v2344_v41, 5  ;;  %v2330_v51 = vshll.u32 %v4203_v31, 16  ;;  %v382_v20 = vld [vmem:[%s4526_s22 + $0x144] sm:$0x1] }
  0x31   : > { %3540 = vmatpush2.bf16.msra.mxu0 %v4399_v26  ;;  %v2352_v53 = vrot.slane %v2350_v45, 5  ;;  %v2329_v54 = vrot.slane %v2327_v46, 4  ;;  %v2336_v55 = vshll.u32 %v4204_v37, 16  ;;  %v511_v56 = vshrl.u32 %v319_v42, 16  ;;  %4372 = vmatpush2.bf16.msra.mxu1 %v4399_v26  ;;  %v4145_v25 = vld [vmem:[%s4526_s22 + $0x30] sm:$0xf] }
  0x32   : > { %3541 = vmatprep.subr.bf16.mxu0 %v4480_v0  ;;  %v1905_v58 = vsel %vm4549_vm2, %v1900_v48, %v1904_v28  ;;  %v1886_v59 = vrot.slane %v1885_v49, 4  ;;  %v2347_v60 = vor.u32 %v2346_v50, %v2343_v44  ;;  %v2332_v61 = vrot.slane %v2330_v51, 5  ;;  %4357 = vmatprep.subr.bf16.mxu1 %v4480_v0  ;;  %v4402_v26 = vld [vmem:[%s5904_s1 + $0x58] sm:$0xff]   ;;  %v4146_v36 = vld [vmem:[%s4526_s22 + $0x34] sm:$0x1] }
  0x33   : > { %2752 = vrot.lane.b32.xlu1 %v1905_v58, %s4481_s29  ;;  %v2338_v1 = vrot.slane %v2336_v55, 5  ;;  %v513_v2 = vrot.slane %v511_v56, 4  ;;  %v514_v3 = vshll.u32 %v319_v42, 16  ;;  %v520_v4 = vshll.u32 %v320_v52, 16  ;;  %v4143_v41 = vld [vmem:[%s4526_s22 + $0x28] sm:$0xf] }
  0x34   : > { %v1891_v6 = vsel %vm4549_vm2, %v1886_v59, %v1890_v40  ;;  %v2348_v7 = vrot.slane %v2347_v60, 4  ;;  %v2333_v8 = vor.u32 %v2332_v61, %v2329_v54  ;;  %v497_v9 = vshrl.u32 %v317_v57, 16  ;;  %v4144_v46 = vld [vmem:[%s4526_s22 + $0x2c] sm:$0x1]  ;;  %v4209_v52 = vld [vmem:[%s4526_s22 + $0x150] sm:$0xf] }
  0x35   : > { %3542 = vmatpush2.bf16.msra.mxu0 %v4400_v47  ;;  %2750 = vrot.lane.b32.xlu0 %v1891_v6, %s4481_s29  ;;  %v516_v11 = vrot.slane %v514_v3, 5  ;;  %v522_v12 = vrot.slane %v520_v4, 5  ;;  %v500_v13 = vshll.u32 %v317_v57, 16  ;;  %v506_v14 = vshll.u32 %v318_v62, 16  ;;  %v4210_v57 = vld [vmem:[%s4526_s22 + $0x154] sm:$0x1] }
  0x36   : > { %3543 = vmatprep.subr.bf16.mxu0 %v4480_v0  ;;  %4373 = vmatpush2.bf16.msra.mxu1 %v4400_v47  ;;  %v2353_v16 = vsel %vm4549_vm2, %v2348_v7, %v2352_v53  ;;  %v2334_v17 = vrot.slane %v2333_v8, 4  ;;  %v499_v18 = vrot.slane %v497_v9, 4  ;;  %v959_v19 = vshrl.u32 %v383_v5, 16  ;;  %v4403_v47 = vld [vmem:[%s5904_s1 + $0x50] sm:$0xff]   ;;  %v4207_v62 = vld [vmem:[%s4526_s22 + $0x148] sm:$0xf] }
  0x37   : > { %4358 = vmatprep.subr.bf16.mxu1 %v4480_v0  ;;  %2816 = vrot.lane.b32.xlu1 %v2353_v16, %s4481_s29  ;;  %v517_v21 = vor.u32 %v516_v11, %v513_v2  ;;  %v502_v22 = vrot.slane %v500_v13, 5  ;;  %v508_v23 = vrot.slane %v506_v14, 5  ;;  %v962_v24 = vshll.u32 %v383_v5, 16  ;;  %v4208_v4 = vld [vmem:[%s4526_s22 + $0x14c] sm:$0x1] }
  0x38   : > { %v2339_v27 = vsel %vm4549_vm2, %v2334_v17, %v2338_v1  ;;  %v961_v28 = vrot.slane %v959_v19, 4  ;;  %v968_v29 = vshll.u32 %v384_v10, 16  ;;  %v945_v30 = vshrl.u32 %v381_v15, 16  ;;  %v4404_v5 = vld [vmem:[%s5904_s1 + $0x48] sm:$0xff]   ;;  %v323_v10 = vld [vmem:[%s4526_s22 + $0x38] sm:$0xf] }
  0x39   : > { %3544 = vmatpush2.bf16.msra.mxu0 %v4401_v63  ;;  %2814 = vrot.lane.b32.xlu0 %v2339_v27, %s4481_s29  ;;  %v518_v31 = vrot.slane %v517_v21, 4  ;;  %v503_v33 = vor.u32 %v502_v22, %v499_v18  ;;  %v964_v34 = vrot.slane %v962_v24, 5  ;;  %v948_v35 = vshll.u32 %v381_v15, 16  ;;  %v324_v19 = vld [vmem:[%s4526_s22 + $0x3c] sm:$0x1] }
  0x3a   : > { %3545 = vmatprep.subr.bf16.mxu0 %v4480_v0  ;;  %4374 = vmatpush2.bf16.msra.mxu1 %v4401_v63  ;;  %v970_v37 = vrot.slane %v968_v29, 5  ;;  %v947_v38 = vrot.slane %v945_v30, 4  ;;  %v954_v39 = vshll.u32 %v382_v20, 16  ;;  %v1921_v40 = vshrl.u32 %v4145_v25, 16  ;;  %v4405_v20 = vld [vmem:[%s5904_s1 + $0x40] sm:$0xff]  }
  0x3b   : > { %4359 = vmatprep.subr.bf16.mxu1 %v4480_v0  ;;  %v523_v42 = vsel %vm4549_vm2, %v518_v31, %v522_v12  ;;  %v504_v43 = vrot.slane %v503_v33, 4  ;;  %v965_v44 = vor.u32 %v964_v34, %v961_v28  ;;  %v950_v45 = vrot.slane %v948_v35, 5  ;;  %v322_v30 = vld [vmem:[%s4526_s22 + $0x34] sm:$0x1]  ;;  %1678 = vst.msk [vmem:[#allocation2 + $0xa4] sm:$0xf] %vm244_vm3, %v4091_v32 }
  0x3c   : > { %1346 = vrot.lane.b32.xlu1 %v523_v42, %s4481_s29  ;;  %v956_v48 = vrot.slane %v954_v39, 5  ;;  %v1923_v49 = vrot.slane %v1921_v40, 4  ;;  %v1924_v50 = vshll.u32 %v4145_v25, 16  ;;  %v1930_v51 = vshll.u32 %v4146_v36, 16  ;;  %v321_v25 = vld [vmem:[%s4526_s22 + $0x30] sm:$0xf] }
  0x3d   : > { %3546 = vmatpush2.bf16.msra.mxu0 %v4402_v26  ;;  %v509_v53 = vsel %vm4549_vm2, %v504_v43, %v508_v23  ;;  %v966_v54 = vrot.slane %v965_v44, 4  ;;  %v951_v55 = vor.u32 %v950_v45, %v947_v38  ;;  %v1907_v56 = vshrl.u32 %v4143_v41, 16  ;;  %v387_v36 = vld [vmem:[%s4526_s22 + $0x158] sm:$0xf] }
  0x3e   : > { %3547 = vmatprep.subr.bf16.mxu0 %v4480_v0  ;;  %4375 = vmatpush2.bf16.msra.mxu1 %v4402_v26  ;;  %v1926_v58 = vrot.slane %v1924_v50, 5  ;;  %v1932_v59 = vrot.slane %v1930_v51, 5  ;;  %v1910_v60 = vshll.u32 %v4143_v41, 16  ;;  %v1916_v61 = vshll.u32 %v4144_v46, 16  ;;  %v388_v41 = vld [vmem:[%s4526_s22 + $0x15c] sm:$0x1] }
  0x3f   : > { %1344 = vrot.lane.b32.xlu0 %v509_v53, %s4481_s29  ;;  %4360 = vmatprep.subr.bf16.mxu1 %v4480_v0  ;;  %v971_v63 = vsel %vm4549_vm2, %v966_v54, %v970_v37  ;;  %v952_v1 = vrot.slane %v951_v55, 4  ;;  %v1909_v2 = vrot.slane %v1907_v56, 4  ;;  %v2369_v3 = vshrl.u32 %v4209_v52, 16  ;;  %v385_v46 = vld [vmem:[%s4526_s22 + $0x150] sm:$0xf] }
  0x40   : > { %1410 = vrot.lane.b32.xlu1 %v971_v63, %s4481_s29  ;;  %v1927_v6 = vor.u32 %v1926_v58, %v1923_v49  ;;  %v1912_v7 = vrot.slane %v1910_v60, 5  ;;  %v1918_v8 = vrot.slane %v1916_v61, 5  ;;  %v2372_v9 = vshll.u32 %v4209_v52, 16  ;;  %v386_v51 = vld [vmem:[%s4526_s22 + $0x154] sm:$0x1] }
  0x41   : > { %3548 = vmatpush2.bf16.msra.mxu0 %v4403_v47  ;;  %v957_v11 = vsel %vm4549_vm2, %v952_v1, %v956_v48  ;;  %v2371_v12 = vrot.slane %v2369_v3, 4  ;;  %v2378_v13 = vshll.u32 %v4210_v57, 16  ;;  %v2355_v14 = vshrl.u32 %v4207_v62, 16  ;;  %v4149_v55 = vld [vmem:[%s4526_s22 + $0x40] sm:$0xf] }
  0x42   : > { %3549 = vmatprep.subr.bf16.mxu0 %v4480_v0  ;;  %4376 = vmatpush2.bf16.msra.mxu1 %v4403_v47  ;;  %v1928_v15 = vrot.slane %v1927_v6, 4  ;;  %v1913_v16 = vor.u32 %v1912_v7, %v1909_v2  ;;  %v2374_v17 = vrot.slane %v2372_v9, 5  ;;  %v2358_v18 = vshll.u32 %v4207_v62, 16  ;;  %v4150_v1 = vld [vmem:[%s4526_s22 + $0x44] sm:$0x1] }
  0x43   : > { %1408 = vrot.lane.b32.xlu0 %v957_v11, %s4481_s29  ;;  %4361 = vmatprep.subr.bf16.mxu1 %v4480_v0  ;;  %v2380_v21 = vrot.slane %v2378_v13, 5  ;;  %v2357_v22 = vrot.slane %v2355_v14, 4  ;;  %v2364_v23 = vshll.u32 %v4208_v4, 16  ;;  %v539_v24 = vshrl.u32 %v323_v10, 16  ;;  %v4147_v6 = vld [vmem:[%s4526_s22 + $0x38] sm:$0xf] }
  0x44   : > { %v1933_v26 = vsel %vm4549_vm2, %v1928_v15, %v1932_v59  ;;  %v1914_v27 = vrot.slane %v1913_v16, 4  ;;  %v2375_v28 = vor.u32 %v2374_v17, %v2371_v12  ;;  %v2360_v29 = vrot.slane %v2358_v18, 5  ;;  %v4148_v11 = vld [vmem:[%s4526_s22 + $0x3c] sm:$0x1]  ;;  %v4213_v16 = vld [vmem:[%s4526_s22 + $0x160] sm:$0xf] }
  0x45   : > { %3550 = vmatpush2.bf16.msra.mxu0 %v4404_v5  ;;  %2756 = vrot.lane.b32.xlu1 %v1933_v26, %s4481_s29  ;;  %v2366_v31 = vrot.slane %v2364_v23, 5  ;;  %v541_v33 = vrot.slane %v539_v24, 4  ;;  %v542_v34 = vshll.u32 %v323_v10, 16  ;;  %v548_v35 = vshll.u32 %v324_v19, 16  ;;  %v4211_v26 = vld [vmem:[%s4526_s22 + $0x158] sm:$0xf] }
  0x46   : > { %3551 = vmatprep.subr.bf16.mxu0 %v4480_v0  ;;  %4377 = vmatpush2.bf16.msra.mxu1 %v4404_v5  ;;  %v1919_v37 = vsel %vm4549_vm2, %v1914_v27, %v1918_v8  ;;  %v2376_v38 = vrot.slane %v2375_v28, 4  ;;  %v2361_v39 = vor.u32 %v2360_v29, %v2357_v22  ;;  %v525_v40 = vshrl.u32 %v321_v25, 16 }
  0x47   : > { %4362 = vmatprep.subr.bf16.mxu1 %v4480_v0  ;;  %2754 = vrot.lane.b32.xlu0 %v1919_v37, %s4481_s29  ;;  %v544_v42 = vrot.slane %v542_v34, 5  ;;  %v550_v43 = vrot.slane %v548_v35, 5  ;;  %v528_v44 = vshll.u32 %v321_v25, 16  ;;  %v534_v45 = vshll.u32 %v322_v30, 16  ;;  %v327_v37 = vld [vmem:[%s4526_s22 + $0x50] sm:$0xf] }
  0x48   : > { %v2381_v47 = vsel %vm4549_vm2, %v2376_v38, %v2380_v21  ;;  %v2362_v48 = vrot.slane %v2361_v39, 4  ;;  %v527_v49 = vrot.slane %v525_v40, 4  ;;  %v987_v50 = vshrl.u32 %v387_v36, 16  ;;  %v4214_v21 = vld [vmem:[%s4526_s22 + $0x164] sm:$0x1] }
  0x49   : > { %3552 = vmatpush2.bf16.msra.mxu0 %v4405_v20  ;;  %2820 = vrot.lane.b32.xlu1 %v2381_v47, %s4481_s29  ;;  %v545_v0 = vor.u32 %v544_v42, %v541_v33  ;;  %v530_v52 = vrot.slane %v528_v44, 5  ;;  %v536_v53 = vrot.slane %v534_v45, 5  ;;  %v990_v54 = vshll.u32 %v387_v36, 16 }
  0x4a   : > { %4378 = vmatpush2.bf16.msra.mxu1 %v4405_v20  ;;  %v2367_v56 = vsel %vm4549_vm2, %v2362_v48, %v2366_v31  ;;  %v989_v57 = vrot.slane %v987_v50, 4  ;;  %v996_v58 = vshll.u32 %v388_v41, 16  ;;  %v973_v59 = vshrl.u32 %v385_v46, 16  ;;  %v4212_v31 = vld [vmem:[%s4526_s22 + $0x15c] sm:$0x1] }
  0x4b   : > { %2818 = vrot.lane.b32.xlu0 %v2367_v56, %s4481_s29  ;;  %v546_v60 = vrot.slane %v545_v0, 4  ;;  %v531_v61 = vor.u32 %v530_v52, %v527_v49  ;;  %v992_v62 = vrot.slane %v990_v54, 5  ;;  %v976_v63 = vshll.u32 %v385_v46, 16  ;;  %v328_v46 = vld [vmem:[%s4526_s22 + $0x54] sm:$0x1] }
  0x4c   : > { %v998_v2 = vrot.slane %v996_v58, 5  ;;  %v975_v3 = vrot.slane %v973_v59, 4  ;;  %v982_v4 = vshll.u32 %v386_v51, 16  ;;  %v1949_v5 = vshrl.u32 %v4149_v55, 16  ;;  %v325_v51 = vld [vmem:[%s4526_s22 + $0x48] sm:$0xf] }
  0x4d   : > { %v551_v7 = vsel %vm4549_vm2, %v546_v60, %v550_v43  ;;  %v532_v8 = vrot.slane %v531_v61, 4  ;;  %v993_v9 = vor.u32 %v992_v62, %v989_v57  ;;  %v978_v10 = vrot.slane %v976_v63, 5  ;;  %v391_v60 = vld [vmem:[%s4526_s22 + $0x170] sm:$0xf] }
  0x4e   : > { %1350 = vrot.lane.b32.xlu1 %v551_v7, %s4481_s29  ;;  %v984_v12 = vrot.slane %v982_v4, 5  ;;  %v1951_v13 = vrot.slane %v1949_v5, 4  ;;  %v1952_v14 = vshll.u32 %v4149_v55, 16  ;;  %v1958_v15 = vshll.u32 %v4150_v1, 16  ;;  %v326_v55 = vld [vmem:[%s4526_s22 + $0x4c] sm:$0x1] }
  0x4f   : > { %v537_v17 = vsel %vm4549_vm2, %v532_v8, %v536_v53  ;;  %v994_v18 = vrot.slane %v993_v9, 4  ;;  %v979_v19 = vor.u32 %v978_v10, %v975_v3  ;;  %v1935_v20 = vshrl.u32 %v4147_v6, 16  ;;  %v389_v7 = vld [vmem:[%s4526_s22 + $0x168] sm:$0xf] }
  0x50   : > { %1348 = vrot.lane.b32.xlu0 %v537_v17, %s4481_s29  ;;  %v1954_v22 = vrot.slane %v1952_v14, 5  ;;  %v1960_v23 = vrot.slane %v1958_v15, 5  ;;  %v1938_v24 = vshll.u32 %v4147_v6, 16  ;;  %v1944_v25 = vshll.u32 %v4148_v11, 16  ;;  %v4153_v17 = vld [vmem:[%s4526_s22 + $0x58] sm:$0xf] }
  0x51   : > { %v999_v27 = vsel %vm4549_vm2, %v994_v18, %v998_v2  ;;  %v980_v28 = vrot.slane %v979_v19, 4  ;;  %v1937_v29 = vrot.slane %v1935_v20, 4  ;;  %v2397_v30 = vshrl.u32 %v4213_v16, 16  ;;  %v392_v2 = vld [vmem:[%s4526_s22 + $0x174] sm:$0x1] }
  0x52   : > { %1414 = vrot.lane.b32.xlu1 %v999_v27, %s4481_s29  ;;  %v1955_v33 = vor.u32 %v1954_v22, %v1951_v13  ;;  %v1940_v34 = vrot.slane %v1938_v24, 5  ;;  %v1946_v35 = vrot.slane %v1944_v25, 5  ;;  %v2400_v36 = vshll.u32 %v4213_v16, 16  ;;  %v4154_v22 = vld [vmem:[%s4526_s22 + $0x5c] sm:$0x1] }
  0x53   : > { %v985_v38 = vsel %vm4549_vm2, %v980_v28, %v984_v12  ;;  %v2399_v39 = vrot.slane %v2397_v30, 4  ;;  %v2406_v40 = vshll.u32 %v4214_v21, 16  ;;  %v2383_v41 = vshrl.u32 %v4211_v26, 16  ;;  %v390_v12 = vld [vmem:[%s4526_s22 + $0x16c] sm:$0x1] }
  0x54   : > { %1412 = vrot.lane.b32.xlu0 %v985_v38, %s4481_s29  ;;  %v1956_v42 = vrot.slane %v1955_v33, 4  ;;  %v1941_v43 = vor.u32 %v1940_v34, %v1937_v29  ;;  %v2402_v44 = vrot.slane %v2400_v36, 5  ;;  %v2386_v45 = vshll.u32 %v4211_v26, 16  ;;  %v4151_v27 = vld [vmem:[%s4526_s22 + $0x50] sm:$0xf] }
  0x55   : > { %v2408_v47 = vrot.slane %v2406_v40, 5  ;;  %v2385_v48 = vrot.slane %v2383_v41, 4  ;;  %v2392_v49 = vshll.u32 %v4212_v31, 16  ;;  %v567_v50 = vshrl.u32 %v327_v37, 16  ;;  %v4152_v33 = vld [vmem:[%s4526_s22 + $0x54] sm:$0x1] }
  0x56   : > { %v1961_v0 = vsel %vm4549_vm2, %v1956_v42, %v1960_v23  ;;  %v1942_v52 = vrot.slane %v1941_v43, 4  ;;  %v2403_v53 = vor.u32 %v2402_v44, %v2399_v39  ;;  %v2388_v54 = vrot.slane %v2386_v45, 5  ;;  %v4217_v38 = vld [vmem:[%s4526_s22 + $0x178] sm:$0xf] }
  0x57   : > { %2760 = vrot.lane.b32.xlu1 %v1961_v0, %s4481_s29  ;;  %v2394_v56 = vrot.slane %v2392_v49, 5  ;;  %v569_v57 = vrot.slane %v567_v50, 4  ;;  %v570_v58 = vshll.u32 %v327_v37, 16  ;;  %v576_v59 = vshll.u32 %v328_v46, 16 }
  0x58   : > { %v1947_v61 = vsel %vm4549_vm2, %v1942_v52, %v1946_v35  ;;  %v2404_v62 = vrot.slane %v2403_v53, 4  ;;  %v2389_v63 = vor.u32 %v2388_v54, %v2385_v48  ;;  %v553_v1 = vshrl.u32 %v325_v51, 16  ;;  %v4215_v48 = vld [vmem:[%s4526_s22 + $0x170] sm:$0xf]  ;;  %v4216_v52 = vld [vmem:[%s4526_s22 + $0x174] sm:$0x1] }
  0x59   : > { %2758 = vrot.lane.b32.xlu0 %v1947_v61, %s4481_s29  ;;  %v572_v3 = vrot.slane %v570_v58, 5  ;;  %v578_v4 = vrot.slane %v576_v59, 5  ;;  %v556_v5 = vshll.u32 %v325_v51, 16  ;;  %v562_v6 = vshll.u32 %v326_v55, 16 }
  0x5a   : > { %v2409_v8 = vsel %vm4549_vm2, %v2404_v62, %v2408_v47  ;;  %v2390_v9 = vrot.slane %v2389_v63, 4  ;;  %v555_v10 = vrot.slane %v553_v1, 4  ;;  %v1015_v11 = vshrl.u32 %v391_v60, 16  ;;  %v4218_v47 = vld [vmem:[%s4526_s22 + $0x17c] sm:$0x1] }
  0x5b   : > { %2824 = vrot.lane.b32.xlu1 %v2409_v8, %s4481_s29  ;;  %v573_v13 = vor.u32 %v572_v3, %v569_v57  ;;  %v558_v14 = vrot.slane %v556_v5, 5  ;;  %v564_v15 = vrot.slane %v562_v6, 5  ;;  %v1018_v16 = vshll.u32 %v391_v60, 16  ;;  %v331_v57 = vld [vmem:[%s4526_s22 + $0x60] sm:$0xf] }
  0x5c   : > { %v2395_v18 = vsel %vm4549_vm2, %v2390_v9, %v2394_v56  ;;  %v1017_v19 = vrot.slane %v1015_v11, 4  ;;  %v1024_v20 = vshll.u32 %v392_v2, 16  ;;  %v1001_v21 = vshrl.u32 %v389_v7, 16 }
  0x5d   : > { %2822 = vrot.lane.b32.xlu0 %v2395_v18, %s4481_s29  ;;  %v574_v23 = vrot.slane %v573_v13, 4  ;;  %v559_v24 = vor.u32 %v558_v14, %v555_v10  ;;  %v1020_v25 = vrot.slane %v1018_v16, 5  ;;  %v1004_v26 = vshll.u32 %v389_v7, 16  ;;  %v332_v7 = vld [vmem:[%s4526_s22 + $0x64] sm:$0x1] }
  0x5e   : > { %v1026_v28 = vrot.slane %v1024_v20, 5  ;;  %v1003_v29 = vrot.slane %v1001_v21, 4  ;;  %v1010_v30 = vshll.u32 %v390_v12, 16  ;;  %v1977_v31 = vshrl.u32 %v4153_v17, 16  ;;  %v329_v12 = vld [vmem:[%s4526_s22 + $0x58] sm:$0xf] }
  0x5f   : > { %v579_v34 = vsel %vm4549_vm2, %v574_v23, %v578_v4  ;;  %v560_v35 = vrot.slane %v559_v24, 4  ;;  %v1021_v36 = vor.u32 %v1020_v25, %v1017_v19  ;;  %v1006_v37 = vrot.slane %v1004_v26, 5  ;;  %v395_v18 = vld [vmem:[%s4526_s22 + $0x180] sm:$0xf]  ;;  %v396_v23 = vld [vmem:[%s4526_s22 + $0x184] sm:$0x1] }
  0x60   : > { %1354 = vrot.lane.b32.xlu1 %v579_v34, %s4481_s29  ;;  %v1012_v39 = vrot.slane %v1010_v30, 5  ;;  %v1979_v40 = vrot.slane %v1977_v31, 4  ;;  %v1980_v41 = vshll.u32 %v4153_v17, 16  ;;  %v1986_v42 = vshll.u32 %v4154_v22, 16  ;;  %v330_v17 = vld [vmem:[%s4526_s22 + $0x5c] sm:$0x1] }
  0x61   : > { %v565_v43 = vsel %vm4549_vm2, %v560_v35, %v564_v15  ;;  %v1022_v44 = vrot.slane %v1021_v36, 4  ;;  %v1007_v45 = vor.u32 %v1006_v37, %v1003_v29  ;;  %v1963_v46 = vshrl.u32 %v4151_v27, 16  ;;  %v394_v34 = vld [vmem:[%s4526_s22 + $0x17c] sm:$0x1] }
  0x62   : > { %1352 = vrot.lane.b32.xlu0 %v565_v43, %s4481_s29  ;;  %v1982_v49 = vrot.slane %v1980_v41, 5  ;;  %v1988_v50 = vrot.slane %v1986_v42, 5  ;;  %v1966_v51 = vshll.u32 %v4151_v27, 16  ;;  %v1972_v0 = vshll.u32 %v4152_v33, 16 }
  0x63   : > { %v1027_v53 = vsel %vm4549_vm2, %v1022_v44, %v1026_v28  ;;  %v1008_v54 = vrot.slane %v1007_v45, 4  ;;  %v1965_v55 = vrot.slane %v1963_v46, 4  ;;  %v2425_v56 = vshrl.u32 %v4217_v38, 16  ;;  %v393_v28 = vld [vmem:[%s4526_s22 + $0x178] sm:$0xf] }
  0x64   : > { %1418 = vrot.lane.b32.xlu1 %v1027_v53, %s4481_s29  ;;  %v1983_v58 = vor.u32 %v1982_v49, %v1979_v40  ;;  %v1968_v59 = vrot.slane %v1966_v51, 5  ;;  %v1974_v60 = vrot.slane %v1972_v0, 5  ;;  %v2428_v61 = vshll.u32 %v4217_v38, 16  ;;  %v4158_v44 = vld [vmem:[%s4526_s22 + $0x6c] sm:$0x1] }
  0x65   : > { %v1013_v62 = vsel %vm4549_vm2, %v1008_v54, %v1012_v39  ;;  %v2427_v63 = vrot.slane %v2425_v56, 4  ;;  %v2434_v1 = vshll.u32 %v4218_v47, 16  ;;  %v2411_v2 = vshrl.u32 %v4215_v48, 16  ;;  %v4157_v39 = vld [vmem:[%s4526_s22 + $0x68] sm:$0xf] }
  0x66   : > { %1416 = vrot.lane.b32.xlu0 %v1013_v62, %s4481_s29  ;;  %v1984_v3 = vrot.slane %v1983_v58, 4  ;;  %v1969_v4 = vor.u32 %v1968_v59, %v1965_v55  ;;  %v2430_v5 = vrot.slane %v2428_v61, 5  ;;  %v2414_v6 = vshll.u32 %v4215_v48, 16  ;;  %v4155_v56 = vld [vmem:[%s4526_s22 + $0x60] sm:$0xf] }
  0x67   : > { %v2436_v8 = vrot.slane %v2434_v1, 5  ;;  %v2413_v9 = vrot.slane %v2411_v2, 4  ;;  %v2420_v10 = vshll.u32 %v4216_v52, 16  ;;  %v595_v11 = vshrl.u32 %v331_v57, 16  ;;  %v4156_v61 = vld [vmem:[%s4526_s22 + $0x64] sm:$0x1] }
  0x68   : > { %v1989_v13 = vsel %vm4549_vm2, %v1984_v3, %v1988_v50  ;;  %v1970_v14 = vrot.slane %v1969_v4, 4  ;;  %v2431_v15 = vor.u32 %v2430_v5, %v2427_v63  ;;  %v2416_v16 = vrot.slane %v2414_v6, 5  ;;  %v4221_v3 = vld [vmem:[%s4526_s22 + $0x188] sm:$0xf] }
  0x69   : > { %2764 = vrot.lane.b32.xlu1 %v1989_v13, %s4481_s29  ;;  %v2422_v19 = vrot.slane %v2420_v10, 5  ;;  %v597_v20 = vrot.slane %v595_v11, 4  ;;  %v598_v21 = vshll.u32 %v331_v57, 16  ;;  %v604_v22 = vshll.u32 %v332_v7, 16 }
  0x6a   : > { %v1975_v24 = vsel %vm4549_vm2, %v1970_v14, %v1974_v60  ;;  %v2432_v25 = vrot.slane %v2431_v15, 4  ;;  %v2417_v26 = vor.u32 %v2416_v16, %v2413_v9  ;;  %v581_v27 = vshrl.u32 %v329_v12, 16  ;;  %v4219_v9 = vld [vmem:[%s4526_s22 + $0x180] sm:$0xf]  ;;  %v4220_v14 = vld [vmem:[%s4526_s22 + $0x184] sm:$0x1] }
  0x6b   : > { %2762 = vrot.lane.b32.xlu0 %v1975_v24, %s4481_s29  ;;  %v600_v29 = vrot.slane %v598_v21, 5  ;;  %v606_v30 = vrot.slane %v604_v22, 5  ;;  %v584_v31 = vshll.u32 %v329_v12, 16  ;;  %v590_v33 = vshll.u32 %v330_v17, 16 }
  0x6c   : > { %v2437_v35 = vsel %vm4549_vm2, %v2432_v25, %v2436_v8  ;;  %v2418_v36 = vrot.slane %v2417_v26, 4  ;;  %v583_v37 = vrot.slane %v581_v27, 4  ;;  %v1043_v38 = vshrl.u32 %v395_v18, 16  ;;  %v4222_v8 = vld [vmem:[%s4526_s22 + $0x18c] sm:$0x1] }
  0x6d   : > { %2828 = vrot.lane.b32.xlu1 %v2437_v35, %s4481_s29  ;;  %v601_v40 = vor.u32 %v600_v29, %v597_v20  ;;  %v586_v41 = vrot.slane %v584_v31, 5  ;;  %v592_v42 = vrot.slane %v590_v33, 5  ;;  %v1046_v43 = vshll.u32 %v395_v18, 16  ;;  %v336_v33 = vld [vmem:[%s4526_s22 + $0x74] sm:$0x1] }
  0x6e   : > { %v2423_v45 = vsel %vm4549_vm2, %v2418_v36, %v2422_v19  ;;  %v1045_v46 = vrot.slane %v1043_v38, 4  ;;  %v1052_v47 = vshll.u32 %v396_v23, 16  ;;  %v1029_v48 = vshrl.u32 %v393_v28, 16  ;;  %v335_v23 = vld [vmem:[%s4526_s22 + $0x70] sm:$0xf] }
  0x6f   : > { %2826 = vrot.lane.b32.xlu0 %v2423_v45, %s4481_s29  ;;  %v602_v49 = vrot.slane %v601_v40, 4  ;;  %v587_v50 = vor.u32 %v586_v41, %v583_v37  ;;  %v1048_v51 = vrot.slane %v1046_v43, 5  ;;  %v1032_v0 = vshll.u32 %v393_v28, 16  ;;  %v333_v38 = vld [vmem:[%s4526_s22 + $0x68] sm:$0xf] }
  0x70   : > { %v1054_v52 = vrot.slane %v1052_v47, 5  ;;  %v1031_v53 = vrot.slane %v1029_v48, 4  ;;  %v1038_v54 = vshll.u32 %v394_v34, 16  ;;  %v2005_v55 = vshrl.u32 %v4157_v39, 16  ;;  %v334_v43 = vld [vmem:[%s4526_s22 + $0x6c] sm:$0x1] }
  0x71   : > { %v607_v57 = vsel %vm4549_vm2, %v602_v49, %v606_v30  ;;  %v588_v58 = vrot.slane %v587_v50, 4  ;;  %v1049_v59 = vor.u32 %v1048_v51, %v1045_v46  ;;  %v1034_v60 = vrot.slane %v1032_v0, 5 }
  0x72   : > { %1358 = vrot.lane.b32.xlu1 %v607_v57, %s4481_s29  ;;  %v1040_v62 = vrot.slane %v1038_v54, 5  ;;  %v2007_v63 = vrot.slane %v2005_v55, 4  ;;  %v2008_v1 = vshll.u32 %v4157_v39, 16  ;;  %v2014_v2 = vshll.u32 %v4158_v44, 16  ;;  %v399_v44 = vld [vmem:[%s4526_s22 + $0x190] sm:$0xf] }
  0x73   : > { %v593_v4 = vsel %vm4549_vm2, %v588_v58, %v592_v42  ;;  %v1050_v5 = vrot.slane %v1049_v59, 4  ;;  %v1035_v6 = vor.u32 %v1034_v60, %v1031_v53  ;;  %v1991_v7 = vshrl.u32 %v4155_v56, 16  ;;  %v397_v57 = vld [vmem:[%s4526_s22 + $0x188] sm:$0xf] }
  0x74   : > { %1356 = vrot.lane.b32.xlu0 %v593_v4, %s4481_s29  ;;  %v2010_v10 = vrot.slane %v2008_v1, 5  ;;  %v2016_v11 = vrot.slane %v2014_v2, 5  ;;  %v1994_v12 = vshll.u32 %v4155_v56, 16  ;;  %v2000_v13 = vshll.u32 %v4156_v61, 16  ;;  %v4161_v4 = vld [vmem:[%s4526_s22 + $0x78] sm:$0xf] }
  0x75   : > { %v1055_v15 = vsel %vm4549_vm2, %v1050_v5, %v1054_v52  ;;  %v1036_v16 = vrot.slane %v1035_v6, 4  ;;  %v1993_v17 = vrot.slane %v1991_v7, 4  ;;  %v2453_v18 = vshrl.u32 %v4221_v3, 16  ;;  %v400_v52 = vld [vmem:[%s4526_s22 + $0x194] sm:$0x1] }
  0x76   : > { %1422 = vrot.lane.b32.xlu1 %v1055_v15, %s4481_s29  ;;  %v2011_v19 = vor.u32 %v2010_v10, %v2007_v63  ;;  %v1996_v20 = vrot.slane %v1994_v12, 5  ;;  %v2002_v21 = vrot.slane %v2000_v13, 5  ;;  %v2456_v22 = vshll.u32 %v4221_v3, 16 }
  0x77   : > { %v1041_v24 = vsel %vm4549_vm2, %v1036_v16, %v1040_v62  ;;  %v2455_v25 = vrot.slane %v2453_v18, 4  ;;  %v2462_v26 = vshll.u32 %v4222_v8, 16  ;;  %v2439_v27 = vshrl.u32 %v4219_v9, 16  ;;  %v398_v62 = vld [vmem:[%s4526_s22 + $0x18c] sm:$0x1] }
  0x78   : > { %1420 = vrot.lane.b32.xlu0 %v1041_v24, %s4481_s29  ;;  %v2012_v28 = vrot.slane %v2011_v19, 4  ;;  %v1997_v29 = vor.u32 %v1996_v20, %v1993_v17  ;;  %v2458_v30 = vrot.slane %v2456_v22, 5  ;;  %v2442_v31 = vshll.u32 %v4219_v9, 16  ;;  %v4162_v9 = vld [vmem:[%s4526_s22 + $0x7c] sm:$0x1] }
  0x79   : > { %v2464_v34 = vrot.slane %v2462_v26, 5  ;;  %v2441_v35 = vrot.slane %v2439_v27, 4  ;;  %v2448_v36 = vshll.u32 %v4220_v14, 16  ;;  %v623_v37 = vshrl.u32 %v335_v23, 16  ;;  %v4159_v14 = vld [vmem:[%s4526_s22 + $0x70] sm:$0xf] }
  0x7a   : > { %v2017_v39 = vsel %vm4549_vm2, %v2012_v28, %v2016_v11  ;;  %v1998_v40 = vrot.slane %v1997_v29, 4  ;;  %v2459_v41 = vor.u32 %v2458_v30, %v2455_v25  ;;  %v2444_v42 = vrot.slane %v2442_v31, 5  ;;  %v4225_v28 = vld [vmem:[%s4526_s22 + $0x198] sm:$0xf] }
  0x7b   : > { %2768 = vrot.lane.b32.xlu1 %v2017_v39, %s4481_s29  ;;  %v2450_v45 = vrot.slane %v2448_v36, 5  ;;  %v625_v46 = vrot.slane %v623_v37, 4  ;;  %v626_v47 = vshll.u32 %v335_v23, 16  ;;  %v632_v48 = vshll.u32 %v336_v33, 16  ;;  %v4160_v23 = vld [vmem:[%s4526_s22 + $0x74] sm:$0x1] }
  0x7c   : > { %v2003_v49 = vsel %vm4549_vm2, %v1998_v40, %v2002_v21  ;;  %v2460_v50 = vrot.slane %v2459_v41, 4  ;;  %v2445_v51 = vor.u32 %v2444_v42, %v2441_v35  ;;  %v609_v0 = vshrl.u32 %v333_v38, 16  ;;  %v4223_v35 = vld [vmem:[%s4526_s22 + $0x190] sm:$0xf]  ;;  %v4224_v40 = vld [vmem:[%s4526_s22 + $0x194] sm:$0x1] }
  0x7d   : > { %2766 = vrot.lane.b32.xlu0 %v2003_v49, %s4481_s29  ;;  %v628_v53 = vrot.slane %v626_v47, 5  ;;  %v634_v54 = vrot.slane %v632_v48, 5  ;;  %v612_v55 = vshll.u32 %v333_v38, 16  ;;  %v618_v56 = vshll.u32 %v334_v43, 16 }
  0x7e   : > { %v2465_v58 = vsel %vm4549_vm2, %v2460_v50, %v2464_v34  ;;  %v2446_v59 = vrot.slane %v2445_v51, 4  ;;  %v611_v60 = vrot.slane %v609_v0, 4  ;;  %v1071_v61 = vshrl.u32 %v399_v44, 16  ;;  %v4226_v34 = vld [vmem:[%s4526_s22 + $0x19c] sm:$0x1] }
  0x7f   : > { %2832 = vrot.lane.b32.xlu1 %v2465_v58, %s4481_s29  ;;  %v629_v63 = vor.u32 %v628_v53, %v625_v46  ;;  %v614_v1 = vrot.slane %v612_v55, 5  ;;  %v620_v2 = vrot.slane %v618_v56, 5  ;;  %v1074_v3 = vshll.u32 %v399_v44, 16  ;;  %v340_v50 = vld [vmem:[%s4526_s22 + $0x84] sm:$0x1] }
  0x80   : > { %v2451_v5 = vsel %vm4549_vm2, %v2446_v59, %v2450_v45  ;;  %v1073_v6 = vrot.slane %v1071_v61, 4  ;;  %v1080_v7 = vshll.u32 %v400_v52, 16  ;;  %v1057_v8 = vshrl.u32 %v397_v57, 16  ;;  %v339_v45 = vld [vmem:[%s4526_s22 + $0x80] sm:$0xf] }
  0x81   : > { %2830 = vrot.lane.b32.xlu0 %v2451_v5, %s4481_s29  ;;  %v630_v10 = vrot.slane %v629_v63, 4  ;;  %v615_v11 = vor.u32 %v614_v1, %v611_v60  ;;  %v1076_v12 = vrot.slane %v1074_v3, 5  ;;  %v1060_v13 = vshll.u32 %v397_v57, 16  ;;  %v337_v58 = vld [vmem:[%s4526_s22 + $0x78] sm:$0xf] }
  0x82   : > { %v1082_v15 = vrot.slane %v1080_v7, 5  ;;  %v1059_v16 = vrot.slane %v1057_v8, 4  ;;  %v1066_v17 = vshll.u32 %v398_v62, 16  ;;  %v2033_v18 = vshrl.u32 %v4161_v4, 16  ;;  %v338_v63 = vld [vmem:[%s4526_s22 + $0x7c] sm:$0x1] }
  0x83   : > { %v635_v19 = vsel %vm4549_vm2, %v630_v10, %v634_v54  ;;  %v616_v20 = vrot.slane %v615_v11, 4  ;;  %v1077_v21 = vor.u32 %v1076_v12, %v1073_v6  ;;  %v1062_v22 = vrot.slane %v1060_v13, 5  ;;  %v212_v6 = vld [vmem:[%s4526_s22 + $0x120] sm:$0xf]  ;;  %v181_v10 = vld [vmem:[%s4526_s22 + $0x8] sm:$0xf] }
  0x84   : > { %1362 = vrot.lane.b32.xlu1 %v635_v19, %s4481_s29  ;;  %v1068_v24 = vrot.slane %v1066_v17, 5  ;;  %v2035_v25 = vrot.slane %v2033_v18, 4  ;;  %v2036_v26 = vshll.u32 %v4161_v4, 16  ;;  %v2042_v27 = vshll.u32 %v4162_v9, 16  ;;  %v180_v8 = vld [vmem:[%s4526_s22] sm:$0xf] }
  0x85   : > { %v621_v29 = vsel %vm4549_vm2, %v616_v20, %v620_v2  ;;  %v1078_v30 = vrot.slane %v1077_v21, 4  ;;  %v1063_v31 = vor.u32 %v1062_v22, %v1059_v16  ;;  %v2019_v33 = vshrl.u32 %v4159_v14, 16  ;;  %v213_v9 = vld [vmem:[%s4526_s22 + $0x128] sm:$0xf]  ;;  %v4072_v11 = vld [vmem:[%s4526_s22 + $0x10] sm:$0xf] }
  0x86   : > { %1360 = vrot.lane.b32.xlu0 %v621_v29, %s4481_s29  ;;  %v2038_v36 = vrot.slane %v2036_v26, 5  ;;  %v2044_v37 = vrot.slane %v2042_v27, 5  ;;  %v2022_v38 = vshll.u32 %v4159_v14, 16  ;;  %v2028_v39 = vshll.u32 %v4160_v23, 16  ;;  %v4071_v12 = vld [vmem:[%s4526_s22 + $0x8] sm:$0xf] }
  0x87   : > { %v1083_v41 = vsel %vm4549_vm2, %v1078_v30, %v1082_v15  ;;  %v1064_v42 = vrot.slane %v1063_v31, 4  ;;  %v2021_v43 = vrot.slane %v2019_v33, 4  ;;  %v2481_v44 = vshrl.u32 %v4225_v28, 16  ;;  %v4104_v13 = vld [vmem:[%s4526_s22 + $0x130] sm:$0xf] }
  0x88   : > { %1426 = vrot.lane.b32.xlu1 %v1083_v41, %s4481_s29  ;;  %v2039_v46 = vor.u32 %v2038_v36, %v2035_v25  ;;  %v2024_v47 = vrot.slane %v2022_v38, 5  ;;  %v2030_v48 = vrot.slane %v2028_v39, 5  ;;  %v2484_v49 = vshll.u32 %v4225_v28, 16  ;;  %v4103_v14 = vld [vmem:[%s4526_s22 + $0x128] sm:$0xf] }
  0x89   : > { %v1069_v51 = vsel %vm4549_vm2, %v1064_v42, %v1068_v24  ;;  %v2483_v0 = vrot.slane %v2481_v44, 4  ;;  %v2490_v52 = vshll.u32 %v4226_v34, 16  ;;  %v2467_v53 = vshrl.u32 %v4223_v35, 16  ;;  %v403_v19 = vld [vmem:[%s4526_s22 + $0x1a0] sm:$0xf] }
  0x8a   : > { %1424 = vrot.lane.b32.xlu0 %v1069_v51, %s4481_s29  ;;  %v2040_v54 = vrot.slane %v2039_v46, 4  ;;  %v2025_v55 = vor.u32 %v2024_v47, %v2021_v43  ;;  %v2486_v56 = vrot.slane %v2484_v49, 5  ;;  %v2470_v57 = vshll.u32 %v4223_v35, 16  ;;  %v404_v20 = vld [vmem:[%s4526_s22 + $0x1a4] sm:$0x1] }
  0x8b   : > { %v2492_v59 = vrot.slane %v2490_v52, 5  ;;  %v2469_v60 = vrot.slane %v2467_v53, 4  ;;  %v2476_v61 = vshll.u32 %v4224_v40, 16  ;;  %v651_v62 = vshrl.u32 %v339_v45, 16  ;;  %v183_v21 = vld [vmem:[%s4526_s22 + $0x18] sm:$0xf] }
  0x8c   : > { %v2045_v2 = vsel %vm4549_vm2, %v2040_v54, %v2044_v37  ;;  %v2026_v3 = vrot.slane %v2025_v55, 4  ;;  %v2487_v4 = vor.u32 %v2486_v56, %v2483_v0  ;;  %v2472_v5 = vrot.slane %v2470_v57, 5  ;;  %v401_v26 = vld [vmem:[%s4526_s22 + $0x198] sm:$0xf]  ;;  %v182_v27 = vld [vmem:[%s4526_s22 + $0x10] sm:$0xf] }
  0x8d   : > { %v1401_v1 = vpop.permute.xlu1 %1400  ;;  %v1337_v7 = vpop.permute.xlu0 %1336  ;;  %2772 = vrot.lane.b32.xlu1 %v2045_v2, %s4481_s29  ;;  %v2478_v15 = vrot.slane %v2476_v61, 5  ;;  %v653_v16 = vrot.slane %v651_v62, 4  ;;  %v654_v17 = vshll.u32 %v339_v45, 16  ;;  %v660_v18 = vshll.u32 %v340_v50, 16  ;;  %v402_v37 = vld [vmem:[%s4526_s22 + $0x19c] sm:$0x1] }
  0x8e   : > { %v2031_v22 = vsel %vm4549_vm2, %v2026_v3, %v2030_v48  ;;  %v2488_v23 = vrot.slane %v2487_v4, 4  ;;  %v2473_v24 = vor.u32 %v2472_v5, %v2469_v60  ;;  %v637_v25 = vshrl.u32 %v337_v58, 16  ;;  %277 = vst.msk [vmem:[#allocation2 + $0x100] sm:$0xf] %vm244_vm3, %v212_v6  ;;  %245 = vst.msk [vmem:[#allocation2] sm:$0xf] %vm244_vm3, %v180_v8 }
  0x8f   : > { %2770 = vrot.lane.b32.xlu0 %v2031_v22, %s4481_s29  ;;  %v656_v28 = vrot.slane %v654_v17, 5  ;;  %v662_v29 = vrot.slane %v660_v18, 5  ;;  %v640_v30 = vshll.u32 %v337_v58, 16  ;;  %v646_v31 = vshll.u32 %v338_v63, 16  ;;  %278 = vst.msk [vmem:[#allocation2 + $0x108] sm:$0xf] %vm244_vm3, %v213_v9 }
  0x90   : > { %v2493_v34 = vsel %vm4549_vm2, %v2488_v23, %v2492_v59  ;;  %v2474_v35 = vrot.slane %v2473_v24, 4  ;;  %v639_v36 = vrot.slane %v637_v25, 4  ;;  %246 = vst.msk [vmem:[#allocation2 + $0x8] sm:$0xf] %vm244_vm3, %v181_v10  ;;  %v4165_v42 = vld [vmem:[%s4526_s22 + $0x88] sm:$0xf] }
  0x91   : > { %v1403_v33 = vpop.permute.xlu1 %1402  ;;  %v1339_v38 = vpop.permute.xlu0 %1338  ;;  %2836 = vrot.lane.b32.xlu1 %v2493_v34, %s4481_s29  ;;  %v657_v39 = vor.u32 %v656_v28, %v653_v16  ;;  %v642_v40 = vrot.slane %v640_v30, 5  ;;  %v648_v41 = vrot.slane %v646_v31, 5  ;;  %1659 = vst.msk [vmem:[#allocation2 + $0xc] sm:$0xf] %vm244_vm3, %v4072_v11  ;;  %1658 = vst.msk [vmem:[#allocation2 + $0x4] sm:$0xf] %vm244_vm3, %v4071_v12 }
  0x92   : > { %1691 = vst.msk [vmem:[#allocation2 + $0x10c] sm:$0xf] %vm244_vm3, %v4104_v13  ;;  %1690 = vst.msk [vmem:[#allocation2 + $0x104] sm:$0xf] %vm244_vm3, %v4103_v14  ;;  %v2479_v43 = vsel %vm4549_vm2, %v2474_v35, %v2478_v15  ;;  %v1099_v44 = vshrl.u32 %v403_v19, 16  ;;  %v1102_v45 = vshll.u32 %v403_v19, 16 }
  0x93   : > { %248 = vst.msk [vmem:[#allocation2 + $0x18] sm:$0xf] %vm244_vm3, %v183_v21  ;;  %247 = vst.msk [vmem:[#allocation2 + $0x10] sm:$0xf] %vm244_vm3, %v182_v27  ;;  %v1108_v46 = vshll.u32 %v404_v20, 16  ;;  %2834 = vrot.lane.b32.xlu0 %v2479_v43, %s4481_s29  ;;  %v658_v48 = vrot.slane %v657_v39, 4  ;;  %v643_v49 = vor.u32 %v642_v40, %v639_v36 }
  0x94   : > { %1561 = vst.msk [vmem:[#allocation2 + $0x100] sm:$0xf] %vm1528_vm4, %v1401_v1  ;;  %1529 = vst.msk [vmem:[#allocation2] sm:$0xf] %vm1528_vm4, %v1337_v7  ;;  %v4166_v47 = vld [vmem:[%s4526_s22 + $0x8c] sm:$0x1] }
  0x95   : > { %1562 = vst.msk [vmem:[#allocation2 + $0x108] sm:$0xf] %vm1528_vm4, %v1403_v33  ;;  %1530 = vst.msk [vmem:[#allocation2 + $0x8] sm:$0xf] %vm1528_vm4, %v1339_v38  ;;  %v1085_v50 = vshrl.u32 %v401_v26, 16  ;;  %v1088_v51 = vshll.u32 %v401_v26, 16  ;;  %v2749_v52 = vpop.permute.xlu1 %2748  ;;  %v663_v59 = vsel %vm4549_vm2, %v658_v48, %v662_v29  ;;  %v2747_v63 = vpop.permute.xlu0 %2746 }
  0x96   : > { %v4163_v0 = vld [vmem:[%s4526_s22 + $0x80] sm:$0xf]  ;;  %v1101_v53 = vrot.slane %v1099_v44, 4  ;;  %v1104_v54 = vrot.slane %v1102_v45, 5  ;;  %v1110_v55 = vrot.slane %v1108_v46, 5  ;;  %v1094_v56 = vshll.u32 %v402_v37, 16  ;;  %1366 = vrot.lane.b32.xlu1 %v663_v59, %s4481_s29 }
  0x97   : > { %v4164_v57 = vld [vmem:[%s4526_s22 + $0x84] sm:$0x1]  ;;  %2939 = vst.msk [vmem:[#allocation2 + $0xc] sm:$0xf] %vm1528_vm4, %v2749_v52  ;;  %v215_v58 = vld [vmem:[%s4526_s22 + $0x138] sm:$0xf] }
  0x98   : > { %v644_v60 = vrot.slane %v643_v49, 4  ;;  %v1087_v61 = vrot.slane %v1085_v50, 4  ;;  %v1090_v62 = vrot.slane %v1088_v51, 5  ;;  %280 = vst.msk [vmem:[#allocation2 + $0x118] sm:$0xf] %vm244_vm3, %v215_v58  ;;  %v1105_v2 = vor.u32 %v1104_v54, %v1101_v53 }
  0x99   : > { %v214_v1 = vld [vmem:[%s4526_s22 + $0x130] sm:$0xf]  ;;  %v1096_v3 = vrot.slane %v1094_v56, 5  ;;  %v2061_v4 = vshrl.u32 %v4165_v42, 16  ;;  %v2064_v5 = vshll.u32 %v4165_v42, 16  ;;  %v2070_v9 = vshll.u32 %v4166_v47, 16  ;;  %v2813_v13 = vpop.permute.xlu1 %2812  ;;  %v2811_v23 = vpop.permute.xlu0 %2810 }
  0x9a   : > { %2938 = vst.msk [vmem:[#allocation2 + $0x4] sm:$0xf] %vm1528_vm4, %v2747_v63  ;;  %v4229_v6 = vld [vmem:[%s4526_s22 + $0x1a8] sm:$0xf]  ;;  %v649_v7 = vsel %vm4549_vm2, %v644_v60, %v648_v41  ;;  %v1091_v8 = vor.u32 %v1090_v62, %v1087_v61  ;;  %v2047_v10 = vshrl.u32 %v4163_v0, 16  ;;  %v1106_v14 = vrot.slane %v1105_v2, 4 }
  0x9b   : > { %279 = vst.msk [vmem:[#allocation2 + $0x110] sm:$0xf] %vm244_vm3, %v214_v1  ;;  %v4230_v11 = vld [vmem:[%s4526_s22 + $0x1ac] sm:$0x1]  ;;  %v4227_v12 = vld [vmem:[%s4526_s22 + $0x1a0] sm:$0xf]  ;;  %1364 = vrot.lane.b32.xlu0 %v649_v7, %s4481_s29 }
  0x9c   : > { %v2063_v15 = vrot.slane %v2061_v4, 4  ;;  %v2066_v16 = vrot.slane %v2064_v5, 5  ;;  %v2050_v17 = vshll.u32 %v4163_v0, 16  ;;  %v4228_v18 = vld [vmem:[%s4526_s22 + $0x1a4] sm:$0x1]  ;;  %v1092_v19 = vrot.slane %v1091_v8, 4 }
  0x9d   : > { %2971 = vst.msk [vmem:[#allocation2 + $0x10c] sm:$0xf] %vm1528_vm4, %v2813_v13  ;;  %v2072_v20 = vrot.slane %v2070_v9, 5  ;;  %v2049_v21 = vrot.slane %v2047_v10, 4  ;;  %v2056_v22 = vshll.u32 %v4164_v57, 16  ;;  %v1111_v25 = vsel %vm4549_vm2, %v1106_v14, %v1110_v55  ;;  %v1343_v42 = vpop.permute.xlu1 %1342 }
  0x9e   : > { %v4074_v24 = vld [vmem:[%s4526_s22 + $0x20] sm:$0xf]  ;;  %v2067_v26 = vor.u32 %v2066_v16, %v2063_v15  ;;  %v2052_v27 = vrot.slane %v2050_v17, 5  ;;  %v2509_v28 = vshrl.u32 %v4229_v6, 16  ;;  %2970 = vst.msk [vmem:[#allocation2 + $0x104] sm:$0xf] %vm1528_vm4, %v2811_v23  ;;  %1430 = vrot.lane.b32.xlu1 %v1111_v25, %s4481_s29  ;;  %v1097_v31 = vsel %vm4549_vm2, %v1092_v19, %v1096_v3  ;;  %v1341_v52 = vpop.permute.xlu0 %1340 }
  0x9f   : > { %v343_v29 = vld [vmem:[%s4526_s22 + $0x98] sm:$0xf]  ;;  %1661 = vst.msk [vmem:[#allocation2 + $0x1c] sm:$0xf] %vm244_vm3, %v4074_v24  ;;  %v2058_v33 = vrot.slane %v2056_v22, 5  ;;  %v2512_v34 = vshll.u32 %v4229_v6, 16  ;;  %1428 = vrot.lane.b32.xlu0 %v1097_v31, %s4481_s29 }
  0xa0   : > { %v4073_v30 = vld [vmem:[%s4526_s22 + $0x18] sm:$0xf]  ;;  %v2518_v35 = vshll.u32 %v4230_v11, 16  ;;  %v344_v36 = vld [vmem:[%s4526_s22 + $0x9c] sm:$0x1]  ;;  %v2068_v37 = vrot.slane %v2067_v26, 4  ;;  %v2053_v38 = vor.u32 %v2052_v27, %v2049_v21 }
  0xa1   : > { %1660 = vst.msk [vmem:[#allocation2 + $0x14] sm:$0xf] %vm244_vm3, %v4073_v30  ;;  %v2511_v39 = vrot.slane %v2509_v28, 4  ;;  %v2495_v40 = vshrl.u32 %v4227_v12, 16  ;;  %v341_v41 = vld [vmem:[%s4526_s22 + $0x90] sm:$0xf]  ;;  %v1407_v2 = vpop.permute.xlu1 %1406 }
  0xa2   : > { %v2514_v43 = vrot.slane %v2512_v34, 5  ;;  %v2520_v44 = vrot.slane %v2518_v35, 5  ;;  %v2498_v45 = vshll.u32 %v4227_v12, 16  ;;  %v2504_v46 = vshll.u32 %v4228_v18, 16  ;;  %v342_v47 = vld [vmem:[%s4526_s22 + $0x94] sm:$0x1]  ;;  %v1405_v13 = vpop.permute.xlu0 %1404 }
  0xa3   : > { %1532 = vst.msk [vmem:[#allocation2 + $0x18] sm:$0xf] %vm1528_vm4, %v1343_v42  ;;  %v407_v48 = vld [vmem:[%s4526_s22 + $0x1b8] sm:$0xf]  ;;  %v2073_v49 = vsel %vm4549_vm2, %v2068_v37, %v2072_v20  ;;  %v2054_v50 = vrot.slane %v2053_v38, 4  ;;  %v2497_v51 = vrot.slane %v2495_v40, 4 }
  0xa4   : > { %v679_v0 = vshrl.u32 %v343_v29, 16  ;;  %v4406_v53 = vld [vmem:[#allocation2] ss:$8 sps:$4 sm:$0xff]   ;;  %2776 = vrot.lane.b32.xlu1 %v2073_v49, %s4481_s29  ;;  %v2515_v54 = vor.u32 %v2514_v43, %v2511_v39  ;;  %v2500_v55 = vrot.slane %v2498_v45, 5  ;;  %v2506_v56 = vrot.slane %v2504_v46, 5 }
  0xa5   : > { %v682_v57 = vshll.u32 %v343_v29, 16  ;;  %1531 = vst.msk [vmem:[#allocation2 + $0x10] sm:$0xf] %vm1528_vm4, %v1341_v52  ;;  %v408_v58 = vld [vmem:[%s4526_s22 + $0x1bc] sm:$0x1]  ;;  %v2059_v60 = vsel %vm4549_vm2, %v2054_v50, %v2058_v33  ;;  %v688_v62 = vshll.u32 %v344_v36, 16  ;;  %v2753_v33 = vpop.permute.xlu1 %2752 }
  0xa6   : > { %v4408_v59 = vld [vmem:[#allocation2 + $0x4] ss:$8 sps:$4 sm:$0xff]   ;;  %v681_v61 = vrot.slane %v679_v0, 4  ;;  %v665_v63 = vshrl.u32 %v341_v41, 16  ;;  %v405_v1 = vld [vmem:[%s4526_s22 + $0x1b0] sm:$0xf]  ;;  %2774 = vrot.lane.b32.xlu0 %v2059_v60, %s4481_s29  ;;  %v2501_v4 = vor.u32 %v2500_v55, %v2497_v51 }
  0xa7   : > { %v2516_v3 = vrot.slane %v2515_v54, 4  ;;  %v684_v5 = vrot.slane %v682_v57, 5  ;;  %v668_v6 = vshll.u32 %v341_v41, 16  ;;  %v406_v7 = vld [vmem:[%s4526_s22 + $0x1b4] sm:$0x1]  ;;  %3553 = vmatprep.mubr.bf16.mxu0 %v4408_v59  ;;  %v690_v9 = vrot.slane %v688_v62, 5 }
  0xa8   : > { %1564 = vst.msk [vmem:[#allocation2 + $0x118] sm:$0xf] %vm1528_vm4, %v1407_v2  ;;  %v4409_v8 = vld [vmem:[#allocation2 + $0x100] ss:$8 sps:$4 sm:$0xff]   ;;  %v667_v10 = vrot.slane %v665_v63, 4  ;;  %v674_v11 = vshll.u32 %v342_v47, 16  ;;  %3554 = vmatmul.mubr.bf16.vlgmr.msra.gmra.mxu0 %v4406_v53 }
  0xa9   : > { %v1127_v12 = vshrl.u32 %v407_v48, 16  ;;  %v4411_v14 = vld [vmem:[#allocation2 + $0x104] ss:$8 sps:$4 sm:$0xff]   ;;  %v2521_v15 = vsel %vm4549_vm2, %v2516_v3, %v2520_v44  ;;  %v2502_v16 = vrot.slane %v2501_v4, 4  ;;  %v685_v17 = vor.u32 %v684_v5, %v681_v61  ;;  %1563 = vst.msk [vmem:[#allocation2 + $0x110] sm:$0xf] %vm1528_vm4, %v1405_v13  ;;  %v2751_v44 = vpop.permute.xlu0 %2750  ;;  %v2817_v55 = vpop.permute.xlu1 %2816 }
  0xaa   : > { %v670_v18 = vrot.slane %v668_v6, 5  ;;  %v4106_v19 = vld [vmem:[%s4526_s22 + $0x140] sm:$0xf]  ;;  %v4105_v20 = vld [vmem:[%s4526_s22 + $0x138] sm:$0xf]  ;;  %2840 = vrot.lane.b32.xlu1 %v2521_v15, %s4481_s29  ;;  %v676_v21 = vrot.slane %v674_v11, 5  ;;  %3681 = vmatprep.mubr.bf16.mxu1 %v4411_v14 }
  0xab   : > { %v1129_v22 = vrot.slane %v1127_v12, 4  ;;  %v1130_v23 = vshll.u32 %v407_v48, 16  ;;  %v1136_v24 = vshll.u32 %v408_v58, 16  ;;  %v4169_v25 = vld [vmem:[%s4526_s22 + $0xa0] sm:$0xf]  ;;  %v2507_v26 = vsel %vm4549_vm2, %v2502_v16, %v2506_v56  ;;  %3682 = vmatmul.mubr.bf16.vlgmr.msra.gmra.mxu1 %v4409_v8 }
  0xac   : > { %1693 = vst.msk [vmem:[#allocation2 + $0x11c] sm:$0xf] %vm244_vm3, %v4106_v19  ;;  %1692 = vst.msk [vmem:[#allocation2 + $0x114] sm:$0xf] %vm244_vm3, %v4105_v20  ;;  %v686_v27 = vrot.slane %v685_v17, 4  ;;  %v671_v28 = vor.u32 %v670_v18, %v667_v10  ;;  %v1113_v29 = vshrl.u32 %v405_v1, 16  ;;  %2838 = vrot.lane.b32.xlu0 %v2507_v26, %s4481_s29 }
  0xad   : > { %v4170_v30 = vld [vmem:[%s4526_s22 + $0xa4] sm:$0x1]  ;;  %v4167_v31 = vld [vmem:[%s4526_s22 + $0x98] sm:$0xf]  ;;  %v1132_v34 = vrot.slane %v1130_v23, 5  ;;  %v1138_v35 = vrot.slane %v1136_v24, 5  ;;  %v2815_v3 = vpop.permute.xlu0 %2814 }
  0xae   : > { %v1116_v36 = vshll.u32 %v405_v1, 16  ;;  %v1122_v37 = vshll.u32 %v406_v7, 16  ;;  %v4168_v38 = vld [vmem:[%s4526_s22 + $0x9c] sm:$0x1]  ;;  %2941 = vst.msk [vmem:[#allocation2 + $0x1c] sm:$0xf] %vm1528_vm4, %v2753_v33  ;;  %v691_v40 = vsel %vm4549_vm2, %v686_v27, %v690_v9  ;;  %v1347_v20 = vpop.permute.xlu1 %1346 }
  0xaf   : > { %v4233_v39 = vld [vmem:[%s4526_s22 + $0x1c0] sm:$0xf]  ;;  %v672_v41 = vrot.slane %v671_v28, 4  ;;  %v1115_v42 = vrot.slane %v1113_v29, 4  ;;  %v2089_v43 = vshrl.u32 %v4169_v25, 16  ;;  %1370 = vrot.lane.b32.xlu1 %v691_v40, %s4481_s29  ;;  %v1133_v46 = vor.u32 %v1132_v34, %v1129_v22 }
  0xb0   : > { %v185_v45 = vld [vmem:[%s4526_s22 + $0x28] sm:$0xf]  ;;  %v1118_v47 = vrot.slane %v1116_v36, 5  ;;  %v1124_v48 = vrot.slane %v1122_v37, 5  ;;  %v2092_v49 = vshll.u32 %v4169_v25, 16  ;;  %v2098_v52 = vshll.u32 %v4170_v30, 16 }
  0xb1   : > { %2940 = vst.msk [vmem:[#allocation2 + $0x14] sm:$0xf] %vm1528_vm4, %v2751_v44  ;;  %v184_v50 = vld [vmem:[%s4526_s22 + $0x20] sm:$0xf]  ;;  %v677_v51 = vsel %vm4549_vm2, %v672_v41, %v676_v21  ;;  %v2091_v0 = vrot.slane %v2089_v43, 4  ;;  %v2075_v53 = vshrl.u32 %v4167_v31, 16  ;;  %v1345_v33 = vpop.permute.xlu0 %1344 }
  0xb2   : > { %250 = vst.msk [vmem:[#allocation2 + $0x28] sm:$0xf] %vm244_vm3, %v185_v45  ;;  %v4234_v54 = vld [vmem:[%s4526_s22 + $0x1c4] sm:$0x1]  ;;  %249 = vst.msk [vmem:[#allocation2 + $0x20] sm:$0xf] %vm244_vm3, %v184_v50  ;;  %1368 = vrot.lane.b32.xlu0 %v677_v51, %s4481_s29  ;;  %v1119_v57 = vor.u32 %v1118_v47, %v1115_v42  ;;  %v1411_v45 = vpop.permute.xlu1 %1410 }
  0xb3   : > { %v1134_v56 = vrot.slane %v1133_v46, 4  ;;  %v2094_v58 = vrot.slane %v2092_v49, 5  ;;  %v2078_v59 = vshll.u32 %v4167_v31, 16  ;;  %v4231_v60 = vld [vmem:[%s4526_s22 + $0x1b8] sm:$0xf]  ;;  %v2100_v61 = vrot.slane %v2098_v52, 5 }
  0xb4   : > { %2973 = vst.msk [vmem:[#allocation2 + $0x11c] sm:$0xf] %vm1528_vm4, %v2817_v55  ;;  %v2077_v62 = vrot.slane %v2075_v53, 4  ;;  %v2084_v63 = vshll.u32 %v4168_v38, 16  ;;  %v2537_v1 = vshrl.u32 %v4233_v39, 16  ;;  %v1120_v5 = vrot.slane %v1119_v57, 4 }
  0xb5   : > { %v4232_v2 = vld [vmem:[%s4526_s22 + $0x1bc] sm:$0x1]  ;;  %v1139_v4 = vsel %vm4549_vm2, %v1134_v56, %v1138_v35  ;;  %v2095_v6 = vor.u32 %v2094_v58, %v2091_v0  ;;  %v2080_v7 = vrot.slane %v2078_v59, 5  ;;  %2972 = vst.msk [vmem:[#allocation2 + $0x114] sm:$0xf] %vm1528_vm4, %v2815_v3  ;;  %v2540_v12 = vshll.u32 %v4233_v39, 16 }
  0xb6   : > { %v347_v8 = vld [vmem:[%s4526_s22 + $0xa8] sm:$0xf]  ;;  %1434 = vrot.lane.b32.xlu1 %v1139_v4, %s4481_s29  ;;  %v2086_v10 = vrot.slane %v2084_v63, 5  ;;  %v2539_v11 = vrot.slane %v2537_v1, 4  ;;  %v2546_v13 = vshll.u32 %v4234_v54, 16  ;;  %v1125_v15 = vsel %vm4549_vm2, %v1120_v5, %v1124_v48  ;;  %v1409_v54 = vpop.permute.xlu0 %1408  ;;  %v3005_v5 = vld [vmem:[#allocation2 + $0x18] sm:$0xff] }
  0xb7   : > { %v217_v9 = vld [vmem:[%s4526_s22 + $0x148] sm:$0xf]  ;;  %v348_v14 = vld [vmem:[%s4526_s22 + $0xac] sm:$0x1]  ;;  %v2096_v16 = vrot.slane %v2095_v6, 4  ;;  %v2081_v17 = vor.u32 %v2080_v7, %v2077_v62  ;;  %v2523_v18 = vshrl.u32 %v4231_v60, 16  ;;  %1432 = vrot.lane.b32.xlu0 %v1125_v15, %s4481_s29 }
  0xb8   : > { %282 = vst.msk [vmem:[#allocation2 + $0x128] sm:$0xf] %vm244_vm3, %v217_v9  ;;  %v345_v19 = vld [vmem:[%s4526_s22 + $0xa0] sm:$0xf]  ;;  %v2542_v22 = vrot.slane %v2540_v12, 5  ;;  %v2548_v23 = vrot.slane %v2546_v13, 5  ;;  %v2757_v12 = vpop.permute.xlu1 %2756 }
  0xb9   : > { %v216_v21 = vld [vmem:[%s4526_s22 + $0x140] sm:$0xf]  ;;  %v2526_v24 = vshll.u32 %v4231_v60, 16  ;;  %v2532_v25 = vshll.u32 %v4232_v2, 16  ;;  %v346_v26 = vld [vmem:[%s4526_s22 + $0xa4] sm:$0x1]  ;;  %v2101_v28 = vsel %vm4549_vm2, %v2096_v16, %v2100_v61 }
  0xba   : > { %1534 = vst.msk [vmem:[#allocation2 + $0x28] sm:$0xf] %vm1528_vm4, %v1347_v20  ;;  %v411_v27 = vld [vmem:[%s4526_s22 + $0x1c8] sm:$0xf]  ;;  %v2082_v29 = vrot.slane %v2081_v17, 4  ;;  %v2525_v30 = vrot.slane %v2523_v18, 4  ;;  %2780 = vrot.lane.b32.xlu1 %v2101_v28, %s4481_s29  ;;  %v2543_v35 = vor.u32 %v2542_v22, %v2539_v11  ;;  %v2755_v22 = vpop.permute.xlu0 %2754 }
  0xbb   : > { %281 = vst.msk [vmem:[#allocation2 + $0x120] sm:$0xf] %vm244_vm3, %v216_v21  ;;  %v707_v31 = vshrl.u32 %v347_v8, 16  ;;  %v4412_v34 = vld [vmem:[#allocation2 + $0x14] ss:$8 sps:$4 sm:$0xff]   ;;  %v2528_v36 = vrot.slane %v2526_v24, 5 }
  0xbc   : > { %v2534_v37 = vrot.slane %v2532_v25, 5  ;;  %v710_v38 = vshll.u32 %v347_v8, 16  ;;  %1533 = vst.msk [vmem:[#allocation2 + $0x20] sm:$0xf] %vm1528_vm4, %v1345_v33  ;;  %v412_v39 = vld [vmem:[%s4526_s22 + $0x1cc] sm:$0x1]  ;;  %v2087_v40 = vsel %vm4549_vm2, %v2082_v29, %v2086_v10  ;;  %3561 = vmatprep.mubr.bf16.mxu0 %v4412_v34 }
  0xbd   : > { %v709_v41 = vrot.slane %v707_v31, 4  ;;  %v716_v42 = vshll.u32 %v348_v14, 16  ;;  %v693_v43 = vshrl.u32 %v345_v19, 16  ;;  %v409_v44 = vld [vmem:[%s4526_s22 + $0x1c0] sm:$0xf]  ;;  %2778 = vrot.lane.b32.xlu0 %v2087_v40, %s4481_s29  ;;  %v2544_v46 = vrot.slane %v2543_v35, 4 }
  0xbe   : > { %v2529_v47 = vor.u32 %v2528_v36, %v2525_v30  ;;  %v712_v48 = vrot.slane %v710_v38, 5  ;;  %v696_v49 = vshll.u32 %v345_v19, 16  ;;  %v410_v50 = vld [vmem:[%s4526_s22 + $0x1c4] sm:$0x1]  ;;  %1566 = vst.msk [vmem:[#allocation2 + $0x128] sm:$0xf] %vm1528_vm4, %v1411_v45  ;;  %v2821_v38 = vpop.permute.xlu1 %2820 }
  0xbf   : > { %v718_v51 = vrot.slane %v716_v42, 5  ;;  %v695_v0 = vrot.slane %v693_v43, 4  ;;  %v702_v52 = vshll.u32 %v346_v26, 16  ;;  %v1155_v53 = vshrl.u32 %v411_v27, 16  ;;  %v4414_v55 = vld [vmem:[#allocation2 + $0x114] ss:$8 sps:$4 sm:$0xff]  }
  0xc0   : > { %v2549_v56 = vsel %vm4549_vm2, %v2544_v46, %v2548_v23  ;;  %v2530_v57 = vrot.slane %v2529_v47, 4  ;;  %v713_v58 = vor.u32 %v712_v48, %v709_v41  ;;  %v698_v59 = vrot.slane %v696_v49, 5  ;;  %1565 = vst.msk [vmem:[#allocation2 + $0x120] sm:$0xf] %vm1528_vm4, %v1409_v54  ;;  %v4173_v60 = vld [vmem:[%s4526_s22 + $0xb0] sm:$0xf]  ;;  %3689 = vmatprep.mubr.bf16.mxu1 %v4414_v55  ;;  %v2819_v49 = vpop.permute.xlu0 %2818 }
  0xc1   : > { %v4076_v61 = vld [vmem:[%s4526_s22 + $0x30] sm:$0xf]  ;;  %v4075_v62 = vld [vmem:[%s4526_s22 + $0x28] sm:$0xf]  ;;  %2844 = vrot.lane.b32.xlu1 %v2549_v56, %s4481_s29  ;;  %v704_v63 = vrot.slane %v702_v52, 5  ;;  %v1157_v1 = vrot.slane %v1155_v53, 4 }
  0xc2   : > { %v1158_v2 = vshll.u32 %v411_v27, 16  ;;  %v1164_v3 = vshll.u32 %v412_v39, 16  ;;  %v3004_v4 = vld [vmem:[#allocation2 + $0x10] sm:$0xff]  ;;  %1663 = vst.msk [vmem:[#allocation2 + $0x2c] sm:$0xf] %vm244_vm3, %v4076_v61  ;;  %v2535_v6 = vsel %vm4549_vm2, %v2530_v57, %v2534_v37  ;;  %v714_v7 = vrot.slane %v713_v58, 4 }
  0xc3   : > { %1662 = vst.msk [vmem:[#allocation2 + $0x24] sm:$0xf] %vm244_vm3, %v4075_v62  ;;  %v699_v8 = vor.u32 %v698_v59, %v695_v0  ;;  %v1141_v9 = vshrl.u32 %v409_v44, 16  ;;  %v4174_v10 = vld [vmem:[%s4526_s22 + $0xb4] sm:$0x1]  ;;  %2842 = vrot.lane.b32.xlu0 %v2535_v6, %s4481_s29  ;;  %v1144_v15 = vshll.u32 %v409_v44, 16  ;;  %v4266_v21 = vcombine.low %v3004_v4, %v3005_v5 }
  0xc4   : > { %v4171_v11 = vld [vmem:[%s4526_s22 + $0xa8] sm:$0xf]  ;;  %v1160_v13 = vrot.slane %v1158_v2, 5  ;;  %v1166_v14 = vrot.slane %v1164_v3, 5  ;;  %v1150_v16 = vshll.u32 %v410_v50, 16  ;;  %v719_v18 = vsel %vm4549_vm2, %v714_v7, %v718_v51  ;;  %v3037_v29 = vld [vmem:[#allocation2 + $0x118] sm:$0xff]  ;;  %v1351_v3 = vpop.permute.xlu1 %1350 }
  0xc5   : > { %v4172_v17 = vld [vmem:[%s4526_s22 + $0xac] sm:$0x1]  ;;  %2943 = vst.msk [vmem:[#allocation2 + $0x2c] sm:$0xf] %vm1528_vm4, %v2757_v12  ;;  %v700_v19 = vrot.slane %v699_v8, 4  ;;  %v1143_v20 = vrot.slane %v1141_v9, 4  ;;  %1374 = vrot.lane.b32.xlu1 %v719_v18, %s4481_s29  ;;  %3562 = vmatmul.mubr.bf16.gmra.mxu0 %v4266_v21 }
  0xc6   : > { %v4108_v23 = vld [vmem:[%s4526_s22 + $0x150] sm:$0xf]  ;;  %v4107_v24 = vld [vmem:[%s4526_s22 + $0x148] sm:$0xf]  ;;  %v1161_v25 = vor.u32 %v1160_v13, %v1157_v1  ;;  %v1146_v26 = vrot.slane %v1144_v15, 5  ;;  %v1152_v27 = vrot.slane %v1150_v16, 5  ;;  %v1349_v13 = vpop.permute.xlu0 %1348 }
  0xc7   : > { %v2117_v28 = vshrl.u32 %v4173_v60, 16  ;;  %2942 = vst.msk [vmem:[#allocation2 + $0x24] sm:$0xf] %vm1528_vm4, %v2755_v22  ;;  %v4237_v30 = vld [vmem:[%s4526_s22 + $0x1d0] sm:$0xf]  ;;  %v705_v31 = vsel %vm4549_vm2, %v700_v19, %v704_v63  ;;  %v2120_v33 = vshll.u32 %v4173_v60, 16 }
  0xc8   : > { %1695 = vst.msk [vmem:[#allocation2 + $0x12c] sm:$0xf] %vm244_vm3, %v4108_v23  ;;  %1694 = vst.msk [vmem:[#allocation2 + $0x124] sm:$0xf] %vm244_vm3, %v4107_v24  ;;  %v2126_v34 = vshll.u32 %v4174_v10, 16  ;;  %v2103_v35 = vshrl.u32 %v4171_v11, 16  ;;  %1372 = vrot.lane.b32.xlu0 %v705_v31, %s4481_s29  ;;  %v1147_v40 = vor.u32 %v1146_v26, %v1143_v20 }
  0xc9   : > { %v3036_v36 = vld [vmem:[#allocation2 + $0x110] sm:$0xff]  ;;  %v1162_v39 = vrot.slane %v1161_v25, 4  ;;  %v2119_v41 = vrot.slane %v2117_v28, 4  ;;  %v2106_v42 = vshll.u32 %v4171_v11, 16  ;;  %v4235_v43 = vld [vmem:[%s4526_s22 + $0x1c8] sm:$0xf]  ;;  %v1415_v25 = vpop.permute.xlu1 %1414 }
  0xca   : > { %v4238_v37 = vld [vmem:[%s4526_s22 + $0x1d4] sm:$0x1]  ;;  %2975 = vst.msk [vmem:[#allocation2 + $0x12c] sm:$0xf] %vm1528_vm4, %v2821_v38  ;;  %v2122_v44 = vrot.slane %v2120_v33, 5  ;;  %v2128_v45 = vrot.slane %v2126_v34, 5  ;;  %v4298_v52 = vcombine.low %v3036_v36, %v3037_v29  ;;  %v1413_v38 = vpop.permute.xlu0 %1412 }
  0xcb   : > { %v2105_v46 = vrot.slane %v2103_v35, 4  ;;  %v2112_v47 = vshll.u32 %v4172_v17, 16  ;;  %v4236_v48 = vld [vmem:[%s4526_s22 + $0x1cc] sm:$0x1]  ;;  %v1167_v50 = vsel %vm4549_vm2, %v1162_v39, %v1166_v14  ;;  %v1148_v51 = vrot.slane %v1147_v40, 4 }
  0xcc   : > { %v2108_v0 = vrot.slane %v2106_v42, 5  ;;  %2974 = vst.msk [vmem:[#allocation2 + $0x124] sm:$0xf] %vm1528_vm4, %v2819_v49  ;;  %v187_v53 = vld [vmem:[%s4526_s22 + $0x38] sm:$0xf]  ;;  %1438 = vrot.lane.b32.xlu1 %v1167_v50, %s4481_s29  ;;  %v2123_v55 = vor.u32 %v2122_v44, %v2119_v41  ;;  %v2565_v57 = vshrl.u32 %v4237_v30, 16  ;;  %3690 = vmatmul.mubr.bf16.gmra.mxu1 %v4298_v52 }
  0xcd   : > { %v186_v54 = vld [vmem:[%s4526_s22 + $0x30] sm:$0xf]  ;;  %v2114_v56 = vrot.slane %v2112_v47, 5  ;;  %v2568_v58 = vshll.u32 %v4237_v30, 16  ;;  %v351_v59 = vld [vmem:[%s4526_s22 + $0xb8] sm:$0xf]  ;;  %v1153_v60 = vsel %vm4549_vm2, %v1148_v51, %v1152_v27 }
  0xce   : > { %252 = vst.msk [vmem:[#allocation2 + $0x38] sm:$0xf] %vm244_vm3, %v187_v53  ;;  %251 = vst.msk [vmem:[#allocation2 + $0x30] sm:$0xf] %vm244_vm3, %v186_v54  ;;  %v2109_v61 = vor.u32 %v2108_v0, %v2105_v46  ;;  %v2574_v62 = vshll.u32 %v4238_v37, 16  ;;  %v2551_v63 = vshrl.u32 %v4235_v43, 16  ;;  %1436 = vrot.lane.b32.xlu0 %v1153_v60, %s4481_s29 }
  0xcf   : > { %v352_v1 = vld [vmem:[%s4526_s22 + $0xbc] sm:$0x1]  ;;  %v349_v2 = vld [vmem:[%s4526_s22 + $0xb0] sm:$0xf]  ;;  %v2124_v4 = vrot.slane %v2123_v55, 4  ;;  %v2567_v5 = vrot.slane %v2565_v57, 4  ;;  %v2761_v57 = vpop.permute.xlu1 %2760 }
  0xd0   : > { %v2570_v6 = vrot.slane %v2568_v58, 5  ;;  %v2554_v7 = vshll.u32 %v4235_v43, 16  ;;  %v350_v8 = vld [vmem:[%s4526_s22 + $0xb4] sm:$0x1]  ;;  %1536 = vst.msk [vmem:[#allocation2 + $0x38] sm:$0xf] %vm1528_vm4, %v1351_v3 }
  0xd1   : > { %v2110_v9 = vrot.slane %v2109_v61, 4  ;;  %v2576_v10 = vrot.slane %v2574_v62, 5  ;;  %v2553_v11 = vrot.slane %v2551_v63, 4  ;;  %v2560_v12 = vshll.u32 %v4236_v48, 16  ;;  %v415_v14 = vld [vmem:[%s4526_s22 + $0x1d8] sm:$0xf] }
  0xd2   : > { %v2129_v15 = vsel %vm4549_vm2, %v2124_v4, %v2128_v45  ;;  %v2571_v16 = vor.u32 %v2570_v6, %v2567_v5  ;;  %v2556_v17 = vrot.slane %v2554_v7, 5  ;;  %v735_v18 = vshrl.u32 %v351_v59, 16  ;;  %1535 = vst.msk [vmem:[#allocation2 + $0x30] sm:$0xf] %vm1528_vm4, %v1349_v13  ;;  %v4416_v19 = vld [vmem:[#allocation2 + $0x24] ss:$8 sps:$4 sm:$0xff]   ;;  %v2759_v5 = vpop.permute.xlu0 %2758 }
  0xd3   : > { %v219_v20 = vld [vmem:[%s4526_s22 + $0x158] sm:$0xf]  ;;  %2784 = vrot.lane.b32.xlu1 %v2129_v15, %s4481_s29  ;;  %v2115_v21 = vsel %vm4549_vm2, %v2110_v9, %v2114_v56  ;;  %v2562_v22 = vrot.slane %v2560_v12, 5  ;;  %v738_v23 = vshll.u32 %v351_v59, 16  ;;  %v744_v24 = vshll.u32 %v352_v1, 16  ;;  %3569 = vmatprep.mubr.bf16.mxu0 %v4416_v19  ;;  %v3007_v44 = vld [vmem:[#allocation2 + $0x28] sm:$0xff] }
  0xd4   : > { %284 = vst.msk [vmem:[#allocation2 + $0x138] sm:$0xf] %vm244_vm3, %v219_v20  ;;  %v218_v26 = vld [vmem:[%s4526_s22 + $0x150] sm:$0xf]  ;;  %2782 = vrot.lane.b32.xlu0 %v2115_v21, %s4481_s29  ;;  %v2572_v27 = vrot.slane %v2571_v16, 4  ;;  %v2557_v28 = vor.u32 %v2556_v17, %v2553_v11  ;;  %v737_v29 = vrot.slane %v735_v18, 4  ;;  %v2825_v18 = vpop.permute.xlu1 %2824 }
  0xd5   : > { %v721_v30 = vshrl.u32 %v349_v2, 16  ;;  %v416_v31 = vld [vmem:[%s4526_s22 + $0x1dc] sm:$0x1]  ;;  %1568 = vst.msk [vmem:[#allocation2 + $0x138] sm:$0xf] %vm1528_vm4, %v1415_v25  ;;  %v740_v33 = vrot.slane %v738_v23, 5 }
  0xd6   : > { %283 = vst.msk [vmem:[#allocation2 + $0x130] sm:$0xf] %vm244_vm3, %v218_v26  ;;  %v746_v34 = vrot.slane %v744_v24, 5  ;;  %v724_v35 = vshll.u32 %v349_v2, 16  ;;  %v730_v36 = vshll.u32 %v350_v8, 16  ;;  %v2577_v39 = vsel %vm4549_vm2, %v2572_v27, %v2576_v10  ;;  %v3006_v49 = vld [vmem:[#allocation2 + $0x20] sm:$0xff] }
  0xd7   : > { %v413_v37 = vld [vmem:[%s4526_s22 + $0x1d0] sm:$0xf]  ;;  %v2558_v40 = vrot.slane %v2557_v28, 4  ;;  %v723_v41 = vrot.slane %v721_v30, 4  ;;  %v1183_v42 = vshrl.u32 %v415_v14, 16  ;;  %2848 = vrot.lane.b32.xlu1 %v2577_v39, %s4481_s29  ;;  %v741_v45 = vor.u32 %v740_v33, %v737_v29  ;;  %v3038_v11 = vld [vmem:[#allocation2 + $0x120] sm:$0xff]  ;;  %v2823_v30 = vpop.permute.xlu0 %2822 }
  0xd8   : > { %v414_v43 = vld [vmem:[%s4526_s22 + $0x1d4] sm:$0x1]  ;;  %1567 = vst.msk [vmem:[#allocation2 + $0x130] sm:$0xf] %vm1528_vm4, %v1413_v38  ;;  %v726_v46 = vrot.slane %v724_v35, 5  ;;  %v732_v47 = vrot.slane %v730_v36, 5  ;;  %v4268_v3 = vcombine.low %v3006_v49, %v3007_v44  ;;  %v1355_v49 = vpop.permute.xlu1 %1354 }
  0xd9   : > { %v1186_v48 = vshll.u32 %v415_v14, 16  ;;  %v4177_v50 = vld [vmem:[%s4526_s22 + $0xc0] sm:$0xf]  ;;  %v4178_v51 = vld [vmem:[%s4526_s22 + $0xc4] sm:$0x1]  ;;  %v2563_v0 = vsel %vm4549_vm2, %v2558_v40, %v2562_v22  ;;  %v1185_v52 = vrot.slane %v1183_v42, 4 }
  0xda   : > { %v1192_v53 = vshll.u32 %v416_v31, 16  ;;  %v1169_v54 = vshrl.u32 %v413_v37, 16  ;;  %v4175_v55 = vld [vmem:[%s4526_s22 + $0xb8] sm:$0xf]  ;;  %v4418_v56 = vld [vmem:[#allocation2 + $0x124] ss:$8 sps:$4 sm:$0xff]   ;;  %2846 = vrot.lane.b32.xlu0 %v2563_v0, %s4481_s29  ;;  %v727_v59 = vor.u32 %v726_v46, %v723_v41  ;;  %3570 = vmatmul.mubr.bf16.gmra.mxu0 %v4268_v3 }
  0xdb   : > { %v742_v58 = vrot.slane %v741_v45, 4  ;;  %v1188_v60 = vrot.slane %v1186_v48, 5  ;;  %v1172_v61 = vshll.u32 %v413_v37, 16  ;;  %v4078_v62 = vld [vmem:[%s4526_s22 + $0x40] sm:$0xf]  ;;  %v1178_v2 = vshll.u32 %v414_v43, 16  ;;  %3697 = vmatprep.mubr.bf16.mxu1 %v4418_v56 }
  0xdc   : > { %v1194_v63 = vrot.slane %v1192_v53, 5  ;;  %v1171_v1 = vrot.slane %v1169_v54, 4  ;;  %1665 = vst.msk [vmem:[#allocation2 + $0x3c] sm:$0xf] %vm244_vm3, %v4078_v62  ;;  %v4077_v4 = vld [vmem:[%s4526_s22 + $0x38] sm:$0xf] }
  0xdd   : > { %v747_v6 = vsel %vm4549_vm2, %v742_v58, %v746_v34  ;;  %v728_v7 = vrot.slane %v727_v59, 4  ;;  %v1189_v8 = vor.u32 %v1188_v60, %v1185_v52  ;;  %v1174_v9 = vrot.slane %v1172_v61, 5  ;;  %v4176_v10 = vld [vmem:[%s4526_s22 + $0xbc] sm:$0x1]  ;;  %v3039_v12 = vld [vmem:[#allocation2 + $0x128] sm:$0xff]  ;;  %v1353_v59 = vpop.permute.xlu0 %1352 }
  0xde   : > { %2945 = vst.msk [vmem:[#allocation2 + $0x3c] sm:$0xf] %vm1528_vm4, %v2761_v57  ;;  %1378 = vrot.lane.b32.xlu1 %v747_v6, %s4481_s29  ;;  %v1180_v13 = vrot.slane %v1178_v2, 5  ;;  %v2145_v14 = vshrl.u32 %v4177_v50, 16  ;;  %v2148_v15 = vshll.u32 %v4177_v50, 16  ;;  %v2154_v16 = vshll.u32 %v4178_v51, 16 }
  0xdf   : > { %1664 = vst.msk [vmem:[#allocation2 + $0x34] sm:$0xf] %vm244_vm3, %v4077_v4  ;;  %v4241_v17 = vld [vmem:[%s4526_s22 + $0x1e0] sm:$0xf]  ;;  %v733_v19 = vsel %vm4549_vm2, %v728_v7, %v732_v47  ;;  %v1190_v20 = vrot.slane %v1189_v8, 4  ;;  %v1175_v21 = vor.u32 %v1174_v9, %v1171_v1  ;;  %v2131_v22 = vshrl.u32 %v4175_v55, 16  ;;  %v1419_v8 = vpop.permute.xlu1 %1418 }
  0xe0   : > { %2944 = vst.msk [vmem:[#allocation2 + $0x34] sm:$0xf] %vm1528_vm4, %v2759_v5  ;;  %v4242_v23 = vld [vmem:[%s4526_s22 + $0x1e4] sm:$0x1]  ;;  %v4110_v24 = vld [vmem:[%s4526_s22 + $0x160] sm:$0xf]  ;;  %1376 = vrot.lane.b32.xlu0 %v733_v19, %s4481_s29  ;;  %v4300_v39 = vcombine.low %v3038_v11, %v3039_v12 }
  0xe1   : > { %v2147_v25 = vrot.slane %v2145_v14, 4  ;;  %v2150_v26 = vrot.slane %v2148_v15, 5  ;;  %v2156_v27 = vrot.slane %v2154_v16, 5  ;;  %v2134_v28 = vshll.u32 %v4175_v55, 16  ;;  %1697 = vst.msk [vmem:[#allocation2 + $0x13c] sm:$0xf] %vm244_vm3, %v4110_v24  ;;  %v1417_v19 = vpop.permute.xlu0 %1416 }
  0xe2   : > { %v4109_v29 = vld [vmem:[%s4526_s22 + $0x158] sm:$0xf]  ;;  %v1195_v31 = vsel %vm4549_vm2, %v1190_v20, %v1194_v63  ;;  %v1176_v33 = vrot.slane %v1175_v21, 4  ;;  %v2133_v34 = vrot.slane %v2131_v22, 4  ;;  %v2140_v35 = vshll.u32 %v4176_v10, 16  ;;  %3698 = vmatmul.mubr.bf16.gmra.mxu1 %v4300_v39 }
  0xe3   : > { %v4239_v36 = vld [vmem:[%s4526_s22 + $0x1d8] sm:$0xf]  ;;  %2977 = vst.msk [vmem:[#allocation2 + $0x13c] sm:$0xf] %vm1528_vm4, %v2825_v18  ;;  %1442 = vrot.lane.b32.xlu1 %v1195_v31, %s4481_s29  ;;  %v2151_v37 = vor.u32 %v2150_v26, %v2147_v25  ;;  %v2136_v38 = vrot.slane %v2134_v28, 5  ;;  %v2593_v40 = vshrl.u32 %v4241_v17, 16  ;;  %v2765_v39 = vpop.permute.xlu1 %2764 }
  0xe4   : > { %1696 = vst.msk [vmem:[#allocation2 + $0x134] sm:$0xf] %vm244_vm3, %v4109_v29  ;;  %v4240_v41 = vld [vmem:[%s4526_s22 + $0x1dc] sm:$0x1]  ;;  %v355_v42 = vld [vmem:[%s4526_s22 + $0xc8] sm:$0xf]  ;;  %v1181_v43 = vsel %vm4549_vm2, %v1176_v33, %v1180_v13 }
  0xe5   : > { %2976 = vst.msk [vmem:[#allocation2 + $0x134] sm:$0xf] %vm1528_vm4, %v2823_v30  ;;  %v2142_v44 = vrot.slane %v2140_v35, 5  ;;  %v2596_v45 = vshll.u32 %v4241_v17, 16  ;;  %v2602_v46 = vshll.u32 %v4242_v23, 16  ;;  %1440 = vrot.lane.b32.xlu0 %v1181_v43, %s4481_s29  ;;  %v2152_v50 = vrot.slane %v2151_v37, 4 }
  0xe6   : > { %v356_v47 = vld [vmem:[%s4526_s22 + $0xcc] sm:$0x1]  ;;  %v353_v48 = vld [vmem:[%s4526_s22 + $0xc0] sm:$0xf]  ;;  %v2137_v51 = vor.u32 %v2136_v38, %v2133_v34  ;;  %v2595_v0 = vrot.slane %v2593_v40, 4  ;;  %v2579_v52 = vshrl.u32 %v4239_v36, 16 }
  0xe7   : > { %v189_v53 = vld [vmem:[%s4526_s22 + $0x50] sm:$0xf]  ;;  %v2598_v54 = vrot.slane %v2596_v45, 5  ;;  %v2604_v55 = vrot.slane %v2602_v46, 5  ;;  %v2582_v56 = vshll.u32 %v4239_v36, 16  ;;  %v2588_v57 = vshll.u32 %v4240_v41, 16 }
  0xe8   : > { %v354_v58 = vld [vmem:[%s4526_s22 + $0xc4] sm:$0x1]  ;;  %254 = vst.msk [vmem:[#allocation2 + $0x48] sm:$0xf] %vm244_vm3, %v189_v53  ;;  %v188_v60 = vld [vmem:[%s4526_s22 + $0x48] sm:$0xf]  ;;  %v2157_v61 = vsel %vm4549_vm2, %v2152_v50, %v2156_v27 }
  0xe9   : > { %v2138_v62 = vrot.slane %v2137_v51, 4  ;;  %v2581_v63 = vrot.slane %v2579_v52, 4  ;;  %v763_v1 = vshrl.u32 %v355_v42, 16  ;;  %1538 = vst.msk [vmem:[#allocation2 + $0x48] sm:$0xf] %vm1528_vm4, %v1355_v49  ;;  %2788 = vrot.lane.b32.xlu1 %v2157_v61, %s4481_s29  ;;  %v2599_v3 = vor.u32 %v2598_v54, %v2595_v0  ;;  %v3008_v24 = vld [vmem:[#allocation2 + $0x30] sm:$0xff]  ;;  %v2763_v51 = vpop.permute.xlu0 %2762 }
  0xea   : > { %253 = vst.msk [vmem:[#allocation2 + $0x40] sm:$0xf] %vm244_vm3, %v188_v60  ;;  %v419_v2 = vld [vmem:[%s4526_s22 + $0x1e8] sm:$0xf]  ;;  %v2584_v4 = vrot.slane %v2582_v56, 5  ;;  %v2590_v5 = vrot.slane %v2588_v57, 5 }
  0xeb   : > { %v766_v6 = vshll.u32 %v355_v42, 16  ;;  %1537 = vst.msk [vmem:[#allocation2 + $0x40] sm:$0xf] %vm1528_vm4, %v1353_v59  ;;  %v420_v7 = vld [vmem:[%s4526_s22 + $0x1ec] sm:$0x1]  ;;  %v2143_v9 = vsel %vm4549_vm2, %v2138_v62, %v2142_v44  ;;  %v765_v10 = vrot.slane %v763_v1, 4 }
  0xec   : > { %v772_v11 = vshll.u32 %v356_v47, 16  ;;  %v749_v12 = vshrl.u32 %v353_v48, 16  ;;  %v417_v13 = vld [vmem:[%s4526_s22 + $0x1e0] sm:$0xf]  ;;  %2786 = vrot.lane.b32.xlu0 %v2143_v9, %s4481_s29  ;;  %v2600_v14 = vrot.slane %v2599_v3, 4  ;;  %v2585_v15 = vor.u32 %v2584_v4, %v2581_v63  ;;  %v3009_v25 = vld [vmem:[#allocation2 + $0x38] sm:$0xff]  ;;  %v2829_v63 = vpop.permute.xlu1 %2828 }
  0xed   : > { %v768_v16 = vrot.slane %v766_v6, 5  ;;  %v752_v17 = vshll.u32 %v353_v48, 16  ;;  %v418_v18 = vld [vmem:[%s4526_s22 + $0x1e4] sm:$0x1]  ;;  %v758_v22 = vshll.u32 %v354_v58, 16  ;;  %v1211_v23 = vshrl.u32 %v419_v2, 16 }
  0xee   : > { %v774_v20 = vrot.slane %v772_v11, 5  ;;  %v751_v21 = vrot.slane %v749_v12, 4  ;;  %v4420_v26 = vld [vmem:[#allocation2 + $0x34] ss:$8 sps:$4 sm:$0xff]   ;;  %v2605_v27 = vsel %vm4549_vm2, %v2600_v14, %v2604_v55  ;;  %v2586_v28 = vrot.slane %v2585_v15, 4  ;;  %v2827_v12 = vpop.permute.xlu0 %2826 }
  0xef   : > { %v769_v29 = vor.u32 %v768_v16, %v765_v10  ;;  %v754_v30 = vrot.slane %v752_v17, 5  ;;  %v221_v31 = vld [vmem:[%s4526_s22 + $0x170] sm:$0xf]  ;;  %v220_v33 = vld [vmem:[%s4526_s22 + $0x168] sm:$0xf]  ;;  %2852 = vrot.lane.b32.xlu1 %v2605_v27, %s4481_s29  ;;  %v760_v34 = vrot.slane %v758_v22, 5  ;;  %3577 = vmatprep.mubr.bf16.mxu0 %v4420_v26  ;;  %v4270_v54 = vcombine.low %v3008_v24, %v3009_v25 }
  0xf0   : > { %v1213_v35 = vrot.slane %v1211_v23, 4  ;;  %v1214_v36 = vshll.u32 %v419_v2, 16  ;;  %v1220_v37 = vshll.u32 %v420_v7, 16  ;;  %286 = vst.msk [vmem:[#allocation2 + $0x148] sm:$0xf] %vm244_vm3, %v221_v31  ;;  %v2591_v40 = vsel %vm4549_vm2, %v2586_v28, %v2590_v5  ;;  %v3041_v61 = vld [vmem:[#allocation2 + $0x138] sm:$0xff] }
  0xf1   : > { %285 = vst.msk [vmem:[#allocation2 + $0x140] sm:$0xf] %vm244_vm3, %v220_v33  ;;  %v4181_v38 = vld [vmem:[%s4526_s22 + $0xd0] sm:$0xf]  ;;  %v770_v41 = vrot.slane %v769_v29, 4  ;;  %v755_v42 = vor.u32 %v754_v30, %v751_v21  ;;  %v1197_v43 = vshrl.u32 %v417_v13, 16  ;;  %2850 = vrot.lane.b32.xlu0 %v2591_v40, %s4481_s29  ;;  %3578 = vmatmul.mubr.bf16.gmra.mxu0 %v4270_v54  ;;  %v1359_v29 = vpop.permute.xlu1 %1358 }
  0xf2   : > { %1570 = vst.msk [vmem:[#allocation2 + $0x148] sm:$0xf] %vm1528_vm4, %v1419_v8  ;;  %1569 = vst.msk [vmem:[#allocation2 + $0x140] sm:$0xf] %vm1528_vm4, %v1417_v19  ;;  %v4182_v44 = vld [vmem:[%s4526_s22 + $0xd4] sm:$0x1] }
  0xf3   : > { %v4179_v45 = vld [vmem:[%s4526_s22 + $0xc8] sm:$0xf]  ;;  %v1216_v46 = vrot.slane %v1214_v36, 5  ;;  %v1222_v47 = vrot.slane %v1220_v37, 5  ;;  %v1200_v48 = vshll.u32 %v417_v13, 16  ;;  %v1206_v49 = vshll.u32 %v418_v18, 16 }
  0xf4   : > { %v4180_v50 = vld [vmem:[%s4526_s22 + $0xcc] sm:$0x1]  ;;  %v775_v0 = vsel %vm4549_vm2, %v770_v41, %v774_v20  ;;  %v756_v52 = vrot.slane %v755_v42, 4  ;;  %v1199_v53 = vrot.slane %v1197_v43, 4  ;;  %v4422_v55 = vld [vmem:[#allocation2 + $0x134] ss:$8 sps:$4 sm:$0xff]   ;;  %v1357_v42 = vpop.permute.xlu0 %1356 }
  0xf5   : > { %v4080_v56 = vld [vmem:[%s4526_s22 + $0x58] sm:$0xf]  ;;  %1382 = vrot.lane.b32.xlu1 %v775_v0, %s4481_s29  ;;  %v1217_v57 = vor.u32 %v1216_v46, %v1213_v35  ;;  %v1202_v58 = vrot.slane %v1200_v48, 5  ;;  %v1208_v59 = vrot.slane %v1206_v49, 5  ;;  %v2173_v60 = vshrl.u32 %v4181_v38, 16  ;;  %v3040_v5 = vld [vmem:[#allocation2 + $0x130] sm:$0xff]  ;;  %3705 = vmatprep.mubr.bf16.mxu1 %v4422_v55 }
  0xf6   : > { %1667 = vst.msk [vmem:[#allocation2 + $0x4c] sm:$0xf] %vm244_vm3, %v4080_v56  ;;  %v4079_v62 = vld [vmem:[%s4526_s22 + $0x50] sm:$0xf]  ;;  %v761_v1 = vsel %vm4549_vm2, %v756_v52, %v760_v34  ;;  %v2176_v2 = vshll.u32 %v4181_v38, 16  ;;  %v2182_v3 = vshll.u32 %v4182_v44, 16  ;;  %v4302_v21 = vcombine.low %v3040_v5, %v3041_v61 }
  0xf7   : > { %v2159_v4 = vshrl.u32 %v4179_v45, 16  ;;  %2947 = vst.msk [vmem:[#allocation2 + $0x4c] sm:$0xf] %vm1528_vm4, %v2765_v39  ;;  %v4245_v6 = vld [vmem:[%s4526_s22 + $0x1f0] sm:$0xf]  ;;  %1380 = vrot.lane.b32.xlu0 %v761_v1, %s4481_s29  ;;  %v1218_v7 = vrot.slane %v1217_v57, 4  ;;  %v1203_v8 = vor.u32 %v1202_v58, %v1199_v53  ;;  %v1423_v53 = vpop.permute.xlu1 %1422 }
  0xf8   : > { %1666 = vst.msk [vmem:[#allocation2 + $0x44] sm:$0xf] %vm244_vm3, %v4079_v62  ;;  %v2175_v9 = vrot.slane %v2173_v60, 4  ;;  %v2162_v10 = vshll.u32 %v4179_v45, 16  ;;  %v4246_v11 = vld [vmem:[%s4526_s22 + $0x1f4] sm:$0x1]  ;;  %3706 = vmatmul.mubr.bf16.gmra.mxu1 %v4302_v21  ;;  %v1421_v1 = vpop.permute.xlu0 %1420 }
  0xf9   : > { %2946 = vst.msk [vmem:[#allocation2 + $0x44] sm:$0xf] %vm1528_vm4, %v2763_v51  ;;  %v2178_v13 = vrot.slane %v2176_v2, 5  ;;  %v2184_v14 = vrot.slane %v2182_v3, 5  ;;  %v2161_v15 = vrot.slane %v2159_v4, 4  ;;  %v2168_v16 = vshll.u32 %v4180_v50, 16 }
  0xfa   : > { %v4243_v17 = vld [vmem:[%s4526_s22 + $0x1e8] sm:$0xf]  ;;  %v1223_v18 = vsel %vm4549_vm2, %v1218_v7, %v1222_v47  ;;  %v1204_v19 = vrot.slane %v1203_v8, 4  ;;  %v2164_v20 = vrot.slane %v2162_v10, 5  ;;  %v4244_v22 = vld [vmem:[%s4526_s22 + $0x1ec] sm:$0x1] }
  0xfb   : > { %v4112_v23 = vld [vmem:[%s4526_s22 + $0x178] sm:$0xf]  ;;  %1446 = vrot.lane.b32.xlu1 %v1223_v18, %s4481_s29  ;;  %v2179_v24 = vor.u32 %v2178_v13, %v2175_v9  ;;  %v2170_v25 = vrot.slane %v2168_v16, 5  ;;  %v2621_v26 = vshrl.u32 %v4245_v6, 16  ;;  %v2624_v27 = vshll.u32 %v4245_v6, 16 }
  0xfc   : > { %1699 = vst.msk [vmem:[#allocation2 + $0x14c] sm:$0xf] %vm244_vm3, %v4112_v23  ;;  %v4111_v28 = vld [vmem:[%s4526_s22 + $0x170] sm:$0xf]  ;;  %v1209_v30 = vsel %vm4549_vm2, %v1204_v19, %v1208_v59  ;;  %v2165_v31 = vor.u32 %v2164_v20, %v2161_v15  ;;  %v2630_v33 = vshll.u32 %v4246_v11, 16  ;;  %v2607_v34 = vshrl.u32 %v4243_v17, 16  ;;  %v2769_v19 = vpop.permute.xlu1 %2768 }
  0xfd   : > { %2979 = vst.msk [vmem:[#allocation2 + $0x14c] sm:$0xf] %vm1528_vm4, %v2829_v63  ;;  %v359_v35 = vld [vmem:[%s4526_s22 + $0xe0] sm:$0xf]  ;;  %v360_v36 = vld [vmem:[%s4526_s22 + $0xe4] sm:$0x1]  ;;  %1444 = vrot.lane.b32.xlu0 %v1209_v30, %s4481_s29  ;;  %v2767_v30 = vpop.permute.xlu0 %2766 }
  0xfe   : > { %1698 = vst.msk [vmem:[#allocation2 + $0x144] sm:$0xf] %vm244_vm3, %v4111_v28  ;;  %v2180_v37 = vrot.slane %v2179_v24, 4  ;;  %v2623_v38 = vrot.slane %v2621_v26, 4  ;;  %v2626_v39 = vrot.slane %v2624_v27, 5  ;;  %v2610_v40 = vshll.u32 %v4243_v17, 16 }
  0xff   : > { %2978 = vst.msk [vmem:[#allocation2 + $0x144] sm:$0xf] %vm1528_vm4, %v2827_v12  ;;  %v357_v41 = vld [vmem:[%s4526_s22 + $0xd8] sm:$0xf]  ;;  %v2166_v43 = vrot.slane %v2165_v31, 4  ;;  %v2632_v44 = vrot.slane %v2630_v33, 5 }
 0x100   : > { %v2609_v45 = vrot.slane %v2607_v34, 4  ;;  %v2616_v46 = vshll.u32 %v4244_v22, 16  ;;  %v358_v47 = vld [vmem:[%s4526_s22 + $0xdc] sm:$0x1]  ;;  %v2185_v48 = vsel %vm4549_vm2, %v2180_v37, %v2184_v14  ;;  %v2627_v49 = vor.u32 %v2626_v39, %v2623_v38  ;;  %v191_v0 = vld [vmem:[%s4526_s22 + $0x60] sm:$0xf] }
 0x101   : > { %v2612_v50 = vrot.slane %v2610_v40, 5  ;;  %v791_v51 = vshrl.u32 %v359_v35, 16  ;;  %v190_v52 = vld [vmem:[%s4526_s22 + $0x58] sm:$0xf]  ;;  %2792 = vrot.lane.b32.xlu1 %v2185_v48, %s4481_s29  ;;  %v2171_v54 = vsel %vm4549_vm2, %v2166_v43, %v2170_v25  ;;  %v794_v56 = vshll.u32 %v359_v35, 16  ;;  %v3010_v12 = vld [vmem:[#allocation2 + $0x40] sm:$0xff] }
 0x102   : > { %v2618_v55 = vrot.slane %v2616_v46, 5  ;;  %v800_v57 = vshll.u32 %v360_v36, 16  ;;  %256 = vst.msk [vmem:[#allocation2 + $0x58] sm:$0xf] %vm244_vm3, %v191_v0  ;;  %255 = vst.msk [vmem:[#allocation2 + $0x50] sm:$0xf] %vm244_vm3, %v190_v52  ;;  %2790 = vrot.lane.b32.xlu0 %v2171_v54, %s4481_s29 }
 0x103   : > { %v423_v58 = vld [vmem:[%s4526_s22 + $0x200] sm:$0xf]  ;;  %v2628_v59 = vrot.slane %v2627_v49, 4  ;;  %v2613_v60 = vor.u32 %v2612_v50, %v2609_v45  ;;  %v793_v61 = vrot.slane %v791_v51, 4  ;;  %v777_v62 = vshrl.u32 %v357_v41, 16  ;;  %v3011_v17 = vld [vmem:[#allocation2 + $0x48] sm:$0xff]  ;;  %v2833_v45 = vpop.permute.xlu1 %2832 }
 0x104   : > { %1540 = vst.msk [vmem:[#allocation2 + $0x58] sm:$0xf] %vm1528_vm4, %v1359_v29  ;;  %1539 = vst.msk [vmem:[#allocation2 + $0x50] sm:$0xf] %vm1528_vm4, %v1357_v42  ;;  %v424_v63 = vld [vmem:[%s4526_s22 + $0x204] sm:$0x1]  ;;  %v4272_v35 = vcombine.low %v3010_v12, %v3011_v17 }
 0x105   : > { %v796_v2 = vrot.slane %v794_v56, 5  ;;  %v802_v3 = vrot.slane %v800_v57, 5  ;;  %v780_v4 = vshll.u32 %v357_v41, 16  ;;  %v786_v5 = vshll.u32 %v358_v47, 16  ;;  %v421_v6 = vld [vmem:[%s4526_s22 + $0x1f8] sm:$0xf]  ;;  %v2831_v56 = vpop.permute.xlu0 %2830 }
 0x106   : > { %v2633_v7 = vsel %vm4549_vm2, %v2628_v59, %v2632_v44  ;;  %v2614_v8 = vrot.slane %v2613_v60, 4  ;;  %v779_v9 = vrot.slane %v777_v62, 4  ;;  %v1239_v10 = vshrl.u32 %v423_v58, 16  ;;  %v422_v11 = vld [vmem:[%s4526_s22 + $0x1fc] sm:$0x1]  ;;  %v3042_v43 = vld [vmem:[#allocation2 + $0x140] sm:$0xff] }
 0x107   : > { %2856 = vrot.lane.b32.xlu1 %v2633_v7, %s4481_s29  ;;  %v797_v13 = vor.u32 %v796_v2, %v793_v61  ;;  %v782_v14 = vrot.slane %v780_v4, 5  ;;  %v788_v15 = vrot.slane %v786_v5, 5  ;;  %v1242_v16 = vshll.u32 %v423_v58, 16  ;;  %v4424_v18 = vld [vmem:[#allocation2 + $0x44] ss:$8 sps:$4 sm:$0xff]  }
 0x108   : > { %v2619_v20 = vsel %vm4549_vm2, %v2614_v8, %v2618_v55  ;;  %v1241_v21 = vrot.slane %v1239_v10, 4  ;;  %v1248_v22 = vshll.u32 %v424_v63, 16  ;;  %v1225_v23 = vshrl.u32 %v421_v6, 16  ;;  %v223_v24 = vld [vmem:[%s4526_s22 + $0x180] sm:$0xf]  ;;  %3585 = vmatprep.mubr.bf16.mxu0 %v4424_v18  ;;  %v3043_v44 = vld [vmem:[#allocation2 + $0x148] sm:$0xff]  ;;  %v1363_v10 = vpop.permute.xlu1 %1362 }
 0x109   : > { %2854 = vrot.lane.b32.xlu0 %v2619_v20, %s4481_s29  ;;  %v798_v25 = vrot.slane %v797_v13, 4  ;;  %v783_v26 = vor.u32 %v782_v14, %v779_v9  ;;  %v1244_v27 = vrot.slane %v1242_v16, 5  ;;  %v1228_v28 = vshll.u32 %v421_v6, 16  ;;  %288 = vst.msk [vmem:[#allocation2 + $0x158] sm:$0xf] %vm244_vm3, %v223_v24  ;;  %3586 = vmatmul.mubr.bf16.gmra.mxu0 %v4272_v35 }
 0x10a   : > { %v222_v29 = vld [vmem:[%s4526_s22 + $0x178] sm:$0xf]  ;;  %v1250_v31 = vrot.slane %v1248_v22, 5  ;;  %v1227_v33 = vrot.slane %v1225_v23, 4  ;;  %v1234_v34 = vshll.u32 %v422_v11, 16  ;;  %v4304_v6 = vcombine.low %v3042_v43, %v3043_v44 }
 0x10b   : > { %1572 = vst.msk [vmem:[#allocation2 + $0x158] sm:$0xf] %vm1528_vm4, %v1423_v53  ;;  %v4185_v36 = vld [vmem:[%s4526_s22 + $0xe8] sm:$0xf]  ;;  %v803_v37 = vsel %vm4549_vm2, %v798_v25, %v802_v3  ;;  %v784_v38 = vrot.slane %v783_v26, 4  ;;  %v1245_v39 = vor.u32 %v1244_v27, %v1241_v21  ;;  %v1230_v40 = vrot.slane %v1228_v28, 5  ;;  %v1361_v21 = vpop.permute.xlu0 %1360 }
 0x10c   : > { %287 = vst.msk [vmem:[#allocation2 + $0x150] sm:$0xf] %vm244_vm3, %v222_v29  ;;  %v4186_v41 = vld [vmem:[%s4526_s22 + $0xec] sm:$0x1]  ;;  %v4183_v42 = vld [vmem:[%s4526_s22 + $0xe0] sm:$0xf]  ;;  %1386 = vrot.lane.b32.xlu1 %v803_v37, %s4481_s29 }
 0x10d   : > { %1571 = vst.msk [vmem:[#allocation2 + $0x150] sm:$0xf] %vm1528_vm4, %v1421_v1  ;;  %v1236_v46 = vrot.slane %v1234_v34, 5  ;;  %v2201_v47 = vshrl.u32 %v4185_v36, 16  ;;  %v2204_v48 = vshll.u32 %v4185_v36, 16  ;;  %v2210_v49 = vshll.u32 %v4186_v41, 16 }
 0x10e   : > { %v4184_v50 = vld [vmem:[%s4526_s22 + $0xe4] sm:$0x1]  ;;  %v789_v51 = vsel %vm4549_vm2, %v784_v38, %v788_v15  ;;  %v1246_v0 = vrot.slane %v1245_v39, 4  ;;  %v1231_v52 = vor.u32 %v1230_v40, %v1227_v33  ;;  %v2187_v53 = vshrl.u32 %v4183_v42, 16  ;;  %v4082_v55 = vld [vmem:[%s4526_s22 + $0x68] sm:$0xf]  ;;  %v5259_v33 = vpop.permute.xlu1 %1426 }
 0x10f   : > { %v4426_v54 = vld [vmem:[#allocation2 + $0x144] ss:$8 sps:$4 sm:$0xff]   ;;  %1384 = vrot.lane.b32.xlu0 %v789_v51, %s4481_s29  ;;  %v2203_v57 = vrot.slane %v2201_v47, 4  ;;  %v2206_v58 = vrot.slane %v2204_v48, 5  ;;  %v2212_v59 = vrot.slane %v2210_v49, 5  ;;  %v2190_v60 = vshll.u32 %v4183_v42, 16 }
 0x110   : > { %1669 = vst.msk [vmem:[#allocation2 + $0x5c] sm:$0xf] %vm244_vm3, %v4082_v55  ;;  %v4081_v61 = vld [vmem:[%s4526_s22 + $0x60] sm:$0xf]  ;;  %v1251_v62 = vsel %vm4549_vm2, %v1246_v0, %v1250_v31  ;;  %v1232_v63 = vrot.slane %v1231_v52, 4  ;;  %v2189_v1 = vrot.slane %v2187_v53, 4  ;;  %3713 = vmatprep.mubr.bf16.mxu1 %v4426_v54 }
 0x111   : > { %v2196_v2 = vshll.u32 %v4184_v50, 16  ;;  %2949 = vst.msk [vmem:[#allocation2 + $0x5c] sm:$0xf] %vm1528_vm4, %v2769_v19  ;;  %v4249_v3 = vld [vmem:[%s4526_s22 + $0x208] sm:$0xf]  ;;  %1450 = vrot.lane.b32.xlu1 %v1251_v62, %s4481_s29  ;;  %v2207_v4 = vor.u32 %v2206_v58, %v2203_v57  ;;  %v2192_v5 = vrot.slane %v2190_v60, 5  ;;  %3714 = vmatmul.mubr.bf16.gmra.mxu1 %v4304_v6 }
 0x112   : > { %1668 = vst.msk [vmem:[#allocation2 + $0x54] sm:$0xf] %vm244_vm3, %v4081_v61  ;;  %v4250_v7 = vld [vmem:[%s4526_s22 + $0x20c] sm:$0x1]  ;;  %v2649_v8 = vshrl.u32 %v4249_v3, 16  ;;  %v1237_v11 = vsel %vm4549_vm2, %v1232_v63, %v1236_v46  ;;  %v2652_v13 = vshll.u32 %v4249_v3, 16  ;;  %v5277_v62 = vpop.permute.xlu1 %2772 }
 0x113   : > { %2948 = vst.msk [vmem:[#allocation2 + $0x54] sm:$0xf] %vm1528_vm4, %v2767_v30  ;;  %v4247_v9 = vld [vmem:[%s4526_s22 + $0x200] sm:$0xf]  ;;  %v2198_v12 = vrot.slane %v2196_v2, 5  ;;  %v2658_v14 = vshll.u32 %v4250_v7, 16  ;;  %1448 = vrot.lane.b32.xlu0 %v1237_v11, %s4481_s29  ;;  %v2193_v17 = vor.u32 %v2192_v5, %v2189_v1 }
 0x114   : > { %v4248_v15 = vld [vmem:[%s4526_s22 + $0x204] sm:$0x1]  ;;  %v2208_v16 = vrot.slane %v2207_v4, 4  ;;  %v2651_v18 = vrot.slane %v2649_v8, 4  ;;  %v2635_v19 = vshrl.u32 %v4247_v9, 16  ;;  %v2654_v22 = vrot.slane %v2652_v13, 5 }
 0x115   : > { %v4114_v20 = vld [vmem:[%s4526_s22 + $0x188] sm:$0xf]  ;;  %v2660_v23 = vrot.slane %v2658_v14, 5  ;;  %v2638_v24 = vshll.u32 %v4247_v9, 16  ;;  %v2644_v25 = vshll.u32 %v4248_v15, 16  ;;  %v2194_v28 = vrot.slane %v2193_v17, 4 }
 0x116   : > { %1701 = vst.msk [vmem:[#allocation2 + $0x15c] sm:$0xf] %vm244_vm3, %v4114_v20  ;;  %v4113_v26 = vld [vmem:[%s4526_s22 + $0x180] sm:$0xf]  ;;  %v2213_v27 = vsel %vm4549_vm2, %v2208_v16, %v2212_v59  ;;  %v2637_v29 = vrot.slane %v2635_v19, 4  ;;  %v2655_v34 = vor.u32 %v2654_v22, %v2651_v18 }
 0x117   : > { %2981 = vst.msk [vmem:[#allocation2 + $0x15c] sm:$0xf] %vm1528_vm4, %v2833_v45  ;;  %v363_v30 = vld [vmem:[%s4526_s22 + $0xf0] sm:$0xf]  ;;  %v364_v31 = vld [vmem:[%s4526_s22 + $0xf4] sm:$0x1]  ;;  %2796 = vrot.lane.b32.xlu1 %v2213_v27, %s4481_s29  ;;  %v2199_v39 = vsel %vm4549_vm2, %v2194_v28, %v2198_v12  ;;  %v1425_v45 = vpop.permute.xlu0 %1424 }
 0x118   : > { %1700 = vst.msk [vmem:[#allocation2 + $0x154] sm:$0xf] %vm244_vm3, %v4113_v26  ;;  %v2640_v35 = vrot.slane %v2638_v24, 5  ;;  %v2646_v36 = vrot.slane %v2644_v25, 5  ;;  %v819_v37 = vshrl.u32 %v363_v30, 16  ;;  %v822_v40 = vshll.u32 %v363_v30, 16  ;;  %2794 = vrot.lane.b32.xlu0 %v2199_v39, %s4481_s29 }
 0x119   : > { %2980 = vst.msk [vmem:[#allocation2 + $0x154] sm:$0xf] %vm1528_vm4, %v2831_v56  ;;  %v361_v38 = vld [vmem:[%s4526_s22 + $0xe8] sm:$0xf]  ;;  %v828_v41 = vshll.u32 %v364_v31, 16  ;;  %v3013_v44 = vld [vmem:[#allocation2 + $0x58] sm:$0xff] }
 0x11a   : > { %v362_v42 = vld [vmem:[%s4526_s22 + $0xec] sm:$0x1]  ;;  %v805_v43 = vshrl.u32 %v361_v38, 16  ;;  %v2656_v46 = vrot.slane %v2655_v34, 4  ;;  %v2641_v47 = vor.u32 %v2640_v35, %v2637_v29  ;;  %v821_v48 = vrot.slane %v819_v37, 4  ;;  %v3012_v51 = vld [vmem:[#allocation2 + $0x50] sm:$0xff] }
 0x11b   : > { %v808_v49 = vshll.u32 %v361_v38, 16  ;;  %v193_v50 = vld [vmem:[%s4526_s22 + $0x70] sm:$0xf]  ;;  %v824_v0 = vrot.slane %v822_v40, 5  ;;  %v830_v52 = vrot.slane %v828_v41, 5  ;;  %v814_v54 = vshll.u32 %v362_v42, 16  ;;  %v5285_v11 = vpop.permute.xlu0 %2770 }
 0x11c   : > { %v807_v53 = vrot.slane %v805_v43, 4  ;;  %258 = vst.msk [vmem:[#allocation2 + $0x68] sm:$0xf] %vm244_vm3, %v193_v50  ;;  %v192_v55 = vld [vmem:[%s4526_s22 + $0x68] sm:$0xf]  ;;  %v2661_v56 = vsel %vm4549_vm2, %v2656_v46, %v2660_v23  ;;  %v2642_v57 = vrot.slane %v2641_v47, 4  ;;  %v4274_v61 = vcombine.low %v3012_v51, %v3013_v44 }
 0x11d   : > { %v810_v58 = vrot.slane %v808_v49, 5  ;;  %1542 = vst.msk [vmem:[#allocation2 + $0x68] sm:$0xf] %vm1528_vm4, %v1363_v10  ;;  %v427_v59 = vld [vmem:[%s4526_s22 + $0x210] sm:$0xf]  ;;  %2860 = vrot.lane.b32.xlu1 %v2661_v56, %s4481_s29  ;;  %v825_v63 = vor.u32 %v824_v0, %v821_v48  ;;  %v816_v1 = vrot.slane %v814_v54, 5 }
 0x11e   : > { %257 = vst.msk [vmem:[#allocation2 + $0x60] sm:$0xf] %vm244_vm3, %v192_v55  ;;  %v428_v60 = vld [vmem:[%s4526_s22 + $0x214] sm:$0x1]  ;;  %v1267_v2 = vshrl.u32 %v427_v59, 16  ;;  %v1270_v3 = vshll.u32 %v427_v59, 16  ;;  %v2647_v5 = vsel %vm4549_vm2, %v2642_v57, %v2646_v36 }
 0x11f   : > { %1541 = vst.msk [vmem:[#allocation2 + $0x60] sm:$0xf] %vm1528_vm4, %v1361_v21  ;;  %v425_v4 = vld [vmem:[%s4526_s22 + $0x208] sm:$0xf]  ;;  %v811_v6 = vor.u32 %v810_v58, %v807_v53  ;;  %v1276_v7 = vshll.u32 %v428_v60, 16  ;;  %2858 = vrot.lane.b32.xlu0 %v2647_v5, %s4481_s29  ;;  %v826_v12 = vrot.slane %v825_v63, 4  ;;  %v5291_v21 = vpop.permute.xlu1 %2836  ;;  %v5305_v36 = vpop.permute.xlu0 %2834 }
 0x120   : > { %v426_v8 = vld [vmem:[%s4526_s22 + $0x20c] sm:$0x1]  ;;  %v1253_v9 = vshrl.u32 %v425_v4, 16  ;;  %v4428_v10 = vld [vmem:[#allocation2 + $0x54] ss:$8 sps:$4 sm:$0xff]   ;;  %v1269_v13 = vrot.slane %v1267_v2, 4 }
 0x121   : > { %v1272_v14 = vrot.slane %v1270_v3, 5  ;;  %v1256_v15 = vshll.u32 %v425_v4, 16  ;;  %v225_v16 = vld [vmem:[%s4526_s22 + $0x190] sm:$0xf]  ;;  %v812_v17 = vrot.slane %v811_v6, 4  ;;  %v1262_v19 = vshll.u32 %v426_v8, 16  ;;  %3593 = vmatprep.mubr.bf16.mxu0 %v4428_v10 }
 0x122   : > { %v1255_v18 = vrot.slane %v1253_v9, 4  ;;  %290 = vst.msk [vmem:[#allocation2 + $0x168] sm:$0xf] %vm244_vm3, %v225_v16  ;;  %v224_v20 = vld [vmem:[%s4526_s22 + $0x188] sm:$0xf]  ;;  %v831_v22 = vsel %vm4549_vm2, %v826_v12, %v830_v52  ;;  %v1278_v24 = vrot.slane %v1276_v7, 5  ;;  %3594 = vmatmul.mubr.bf16.gmra.mxu0 %v4274_v61 }
 0x123   : > { %v1273_v23 = vor.u32 %v1272_v14, %v1269_v13  ;;  %v1258_v25 = vrot.slane %v1256_v15, 5  ;;  %1574 = vst.msk [vmem:[#allocation2 + $0x168] sm:$0xf] %vm1528_vm4, %v5259_v33  ;;  %v4189_v26 = vld [vmem:[%s4526_s22 + $0xf8] sm:$0xf]  ;;  %1390 = vrot.lane.b32.xlu1 %v831_v22, %s4481_s29  ;;  %v817_v28 = vsel %vm4549_vm2, %v812_v17, %v816_v1  ;;  %v1264_v29 = vrot.slane %v1262_v19, 5  ;;  %v5312_v0 = vpop.permute.xlu1 %1366  ;;  %v5325_v1 = vpop.permute.xlu0 %1364 }
 0x124   : > { %289 = vst.msk [vmem:[#allocation2 + $0x160] sm:$0xf] %vm244_vm3, %v224_v20  ;;  %v4190_v27 = vld [vmem:[%s4526_s22 + $0xfc] sm:$0x1]  ;;  %v2229_v30 = vshrl.u32 %v4189_v26, 16  ;;  %v2232_v31 = vshll.u32 %v4189_v26, 16  ;;  %1388 = vrot.lane.b32.xlu0 %v817_v28, %s4481_s29 }
 0x125   : > { %1573 = vst.msk [vmem:[#allocation2 + $0x160] sm:$0xf] %vm1528_vm4, %v1425_v45  ;;  %v4187_v34 = vld [vmem:[%s4526_s22 + $0xf0] sm:$0xf]  ;;  %v1274_v33 = vrot.slane %v1273_v23, 4  ;;  %v1259_v37 = vor.u32 %v1258_v25, %v1255_v18  ;;  %v2238_v38 = vshll.u32 %v4190_v27, 16 }
 0x126   : > { %v3044_v35 = vld [vmem:[#allocation2 + $0x150] sm:$0xff]  ;;  %v2215_v40 = vshrl.u32 %v4187_v34, 16  ;;  %v3045_v41 = vld [vmem:[#allocation2 + $0x158] sm:$0xff]  ;;  %v2231_v42 = vrot.slane %v2229_v30, 4  ;;  %v2234_v43 = vrot.slane %v2232_v31, 5  ;;  %v2218_v44 = vshll.u32 %v4187_v34, 16 }
 0x127   : > { %v4188_v39 = vld [vmem:[%s4526_s22 + $0xf4] sm:$0x1]  ;;  %v1279_v47 = vsel %vm4549_vm2, %v1274_v33, %v1278_v24  ;;  %v1260_v48 = vrot.slane %v1259_v37, 4  ;;  %v2240_v49 = vrot.slane %v2238_v38, 5  ;;  %v4084_v51 = vld [vmem:[%s4526_s22 + $0x78] sm:$0xf]  ;;  %v4306_v56 = vcombine.low %v3044_v35, %v3045_v41  ;;  %v5336_v16 = vpop.permute.xlu1 %1430  ;;  %v5344_v23 = vpop.permute.xlu0 %1428 }
 0x128   : > { %v2224_v45 = vshll.u32 %v4188_v39, 16  ;;  %v4430_v46 = vld [vmem:[#allocation2 + $0x154] ss:$8 sps:$4 sm:$0xff]   ;;  %v2217_v50 = vrot.slane %v2215_v40, 4  ;;  %1454 = vrot.lane.b32.xlu1 %v1279_v47, %s4481_s29  ;;  %v2235_v52 = vor.u32 %v2234_v43, %v2231_v42  ;;  %v2220_v53 = vrot.slane %v2218_v44, 5 }
 0x129   : > { %3721 = vmatprep.mubr.bf16.mxu1 %v4430_v46  ;;  %1671 = vst.msk [vmem:[#allocation2 + $0x6c] sm:$0xf] %vm244_vm3, %v4084_v51  ;;  %v4083_v55 = vld [vmem:[%s4526_s22 + $0x70] sm:$0xf]  ;;  %v4253_v57 = vld [vmem:[%s4526_s22 + $0x218] sm:$0xf]  ;;  %v1265_v58 = vsel %vm4549_vm2, %v1260_v48, %v1264_v29 }
 0x12a   : > { %v2226_v54 = vrot.slane %v2224_v45, 5  ;;  %2951 = vst.msk [vmem:[#allocation2 + $0x6c] sm:$0xf] %vm1528_vm4, %v5277_v62  ;;  %v4254_v59 = vld [vmem:[%s4526_s22 + $0x21c] sm:$0x1]  ;;  %v2677_v60 = vshrl.u32 %v4253_v57, 16  ;;  %1452 = vrot.lane.b32.xlu0 %v1265_v58, %s4481_s29  ;;  %v2221_v3 = vor.u32 %v2220_v53, %v2217_v50  ;;  %3722 = vmatmul.mubr.bf16.gmra.mxu1 %v4306_v56 }
 0x12b   : > { %1670 = vst.msk [vmem:[#allocation2 + $0x64] sm:$0xf] %vm244_vm3, %v4083_v55  ;;  %v2680_v61 = vshll.u32 %v4253_v57, 16  ;;  %v4251_v63 = vld [vmem:[%s4526_s22 + $0x210] sm:$0xf]  ;;  %v2236_v2 = vrot.slane %v2235_v52, 4  ;;  %v5366_v51 = vpop.permute.xlu0 %2774 }
 0x12c   : > { %2950 = vst.msk [vmem:[#allocation2 + $0x64] sm:$0xf] %vm1528_vm4, %v5285_v11  ;;  %v2686_v4 = vshll.u32 %v4254_v59, 16  ;;  %v4252_v62 = vld [vmem:[%s4526_s22 + $0x214] sm:$0x1]  ;;  %v2663_v5 = vshrl.u32 %v4251_v63, 16 }
 0x12d   : > { %v2679_v6 = vrot.slane %v2677_v60, 4  ;;  %v2682_v7 = vrot.slane %v2680_v61, 5  ;;  %v2666_v8 = vshll.u32 %v4251_v63, 16  ;;  %v2672_v9 = vshll.u32 %v4252_v62, 16  ;;  %v4116_v10 = vld [vmem:[%s4526_s22 + $0x198] sm:$0xf] }
 0x12e   : > { %v2241_v12 = vsel %vm4549_vm2, %v2236_v2, %v2240_v49  ;;  %v2222_v13 = vrot.slane %v2221_v3, 4  ;;  %v2688_v14 = vrot.slane %v2686_v4, 5  ;;  %v2665_v15 = vrot.slane %v2663_v5, 4  ;;  %1703 = vst.msk [vmem:[#allocation2 + $0x16c] sm:$0xf] %vm244_vm3, %v4116_v10 }
 0x12f   : > { %v4115_v11 = vld [vmem:[%s4526_s22 + $0x190] sm:$0xf]  ;;  %2800 = vrot.lane.b32.xlu1 %v2241_v12, %s4481_s29  ;;  %v2683_v17 = vor.u32 %v2682_v7, %v2679_v6  ;;  %v2668_v18 = vrot.slane %v2666_v8, 5  ;;  %v2674_v19 = vrot.slane %v2672_v9, 5  ;;  %2983 = vst.msk [vmem:[#allocation2 + $0x16c] sm:$0xf] %vm1528_vm4, %v5291_v21 }
 0x130   : > { %1702 = vst.msk [vmem:[#allocation2 + $0x164] sm:$0xf] %vm244_vm3, %v4115_v11  ;;  %v367_v20 = vld [vmem:[%s4526_s22 + $0x100] sm:$0xf]  ;;  %v368_v22 = vld [vmem:[%s4526_s22 + $0x104] sm:$0x1]  ;;  %v2227_v24 = vsel %vm4549_vm2, %v2222_v13, %v2226_v54 }
 0x131   : > { %2982 = vst.msk [vmem:[#allocation2 + $0x164] sm:$0xf] %vm1528_vm4, %v5305_v36  ;;  %v847_v25 = vshrl.u32 %v367_v20, 16  ;;  %v850_v26 = vshll.u32 %v367_v20, 16  ;;  %v856_v27 = vshll.u32 %v368_v22, 16  ;;  %2798 = vrot.lane.b32.xlu0 %v2227_v24, %s4481_s29  ;;  %v2684_v21 = vrot.slane %v2683_v17, 4  ;;  %v5354_v36 = vpop.permute.xlu1 %2776 }
 0x132   : > { %v365_v28 = vld [vmem:[%s4526_s22 + $0xf8] sm:$0xf]  ;;  %v2669_v29 = vor.u32 %v2668_v18, %v2665_v15  ;;  %v366_v30 = vld [vmem:[%s4526_s22 + $0xfc] sm:$0x1]  ;;  %v195_v39 = vld [vmem:[%s4526_s22 + $0x80] sm:$0xf] }
 0x133   : > { %v833_v31 = vshrl.u32 %v365_v28, 16  ;;  %v836_v34 = vshll.u32 %v365_v28, 16  ;;  %v849_v35 = vrot.slane %v847_v25, 4  ;;  %v852_v33 = vrot.slane %v850_v26, 5  ;;  %260 = vst.msk [vmem:[#allocation2 + $0x78] sm:$0xf] %vm244_vm3, %v195_v39 }
 0x134   : > { %v858_v37 = vrot.slane %v856_v27, 5  ;;  %v842_v38 = vshll.u32 %v366_v30, 16  ;;  %v2689_v40 = vsel %vm4549_vm2, %v2684_v21, %v2688_v14  ;;  %v2670_v41 = vrot.slane %v2669_v29, 4  ;;  %v194_v44 = vld [vmem:[%s4526_s22 + $0x78] sm:$0xf]  ;;  %v3014_v49 = vld [vmem:[#allocation2 + $0x60] sm:$0xff] }
 0x135   : > { %v835_v42 = vrot.slane %v833_v31, 4  ;;  %v838_v43 = vrot.slane %v836_v34, 5  ;;  %2864 = vrot.lane.b32.xlu1 %v2689_v40, %s4481_s29  ;;  %v853_v45 = vor.u32 %v852_v33, %v849_v35  ;;  %1544 = vst.msk [vmem:[#allocation2 + $0x78] sm:$0xf] %vm1528_vm4, %v5312_v0  ;;  %v431_v47 = vld [vmem:[%s4526_s22 + $0x220] sm:$0xf]  ;;  %v5376_v5 = vpop.permute.xlu1 %2840 }
 0x136   : > { %v844_v46 = vrot.slane %v842_v38, 5  ;;  %259 = vst.msk [vmem:[#allocation2 + $0x70] sm:$0xf] %vm244_vm3, %v194_v44  ;;  %v432_v48 = vld [vmem:[%s4526_s22 + $0x224] sm:$0x1]  ;;  %v3015_v50 = vld [vmem:[#allocation2 + $0x68] sm:$0xff]  ;;  %v2675_v52 = vsel %vm4549_vm2, %v2670_v41, %v2674_v19  ;;  %v5390_v19 = vpop.permute.xlu0 %2838 }
 0x137   : > { %v839_v53 = vor.u32 %v838_v43, %v835_v42  ;;  %1543 = vst.msk [vmem:[#allocation2 + $0x70] sm:$0xf] %vm1528_vm4, %v5325_v1  ;;  %v1295_v54 = vshrl.u32 %v431_v47, 16  ;;  %v1298_v55 = vshll.u32 %v431_v47, 16  ;;  %v429_v56 = vld [vmem:[%s4526_s22 + $0x218] sm:$0xf]  ;;  %2862 = vrot.lane.b32.xlu0 %v2675_v52, %s4481_s29  ;;  %v4276_v15 = vcombine.low %v3014_v49, %v3015_v50 }
 0x138   : > { %v430_v0 = vld [vmem:[%s4526_s22 + $0x21c] sm:$0x1]  ;;  %v854_v57 = vrot.slane %v853_v45, 4  ;;  %v1304_v58 = vshll.u32 %v432_v48, 16  ;;  %v1281_v59 = vshrl.u32 %v429_v56, 16  ;;  %v1284_v60 = vshll.u32 %v429_v56, 16 }
 0x139   : > { %v4432_v61 = vld [vmem:[#allocation2 + $0x64] ss:$8 sps:$4 sm:$0xff]   ;;  %v840_v63 = vrot.slane %v839_v53, 4  ;;  %v1297_v2 = vrot.slane %v1295_v54, 4  ;;  %v1300_v3 = vrot.slane %v1298_v55, 5  ;;  %v1290_v4 = vshll.u32 %v430_v0, 16  ;;  %v5397_v30 = vpop.permute.xlu1 %1370 }
 0x13a   : > { %v227_v62 = vld [vmem:[%s4526_s22 + $0x1a0] sm:$0xf]  ;;  %v859_v1 = vsel %vm4549_vm2, %v854_v57, %v858_v37  ;;  %v1306_v6 = vrot.slane %v1304_v58, 5  ;;  %v1283_v7 = vrot.slane %v1281_v59, 4  ;;  %v1286_v8 = vrot.slane %v1284_v60, 5  ;;  %3601 = vmatprep.mubr.bf16.mxu0 %v4432_v61  ;;  %v3047_v18 = vld [vmem:[#allocation2 + $0x168] sm:$0xff]  ;;  %v5402_v42 = vpop.permute.xlu0 %1368 }
 0x13b   : > { %292 = vst.msk [vmem:[#allocation2 + $0x178] sm:$0xf] %vm244_vm3, %v227_v62  ;;  %v226_v9 = vld [vmem:[%s4526_s22 + $0x198] sm:$0xf]  ;;  %v3046_v10 = vld [vmem:[#allocation2 + $0x160] sm:$0xff]  ;;  %1394 = vrot.lane.b32.xlu1 %v859_v1, %s4481_s29  ;;  %v845_v12 = vsel %vm4549_vm2, %v840_v63, %v844_v46  ;;  %v1301_v13 = vor.u32 %v1300_v3, %v1297_v2  ;;  %v1292_v14 = vrot.slane %v1290_v4, 5  ;;  %3602 = vmatmul.mubr.bf16.gmra.mxu0 %v4276_v15 }
 0x13c   : > { %1576 = vst.msk [vmem:[#allocation2 + $0x178] sm:$0xf] %vm1528_vm4, %v5336_v16  ;;  %v4193_v11 = vld [vmem:[%s4526_s22 + $0x108] sm:$0xf]  ;;  %v4194_v17 = vld [vmem:[%s4526_s22 + $0x10c] sm:$0x1]  ;;  %1392 = vrot.lane.b32.xlu0 %v845_v12, %s4481_s29  ;;  %v1287_v20 = vor.u32 %v1286_v8, %v1283_v7  ;;  %v4308_v29 = vcombine.low %v3046_v10, %v3047_v18 }
 0x13d   : > { %291 = vst.msk [vmem:[#allocation2 + $0x170] sm:$0xf] %vm244_vm3, %v226_v9  ;;  %v2257_v22 = vshrl.u32 %v4193_v11, 16  ;;  %v2260_v24 = vshll.u32 %v4193_v11, 16  ;;  %v2266_v25 = vshll.u32 %v4194_v17, 16  ;;  %v1302_v16 = vrot.slane %v1301_v13, 4  ;;  %v5419_v58 = vpop.permute.xlu1 %1434 }
 0x13e   : > { %1575 = vst.msk [vmem:[#allocation2 + $0x170] sm:$0xf] %vm1528_vm4, %v5344_v23  ;;  %v4191_v26 = vld [vmem:[%s4526_s22 + $0x100] sm:$0xf]  ;;  %v4192_v27 = vld [vmem:[%s4526_s22 + $0x104] sm:$0x1]  ;;  %v5426_v62 = vpop.permute.xlu0 %1432 }
 0x13f   : > { %v2243_v28 = vshrl.u32 %v4191_v26, 16  ;;  %v2246_v21 = vshll.u32 %v4191_v26, 16  ;;  %v1288_v31 = vrot.slane %v1287_v20, 4  ;;  %v2259_v34 = vrot.slane %v2257_v22, 4  ;;  %v4434_v33 = vld [vmem:[#allocation2 + $0x164] ss:$8 sps:$4 sm:$0xff]  }
 0x140   : > { %v2262_v35 = vrot.slane %v2260_v24, 5  ;;  %v2268_v23 = vrot.slane %v2266_v25, 5  ;;  %v1307_v37 = vsel %vm4549_vm2, %v1302_v16, %v1306_v6  ;;  %v2252_v40 = vshll.u32 %v4192_v27, 16  ;;  %v4086_v41 = vld [vmem:[%s4526_s22 + $0x88] sm:$0xf]  ;;  %3729 = vmatprep.mubr.bf16.mxu1 %v4434_v33 }
 0x141   : > { %v2245_v38 = vrot.slane %v2243_v28, 4  ;;  %v2248_v39 = vrot.slane %v2246_v21, 5  ;;  %1458 = vrot.lane.b32.xlu1 %v1307_v37, %s4481_s29  ;;  %v1293_v43 = vsel %vm4549_vm2, %v1288_v31, %v1292_v14  ;;  %1673 = vst.msk [vmem:[#allocation2 + $0x7c] sm:$0xf] %vm244_vm3, %v4086_v41  ;;  %v4085_v45 = vld [vmem:[%s4526_s22 + $0x80] sm:$0xf]  ;;  %3730 = vmatmul.mubr.bf16.gmra.mxu1 %v4308_v29  ;;  %v5440_v17 = vpop.permute.xlu1 %2780 }
 0x142   : > { %v2263_v44 = vor.u32 %v2262_v35, %v2259_v34  ;;  %v4257_v46 = vld [vmem:[%s4526_s22 + $0x228] sm:$0xf]  ;;  %v4258_v47 = vld [vmem:[%s4526_s22 + $0x22c] sm:$0x1]  ;;  %1456 = vrot.lane.b32.xlu0 %v1293_v43, %s4481_s29  ;;  %v2254_v49 = vrot.slane %v2252_v40, 5 }
 0x143   : > { %v2249_v48 = vor.u32 %v2248_v39, %v2245_v38  ;;  %2953 = vst.msk [vmem:[#allocation2 + $0x7c] sm:$0xf] %vm1528_vm4, %v5354_v36  ;;  %v2705_v50 = vshrl.u32 %v4257_v46, 16  ;;  %v2708_v52 = vshll.u32 %v4257_v46, 16  ;;  %v4255_v53 = vld [vmem:[%s4526_s22 + $0x220] sm:$0xf] }
 0x144   : > { %1672 = vst.msk [vmem:[#allocation2 + $0x74] sm:$0xf] %vm244_vm3, %v4085_v45  ;;  %v2264_v54 = vrot.slane %v2263_v44, 4  ;;  %v2714_v55 = vshll.u32 %v4258_v47, 16  ;;  %v4256_v56 = vld [vmem:[%s4526_s22 + $0x224] sm:$0x1] }
 0x145   : > { %2952 = vst.msk [vmem:[#allocation2 + $0x74] sm:$0xf] %vm1528_vm4, %v5366_v51  ;;  %v2691_v0 = vshrl.u32 %v4255_v53, 16  ;;  %v2694_v57 = vshll.u32 %v4255_v53, 16  ;;  %v2250_v59 = vrot.slane %v2249_v48, 4  ;;  %v2707_v36 = vrot.slane %v2705_v50, 4  ;;  %v5463_v47 = vpop.permute.xlu1 %2844 }
 0x146   : > { %v2710_v60 = vrot.slane %v2708_v52, 5  ;;  %v2700_v61 = vshll.u32 %v4256_v56, 16  ;;  %v4118_v63 = vld [vmem:[%s4526_s22 + $0x1a8] sm:$0xf]  ;;  %v2269_v2 = vsel %vm4549_vm2, %v2264_v54, %v2268_v23  ;;  %v4117_v51 = vld [vmem:[%s4526_s22 + $0x1a0] sm:$0xf] }
 0x147   : > { %v2693_v3 = vrot.slane %v2691_v0, 4  ;;  %v2696_v4 = vrot.slane %v2694_v57, 5  ;;  %1705 = vst.msk [vmem:[#allocation2 + $0x17c] sm:$0xf] %vm244_vm3, %v4118_v63  ;;  %2804 = vrot.lane.b32.xlu1 %v2269_v2, %s4481_s29  ;;  %v2255_v1 = vsel %vm4549_vm2, %v2250_v59, %v2254_v49  ;;  %v2716_v7 = vrot.slane %v2714_v55, 5 }
 0x148   : > { %v2711_v6 = vor.u32 %v2710_v60, %v2707_v36  ;;  %v2702_v8 = vrot.slane %v2700_v61, 5  ;;  %2985 = vst.msk [vmem:[#allocation2 + $0x17c] sm:$0xf] %vm1528_vm4, %v5376_v5  ;;  %v371_v9 = vld [vmem:[%s4526_s22 + $0x110] sm:$0xf]  ;;  %2802 = vrot.lane.b32.xlu0 %v2255_v1, %s4481_s29 }
 0x149   : > { %1704 = vst.msk [vmem:[#allocation2 + $0x174] sm:$0xf] %vm244_vm3, %v4117_v51  ;;  %v372_v10 = vld [vmem:[%s4526_s22 + $0x114] sm:$0x1]  ;;  %v2697_v12 = vor.u32 %v2696_v4, %v2693_v3  ;;  %v875_v13 = vshrl.u32 %v371_v9, 16  ;;  %v878_v14 = vshll.u32 %v371_v9, 16 }
 0x14a   : > { %2984 = vst.msk [vmem:[#allocation2 + $0x174] sm:$0xf] %vm1528_vm4, %v5390_v19  ;;  %v884_v15 = vshll.u32 %v372_v10, 16  ;;  %v369_v11 = vld [vmem:[%s4526_s22 + $0x108] sm:$0xf]  ;;  %v2712_v18 = vrot.slane %v2711_v6, 4  ;;  %v5444_v19 = vpop.permute.xlu0 %2778 }
 0x14b   : > { %v370_v5 = vld [vmem:[%s4526_s22 + $0x10c] sm:$0x1]  ;;  %v861_v20 = vshrl.u32 %v369_v11, 16  ;;  %v864_v22 = vshll.u32 %v369_v11, 16  ;;  %v2698_v24 = vrot.slane %v2697_v12, 4  ;;  %v877_v25 = vrot.slane %v875_v13, 4 }
 0x14c   : > { %v880_v26 = vrot.slane %v878_v14, 5  ;;  %v886_v16 = vrot.slane %v884_v15, 5  ;;  %v197_v27 = vld [vmem:[%s4526_s22 + $0x98] sm:$0xf]  ;;  %v2717_v28 = vsel %vm4549_vm2, %v2712_v18, %v2716_v7  ;;  %v870_v31 = vshll.u32 %v370_v5, 16  ;;  %v3016_v39 = vld [vmem:[#allocation2 + $0x70] sm:$0xff] }
 0x14d   : > { %v863_v21 = vrot.slane %v861_v20, 4  ;;  %v866_v29 = vrot.slane %v864_v22, 5  ;;  %262 = vst.msk [vmem:[#allocation2 + $0x88] sm:$0xf] %vm244_vm3, %v197_v27  ;;  %v196_v34 = vld [vmem:[%s4526_s22 + $0x90] sm:$0xf]  ;;  %2868 = vrot.lane.b32.xlu1 %v2717_v28, %s4481_s29  ;;  %v2703_v35 = vsel %vm4549_vm2, %v2698_v24, %v2702_v8  ;;  %v5480_v8 = vpop.permute.xlu1 %1374 }
 0x14e   : > { %v881_v23 = vor.u32 %v880_v26, %v877_v25  ;;  %1546 = vst.msk [vmem:[#allocation2 + $0x88] sm:$0xf] %vm1528_vm4, %v5397_v30  ;;  %v435_v33 = vld [vmem:[%s4526_s22 + $0x230] sm:$0xf]  ;;  %v436_v37 = vld [vmem:[%s4526_s22 + $0x234] sm:$0x1]  ;;  %2866 = vrot.lane.b32.xlu0 %v2703_v35, %s4481_s29  ;;  %v5466_v57 = vpop.permute.xlu0 %2842 }
 0x14f   : > { %261 = vst.msk [vmem:[#allocation2 + $0x80] sm:$0xf] %vm244_vm3, %v196_v34  ;;  %v433_v38 = vld [vmem:[%s4526_s22 + $0x228] sm:$0xf]  ;;  %v867_v40 = vor.u32 %v866_v29, %v863_v21  ;;  %v872_v41 = vrot.slane %v870_v31, 5  ;;  %v1323_v43 = vshrl.u32 %v435_v33, 16 }
 0x150   : > { %1545 = vst.msk [vmem:[#allocation2 + $0x80] sm:$0xf] %vm1528_vm4, %v5402_v42  ;;  %v1326_v44 = vshll.u32 %v435_v33, 16  ;;  %v434_v45 = vld [vmem:[%s4526_s22 + $0x22c] sm:$0x1]  ;;  %v3017_v46 = vld [vmem:[#allocation2 + $0x78] sm:$0xff] }
 0x151   : > { %v882_v30 = vrot.slane %v881_v23, 4  ;;  %v1332_v48 = vshll.u32 %v436_v37, 16  ;;  %v1309_v49 = vshrl.u32 %v433_v38, 16  ;;  %v1312_v50 = vshll.u32 %v433_v38, 16  ;;  %v4436_v52 = vld [vmem:[#allocation2 + $0x74] ss:$8 sps:$4 sm:$0xff]   ;;  %v1439_v37 = vpop.permute.xlu1 %1438 }
 0x152   : > { %v868_v53 = vrot.slane %v867_v40, 4  ;;  %v1325_v54 = vrot.slane %v1323_v43, 4  ;;  %v1328_v55 = vrot.slane %v1326_v44, 5  ;;  %v1318_v56 = vshll.u32 %v434_v45, 16  ;;  %v229_v0 = vld [vmem:[%s4526_s22 + $0x1b8] sm:$0xf]  ;;  %3609 = vmatprep.mubr.bf16.mxu0 %v4436_v52  ;;  %v5487_v20 = vpop.permute.xlu0 %1372 }
 0x153   : > { %v887_v42 = vsel %vm4549_vm2, %v882_v30, %v886_v16  ;;  %v1334_v59 = vrot.slane %v1332_v48, 5  ;;  %v1311_v36 = vrot.slane %v1309_v49, 4  ;;  %v1314_v60 = vrot.slane %v1312_v50, 5  ;;  %294 = vst.msk [vmem:[#allocation2 + $0x188] sm:$0xf] %vm244_vm3, %v229_v0  ;;  %v3048_v63 = vld [vmem:[#allocation2 + $0x170] sm:$0xff] }
 0x154   : > { %v228_v61 = vld [vmem:[%s4526_s22 + $0x1b0] sm:$0xf]  ;;  %1398 = vrot.lane.b32.xlu1 %v887_v42, %s4481_s29  ;;  %v873_v2 = vsel %vm4549_vm2, %v868_v53, %v872_v41  ;;  %v1329_v3 = vor.u32 %v1328_v55, %v1325_v54  ;;  %v1320_v4 = vrot.slane %v1318_v56, 5  ;;  %1578 = vst.msk [vmem:[#allocation2 + $0x188] sm:$0xf] %vm1528_vm4, %v5419_v58  ;;  %v4278_v51 = vcombine.low %v3016_v39, %v3017_v46  ;;  %v3049_v7 = vld [vmem:[#allocation2 + $0x178] sm:$0xff] }
 0x155   : > { %293 = vst.msk [vmem:[#allocation2 + $0x180] sm:$0xf] %vm244_vm3, %v228_v61  ;;  %v4197_v1 = vld [vmem:[%s4526_s22 + $0x118] sm:$0xf]  ;;  %v4198_v6 = vld [vmem:[%s4526_s22 + $0x11c] sm:$0x1]  ;;  %1396 = vrot.lane.b32.xlu0 %v873_v2, %s4481_s29  ;;  %v1315_v9 = vor.u32 %v1314_v60, %v1311_v36  ;;  %v4310_v5 = vcombine.low %v3048_v63, %v3049_v7  ;;  %v2785_v2 = vpop.permute.xlu1 %2784 }
 0x156   : > { %1577 = vst.msk [vmem:[#allocation2 + $0x180] sm:$0xf] %vm1528_vm4, %v5426_v62  ;;  %v2285_v10 = vshrl.u32 %v4197_v1, 16  ;;  %v2288_v12 = vshll.u32 %v4197_v1, 16  ;;  %v2294_v13 = vshll.u32 %v4198_v6, 16  ;;  %v1330_v58 = vrot.slane %v1329_v3, 4  ;;  %3610 = vmatmul.mubr.bf16.gmra.mxu0 %v4278_v51  ;;  %v1437_v49 = vpop.permute.xlu0 %1436 }
 0x157   : > { %v4195_v14 = vld [vmem:[%s4526_s22 + $0x110] sm:$0xf]  ;;  %v4196_v15 = vld [vmem:[%s4526_s22 + $0x114] sm:$0x1]  ;;  %v1316_v22 = vrot.slane %v1315_v9, 4 }
 0x158   : > { %v2271_v11 = vshrl.u32 %v4195_v14, 16  ;;  %v2274_v18 = vshll.u32 %v4195_v14, 16  ;;  %v2287_v24 = vrot.slane %v2285_v10, 4  ;;  %v2290_v25 = vrot.slane %v2288_v12, 5  ;;  %v4438_v26 = vld [vmem:[#allocation2 + $0x174] ss:$8 sps:$4 sm:$0xff]  }
 0x159   : > { %v2296_v62 = vrot.slane %v2294_v13, 5  ;;  %v1335_v16 = vsel %vm4549_vm2, %v1330_v58, %v1334_v59  ;;  %v2280_v21 = vshll.u32 %v4196_v15, 16  ;;  %v4088_v29 = vld [vmem:[%s4526_s22 + $0xa0] sm:$0xf]  ;;  %v1321_v31 = vsel %vm4549_vm2, %v1316_v22, %v1320_v4  ;;  %3737 = vmatprep.mubr.bf16.mxu1 %v4438_v26  ;;  %v4087_v35 = vld [vmem:[%s4526_s22 + $0x98] sm:$0xf]  ;;  %v2849_v15 = vpop.permute.xlu1 %2848 }
 0x15a   : > { %v2273_v27 = vrot.slane %v2271_v11, 4  ;;  %v2276_v28 = vrot.slane %v2274_v18, 5  ;;  %1462 = vrot.lane.b32.xlu1 %v1335_v16, %s4481_s29  ;;  %v2291_v34 = vor.u32 %v2290_v25, %v2287_v24  ;;  %1675 = vst.msk [vmem:[#allocation2 + $0x8c] sm:$0xf] %vm244_vm3, %v4088_v29  ;;  %v4261_v23 = vld [vmem:[%s4526_s22 + $0x238] sm:$0xf]  ;;  %1460 = vrot.lane.b32.xlu0 %v1321_v31, %s4481_s29  ;;  %v2783_v1 = vpop.permute.xlu0 %2782 }
 0x15b   : > { %v4262_v33 = vld [vmem:[%s4526_s22 + $0x23c] sm:$0x1]  ;;  %v2282_v39 = vrot.slane %v2280_v21, 5  ;;  %2955 = vst.msk [vmem:[#allocation2 + $0x8c] sm:$0xf] %vm1528_vm4, %v5440_v17  ;;  %3738 = vmatmul.mubr.bf16.gmra.mxu1 %v4310_v5  ;;  %v2733_v40 = vshrl.u32 %v4261_v23, 16 }
 0x15c   : > { %v2277_v38 = vor.u32 %v2276_v28, %v2273_v27  ;;  %1674 = vst.msk [vmem:[#allocation2 + $0x84] sm:$0xf] %vm244_vm3, %v4087_v35  ;;  %v2736_v41 = vshll.u32 %v4261_v23, 16  ;;  %v4259_v43 = vld [vmem:[%s4526_s22 + $0x230] sm:$0xf]  ;;  %v2292_v44 = vrot.slane %v2291_v34, 4 }
 0x15d   : > { %2954 = vst.msk [vmem:[#allocation2 + $0x84] sm:$0xf] %vm1528_vm4, %v5444_v19  ;;  %v2742_v45 = vshll.u32 %v4262_v33, 16  ;;  %v4260_v46 = vld [vmem:[%s4526_s22 + $0x234] sm:$0x1]  ;;  %v2719_v30 = vshrl.u32 %v4259_v43, 16  ;;  %v1379_v35 = vpop.permute.xlu1 %1378 }
 0x15e   : > { %v2722_v48 = vshll.u32 %v4259_v43, 16  ;;  %v2278_v50 = vrot.slane %v2277_v38, 4  ;;  %v2735_v52 = vrot.slane %v2733_v40, 4  ;;  %v2738_v17 = vrot.slane %v2736_v41, 5  ;;  %v4120_v54 = vld [vmem:[%s4526_s22 + $0x1c0] sm:$0xf]  ;;  %v2847_v25 = vpop.permute.xlu0 %2846 }
 0x15f   : > { %v2728_v53 = vshll.u32 %v4260_v46, 16  ;;  %v2297_v55 = vsel %vm4549_vm2, %v2292_v44, %v2296_v62  ;;  %v2721_v56 = vrot.slane %v2719_v30, 4  ;;  %1707 = vst.msk [vmem:[#allocation2 + $0x18c] sm:$0xf] %vm244_vm3, %v4120_v54  ;;  %v4119_v19 = vld [vmem:[%s4526_s22 + $0x1b8] sm:$0xf] }
 0x160   : > { %v2724_v0 = vrot.slane %v2722_v48, 5  ;;  %2808 = vrot.lane.b32.xlu1 %v2297_v55, %s4481_s29  ;;  %v2283_v42 = vsel %vm4549_vm2, %v2278_v50, %v2282_v39  ;;  %v2739_v59 = vor.u32 %v2738_v17, %v2735_v52  ;;  %v2744_v36 = vrot.slane %v2742_v45, 5  ;;  %2987 = vst.msk [vmem:[#allocation2 + $0x18c] sm:$0xf] %vm1528_vm4, %v5463_v47  ;;  %v199_v61 = vld [vmem:[%s4526_s22 + $0xa8] sm:$0xf] }
 0x161   : > { %v2730_v60 = vrot.slane %v2728_v53, 5  ;;  %1706 = vst.msk [vmem:[#allocation2 + $0x184] sm:$0xf] %vm244_vm3, %v4119_v19  ;;  %v198_v63 = vld [vmem:[%s4526_s22 + $0xa0] sm:$0xf]  ;;  %2806 = vrot.lane.b32.xlu0 %v2283_v42, %s4481_s29  ;;  %v1443_v50 = vpop.permute.xlu1 %1442 }
 0x162   : > { %v2725_v3 = vor.u32 %v2724_v0, %v2721_v56  ;;  %2986 = vst.msk [vmem:[#allocation2 + $0x184] sm:$0xf] %vm1528_vm4, %v5466_v57  ;;  %v231_v4 = vld [vmem:[%s4526_s22 + $0x1c8] sm:$0xf]  ;;  %v230_v51 = vld [vmem:[%s4526_s22 + $0x1c0] sm:$0xf]  ;;  %v1377_v41 = vpop.permute.xlu0 %1376 }
 0x163   : > { %264 = vst.msk [vmem:[#allocation2 + $0x98] sm:$0xf] %vm244_vm3, %v199_v61  ;;  %263 = vst.msk [vmem:[#allocation2 + $0x90] sm:$0xf] %vm244_vm3, %v198_v63  ;;  %v4090_v47 = vld [vmem:[%s4526_s22 + $0xb0] sm:$0xf] }
 0x164   : > { %v2740_v6 = vrot.slane %v2739_v59, 4  ;;  %1548 = vst.msk [vmem:[#allocation2 + $0x98] sm:$0xf] %vm1528_vm4, %v5480_v8  ;;  %1547 = vst.msk [vmem:[#allocation2 + $0x90] sm:$0xf] %vm1528_vm4, %v5487_v20  ;;  %v2726_v9 = vrot.slane %v2725_v3, 4 }
 0x165   : > { %296 = vst.msk [vmem:[#allocation2 + $0x198] sm:$0xf] %vm244_vm3, %v231_v4  ;;  %295 = vst.msk [vmem:[#allocation2 + $0x190] sm:$0xf] %vm244_vm3, %v230_v51  ;;  %v4089_v57 = vld [vmem:[%s4526_s22 + $0xa8] sm:$0xf]  ;;  %v2789_v4 = vpop.permute.xlu1 %2788 }
 0x166   : > { %1677 = vst.msk [vmem:[#allocation2 + $0x9c] sm:$0xf] %vm244_vm3, %v4090_v47  ;;  %v4122_v7 = vld [vmem:[%s4526_s22 + $0x1d0] sm:$0xf]  ;;  %v3019_v10 = vld [vmem:[#allocation2 + $0x88] sm:$0xff]  ;;  %v2745_v13 = vsel %vm4549_vm2, %v2740_v6, %v2744_v36  ;;  %v3018_v14 = vld [vmem:[#allocation2 + $0x80] sm:$0xff]  ;;  %v2731_v18 = vsel %vm4549_vm2, %v2726_v9, %v2730_v60  ;;  %v1441_v0 = vpop.permute.xlu0 %1440 }
 0x167   : > { %1580 = vst.msk [vmem:[#allocation2 + $0x198] sm:$0xf] %vm1528_vm4, %v1439_v37  ;;  %1579 = vst.msk [vmem:[#allocation2 + $0x190] sm:$0xf] %vm1528_vm4, %v1437_v49  ;;  %v4121_v8 = vld [vmem:[%s4526_s22 + $0x1c8] sm:$0xf]  ;;  %2872 = vrot.lane.b32.xlu1 %v2745_v13, %s4481_s29  ;;  %v4280_v5 = vcombine.low %v3018_v14, %v3019_v10  ;;  %2870 = vrot.lane.b32.xlu0 %v2731_v18, %s4481_s29 }
 0x168   : > { %2957 = vst.msk [vmem:[#allocation2 + $0x9c] sm:$0xf] %vm1528_vm4, %v2785_v2  ;;  %v201_v12 = vld [vmem:[%s4526_s22 + $0xb8] sm:$0xf]  ;;  %v4440_v58 = vld [vmem:[#allocation2 + $0x84] ss:$8 sps:$4 sm:$0xff]  }
 0x169   : > { %1676 = vst.msk [vmem:[#allocation2 + $0x94] sm:$0xf] %vm244_vm3, %v4089_v57  ;;  %1709 = vst.msk [vmem:[#allocation2 + $0x19c] sm:$0xf] %vm244_vm3, %v4122_v7  ;;  %v200_v11 = vld [vmem:[%s4526_s22 + $0xb0] sm:$0xf]  ;;  %3617 = vmatprep.mubr.bf16.mxu0 %v4440_v58 }
 0x16a   : > { %2956 = vst.msk [vmem:[#allocation2 + $0x94] sm:$0xf] %vm1528_vm4, %v2783_v1  ;;  %2989 = vst.msk [vmem:[#allocation2 + $0x19c] sm:$0xf] %vm1528_vm4, %v2849_v15  ;;  %v233_v20 = vld [vmem:[%s4526_s22 + $0x1d8] sm:$0xf]  ;;  %3618 = vmatmul.mubr.bf16.gmra.mxu0 %v4280_v5  ;;  %v2787_v9 = vpop.permute.xlu0 %2786  ;;  %v2853_v5 = vpop.permute.xlu1 %2852 }
 0x16b   : > { %1708 = vst.msk [vmem:[#allocation2 + $0x194] sm:$0xf] %vm244_vm3, %v4121_v8  ;;  %266 = vst.msk [vmem:[#allocation2 + $0xa8] sm:$0xf] %vm244_vm3, %v201_v12  ;;  %v232_v22 = vld [vmem:[%s4526_s22 + $0x1d0] sm:$0xf] }
 0x16c   : > { %265 = vst.msk [vmem:[#allocation2 + $0xa0] sm:$0xf] %vm244_vm3, %v200_v11  ;;  %v4092_v24 = vld [vmem:[%s4526_s22 + $0xc0] sm:$0xf]  ;;  %298 = vst.msk [vmem:[#allocation2 + $0x1a8] sm:$0xf] %vm244_vm3, %v233_v20 }
 0x16d   : > { %297 = vst.msk [vmem:[#allocation2 + $0x1a0] sm:$0xf] %vm244_vm3, %v232_v22  ;;  %1679 = vst.msk [vmem:[#allocation2 + $0xac] sm:$0xf] %vm244_vm3, %v4092_v24  ;;  %v4124_v62 = vld [vmem:[%s4526_s22 + $0x1e0] sm:$0xf] }
 0x16e   : > { %v4123_v26 = vld [vmem:[%s4526_s22 + $0x1d8] sm:$0xf]  ;;  %v3051_v16 = vld [vmem:[#allocation2 + $0x188] sm:$0xff]  ;;  %2988 = vst.msk [vmem:[#allocation2 + $0x194] sm:$0xf] %vm1528_vm4, %v2847_v25  ;;  %v3050_v21 = vld [vmem:[#allocation2 + $0x180] sm:$0xff]  ;;  %v2851_v24 = vpop.permute.xlu0 %2850  ;;  %v1383_v32 = vpop.permute.xlu1 %1382 }
 0x16f   : > { %1711 = vst.msk [vmem:[#allocation2 + $0x1ac] sm:$0xf] %vm244_vm3, %v4124_v62  ;;  %1710 = vst.msk [vmem:[#allocation2 + $0x1a4] sm:$0xf] %vm244_vm3, %v4123_v26  ;;  %v203_v27 = vld [vmem:[%s4526_s22 + $0xc8] sm:$0xf]  ;;  %v4312_v34 = vcombine.low %v3050_v21, %v3051_v16 }
 0x170   : > { %v202_v28 = vld [vmem:[%s4526_s22 + $0xc0] sm:$0xf]  ;;  %v4442_v29 = vld [vmem:[#allocation2 + $0x184] ss:$8 sps:$4 sm:$0xff]   ;;  %268 = vst.msk [vmem:[#allocation2 + $0xb8] sm:$0xf] %vm244_vm3, %v203_v27 }
 0x171   : > { %267 = vst.msk [vmem:[#allocation2 + $0xb0] sm:$0xf] %vm244_vm3, %v202_v28  ;;  %v235_v31 = vld [vmem:[%s4526_s22 + $0x1e8] sm:$0xf]  ;;  %v234_v23 = vld [vmem:[%s4526_s22 + $0x1e0] sm:$0xf]  ;;  %3745 = vmatprep.mubr.bf16.mxu1 %v4442_v29 }
 0x172   : > { %300 = vst.msk [vmem:[#allocation2 + $0x1b8] sm:$0xf] %vm244_vm3, %v235_v31  ;;  %v4094_v33 = vld [vmem:[%s4526_s22 + $0xd0] sm:$0xf]  ;;  %v4093_v37 = vld [vmem:[%s4526_s22 + $0xc8] sm:$0xf]  ;;  %3746 = vmatmul.mubr.bf16.gmra.mxu1 %v4312_v34  ;;  %v1381_v16 = vpop.permute.xlu0 %1380  ;;  %v1447_v21 = vpop.permute.xlu1 %1446 }
 0x173   : > { %1550 = vst.msk [vmem:[#allocation2 + $0xa8] sm:$0xf] %vm1528_vm4, %v1379_v35  ;;  %v3021_v38 = vld [vmem:[#allocation2 + $0x98] sm:$0xff]  ;;  %v4126_v39 = vld [vmem:[%s4526_s22 + $0x1f0] sm:$0xf]  ;;  %s4346_s29 = sshll.u32 %s5910_s14, 5 }
 0x174   : > { %299 = vst.msk [vmem:[#allocation2 + $0x1b0] sm:$0xf] %vm244_vm3, %v234_v23  ;;  %1681 = vst.msk [vmem:[#allocation2 + $0xbc] sm:$0xf] %vm244_vm3, %v4094_v33  ;;  %v4125_v40 = vld [vmem:[%s4526_s22 + $0x1e8] sm:$0xf]  ;;  %s5676_s5 = scalar_lea.vmem %s5906_s3, %s4346_s29 }
 0x175   : > { %1680 = vst.msk [vmem:[#allocation2 + $0xb4] sm:$0xf] %vm244_vm3, %v4093_v37  ;;  %v3020_v43 = vld [vmem:[#allocation2 + $0x90] sm:$0xff]  ;;  %1713 = vst.msk [vmem:[#allocation2 + $0x1bc] sm:$0xf] %vm244_vm3, %v4126_v39  ;;  %v3053_v30 = vld [vmem:[#allocation2 + $0x198] sm:$0xff] }
 0x176   : > { %v4444_v44 = vld [vmem:[#allocation2 + $0x94] ss:$8 sps:$4 sm:$0xff]   ;;  %1712 = vst.msk [vmem:[#allocation2 + $0x1b4] sm:$0xf] %vm244_vm3, %v4125_v40  ;;  %v205_v45 = vld [vmem:[%s4526_s22 + $0xe0] sm:$0xf]  ;;  %v4282_v46 = vcombine.low %v3020_v43, %v3021_v38  ;;  %v1445_v34 = vpop.permute.xlu0 %1444  ;;  %v2793_v23 = vpop.permute.xlu1 %2792 }
 0x177   : > { %1549 = vst.msk [vmem:[#allocation2 + $0xa0] sm:$0xf] %vm1528_vm4, %v1377_v41  ;;  %v204_v48 = vld [vmem:[%s4526_s22 + $0xd8] sm:$0xf]  ;;  %v237_v49 = vld [vmem:[%s4526_s22 + $0x200] sm:$0xf]  ;;  %3625 = vmatprep.mubr.bf16.mxu0 %v4444_v44  ;;  %v3555_v40 = vpop.f32.mrf.mxu0 }
 0x178   : > { %270 = vst.msk [vmem:[#allocation2 + $0xc8] sm:$0xf] %vm244_vm3, %v205_v45  ;;  %269 = vst.msk [vmem:[#allocation2 + $0xc0] sm:$0xf] %vm244_vm3, %v204_v48  ;;  %v236_v52 = vld [vmem:[%s4526_s22 + $0x1f8] sm:$0xf]  ;;  %3626 = vmatmul.mubr.bf16.gmra.mxu0 %v4282_v46 }
 0x179   : > { %302 = vst.msk [vmem:[#allocation2 + $0x1c8] sm:$0xf] %vm244_vm3, %v237_v49  ;;  %v4096_v17 = vld [vmem:[%s4526_s22 + $0xe8] sm:$0xf]  ;;  %v4095_v53 = vld [vmem:[%s4526_s22 + $0xe0] sm:$0xf] }
 0x17a   : > { %1582 = vst.msk [vmem:[#allocation2 + $0x1a8] sm:$0xf] %vm1528_vm4, %v1443_v50  ;;  %v3052_v54 = vld [vmem:[#allocation2 + $0x190] sm:$0xff]  ;;  %v4128_v56 = vld [vmem:[%s4526_s22 + $0x208] sm:$0xf]  ;;  %v2791_v33 = vpop.permute.xlu0 %2790  ;;  %v2857_v37 = vpop.permute.xlu1 %2856 }
 0x17b   : > { %v4446_v55 = vld [vmem:[#allocation2 + $0x194] ss:$8 sps:$4 sm:$0xff]   ;;  %301 = vst.msk [vmem:[#allocation2 + $0x1c0] sm:$0xf] %vm244_vm3, %v236_v52  ;;  %1683 = vst.msk [vmem:[#allocation2 + $0xcc] sm:$0xf] %vm244_vm3, %v4096_v17  ;;  %v4314_v19 = vcombine.low %v3052_v54, %v3053_v30  ;;  %v3557_v30 = vpop.f32.mrf.mxu0  ;;  %v3683_v50 = vpop.f32.mrf.mxu1 }
 0x17c   : > { %1682 = vst.msk [vmem:[#allocation2 + $0xc4] sm:$0xf] %vm244_vm3, %v4095_v53  ;;  %1715 = vst.msk [vmem:[#allocation2 + $0x1cc] sm:$0xf] %vm244_vm3, %v4128_v56  ;;  %v4127_v42 = vld [vmem:[%s4526_s22 + $0x200] sm:$0xf]  ;;  %3753 = vmatprep.mubr.bf16.mxu1 %v4446_v55 }
 0x17d   : > { %v207_v59 = vld [vmem:[%s4526_s22 + $0xf0] sm:$0xf]  ;;  %v206_v36 = vld [vmem:[%s4526_s22 + $0xe8] sm:$0xf]  ;;  %1581 = vst.msk [vmem:[#allocation2 + $0x1a0] sm:$0xf] %vm1528_vm4, %v1441_v0  ;;  %3754 = vmatmul.mubr.bf16.gmra.mxu1 %v4314_v19  ;;  %v3558_v17 = vpop.f32.mrf.mxu0  ;;  %v3685_v0 = vpop.f32.mrf.mxu1 }
 0x17e   : > { %1714 = vst.msk [vmem:[#allocation2 + $0x1c4] sm:$0xf] %vm244_vm3, %v4127_v42  ;;  %272 = vst.msk [vmem:[#allocation2 + $0xd8] sm:$0xf] %vm244_vm3, %v207_v59  ;;  %v239_v60 = vld [vmem:[%s4526_s22 + $0x210] sm:$0xf]  ;;  %v2855_v39 = vpop.permute.xlu0 %2854  ;;  %v1387_v44 = vpop.permute.xlu1 %1386 }
 0x17f   : > { %271 = vst.msk [vmem:[#allocation2 + $0xd0] sm:$0xf] %vm244_vm3, %v206_v36  ;;  %v238_v61 = vld [vmem:[%s4526_s22 + $0x208] sm:$0xf]  ;;  %304 = vst.msk [vmem:[#allocation2 + $0x1d8] sm:$0xf] %vm244_vm3, %v239_v60  ;;  %v3560_v59 = vpop.f32.mrf.mxu0 }
 0x180   : > { %303 = vst.msk [vmem:[#allocation2 + $0x1d0] sm:$0xf] %vm244_vm3, %v238_v61  ;;  %v4098_v63 = vld [vmem:[%s4526_s22 + $0xf8] sm:$0xf]  ;;  %v4097_v2 = vld [vmem:[%s4526_s22 + $0xf0] sm:$0xf] }
 0x181   : > { %v4130_v3 = vld [vmem:[%s4526_s22 + $0x218] sm:$0xf]  ;;  %1685 = vst.msk [vmem:[#allocation2 + $0xdc] sm:$0xf] %vm244_vm3, %v4098_v63  ;;  %1684 = vst.msk [vmem:[#allocation2 + $0xd4] sm:$0xf] %vm244_vm3, %v4097_v2  ;;  %v3686_v63 = vpop.f32.mrf.mxu1 }
 0x182   : > { %1717 = vst.msk [vmem:[#allocation2 + $0x1dc] sm:$0xf] %vm244_vm3, %v4130_v3  ;;  %v4129_v51 = vld [vmem:[%s4526_s22 + $0x210] sm:$0xf]  ;;  %v209_v47 = vld [vmem:[%s4526_s22 + $0x100] sm:$0xf]  ;;  %v1385_v52 = vpop.permute.xlu0 %1384 }
 0x183   : > { %v208_v1 = vld [vmem:[%s4526_s22 + $0xf8] sm:$0xf]  ;;  %2959 = vst.msk [vmem:[#allocation2 + $0xac] sm:$0xf] %vm1528_vm4, %v2789_v4  ;;  %v241_v6 = vld [vmem:[%s4526_s22 + $0x220] sm:$0xf]  ;;  %v1451_v19 = vpop.permute.xlu1 %1450 }
 0x184   : > { %1716 = vst.msk [vmem:[#allocation2 + $0x1d4] sm:$0xf] %vm244_vm3, %v4129_v51  ;;  %274 = vst.msk [vmem:[#allocation2 + $0xe8] sm:$0xf] %vm244_vm3, %v209_v47  ;;  %v240_v57 = vld [vmem:[%s4526_s22 + $0x218] sm:$0xf] }
 0x185   : > { %273 = vst.msk [vmem:[#allocation2 + $0xe0] sm:$0xf] %vm244_vm3, %v208_v1  ;;  %v4100_v7 = vld [vmem:[%s4526_s22 + $0x108] sm:$0xf]  ;;  %306 = vst.msk [vmem:[#allocation2 + $0x1e8] sm:$0xf] %vm244_vm3, %v241_v6  ;;  %v3688_v1 = vpop.f32.mrf.mxu1 }
 0x186   : > { %305 = vst.msk [vmem:[#allocation2 + $0x1e0] sm:$0xf] %vm244_vm3, %v240_v57  ;;  %1687 = vst.msk [vmem:[#allocation2 + $0xec] sm:$0xf] %vm244_vm3, %v4100_v7  ;;  %v4099_v10 = vld [vmem:[%s4526_s22 + $0x100] sm:$0xf]  ;;  %v1449_v2 = vpop.permute.xlu0 %1448 }
 0x187   : > { %v4132_v8 = vld [vmem:[%s4526_s22 + $0x228] sm:$0xf]  ;;  %v4131_v12 = vld [vmem:[%s4526_s22 + $0x220] sm:$0xf]  ;;  %2958 = vst.msk [vmem:[#allocation2 + $0xa4] sm:$0xf] %vm1528_vm4, %v2787_v9 }
 0x188   : > { %1686 = vst.msk [vmem:[#allocation2 + $0xe4] sm:$0xf] %vm244_vm3, %v4099_v10  ;;  %1719 = vst.msk [vmem:[#allocation2 + $0x1ec] sm:$0xf] %vm244_vm3, %v4132_v8  ;;  %v211_v13 = vld [vmem:[%s4526_s22 + $0x110] sm:$0xf] }
 0x189   : > { %1718 = vst.msk [vmem:[#allocation2 + $0x1e4] sm:$0xf] %vm244_vm3, %v4131_v12  ;;  %v210_v14 = vld [vmem:[%s4526_s22 + $0x108] sm:$0xf]  ;;  %v243_v58 = vld [vmem:[%s4526_s22 + $0x230] sm:$0xf]  ;;  %v2797_v57 = vpop.permute.xlu1 %2796 }
 0x18a   : > { %276 = vst.msk [vmem:[#allocation2 + $0xf8] sm:$0xf] %vm244_vm3, %v211_v13  ;;  %275 = vst.msk [vmem:[#allocation2 + $0xf0] sm:$0xf] %vm244_vm3, %v210_v14  ;;  %v242_v15 = vld [vmem:[%s4526_s22 + $0x228] sm:$0xf]  ;;  %v2795_v9 = vpop.permute.xlu0 %2794 }
 0x18b   : > { %308 = vst.msk [vmem:[#allocation2 + $0x1f8] sm:$0xf] %vm244_vm3, %v243_v58  ;;  %v4102_v11 = vld [vmem:[%s4526_s22 + $0x118] sm:$0xf]  ;;  %v4101_v18 = vld [vmem:[%s4526_s22 + $0x110] sm:$0xf] }
 0x18c   : > { %307 = vst.msk [vmem:[#allocation2 + $0x1f0] sm:$0xf] %vm244_vm3, %v242_v15  ;;  %1689 = vst.msk [vmem:[#allocation2 + $0xfc] sm:$0xf] %vm244_vm3, %v4102_v11  ;;  %v4134_v20 = vld [vmem:[%s4526_s22 + $0x238] sm:$0xf] }
 0x18d   : > { %1688 = vst.msk [vmem:[#allocation2 + $0xf4] sm:$0xf] %vm244_vm3, %v4101_v18  ;;  %v4133_v22 = vld [vmem:[%s4526_s22 + $0x230] sm:$0xf]  ;;  %1721 = vst.msk [vmem:[#allocation2 + $0x1fc] sm:$0xf] %vm244_vm3, %v4134_v20  ;;  %v3563_v20 = vpop.f32.mrf.mxu0 }
 0x18e   : > { %2991 = vst.msk [vmem:[#allocation2 + $0x1ac] sm:$0xf] %vm1528_vm4, %v2853_v5  ;;  %2990 = vst.msk [vmem:[#allocation2 + $0x1a4] sm:$0xf] %vm1528_vm4, %v2851_v24  ;;  %v3023_v25 = vld [vmem:[#allocation2 + $0xa8] sm:$0xff]  ;;  %v3022_v62 = vld [vmem:[#allocation2 + $0xa0] sm:$0xff] }
 0x18f   : > { %1720 = vst.msk [vmem:[#allocation2 + $0x1f4] sm:$0xf] %vm244_vm3, %v4133_v22  ;;  %v4448_v26 = vld [vmem:[#allocation2 + $0xa4] ss:$8 sps:$4 sm:$0xff]   ;;  %v4284_v27 = vcombine.low %v3022_v62, %v3023_v25  ;;  %v5667_v38 = vld [vmem:[%s5905_s2] ss:$0 sm:$0xff]  ;;  %v2861_v10 = vpop.permute.xlu1 %2860 }
 0x190   : > { %1552 = vst.msk [vmem:[#allocation2 + $0xb8] sm:$0xf] %vm1528_vm4, %v1383_v32  ;;  %1551 = vst.msk [vmem:[#allocation2 + $0xb0] sm:$0xf] %vm1528_vm4, %v1381_v16  ;;  %3633 = vmatprep.mubr.bf16.mxu0 %v4448_v26  ;;  %v3556_v43 = vadd.f32 %v5667_v38, %v3555_v40  ;;  %v3684_v53 = vadd.f32 %v5667_v38, %v3683_v50  ;;  %v3559_v56 = vadd.f32 %v5667_v38, %v3558_v17  ;;  %v3565_v26 = vpop.f32.mrf.mxu0 }
 0x191   : > { %3634 = vmatmul.mubr.bf16.gmra.mxu0 %v4284_v27  ;;  %1584 = vst.msk [vmem:[#allocation2 + $0x1b8] sm:$0xf] %vm1528_vm4, %v1447_v21  ;;  %1583 = vst.msk [vmem:[#allocation2 + $0x1b0] sm:$0xf] %vm1528_vm4, %v1445_v34  ;;  %v3687_v51 = vadd.f32 %v5667_v38, %v3686_v63  ;;  %v2859_v8 = vpop.permute.xlu0 %2858  ;;  %v3564_v25 = vadd.f32 %v5667_v38, %v3563_v20 }
 0x192   : > { %2961 = vst.msk [vmem:[#allocation2 + $0xbc] sm:$0xf] %vm1528_vm4, %v2793_v23  ;;  %2960 = vst.msk [vmem:[#allocation2 + $0xb4] sm:$0xf] %vm1528_vm4, %v2791_v33  ;;  %v3810_v49 = vmax.f32 %v3556_v43, 0.0  ;;  %v3842_v42 = vmax.f32 %v3684_v53, 0.0  ;;  %v3566_v27 = vpop.f32.mrf.mxu0 }
 0x193   : > { %2993 = vst.msk [vmem:[#allocation2 + $0x1bc] sm:$0xf] %vm1528_vm4, %v2857_v37  ;;  %2992 = vst.msk [vmem:[#allocation2 + $0x1b4] sm:$0xf] %vm1528_vm4, %v2855_v39  ;;  %v3811_v61 = vmax.f32 %v3559_v56, 0.0  ;;  %v3843_v6 = vmax.f32 %v3687_v51, 0.0 }
 0x194   : > { %1554 = vst.msk [vmem:[#allocation2 + $0xc8] sm:$0xf] %vm1528_vm4, %v1387_v44  ;;  %1553 = vst.msk [vmem:[#allocation2 + $0xc0] sm:$0xf] %vm1528_vm4, %v1385_v52  ;;  %v3874_v55 = vpack.c.bf16 %v3810_v49, %v3810_v49  ;;  %v3906_v4 = vpack.c.bf16 %v3842_v42, %v3842_v42  ;;  %v3812_v16 = vmax.f32 %v3564_v25, 0.0 }
 0x195   : > { %v3055_v28 = vld [vmem:[#allocation2 + $0x1a8] sm:$0xff]  ;;  %v3054_v29 = vld [vmem:[#allocation2 + $0x1a0] sm:$0xff]  ;;  %1586 = vst.msk [vmem:[#allocation2 + $0x1c8] sm:$0xf] %vm1528_vm4, %v1451_v19  ;;  %1585 = vst.msk [vmem:[#allocation2 + $0x1c0] sm:$0xf] %vm1528_vm4, %v1449_v2  ;;  %v3875_v47 = vpack.c.bf16 %v3811_v61, %v3811_v61  ;;  %v3907_v7 = vpack.c.bf16 %v3843_v6, %v3843_v6  ;;  %v1391_v13 = vpop.permute.xlu1 %1390 }
 0x196   : > { %v4450_v31 = vld [vmem:[#allocation2 + $0x1a4] ss:$8 sps:$4 sm:$0xff]   ;;  %v4316_v35 = vcombine.low %v3054_v29, %v3055_v28  ;;  %3939 = vst.msk [vmem:[%s5676_s5] sm:$0xf] %vm3938_vm5, %v3874_v55  ;;  %3971 = vst.msk [vmem:[%s5676_s5 + $0x80] sm:$0xf] %vm3938_vm5, %v3906_v4  ;;  %v1389_v15 = vpop.permute.xlu0 %1388  ;;  %v3876_v21 = vpack.c.bf16 %v3812_v16, %v3812_v16  ;;  %v3567_v29 = vadd.f32 %v5667_v38, %v3566_v27 }
 0x197   : > { %3761 = vmatprep.mubr.bf16.mxu1 %v4450_v31  ;;  %3940 = vst.msk [vmem:[%s5676_s5 + $0x4] sm:$0xf] %vm3938_vm5, %v3875_v47  ;;  %3972 = vst.msk [vmem:[%s5676_s5 + $0x84] sm:$0xf] %vm3938_vm5, %v3907_v7  ;;  %v3691_v31 = vpop.f32.mrf.mxu1 }
 0x198   : > { %3762 = vmatmul.mubr.bf16.gmra.mxu1 %v4316_v35  ;;  %2963 = vst.msk [vmem:[#allocation2 + $0xcc] sm:$0xf] %vm1528_vm4, %v2797_v57  ;;  %2962 = vst.msk [vmem:[#allocation2 + $0xc4] sm:$0xf] %vm1528_vm4, %v2795_v9  ;;  %v3692_v34 = vadd.f32 %v5667_v38, %v3691_v31  ;;  %v3568_v35 = vpop.f32.mrf.mxu0  ;;  %v3813_v33 = vmax.f32 %v3567_v29, 0.0 }
 0x199   : > { %v3025_v41 = vld [vmem:[#allocation2 + $0xb8] sm:$0xff]  ;;  %v3024_v45 = vld [vmem:[#allocation2 + $0xb0] sm:$0xff]  ;;  %2995 = vst.msk [vmem:[#allocation2 + $0x1cc] sm:$0xf] %vm1528_vm4, %v2861_v10  ;;  %2994 = vst.msk [vmem:[#allocation2 + $0x1c4] sm:$0xf] %vm1528_vm4, %v2859_v8  ;;  %v3693_v37 = vpop.f32.mrf.mxu1 }
 0x19a   : > { %v4452_v46 = vld [vmem:[#allocation2 + $0xb4] ss:$8 sps:$4 sm:$0xff]   ;;  %v4286_v48 = vcombine.low %v3024_v45, %v3025_v41  ;;  %1556 = vst.msk [vmem:[#allocation2 + $0xd8] sm:$0xf] %vm1528_vm4, %v1391_v13  ;;  %1555 = vst.msk [vmem:[#allocation2 + $0xd0] sm:$0xf] %vm1528_vm4, %v1389_v15  ;;  %v1455_v5 = vpop.permute.xlu1 %1454  ;;  %v3877_v40 = vpack.c.bf16 %v3813_v33, %v3813_v33  ;;  %v3571_v0 = vpop.f32.mrf.mxu0 }
 0x19b   : > { %3641 = vmatprep.mubr.bf16.mxu0 %v4452_v46  ;;  %v3057_v54 = vld [vmem:[#allocation2 + $0x1b8] sm:$0xff]  ;;  %v3056_v36 = vld [vmem:[#allocation2 + $0x1b0] sm:$0xff]  ;;  %1588 = vst.msk [vmem:[#allocation2 + $0x1d8] sm:$0xf] %vm1528_vm4, %v1455_v5  ;;  %v3844_v39 = vmax.f32 %v3692_v34, 0.0  ;;  %v3694_v41 = vpop.f32.mrf.mxu1  ;;  %v3572_v19 = vadd.f32 %v5667_v38, %v3571_v0 }
 0x19c   : > { %3642 = vmatmul.mubr.bf16.gmra.mxu0 %v4286_v48  ;;  %v4454_v60 = vld [vmem:[#allocation2 + $0x1b4] ss:$8 sps:$4 sm:$0xff]   ;;  %v4318_v3 = vcombine.low %v3056_v36, %v3057_v54  ;;  %v1453_v32 = vpop.permute.xlu0 %1452  ;;  %3941 = vst.msk [vmem:[%s5676_s5 + $0x8] sm:$0xf] %vm3938_vm5, %v3876_v21  ;;  %v3695_v45 = vadd.f32 %v5667_v38, %v3694_v41  ;;  %3942 = vst.msk [vmem:[%s5676_s5 + $0xc] sm:$0xf] %vm3938_vm5, %v3877_v40 }
 0x19d   : > { %3769 = vmatprep.mubr.bf16.mxu1 %v4454_v60  ;;  %1587 = vst.msk [vmem:[#allocation2 + $0x1d0] sm:$0xf] %vm1528_vm4, %v1453_v32  ;;  %v3908_v44 = vpack.c.bf16 %v3844_v39, %v3844_v39  ;;  %v3696_v46 = vpop.f32.mrf.mxu1  ;;  %v3573_v60 = vpop.f32.mrf.mxu0  ;;  %v3814_v2 = vmax.f32 %v3572_v19, 0.0 }
 0x19e   : > { %v3845_v48 = vmax.f32 %v3695_v45, 0.0 }
 0x19f   : > { %v3027_v12 = vld [vmem:[#allocation2 + $0xc8] sm:$0xff]  ;;  %v3026_v14 = vld [vmem:[#allocation2 + $0xc0] sm:$0xff]  ;;  %3973 = vst.msk [vmem:[%s5676_s5 + $0x88] sm:$0xf] %vm3938_vm5, %v3908_v44  ;;  %v3878_v4 = vpack.c.bf16 %v3814_v2, %v3814_v2 }
 0x1a0   : > { %3770 = vmatmul.mubr.bf16.gmra.mxu1 %v4318_v3  ;;  %v4456_v58 = vld [vmem:[#allocation2 + $0xc4] ss:$8 sps:$4 sm:$0xff]   ;;  %v4288_v11 = vcombine.low %v3026_v14, %v3027_v12  ;;  %v3909_v50 = vpack.c.bf16 %v3845_v48, %v3845_v48  ;;  %v3574_v3 = vpop.f32.mrf.mxu0 }
 0x1a1   : > { %3649 = vmatprep.mubr.bf16.mxu0 %v4456_v58  ;;  %v3059_v18 = vld [vmem:[#allocation2 + $0x1c8] sm:$0xff]  ;;  %v3058_v22 = vld [vmem:[#allocation2 + $0x1c0] sm:$0xff]  ;;  %v2801_v28 = vpop.permute.xlu1 %2800  ;;  %v3575_v51 = vadd.f32 %v5667_v38, %v3574_v3  ;;  %3943 = vst.msk [vmem:[%s5676_s5 + $0x10] sm:$0xf] %vm3938_vm5, %v3878_v4 }
 0x1a2   : > { %v4458_v24 = vld [vmem:[#allocation2 + $0x1c4] ss:$8 sps:$4 sm:$0xff]   ;;  %v4320_v62 = vcombine.low %v3058_v22, %v3059_v18  ;;  %2965 = vst.msk [vmem:[#allocation2 + $0xdc] sm:$0xf] %vm1528_vm4, %v2801_v28  ;;  %v3699_v47 = vpop.f32.mrf.mxu1  ;;  %v3576_v1 = vpop.f32.mrf.mxu0 }
 0x1a3   : > { %3777 = vmatprep.mubr.bf16.mxu1 %v4458_v24  ;;  %v2799_v23 = vpop.permute.xlu0 %2798  ;;  %3974 = vst.msk [vmem:[%s5676_s5 + $0x8c] sm:$0xf] %vm3938_vm5, %v3909_v50  ;;  %v3815_v57 = vmax.f32 %v3575_v51, 0.0  ;;  %v3700_v7 = vadd.f32 %v5667_v38, %v3699_v47 }
 0x1a4   : > { %3650 = vmatmul.mubr.bf16.gmra.mxu0 %v4288_v11  ;;  %2964 = vst.msk [vmem:[#allocation2 + $0xd4] sm:$0xf] %vm1528_vm4, %v2799_v23  ;;  %v3701_v10 = vpop.f32.mrf.mxu1 }
 0x1a5   : > { %v3879_v8 = vpack.c.bf16 %v3815_v57, %v3815_v57  ;;  %v3846_v12 = vmax.f32 %v3700_v7, 0.0 }
 0x1a6   : > { %v3702_v13 = vpop.f32.mrf.mxu1 }
 0x1a7   : > { %v2865_v43 = vpop.permute.xlu1 %2864  ;;  %3944 = vst.msk [vmem:[%s5676_s5 + $0x14] sm:$0xf] %vm3938_vm5, %v3879_v8  ;;  %v3910_v14 = vpack.c.bf16 %v3846_v12, %v3846_v12  ;;  %v3703_v58 = vadd.f32 %v5667_v38, %v3702_v13 }
 0x1a8   : > { %3778 = vmatmul.mubr.bf16.gmra.mxu1 %v4320_v62  ;;  %2997 = vst.msk [vmem:[#allocation2 + $0x1dc] sm:$0xf] %vm1528_vm4, %v2865_v43  ;;  %v3704_v11 = vpop.f32.mrf.mxu1 }
 0x1a9   : > { %v2863_v30 = vpop.permute.xlu0 %2862  ;;  %v3029_v49 = vld [vmem:[#allocation2 + $0xd8] sm:$0xff]  ;;  %3975 = vst.msk [vmem:[%s5676_s5 + $0x90] sm:$0xf] %vm3938_vm5, %v3910_v14  ;;  %v3847_v5 = vmax.f32 %v3703_v58, 0.0 }
 0x1aa   : > { %2996 = vst.msk [vmem:[#allocation2 + $0x1d4] sm:$0xf] %vm1528_vm4, %v2863_v30 }
 0x1ab   : > { %v3028_v17 = vld [vmem:[#allocation2 + $0xd0] sm:$0xff]  ;;  %v3911_v22 = vpack.c.bf16 %v3847_v5, %v3847_v5 }
 0x1ac   : > { %v4460_v53 = vld [vmem:[#allocation2 + $0xd4] ss:$8 sps:$4 sm:$0xff]   ;;  %v4290_v55 = vcombine.low %v3028_v17, %v3029_v49 }
 0x1ad   : > { %v1395_v52 = vpop.permute.xlu1 %1394  ;;  %3657 = vmatprep.mubr.bf16.mxu0 %v4460_v53  ;;  %3976 = vst.msk [vmem:[%s5676_s5 + $0x94] sm:$0xf] %vm3938_vm5, %v3911_v22 }
 0x1ae   : > { %1558 = vst.msk [vmem:[#allocation2 + $0xe8] sm:$0xf] %vm1528_vm4, %v1395_v52  ;;  %v1393_v54 = vpop.permute.xlu0 %1392  ;;  %3658 = vmatmul.mubr.bf16.gmra.mxu0 %v4290_v55 }
 0x1af   : > { %1557 = vst.msk [vmem:[#allocation2 + $0xe0] sm:$0xf] %vm1528_vm4, %v1393_v54  ;;  %v3061_v56 = vld [vmem:[#allocation2 + $0x1d8] sm:$0xff] }
 0x1b1   : > { %v3060_v59 = vld [vmem:[#allocation2 + $0x1d0] sm:$0xff]  ;;  %v3579_v16 = vpop.f32.mrf.mxu0 }
 0x1b2   : > { %v4462_v36 = vld [vmem:[#allocation2 + $0x1d4] ss:$8 sps:$4 sm:$0xff]   ;;  %v4322_v63 = vcombine.low %v3060_v59, %v3061_v56  ;;  %v3580_v28 = vadd.f32 %v5667_v38, %v3579_v16 }
 0x1b3   : > { %v1459_v42 = vpop.permute.xlu1 %1458  ;;  %3785 = vmatprep.mubr.bf16.mxu1 %v4462_v36  ;;  %v3581_v31 = vpop.f32.mrf.mxu0 }
 0x1b4   : > { %1590 = vst.msk [vmem:[#allocation2 + $0x1e8] sm:$0xf] %vm1528_vm4, %v1459_v42  ;;  %v1457_v61 = vpop.permute.xlu0 %1456  ;;  %3786 = vmatmul.mubr.bf16.gmra.mxu1 %v4322_v63  ;;  %v3816_v23 = vmax.f32 %v3580_v28, 0.0 }
 0x1b5   : > { %1589 = vst.msk [vmem:[#allocation2 + $0x1e0] sm:$0xf] %vm1528_vm4, %v1457_v61  ;;  %v3582_v37 = vpop.f32.mrf.mxu0 }
 0x1b6   : > { %v3880_v39 = vpack.c.bf16 %v3816_v23, %v3816_v23  ;;  %v3583_v40 = vadd.f32 %v5667_v38, %v3582_v37 }
 0x1b7   : > { %v3584_v44 = vpop.f32.mrf.mxu0 }
 0x1b8   : > { %v3707_v41 = vpop.f32.mrf.mxu1  ;;  %3945 = vst.msk [vmem:[%s5676_s5 + $0x18] sm:$0xf] %vm3938_vm5, %v3880_v39  ;;  %v3817_v45 = vmax.f32 %v3583_v40, 0.0 }
 0x1b9   : > { %v2805_v6 = vpop.permute.xlu1 %2804  ;;  %v3708_v43 = vadd.f32 %v5667_v38, %v3707_v41 }
 0x1ba   : > { %2967 = vst.msk [vmem:[#allocation2 + $0xec] sm:$0xf] %vm1528_vm4, %v2805_v6  ;;  %v2803_v9 = vpop.permute.xlu0 %2802  ;;  %v3709_v46 = vpop.f32.mrf.mxu1  ;;  %v3881_v50 = vpack.c.bf16 %v3817_v45, %v3817_v45 }
 0x1bb   : > { %2966 = vst.msk [vmem:[#allocation2 + $0xe4] sm:$0xf] %vm1528_vm4, %v2803_v9  ;;  %v3848_v48 = vmax.f32 %v3708_v43, 0.0 }
 0x1bc   : > { %v3710_v52 = vpop.f32.mrf.mxu1  ;;  %3946 = vst.msk [vmem:[%s5676_s5 + $0x1c] sm:$0xf] %vm3938_vm5, %v3881_v50 }
 0x1bd   : > { %v3912_v17 = vpack.c.bf16 %v3848_v48, %v3848_v48  ;;  %v3711_v53 = vadd.f32 %v5667_v38, %v3710_v52 }
 0x1be   : > { %v3712_v54 = vpop.f32.mrf.mxu1 }
 0x1bf   : > { %v2869_v15 = vpop.permute.xlu1 %2868  ;;  %3977 = vst.msk [vmem:[%s5676_s5 + $0x98] sm:$0xf] %vm3938_vm5, %v3912_v17  ;;  %v3849_v55 = vmax.f32 %v3711_v53, 0.0 }
 0x1c0   : > { %2999 = vst.msk [vmem:[#allocation2 + $0x1ec] sm:$0xf] %vm1528_vm4, %v2869_v15  ;;  %v2867_v18 = vpop.permute.xlu0 %2866 }
 0x1c1   : > { %2998 = vst.msk [vmem:[#allocation2 + $0x1e4] sm:$0xf] %vm1528_vm4, %v2867_v18  ;;  %v3031_v20 = vld [vmem:[#allocation2 + $0xe8] sm:$0xff]  ;;  %v3913_v19 = vpack.c.bf16 %v3849_v55, %v3849_v55 }
 0x1c2   : > { %v3030_v24 = vld [vmem:[#allocation2 + $0xe0] sm:$0xff] }
 0x1c3   : > { %v4464_v25 = vld [vmem:[#allocation2 + $0xe4] ss:$8 sps:$4 sm:$0xff]   ;;  %v4292_v62 = vcombine.low %v3030_v24, %v3031_v20  ;;  %3978 = vst.msk [vmem:[%s5676_s5 + $0x9c] sm:$0xf] %vm3938_vm5, %v3913_v19 }
 0x1c4   : > { %3665 = vmatprep.mubr.bf16.mxu0 %v4464_v25 }
 0x1c5   : > { %3666 = vmatmul.mubr.bf16.gmra.mxu0 %v4292_v62 }
 0x1c6   : > { %v1399_v32 = vpop.permute.xlu1 %1398 }
 0x1c7   : > { %1560 = vst.msk [vmem:[#allocation2 + $0xf8] sm:$0xf] %vm1528_vm4, %v1399_v32  ;;  %v1397_v26 = vpop.permute.xlu0 %1396  ;;  %v3063_v27 = vld [vmem:[#allocation2 + $0x1e8] sm:$0xff] }
 0x1c8   : > { %1559 = vst.msk [vmem:[#allocation2 + $0xf0] sm:$0xf] %vm1528_vm4, %v1397_v26  ;;  %v3062_v21 = vld [vmem:[#allocation2 + $0x1e0] sm:$0xff] }
 0x1c9   : > { %v4466_v29 = vld [vmem:[#allocation2 + $0x1e4] ss:$8 sps:$4 sm:$0xff]   ;;  %v4324_v35 = vcombine.low %v3062_v21, %v3063_v27  ;;  %v3587_v61 = vpop.f32.mrf.mxu0 }
 0x1ca   : > { %3793 = vmatprep.mubr.bf16.mxu1 %v4466_v29  ;;  %v3588_v63 = vadd.f32 %v5667_v38, %v3587_v61 }
 0x1cb   : > { %3794 = vmatmul.mubr.bf16.gmra.mxu1 %v4324_v35  ;;  %v3589_v2 = vpop.f32.mrf.mxu0 }
 0x1cc   : > { %v1463_v34 = vpop.permute.xlu1 %1462  ;;  %v1461_v33 = vpop.permute.xlu0 %1460  ;;  %v3818_v4 = vmax.f32 %v3588_v63, 0.0 }
 0x1cd   : > { %1592 = vst.msk [vmem:[#allocation2 + $0x1f8] sm:$0xf] %vm1528_vm4, %v1463_v34  ;;  %1591 = vst.msk [vmem:[#allocation2 + $0x1f0] sm:$0xf] %vm1528_vm4, %v1461_v33  ;;  %v3590_v1 = vpop.f32.mrf.mxu0 }
 0x1ce   : > { %v3882_v57 = vpack.c.bf16 %v3818_v4, %v3818_v4  ;;  %v3591_v7 = vadd.f32 %v5667_v38, %v3590_v1 }
 0x1cf   : > { %v3592_v10 = vpop.f32.mrf.mxu0 }
 0x1d0   : > { %3947 = vst.msk [vmem:[%s5676_s5 + $0x20] sm:$0xf] %vm3938_vm5, %v3882_v57  ;;  %v3819_v8 = vmax.f32 %v3591_v7, 0.0 }
 0x1d1   : > { %v3715_v9 = vpop.f32.mrf.mxu1 }
 0x1d2   : > { %v2809_v30 = vpop.permute.xlu1 %2808  ;;  %v3716_v12 = vadd.f32 %v5667_v38, %v3715_v9  ;;  %v3883_v14 = vpack.c.bf16 %v3819_v8, %v3819_v8 }
 0x1d3   : > { %2969 = vst.msk [vmem:[#allocation2 + $0xfc] sm:$0xf] %vm1528_vm4, %v2809_v30  ;;  %v2807_v49 = vpop.permute.xlu0 %2806  ;;  %v3717_v13 = vpop.f32.mrf.mxu1 }
 0x1d4   : > { %2968 = vst.msk [vmem:[#allocation2 + $0xf4] sm:$0xf] %vm1528_vm4, %v2807_v49  ;;  %v3850_v58 = vmax.f32 %v3716_v12, 0.0 }
 0x1d5   : > { %v3718_v15 = vpop.f32.mrf.mxu1  ;;  %3948 = vst.msk [vmem:[%s5676_s5 + $0x24] sm:$0xf] %vm3938_vm5, %v3883_v14 }
 0x1d6   : > { %v3914_v11 = vpack.c.bf16 %v3850_v58, %v3850_v58  ;;  %v3719_v18 = vadd.f32 %v5667_v38, %v3718_v15 }
 0x1d7   : > { %v3720_v5 = vpop.f32.mrf.mxu1 }
 0x1d8   : > { %3979 = vst.msk [vmem:[%s5676_s5 + $0xa0] sm:$0xf] %vm3938_vm5, %v3914_v11  ;;  %v3851_v20 = vmax.f32 %v3719_v18, 0.0 }
 0x1d9   : > { %v2873_v56 = vpop.permute.xlu1 %2872  ;;  %v2871_v0 = vpop.permute.xlu0 %2870 }
 0x1da   : > { %3001 = vst.msk [vmem:[#allocation2 + $0x1fc] sm:$0xf] %vm1528_vm4, %v2873_v56  ;;  %3000 = vst.msk [vmem:[#allocation2 + $0x1f4] sm:$0xf] %vm1528_vm4, %v2871_v0  ;;  %v3033_v42 = vld [vmem:[#allocation2 + $0xf8] sm:$0xff]  ;;  %v3915_v22 = vpack.c.bf16 %v3851_v20, %v3851_v20 }
 0x1db   : > { %v3032_v59 = vld [vmem:[#allocation2 + $0xf0] sm:$0xff] }
 0x1dc   : > { %v4468_v36 = vld [vmem:[#allocation2 + $0xf4] ss:$8 sps:$4 sm:$0xff]   ;;  %v4294_v60 = vcombine.low %v3032_v59, %v3033_v42  ;;  %3980 = vst.msk [vmem:[%s5676_s5 + $0xa4] sm:$0xf] %vm3938_vm5, %v3915_v22 }
 0x1dd   : > { %3673 = vmatprep.mubr.bf16.mxu0 %v4468_v36 }
 0x1de   : > { %3674 = vmatmul.mubr.bf16.gmra.mxu0 %v4294_v60 }
 0x1e1   : > { %v3065_v3 = vld [vmem:[#allocation2 + $0x1f8] sm:$0xff]  ;;  %v3064_v51 = vld [vmem:[#allocation2 + $0x1f0] sm:$0xff] }
 0x1e2   : > { %v4470_v47 = vld [vmem:[#allocation2 + $0x1f4] ss:$8 sps:$4 sm:$0xff]   ;;  %v4326_v6 = vcombine.low %v3064_v51, %v3065_v3  ;;  %v3595_v24 = vpop.f32.mrf.mxu0 }
 0x1e3   : > { %3801 = vmatprep.mubr.bf16.mxu1 %v4470_v47  ;;  %v3596_v25 = vadd.f32 %v5667_v38, %v3595_v24 }
 0x1e4   : > { %3802 = vmatmul.mubr.bf16.gmra.mxu1 %v4326_v6  ;;  %v3597_v32 = vpop.f32.mrf.mxu0 }
 0x1e5   : > { %v3820_v62 = vmax.f32 %v3596_v25, 0.0 }
 0x1e6   : > { %v3598_v26 = vpop.f32.mrf.mxu0 }
 0x1e7   : > { %v3884_v16 = vpack.c.bf16 %v3820_v62, %v3820_v62  ;;  %v3599_v27 = vadd.f32 %v5667_v38, %v3598_v26 }
 0x1e8   : > { %v3600_v28 = vpop.f32.mrf.mxu0 }
 0x1e9   : > { %3949 = vst.msk [vmem:[%s5676_s5 + $0x28] sm:$0xf] %vm3938_vm5, %v3884_v16  ;;  %v3821_v21 = vmax.f32 %v3599_v27, 0.0 }
 0x1ea   : > { %v3723_v29 = vpop.f32.mrf.mxu1 }
 0x1eb   : > { %v3724_v31 = vadd.f32 %v5667_v38, %v3723_v29  ;;  %v3885_v34 = vpack.c.bf16 %v3821_v21, %v3821_v21 }
 0x1ec   : > { %v3725_v35 = vpop.f32.mrf.mxu1 }
 0x1ed   : > { %v3852_v23 = vmax.f32 %v3724_v31, 0.0  ;;  %3950 = vst.msk [vmem:[%s5676_s5 + $0x2c] sm:$0xf] %vm3938_vm5, %v3885_v34 }
 0x1ee   : > { %v3726_v33 = vpop.f32.mrf.mxu1 }
 0x1ef   : > { %v3916_v37 = vpack.c.bf16 %v3852_v23, %v3852_v23  ;;  %v3727_v39 = vadd.f32 %v5667_v38, %v3726_v33 }
 0x1f0   : > { %v3728_v40 = vpop.f32.mrf.mxu1 }
 0x1f1   : > { %3981 = vst.msk [vmem:[%s5676_s5 + $0xa8] sm:$0xf] %vm3938_vm5, %v3916_v37  ;;  %v3853_v41 = vmax.f32 %v3727_v39, 0.0 }
 0x1f3   : > { %v3917_v43 = vpack.c.bf16 %v3853_v41, %v3853_v41 }
 0x1f5   : > { %3982 = vst.msk [vmem:[%s5676_s5 + $0xac] sm:$0xf] %vm3938_vm5, %v3917_v43 }
 0x1fb   : > { %v3603_v44 = vpop.f32.mrf.mxu0 }
 0x1fc   : > { %v3604_v45 = vadd.f32 %v5667_v38, %v3603_v44 }
 0x1fd   : > { %v3605_v46 = vpop.f32.mrf.mxu0 }
 0x1fe   : > { %v3822_v30 = vmax.f32 %v3604_v45, 0.0 }
 0x1ff   : > { %v3606_v48 = vpop.f32.mrf.mxu0 }
 0x200   : > { %v3886_v50 = vpack.c.bf16 %v3822_v30, %v3822_v30  ;;  %v3607_v52 = vadd.f32 %v5667_v38, %v3606_v48 }
 0x201   : > { %v3731_v49 = vpop.f32.mrf.mxu1  ;;  %v3608_v53 = vpop.f32.mrf.mxu0 }
 0x202   : > { %v3732_v17 = vadd.f32 %v5667_v38, %v3731_v49  ;;  %3951 = vst.msk [vmem:[%s5676_s5 + $0x30] sm:$0xf] %vm3938_vm5, %v3886_v50  ;;  %v3823_v55 = vmax.f32 %v3607_v52, 0.0 }
 0x203   : > { %v3733_v54 = vpop.f32.mrf.mxu1 }
 0x204   : > { %v3854_v56 = vmax.f32 %v3732_v17, 0.0  ;;  %v3887_v19 = vpack.c.bf16 %v3823_v55, %v3823_v55 }
 0x205   : > { %v3734_v0 = vpop.f32.mrf.mxu1 }
 0x206   : > { %v3918_v42 = vpack.c.bf16 %v3854_v56, %v3854_v56  ;;  %v3735_v59 = vadd.f32 %v5667_v38, %v3734_v0  ;;  %3952 = vst.msk [vmem:[%s5676_s5 + $0x34] sm:$0xf] %vm3938_vm5, %v3887_v19 }
 0x207   : > { %v3736_v36 = vpop.f32.mrf.mxu1 }
 0x208   : > { %3983 = vst.msk [vmem:[%s5676_s5 + $0xb0] sm:$0xf] %vm3938_vm5, %v3918_v42  ;;  %v3855_v60 = vmax.f32 %v3735_v59, 0.0 }
 0x20a   : > { %v3919_v61 = vpack.c.bf16 %v3855_v60, %v3855_v60 }
 0x20c   : > { %3984 = vst.msk [vmem:[%s5676_s5 + $0xb4] sm:$0xf] %vm3938_vm5, %v3919_v61 }
 0x216   : > { %v3611_v63 = vpop.f32.mrf.mxu0 }
 0x217   : > { %v3612_v2 = vadd.f32 %v5667_v38, %v3611_v63 }
 0x218   : > { %v3613_v3 = vpop.f32.mrf.mxu0 }
 0x219   : > { %v3824_v4 = vmax.f32 %v3612_v2, 0.0 }
 0x21a   : > { %v3614_v51 = vpop.f32.mrf.mxu0 }
 0x21b   : > { %v3739_v47 = vpop.f32.mrf.mxu1  ;;  %v3888_v1 = vpack.c.bf16 %v3824_v4, %v3824_v4  ;;  %v3615_v6 = vadd.f32 %v5667_v38, %v3614_v51 }
 0x21c   : > { %v3740_v57 = vadd.f32 %v5667_v38, %v3739_v47  ;;  %v3616_v7 = vpop.f32.mrf.mxu0 }
 0x21d   : > { %v3741_v9 = vpop.f32.mrf.mxu1  ;;  %3953 = vst.msk [vmem:[%s5676_s5 + $0x38] sm:$0xf] %vm3938_vm5, %v3888_v1  ;;  %v3825_v10 = vmax.f32 %v3615_v6, 0.0 }
 0x21e   : > { %v3856_v8 = vmax.f32 %v3740_v57, 0.0 }
 0x21f   : > { %v3742_v12 = vpop.f32.mrf.mxu1  ;;  %v3889_v13 = vpack.c.bf16 %v3825_v10, %v3825_v10 }
 0x220   : > { %v3920_v14 = vpack.c.bf16 %v3856_v8, %v3856_v8  ;;  %v3743_v58 = vadd.f32 %v5667_v38, %v3742_v12 }
 0x221   : > { %v3744_v15 = vpop.f32.mrf.mxu1  ;;  %3954 = vst.msk [vmem:[%s5676_s5 + $0x3c] sm:$0xf] %vm3938_vm5, %v3889_v13 }
 0x222   : > { %3985 = vst.msk [vmem:[%s5676_s5 + $0xb8] sm:$0xf] %vm3938_vm5, %v3920_v14  ;;  %v3857_v11 = vmax.f32 %v3743_v58, 0.0 }
 0x224   : > { %v3921_v18 = vpack.c.bf16 %v3857_v11, %v3857_v11 }
 0x226   : > { %3986 = vst.msk [vmem:[%s5676_s5 + $0xbc] sm:$0xf] %vm3938_vm5, %v3921_v18 }
 0x22a   : > { %v3619_v5 = vpop.f32.mrf.mxu0 }
 0x22b   : > { %v3620_v20 = vadd.f32 %v5667_v38, %v3619_v5 }
 0x22c   : > { %v3621_v22 = vpop.f32.mrf.mxu0 }
 0x22d   : > { %v3826_v24 = vmax.f32 %v3620_v20, 0.0 }
 0x22e   : > { %v3622_v25 = vpop.f32.mrf.mxu0 }
 0x22f   : > { %v3890_v62 = vpack.c.bf16 %v3826_v24, %v3826_v24  ;;  %v3623_v26 = vadd.f32 %v5667_v38, %v3622_v25 }
 0x230   : > { %v3624_v27 = vpop.f32.mrf.mxu0 }
 0x231   : > { %3955 = vst.msk [vmem:[%s5676_s5 + $0x40] sm:$0xf] %vm3938_vm5, %v3890_v62  ;;  %v3827_v21 = vmax.f32 %v3623_v26, 0.0 }
 0x232   : > { %v3747_v32 = vpop.f32.mrf.mxu1 }
 0x233   : > { %v3748_v16 = vadd.f32 %v5667_v38, %v3747_v32  ;;  %v3891_v35 = vpack.c.bf16 %v3827_v21, %v3827_v21 }
 0x234   : > { %v3749_v28 = vpop.f32.mrf.mxu1 }
 0x235   : > { %v3858_v29 = vmax.f32 %v3748_v16, 0.0  ;;  %3956 = vst.msk [vmem:[%s5676_s5 + $0x44] sm:$0xf] %vm3938_vm5, %v3891_v35 }
 0x236   : > { %v3750_v31 = vpop.f32.mrf.mxu1 }
 0x237   : > { %v3922_v23 = vpack.c.bf16 %v3858_v29, %v3858_v29  ;;  %v3751_v33 = vadd.f32 %v5667_v38, %v3750_v31 }
 0x238   : > { %v3627_v34 = vpop.f32.mrf.mxu0  ;;  %v3752_v39 = vpop.f32.mrf.mxu1 }
 0x239   : > { %v3628_v37 = vadd.f32 %v5667_v38, %v3627_v34  ;;  %3987 = vst.msk [vmem:[%s5676_s5 + $0xc0] sm:$0xf] %vm3938_vm5, %v3922_v23  ;;  %v3859_v41 = vmax.f32 %v3751_v33, 0.0 }
 0x23a   : > { %v3629_v40 = vpop.f32.mrf.mxu0 }
 0x23b   : > { %v3828_v43 = vmax.f32 %v3628_v37, 0.0  ;;  %v3923_v46 = vpack.c.bf16 %v3859_v41, %v3859_v41 }
 0x23c   : > { %v3630_v44 = vpop.f32.mrf.mxu0 }
 0x23d   : > { %v3755_v45 = vpop.f32.mrf.mxu1  ;;  %v3892_v30 = vpack.c.bf16 %v3828_v43, %v3828_v43  ;;  %v3631_v48 = vadd.f32 %v5667_v38, %v3630_v44  ;;  %3988 = vst.msk [vmem:[%s5676_s5 + $0xc4] sm:$0xf] %vm3938_vm5, %v3923_v46 }
 0x23e   : > { %v3756_v49 = vadd.f32 %v5667_v38, %v3755_v45  ;;  %v3632_v50 = vpop.f32.mrf.mxu0 }
 0x23f   : > { %v3757_v52 = vpop.f32.mrf.mxu1  ;;  %3957 = vst.msk [vmem:[%s5676_s5 + $0x48] sm:$0xf] %vm3938_vm5, %v3892_v30  ;;  %v3829_v17 = vmax.f32 %v3631_v48, 0.0 }
 0x240   : > { %v3860_v53 = vmax.f32 %v3756_v49, 0.0 }
 0x241   : > { %v3758_v54 = vpop.f32.mrf.mxu1  ;;  %v3893_v55 = vpack.c.bf16 %v3829_v17, %v3829_v17 }
 0x242   : > { %v3924_v56 = vpack.c.bf16 %v3860_v53, %v3860_v53  ;;  %v3759_v0 = vadd.f32 %v5667_v38, %v3758_v54 }
 0x243   : > { %v3760_v19 = vpop.f32.mrf.mxu1  ;;  %3958 = vst.msk [vmem:[%s5676_s5 + $0x4c] sm:$0xf] %vm3938_vm5, %v3893_v55 }
 0x244   : > { %3989 = vst.msk [vmem:[%s5676_s5 + $0xc8] sm:$0xf] %vm3938_vm5, %v3924_v56  ;;  %v3861_v42 = vmax.f32 %v3759_v0, 0.0 }
 0x246   : > { %v3925_v59 = vpack.c.bf16 %v3861_v42, %v3861_v42 }
 0x248   : > { %3990 = vst.msk [vmem:[%s5676_s5 + $0xcc] sm:$0xf] %vm3938_vm5, %v3925_v59 }
 0x251   : > { %v3635_v36 = vpop.f32.mrf.mxu0 }
 0x252   : > { %v3636_v60 = vadd.f32 %v5667_v38, %v3635_v36 }
 0x253   : > { %v3637_v61 = vpop.f32.mrf.mxu0 }
 0x254   : > { %v3830_v63 = vmax.f32 %v3636_v60, 0.0 }
 0x255   : > { %v3638_v2 = vpop.f32.mrf.mxu0 }
 0x256   : > { %v3894_v3 = vpack.c.bf16 %v3830_v63, %v3830_v63  ;;  %v3639_v4 = vadd.f32 %v5667_v38, %v3638_v2 }
 0x257   : > { %v3640_v1 = vpop.f32.mrf.mxu0 }
 0x258   : > { %v3763_v51 = vpop.f32.mrf.mxu1  ;;  %3959 = vst.msk [vmem:[%s5676_s5 + $0x50] sm:$0xf] %vm3938_vm5, %v3894_v3  ;;  %v3831_v6 = vmax.f32 %v3639_v4, 0.0 }
 0x259   : > { %v3764_v47 = vadd.f32 %v5667_v38, %v3763_v51 }
 0x25a   : > { %v3765_v57 = vpop.f32.mrf.mxu1  ;;  %v3895_v9 = vpack.c.bf16 %v3831_v6, %v3831_v6 }
 0x25b   : > { %v3862_v7 = vmax.f32 %v3764_v47, 0.0 }
 0x25c   : > { %v3766_v10 = vpop.f32.mrf.mxu1  ;;  %3960 = vst.msk [vmem:[%s5676_s5 + $0x54] sm:$0xf] %vm3938_vm5, %v3895_v9  ;;  %v3643_v15 = vpop.f32.mrf.mxu0 }
 0x25d   : > { %v3926_v8 = vpack.c.bf16 %v3862_v7, %v3862_v7  ;;  %v3767_v12 = vadd.f32 %v5667_v38, %v3766_v10  ;;  %v3644_v11 = vadd.f32 %v5667_v38, %v3643_v15 }
 0x25e   : > { %v3768_v13 = vpop.f32.mrf.mxu1  ;;  %v3645_v18 = vpop.f32.mrf.mxu0 }
 0x25f   : > { %3991 = vst.msk [vmem:[%s5676_s5 + $0xd0] sm:$0xf] %vm3938_vm5, %v3926_v8  ;;  %v3863_v14 = vmax.f32 %v3767_v12, 0.0  ;;  %v3832_v5 = vmax.f32 %v3644_v11, 0.0 }
 0x260   : > { %v3646_v20 = vpop.f32.mrf.mxu0  ;;  %v3771_v25 = vpop.f32.mrf.mxu1 }
 0x261   : > { %v3927_v58 = vpack.c.bf16 %v3863_v14, %v3863_v14  ;;  %v3896_v22 = vpack.c.bf16 %v3832_v5, %v3832_v5  ;;  %v3647_v24 = vadd.f32 %v5667_v38, %v3646_v20  ;;  %v3772_v32 = vadd.f32 %v5667_v38, %v3771_v25 }
 0x262   : > { %v3648_v62 = vpop.f32.mrf.mxu0  ;;  %v3773_v16 = vpop.f32.mrf.mxu1 }
 0x263   : > { %3992 = vst.msk [vmem:[%s5676_s5 + $0xd4] sm:$0xf] %vm3938_vm5, %v3927_v58  ;;  %3961 = vst.msk [vmem:[%s5676_s5 + $0x58] sm:$0xf] %vm3938_vm5, %v3896_v22  ;;  %v3833_v26 = vmax.f32 %v3647_v24, 0.0  ;;  %v3864_v27 = vmax.f32 %v3772_v32, 0.0 }
 0x264   : > { %v3774_v21 = vpop.f32.mrf.mxu1  ;;  %v3651_v33 = vpop.f32.mrf.mxu0 }
 0x265   : > { %v3897_v28 = vpack.c.bf16 %v3833_v26, %v3833_v26  ;;  %v3928_v29 = vpack.c.bf16 %v3864_v27, %v3864_v27  ;;  %v3775_v31 = vadd.f32 %v5667_v38, %v3774_v21  ;;  %v3652_v37 = vadd.f32 %v5667_v38, %v3651_v33 }
 0x266   : > { %v3776_v34 = vpop.f32.mrf.mxu1  ;;  %v3653_v39 = vpop.f32.mrf.mxu0 }
 0x267   : > { %3962 = vst.msk [vmem:[%s5676_s5 + $0x5c] sm:$0xf] %vm3938_vm5, %v3897_v28  ;;  %3993 = vst.msk [vmem:[%s5676_s5 + $0xd8] sm:$0xf] %vm3938_vm5, %v3928_v29  ;;  %v3865_v35 = vmax.f32 %v3775_v31, 0.0  ;;  %v3834_v40 = vmax.f32 %v3652_v37, 0.0 }
 0x268   : > { %v3654_v41 = vpop.f32.mrf.mxu0  ;;  %v3779_v45 = vpop.f32.mrf.mxu1 }
 0x269   : > { %v3929_v23 = vpack.c.bf16 %v3865_v35, %v3865_v35  ;;  %v3898_v43 = vpack.c.bf16 %v3834_v40, %v3834_v40  ;;  %v3655_v44 = vadd.f32 %v5667_v38, %v3654_v41  ;;  %v3780_v46 = vadd.f32 %v5667_v38, %v3779_v45 }
 0x26a   : > { %v3656_v30 = vpop.f32.mrf.mxu0  ;;  %v3781_v49 = vpop.f32.mrf.mxu1 }
 0x26b   : > { %3994 = vst.msk [vmem:[%s5676_s5 + $0xdc] sm:$0xf] %vm3938_vm5, %v3929_v23  ;;  %3963 = vst.msk [vmem:[%s5676_s5 + $0x60] sm:$0xf] %vm3938_vm5, %v3898_v43  ;;  %v3835_v48 = vmax.f32 %v3655_v44, 0.0  ;;  %v3866_v50 = vmax.f32 %v3780_v46, 0.0 }
 0x26c   : > { %v3782_v17 = vpop.f32.mrf.mxu1 }
 0x26d   : > { %v3899_v52 = vpack.c.bf16 %v3835_v48, %v3835_v48  ;;  %v3930_v53 = vpack.c.bf16 %v3866_v50, %v3866_v50  ;;  %v3783_v54 = vadd.f32 %v5667_v38, %v3782_v17 }
 0x26e   : > { %v3784_v55 = vpop.f32.mrf.mxu1  ;;  %v3659_v19 = vpop.f32.mrf.mxu0 }
 0x26f   : > { %3964 = vst.msk [vmem:[%s5676_s5 + $0x64] sm:$0xf] %vm3938_vm5, %v3899_v52  ;;  %3995 = vst.msk [vmem:[%s5676_s5 + $0xe0] sm:$0xf] %vm3938_vm5, %v3930_v53  ;;  %v3867_v56 = vmax.f32 %v3783_v54, 0.0  ;;  %v3660_v42 = vadd.f32 %v5667_v38, %v3659_v19 }
 0x270   : > { %v3661_v59 = vpop.f32.mrf.mxu0 }
 0x271   : > { %v3931_v0 = vpack.c.bf16 %v3867_v56, %v3867_v56  ;;  %v3836_v36 = vmax.f32 %v3660_v42, 0.0 }
 0x272   : > { %v3662_v60 = vpop.f32.mrf.mxu0 }
 0x273   : > { %3996 = vst.msk [vmem:[%s5676_s5 + $0xe4] sm:$0xf] %vm3938_vm5, %v3931_v0  ;;  %v3900_v61 = vpack.c.bf16 %v3836_v36, %v3836_v36  ;;  %v3663_v63 = vadd.f32 %v5667_v38, %v3662_v60 }
 0x274   : > { %v3787_v2 = vpop.f32.mrf.mxu1  ;;  %v3664_v4 = vpop.f32.mrf.mxu0 }
 0x275   : > { %v3788_v3 = vadd.f32 %v5667_v38, %v3787_v2  ;;  %3965 = vst.msk [vmem:[%s5676_s5 + $0x68] sm:$0xf] %vm3938_vm5, %v3900_v61  ;;  %v3837_v51 = vmax.f32 %v3663_v63, 0.0 }
 0x276   : > { %v3789_v47 = vpop.f32.mrf.mxu1 }
 0x277   : > { %v3868_v1 = vmax.f32 %v3788_v3, 0.0  ;;  %v3901_v6 = vpack.c.bf16 %v3837_v51, %v3837_v51 }
 0x278   : > { %v3790_v57 = vpop.f32.mrf.mxu1 }
 0x279   : > { %v3932_v7 = vpack.c.bf16 %v3868_v1, %v3868_v1  ;;  %v3791_v9 = vadd.f32 %v5667_v38, %v3790_v57  ;;  %3966 = vst.msk [vmem:[%s5676_s5 + $0x6c] sm:$0xf] %vm3938_vm5, %v3901_v6 }
 0x27a   : > { %v3792_v10 = vpop.f32.mrf.mxu1 }
 0x27b   : > { %3997 = vst.msk [vmem:[%s5676_s5 + $0xe8] sm:$0xf] %vm3938_vm5, %v3932_v7  ;;  %v3869_v8 = vmax.f32 %v3791_v9, 0.0 }
 0x27d   : > { %v3933_v12 = vpack.c.bf16 %v3869_v8, %v3869_v8 }
 0x27f   : > { %3998 = vst.msk [vmem:[%s5676_s5 + $0xec] sm:$0xf] %vm3938_vm5, %v3933_v12 }
 0x285   : > { %v3667_v13 = vpop.f32.mrf.mxu0 }
 0x286   : > { %v3668_v14 = vadd.f32 %v5667_v38, %v3667_v13 }
 0x287   : > { %v3669_v58 = vpop.f32.mrf.mxu0 }
 0x288   : > { %v3838_v15 = vmax.f32 %v3668_v14, 0.0 }
 0x289   : > { %v3670_v11 = vpop.f32.mrf.mxu0 }
 0x28a   : > { %v3902_v18 = vpack.c.bf16 %v3838_v15, %v3838_v15  ;;  %v3671_v5 = vadd.f32 %v5667_v38, %v3670_v11 }
 0x28b   : > { %v3795_v20 = vpop.f32.mrf.mxu1  ;;  %v3672_v24 = vpop.f32.mrf.mxu0 }
 0x28c   : > { %v3796_v22 = vadd.f32 %v5667_v38, %v3795_v20  ;;  %3967 = vst.msk [vmem:[%s5676_s5 + $0x70] sm:$0xf] %vm3938_vm5, %v3902_v18  ;;  %v3839_v25 = vmax.f32 %v3671_v5, 0.0 }
 0x28d   : > { %v3797_v32 = vpop.f32.mrf.mxu1 }
 0x28e   : > { %v3870_v62 = vmax.f32 %v3796_v22, 0.0  ;;  %v3903_v26 = vpack.c.bf16 %v3839_v25, %v3839_v25 }
 0x28f   : > { %v3798_v16 = vpop.f32.mrf.mxu1 }
 0x290   : > { %v3934_v27 = vpack.c.bf16 %v3870_v62, %v3870_v62  ;;  %v3799_v28 = vadd.f32 %v5667_v38, %v3798_v16  ;;  %3968 = vst.msk [vmem:[%s5676_s5 + $0x74] sm:$0xf] %vm3938_vm5, %v3903_v26 }
 0x291   : > { %v3800_v21 = vpop.f32.mrf.mxu1 }
 0x292   : > { %3999 = vst.msk [vmem:[%s5676_s5 + $0xf0] sm:$0xf] %vm3938_vm5, %v3934_v27  ;;  %v3871_v29 = vmax.f32 %v3799_v28, 0.0 }
 0x294   : > { %v3935_v31 = vpack.c.bf16 %v3871_v29, %v3871_v29 }
 0x296   : > { %4000 = vst.msk [vmem:[%s5676_s5 + $0xf4] sm:$0xf] %vm3938_vm5, %v3935_v31 }
 0x29e   : > { %v3675_v34 = vpop.f32.mrf.mxu0 }
 0x29f   : > { %v3676_v35 = vadd.f32 %v5667_v38, %v3675_v34 }
 0x2a0   : > { %v3677_v23 = vpop.f32.mrf.mxu0 }
 0x2a1   : > { %v3840_v33 = vmax.f32 %v3676_v35, 0.0 }
 0x2a2   : > { %v3678_v37 = vpop.f32.mrf.mxu0 }
 0x2a3   : > { %v3904_v39 = vpack.c.bf16 %v3840_v33, %v3840_v33  ;;  %v3679_v40 = vadd.f32 %v5667_v38, %v3678_v37 }
 0x2a4   : > { %v3803_v41 = vpop.f32.mrf.mxu1  ;;  %v3680_v44 = vpop.f32.mrf.mxu0 }
 0x2a5   : > { %v3804_v43 = vadd.f32 %v5667_v38, %v3803_v41  ;;  %3969 = vst.msk [vmem:[%s5676_s5 + $0x78] sm:$0xf] %vm3938_vm5, %v3904_v39  ;;  %v3841_v45 = vmax.f32 %v3679_v40, 0.0 }
 0x2a6   : > { %v3805_v46 = vpop.f32.mrf.mxu1 }
 0x2a7   : > { %v3872_v30 = vmax.f32 %v3804_v43, 0.0  ;;  %v3905_v48 = vpack.c.bf16 %v3841_v45, %v3841_v45 }
 0x2a8   : > { %v3806_v49 = vpop.f32.mrf.mxu1 }
 0x2a9   : > { %v3936_v50 = vpack.c.bf16 %v3872_v30, %v3872_v30  ;;  %v3807_v52 = vadd.f32 %v5667_v38, %v3806_v49  ;;  %3970 = vst.msk [vmem:[%s5676_s5 + $0x7c] sm:$0xf] %vm3938_vm5, %v3905_v48 }
 0x2aa   : > { %v3808_v17 = vpop.f32.mrf.mxu1 }
 0x2ab   : > { %4001 = vst.msk [vmem:[%s5676_s5 + $0xf8] sm:$0xf] %vm3938_vm5, %v3936_v50  ;;  %v3873_v53 = vmax.f32 %v3807_v52, 0.0 }
 0x2ad   : > { %v3937_v54 = vpack.c.bf16 %v3873_v53, %v3873_v53 }
 0x2af   : > { %4002 = vst.msk [vmem:[%s5676_s5 + $0xfc] sm:$0xf] %vm3938_vm5, %v3937_v54 }
 0x2b0 PF: > { %s13_s12 = sadd.s32 1, %s4478_s12  }
 0x2b1   : > { %p10_p4 = scmp.ge.s32.totalorder %s13_s12, 4  }
 0x2b3   :  { %12 = sbr.rel (!%p10_p4) target bundleno = 1 (0x1), region = 63 }

// kernel: nature_cnn_forward.3
= control target key start
LH: loop header
LB: loop body
LE: loop exit
PB: predicated region body
PF: predicated region fallthrough
CT: control target
= control target key end

     0   :  { %20 = vsyncpa [#allocation7], 0  ;;  %s12412_s0 = inlined_call_operand.vmem [shape: bf16[16,4,4,128], index: 0, kind: input, shape index: {}]   ;;  %s12413_s1 = inlined_call_operand.vmem [shape: bf16[16,22], index: 1, kind: input, shape index: {}]   ;;  %s12414_s2 = inlined_call_operand.vmem [shape: bf16[512,64], index: 2, kind: input, shape index: {}]   ;;  %s12415_s3 = inlined_call_operand.vmem [shape: f32[1,64], index: 3, kind: input, shape index: {}]   ;;  %s12416_s4 = inlined_call_operand.vmem [shape: bf16[576,64], index: 4, kind: input, shape index: {}]   ;;  %s12417_s5 = inlined_call_operand.vmem [shape: f32[1,64], index: 5, kind: input, shape index: {}]   ;;  %s12418_s6 = inlined_call_operand.vmem [shape: bf16[22,512], index: 6, kind: input, shape index: {}]   ;;  %s12419_s7 = inlined_call_operand.vmem [shape: f32[1,512], index: 7, kind: input, shape index: {}]   ;;  %s12420_s8 = inlined_call_operand.vmem [shape: bf16[512,512], index: 8, kind: input, shape index: {}]   ;;  %s12421_s9 = inlined_call_operand.vmem [shape: f32[1,512], index: 9, kind: input, shape index: {}]   ;;  %s12422_s10 = inlined_call_operand.vmem [shape: bf16[64,512], index: 10, kind: input, shape index: {}]   ;;  %s12423_s11 = inlined_call_operand.vmem [shape: bf16[512,512], index: 11, kind: input, shape index: {}]   ;;  %s12424_s12 = inlined_call_operand.vmem [shape: f32[1,512], index: 12, kind: input, shape index: {}]   ;;  %s12425_s13 = inlined_call_operand.vmem [shape: bf16[512,128], index: 13, kind: input, shape index: {}]   ;;  %s12426_s14 = inlined_call_operand.vmem [shape: f32[1,128], index: 14, kind: input, shape index: {}]   ;;  %s12427_s15 = inlined_call_operand.hbm [shape: f32[16,128], index: 15, kind: output, shape index: {}]  }
   0x1   :  { %22 = vsyncpa [#allocation7 + $0x1], 0  ;;  %s10230_s18 = smov 0   ;;  %s10232_s19 = smov 0  }
   0x2   :  { %s10234_s20 = smov 0   ;;  %s10236_s21 = smov 0  }
   0x3 LB: > { %12440 = sst [smem:[#allocation9_spill]] %s10129_s18  ;;  %s10251_s22 = sadd.s32 4294967295, %s10141_s21   ;;  %s10141_s21 = sphi %s10236_s21, %s12460_s21   ;;  %s10137_s20 = sphi %s10234_s20, %s12462_s20   ;;  %s10133_s19 = sphi %s10232_s19, %s12464_s19   ;;  %s10129_s18 = sphi %s10230_s18, %s12463_s18  }
   0x4   : > { %12441 = sst [smem:[#allocation10_spill]] %s10137_s20  ;;  %s8533_s23 = sadd.s32 4294967294, %s10141_s21  }
   0x5   : > { %12442 = sst [smem:[#allocation11_spill]] %s10141_s21  ;;  %s10255_s24 = sadd.s32 1, %s10141_s21  }
   0x6   : > { %12443 = sst [smem:[#allocation12_spill]] %s10255_s24  ;;  %s360_s25 = sadd.s32 1, %s10137_s20 }
   0x7   : > { %s357_s26 = ssub.s32 %s10141_s21, %s10255_s24  ;;  %p370_p0 = scmp.ne.s32.totalorder %s10137_s20, %s10133_s19 }
   0x8   : > { %p358_p1 = scmp.eq.s32.totalorder %s357_s26, 0  ;;  %p371_p2 = scmp.eq.s32.totalorder %s10251_s22, 1 }
   0x9   : > { %p376_p3 = scmp.ne.s32.totalorder %s10133_s19, %s10129_s18  ;;  %p377_p4 = scmp.eq.s32.totalorder %s8533_s23, 1 }
   0xa   : > { %s10266_s27 = scalar_select %p358_p1, %s10137_s20, %s360_s25  }
   0xb   : > { %p10268_p5 = por %p371_p2, %p370_p0  ;;  %p10272_p6 = por %p377_p4, %p376_p3 }
   0xc   : > { %12444 = sst [smem:[#allocation13_spill]] %s10266_s27  ;;  %p8536_p7 = scmp.ge.s32.totalorder %s10141_s21, 1 }
   0xd   : > { %s12446_s29 = scalar_select %p10272_p6, 1, 0 }
   0xe   : > { %p451_p8 = scmp.lt.s32.totalorder %s10141_s21, 3 }
   0xf   : > { %12447 = sst [smem:[#allocation14_spill]] %s12446_s29 }
  0x10   : > { %p452_p9 = pnand %p8536_p7, %p451_p8 }
  0x11   : > { %s8538_s17 = sshll.u32 (!%p452_p9), %s10251_s22, 3  ;;  %s10145_s16 = smov (!%p452_p9), 64  }
  0x12   : > { %455 = sbr.rel (%p452_p9) target bundleno = 1491 (0x5d3), region = 80  ;;  %p505_p10 = scmp.lt.s32.totalorder (!%p452_p9), %s8538_s17, 15 }
  0x13   : > { %p511_p11 = scmp.lt.s32.totalorder (!%p452_p9), %s10251_s22, 1 }
  0x17   : > { %v9534_v0 = vld [vmem:[%s12414_s2 + $0x78] sm:$0xff]   ;;  %v9538_v4 = vld [vmem:[%s12414_s2 + $0x70] sm:$0xff]   ;;  %v9542_v8 = vld [vmem:[%s12414_s2 + $0x68] sm:$0xff]   ;;  %s12466_s17 = smov (!%p505_p10, %s8538_s17), 15  ;;  %v869_v30 = vlaneseq  ;;  %v10143_v36 = vmov 1935823168  }
  0x18   : > { %v9535_v1 = vld [vmem:[%s12414_s2 + $0xf8] sm:$0xff]   ;;  %9292 = vmatprep.subr.bf16.mxu0 %v9534_v0  ;;  %v9539_v5 = vld [vmem:[%s12414_s2 + $0xf0] sm:$0xff]   ;;  %v9543_v9 = vld [vmem:[%s12414_s2 + $0xe8] sm:$0xff]   ;;  %s9291_s27 = sshll.u32 %s12466_s17, 3  ;;  %v867_v37 = vunpack.c.l.s4 %v10143_v36  ;;  %vm4423_vm0 = vcmask 517120   ;;  %vm4579_vm3 = vcmask 1041409  }
  0x19   : > { %v9536_v2 = vld [vmem:[%s12414_s2 + $0x38] sm:$0xff]   ;;  %9338 = vmatprep.subr.bf16.mxu1 %v9535_v1  ;;  %v9540_v6 = vld [vmem:[%s12414_s2 + $0x30] sm:$0xff]   ;;  %v9544_v10 = vld [vmem:[%s12414_s2 + $0x28] sm:$0xff]   ;;  %s10372_s26 = scalar_lea.vmem %s12412_s0, %s9291_s27  ;;  %v10384_v38 = vshrl.u32 %v869_v30, 7  ;;  %vm4424_vm1 = vsmask.f32 1280 }
  0x1a   : > { %v9537_v3 = vld [vmem:[%s12414_s2 + $0xb8] sm:$0xff]   ;;  %9293 = vmatpush3.bf16.msra.mxu0 %v9536_v2  ;;  %v9541_v7 = vld [vmem:[%s12414_s2 + $0xb0] sm:$0xff]   ;;  %v9545_v11 = vld [vmem:[%s12414_s2 + $0xa8] sm:$0xff]   ;;  %v868_v46 = vunpack.c.0.s8 %v867_v37  ;;  %vm4582_vm4 = vcmask 1042434   ;;  %vm4585_vm5 = vcmask 1043459   ;;  %vm4588_vm6 = vcmask 1044484  }
  0x1b   : > { %9339 = vmatpush3.bf16.msra.mxu1 %v9537_v3  ;;  %9294 = vmatprep.subr.bf16.mxu0 %v9538_v4  ;;  %v9546_v12 = vld [vmem:[%s12414_s2 + $0x60] sm:$0xff]   ;;  %v9550_v16 = vld [vmem:[%s12414_s2 + $0x58] sm:$0xff]   ;;  %v9554_v20 = vld [vmem:[%s12414_s2 + $0x50] sm:$0xff]   ;;  %vm4591_vm7 = vcmask 1045509   ;;  %vm4594_vm8 = vcmask 1046534   ;;  %vm4597_vm9 = vcmask 1047559  }
  0x1c   : > { %9340 = vmatprep.subr.bf16.mxu1 %v9539_v5  ;;  %v9547_v13 = vld [vmem:[%s12414_s2 + $0xe0] sm:$0xff]   ;;  %v9551_v17 = vld [vmem:[%s12414_s2 + $0xd8] sm:$0xff]   ;;  %v9555_v21 = vld [vmem:[%s12414_s2 + $0xd0] sm:$0xff]   ;;  %v10417_v57 = vsub.s32 %v868_v46, %v10384_v38  ;;  %vm4601_vm10 = vcmask 519168   ;;  %vm5895_vm11 = vcmask 1042432   ;;  %vm4701_vm12 = vcmask 1043968  }
  0x1d   : > { %v9548_v14 = vld [vmem:[%s12414_s2 + $0x20] sm:$0xff]   ;;  %v9552_v18 = vld [vmem:[%s12414_s2 + $0x18] sm:$0xff]   ;;  %v9556_v22 = vld [vmem:[%s12414_s2 + $0x10] sm:$0xff]   ;;  %s512_s24 = scalar_select %p511_p11, %s10251_s22, 1  ;;  %vm10148_vm13 = vmmov 0   ;;  %vm5891_vm14 = vcmask 179200  }
  0x1e   : > { %9295 = vmatpush3.bf16.msra.mxu0 %v9540_v6  ;;  %v9549_v15 = vld [vmem:[%s12414_s2 + $0xa0] sm:$0xff]   ;;  %v9553_v19 = vld [vmem:[%s12414_s2 + $0x98] sm:$0xff]   ;;  %v9557_v23 = vld [vmem:[%s12414_s2 + $0x90] sm:$0xff]   ;;  %vm5705_vm15 = vcmask 523264  }
  0x1f   : > { %9341 = vmatpush3.bf16.msra.mxu1 %v9541_v7  ;;  %9296 = vmatprep.subr.bf16.mxu0 %v9542_v8  ;;  %v9558_v24 = vld [vmem:[%s12414_s2 + $0x48] sm:$0xff]   ;;  %v9562_v28 = vld [vmem:[%s12414_s2 + $0x40] sm:$0xff]   ;;  %vm10866_vm2 = vmand %vm4423_vm0, %vm4424_vm1  ;;  %s8541_s25 = sshll.u32 %s512_s24, 2  ;;  %s501_s24 = sand.u32 1, %s10133_s19  }
  0x20   : > { %9342 = vmatprep.subr.bf16.mxu1 %v9543_v9  ;;  %v9559_v25 = vld [vmem:[%s12414_s2 + $0xc8] sm:$0xff]   ;;  %v9563_v29 = vld [vmem:[%s12414_s2 + $0xc0] sm:$0xff]   ;;  %s514_s21 = scalar_lea.vmem %s12413_s1, %s8541_s25  ;;  %s8537_s27 = sshll.u32 %s501_s24, 3 }
  0x21   : > { %v9560_v26 = vld [vmem:[%s12414_s2 + $0x8] sm:$0xff]   ;;  %v9564_v31 = vld [vmem:[%s12414_s2] sm:$0xff]   ;;  %s503_s23 = scalar_lea.vmem [#allocation6], %s8537_s27  ;;  %s8449_s20 = scalar_lea.sflag [#allocation7], %s501_s24 }
  0x22   : > { %9297 = vmatpush3.bf16.msra.mxu0 %v9544_v10  ;;  %v9561_v27 = vld [vmem:[%s12414_s2 + $0x88] sm:$0xff]   ;;  %v9565_v32 = vld [vmem:[%s12414_s2 + $0x80] sm:$0xff]   ;;  %s8462_s25 = sshll.u32 %s503_s23, 4  ;;  %s8463_s25 = int_to_ptr.vmem [resolvable:$true] %s8462_s25 }
  0x23   : > { %9343 = vmatpush3.bf16.msra.mxu1 %v9545_v11  ;;  %9298 = vmatprep.subr.bf16.mxu0 %v9546_v12  ;;  %v8542_v33 = vld.sshfl [vmem:[%s10372_s26] sm:$0x11 pattern:$0x75316420] }
  0x24   : > { %9344 = vmatprep.subr.bf16.mxu1 %v9547_v13  ;;  %v10382_v34 = vld.sshfl [vmem:[%s10372_s26 + $0x2] sm:$0x11 pattern:$0x75316420]  ;;  %v571_v35 = vcombine.high %v8542_v33, %v8542_v33  ;;  %v1338_v42 = vunpack.i.h.s16 %v8542_v33 }
  0x25   : > { %v10387_v39 = vld.sshfl [vmem:[%s10372_s26 + $0x4] sm:$0x11 pattern:$0x75316420]  ;;  %v10391_v40 = vcombine.high %v10382_v34, %v10382_v34  ;;  %v760_v41 = vunpack.i.h.s16 %v10382_v34 }
  0x26   : > { %9299 = vmatpush3.bf16.msra.mxu0 %v9548_v14  ;;  %v8545_v43 = vld.sshfl [vmem:[%s10372_s26 + $0x8] sm:$0x11 pattern:$0x75316420]  ;;  %v10397_v44 = vcombine.high %v10387_v39, %v10387_v39  ;;  %v8566_v45 = vpack.i.b16 %v10382_v34, %v571_v35  ;;  %v1340_v47 = vunpack.i.h.s16 %v571_v35  ;;  %v1344_v52 = vunpack.i.h.s16 %v10387_v39 }
  0x27   : > { %9345 = vmatpush3.bf16.msra.mxu1 %v9549_v15  ;;  %9300 = vmatprep.subr.bf16.mxu0 %v9550_v16  ;;  %v10401_v48 = vld.sshfl [vmem:[%s10372_s26 + $0xa] sm:$0x11 pattern:$0x75316420]  ;;  %v595_v49 = vcombine.high %v8545_v43, %v8545_v43  ;;  %v766_v50 = vunpack.i.h.s16 %v8545_v43  ;;  %v10404_v51 = vpack.i.b16 %v10391_v40, %v760_v41  ;;  %v8623_v4 = vpack.i.b16 %v571_v35, %v1338_v42 }
  0x28   : > { %9346 = vmatprep.subr.bf16.mxu1 %v9551_v17  ;;  %v10408_v53 = vld.sshfl [vmem:[%s10372_s26 + $0xc] sm:$0x11 pattern:$0x75316420]  ;;  %v10412_v54 = vcombine.high %v10401_v48, %v10401_v48  ;;  %v8568_v55 = vpack.i.b16 %v8545_v43, %v10397_v44  ;;  %v865_v56 = vcombine.low %v8566_v45, %v10387_v39  ;;  %v1346_v0 = vunpack.i.h.s16 %v10397_v44 }
  0x29   : > { %v772_v58 = vunpack.i.h.s16 %v10408_v53  ;;  %v8569_v59 = vpack.i.b16 %v595_v49, %v766_v50  ;;  %v864_v60 = vcombine.low %v8542_v33, %v10404_v51  ;;  %v1350_v2 = vunpack.i.h.s16 %v10401_v48  ;;  %v8670_v9 = vld.sshfl [vmem:[%s10372_s26 + $0x6] sm:$0x11 pattern:$0x75316420] }
  0x2a   : > { %9301 = vmatpush3.bf16.msra.mxu0 %v9552_v18  ;;  %v8570_v61 = vpack.i.b16 %v10408_v53, %v10412_v54  ;;  %v879_v62 = vrot.slane %v865_v56, %v10417_v57  ;;  %v888_v63 = vcombine.low %v8568_v55, %v10401_v48  ;;  %v1352_v3 = vunpack.i.h.s16 %v10412_v54  ;;  %v10436_v17 = vld.sshfl [vmem:[%s10372_s26 + $0xe] sm:$0x11 pattern:$0x75316420] }
  0x2b   : > { %9347 = vmatpush3.bf16.msra.mxu1 %v9553_v19  ;;  %9302 = vmatprep.subr.bf16.mxu0 %v9554_v20  ;;  %v872_v1 = vrot.slane %v864_v60, %v10417_v57  ;;  %v1411_v7 = vpack.i.b16 %v760_v41, %v1340_v47  ;;  %v8624_v8 = vpack.i.b16 %v10397_v44, %v1344_v52  ;;  %v2505_v37 = vunpack.i.h.s16 %v10391_v40  ;;  %v10459_v42 = vld.sshfl [vmem:[%s10372_s26 + $0x10] sm:$0x11 pattern:$0x75316420] }
  0x2c   : > { %9348 = vmatprep.subr.bf16.mxu1 %v9555_v21  ;;  %v889_v5 = vcombine.low %v8569_v59, %v8570_v61  ;;  %v896_v6 = vrot.slane %v888_v63, %v10417_v57  ;;  %v1414_v11 = vpack.i.b16 %v766_v50, %v1346_v0  ;;  %v8625_v12 = vpack.i.b16 %v10412_v54, %v1350_v2  ;;  %v10464_v47 = vld.sshfl [vmem:[%s10372_s26 + $0x12] sm:$0x11 pattern:$0x75316420] }
  0x2d   : > { %v880_v10 = vcombine.low %v872_v1, %v879_v62  ;;  %v1417_v13 = vpack.i.b16 %v772_v58, %v1352_v3  ;;  %v1446_v15 = vcombine.low %v8623_v4, %v10391_v40  ;;  %v1447_v16 = vcombine.low %v1411_v7, %v8624_v8  ;;  %v10469_v50 = vld.sshfl [vmem:[%s10372_s26 + $0x14] sm:$0x11 pattern:$0x75316420] }
  0x2e   : > { %9303 = vmatpush3.bf16.msra.mxu0 %v9556_v22  ;;  %v903_v14 = vrot.slane %v889_v5, %v10417_v57  ;;  %v10440_v18 = vcombine.high %v10408_v53, %v10408_v53  ;;  %v1470_v19 = vcombine.low %v1414_v11, %v8625_v12  ;;  %v1752_v21 = vcombine.high %v8670_v9, %v8670_v9  ;;  %v8551_v60 = vld.sshfl [vmem:[%s10372_s26 + $0x18] sm:$0x11 pattern:$0x75316420] }
  0x2f   : > { %9349 = vmatpush3.bf16.msra.mxu1 %v9557_v23  ;;  %9304 = vmatprep.subr.bf16.mxu0 %v9558_v24  ;;  %8590 = vst.sshfl [vmem:[#allocation2] sm:$0x33 pattern:$0x75316420] %v880_v10  ;;  %v1471_v20 = vcombine.low %v595_v49, %v1417_v13  ;;  %v1454_v23 = vrot.slane %v1446_v15, %v10417_v57  ;;  %v2509_v41 = vunpack.i.h.s16 %v8670_v9 }
  0x30   : > { %9350 = vmatprep.subr.bf16.mxu1 %v9559_v25  ;;  %v904_v22 = vcombine.low %v896_v6, %v903_v14  ;;  %v1461_v24 = vrot.slane %v1447_v16, %v10417_v57  ;;  %v10446_v25 = vcombine.high %v10436_v17, %v10436_v17  ;;  %v2029_v33 = vcombine.low %v10382_v34, %v8624_v8 }
  0x31   : > { %v2511_v46 = vunpack.i.h.s16 %v1752_v21  ;;  %v8774_v49 = vpack.i.b16 %v1752_v21, %v2509_v41  ;;  %v2611_v63 = vcombine.low %v10404_v51, %v10397_v44  ;;  %v619_v4 = vcombine.high %v10459_v42, %v10459_v42 }
  0x32   : > { %9305 = vmatpush3.bf16.msra.mxu0 %v9560_v26  ;;  %v1478_v26 = vrot.slane %v1470_v19, %v10417_v57  ;;  %8591 = vst.sshfl [vmem:[#allocation2 + $0x10] sm:$0x33 pattern:$0x75316420] %v904_v22  ;;  %v1462_v30 = vcombine.low %v1454_v23, %v1461_v24  ;;  %v10493_v44 = vcombine.high %v10469_v50, %v10469_v50  ;;  %v1356_v19 = vunpack.i.h.s16 %v10459_v42 }
  0x33   : > { %9351 = vmatpush3.bf16.msra.mxu1 %v9561_v27  ;;  %9306 = vmatprep.subr.bf16.mxu0 %v9562_v28  ;;  %v1485_v27 = vrot.slane %v1471_v20, %v10417_v57  ;;  %v1937_v28 = vunpack.i.h.s16 %v10436_v17  ;;  %v2579_v59 = vpack.i.b16 %v1350_v2, %v2511_v46  ;;  %v10486_v2 = vcombine.high %v10464_v47, %v10464_v47 }
  0x34   : > { %9352 = vmatprep.subr.bf16.mxu1 %v9563_v29  ;;  %v8692_v29 = vpack.i.b16 %v10387_v39, %v10391_v40  ;;  %8635 = vst.sshfl [vmem:[#allocation2 + $0x4] sm:$0x33 pattern:$0x75316420] %v1462_v30  ;;  %v2037_v39 = vrot.slane %v2029_v33, %v10417_v57  ;;  %v2576_v40 = vpack.i.b16 %v1344_v52, %v2505_v37  ;;  %v1358_v22 = vunpack.i.h.s16 %v619_v4 }
  0x35   : > { %v1486_v35 = vcombine.low %v1478_v26, %v1485_v27  ;;  %v10480_v52 = vld.sshfl [vmem:[%s10372_s26 + $0x1a] sm:$0x11 pattern:$0x75316420]  ;;  %v643_v7 = vcombine.high %v8551_v60, %v8551_v60  ;;  %v8572_v14 = vpack.i.b16 %v10464_v47, %v619_v4  ;;  %v8574_v16 = vpack.i.b16 %v8551_v60, %v10493_v44 }
  0x36   : > { %9307 = vmatpush3.bf16.msra.mxu0 %v9564_v31  ;;  %v8694_v31 = vpack.i.b16 %v10401_v48, %v1752_v21  ;;  %v2030_v36 = vcombine.low %v8692_v29, %v8670_v9  ;;  %v2517_v48 = vunpack.i.h.s16 %v10440_v18  ;;  %v2612_v0 = vcombine.low %v2576_v40, %v8774_v49 }
  0x37   : > { %9353 = vmatpush3.bf16.msra.mxu1 %v9565_v32  ;;  %v8696_v32 = vpack.i.b16 %v10436_v17, %v10440_v18  ;;  %8636 = vst.sshfl [vmem:[#allocation2 + $0x14] sm:$0x33 pattern:$0x75316420] %v1486_v35  ;;  %v10498_v8 = vcombine.high %v10480_v52, %v10480_v52  ;;  %v778_v9 = vunpack.i.h.s16 %v10464_v47  ;;  %v1362_v23 = vunpack.i.h.s16 %v10469_v50 }
  0x38   : > { %v2053_v43 = vcombine.low %v8694_v31, %v10408_v53  ;;  %v2044_v34 = vrot.slane %v2030_v36, %v10417_v57  ;;  %v8775_v53 = vpack.i.b16 %v10440_v18, %v772_v58  ;;  %v2582_v62 = vpack.i.b16 %v1937_v28, %v2517_v48  ;;  %v8676_v35 = vld.sshfl [vmem:[%s10372_s26 + $0x16] sm:$0x11 pattern:$0x75316420] }
  0x39   : > { %v2054_v45 = vcombine.low %v8625_v12, %v8696_v32  ;;  %v2619_v58 = vrot.slane %v2611_v63, %v10417_v57  ;;  %v2626_v5 = vrot.slane %v2612_v0, %v10417_v57  ;;  %v784_v12 = vunpack.i.h.s16 %v8551_v60  ;;  %v9566_v13 = vld [vmem:[#allocation2] ss:$16 sps:$4 sm:$0xff]  }
  0x3a   : > { %v2061_v55 = vrot.slane %v2053_v43, %v10417_v57  ;;  %v2045_v61 = vcombine.low %v2037_v39, %v2044_v34  ;;  %v2635_v3 = vcombine.low %v2579_v59, %v8775_v53  ;;  %v2636_v6 = vcombine.low %v10412_v54, %v2582_v62  ;;  %v10521_v39 = vld.sshfl [vmem:[%s10372_s26 + $0x1c] sm:$0x11 pattern:$0x75316420] }
  0x3b   : > { %v2068_v56 = vrot.slane %v2054_v45, %v10417_v57  ;;  %v2627_v10 = vcombine.low %v2619_v58, %v2626_v5  ;;  %v10504_v15 = vpack.i.b16 %v10486_v2, %v778_v9  ;;  %v8575_v21 = vpack.i.b16 %v643_v7, %v784_v12  ;;  %v10540_v0 = vld.sshfl [vmem:[%s10372_s26 + $0x20] sm:$0x11 pattern:$0x75316420] }
  0x3c   : > { %8716 = vst.sshfl [vmem:[#allocation2 + $0x8] sm:$0x33 pattern:$0x75316420] %v2045_v61  ;;  %v2643_v51 = vrot.slane %v2635_v3, %v10417_v57  ;;  %v2650_v11 = vrot.slane %v2636_v6, %v10417_v57  ;;  %v912_v24 = vcombine.low %v8775_v53, %v8572_v14  ;;  %v937_v27 = vcombine.low %v8574_v16, %v10480_v52 }
  0x3d   : > { %v2069_v1 = vcombine.low %v2061_v55, %v2068_v56  ;;  %8785 = vst.sshfl [vmem:[#allocation2 + $0xc] sm:$0x33 pattern:$0x75316420] %v2627_v10  ;;  %v913_v26 = vcombine.low %v10459_v42, %v10504_v15  ;;  %v1364_v29 = vunpack.i.h.s16 %v10493_v44  ;;  %v936_v30 = vcombine.low %v10469_v50, %v8575_v21 }
  0x3e   : > { %v9568_v54 = vld [vmem:[#allocation2 + $0x4] ss:$16 sps:$4 sm:$0xff]   ;;  %v2651_v20 = vcombine.low %v2643_v51, %v2650_v11  ;;  %v1368_v31 = vunpack.i.h.s16 %v10480_v52  ;;  %v8626_v32 = vpack.i.b16 %v619_v4, %v1356_v19  ;;  %v1420_v33 = vpack.i.b16 %v778_v9, %v1358_v22 }
  0x3f   : > { %8717 = vst.sshfl [vmem:[#allocation2 + $0x18] sm:$0x33 pattern:$0x75316420] %v2069_v1  ;;  %3252 = vmatprep.mubr.bf16.mxu0 %v9568_v54  ;;  %v920_v36 = vrot.slane %v912_v24, %v10417_v57  ;;  %v927_v37 = vrot.slane %v913_v26, %v10417_v57  ;;  %v951_v41 = vrot.slane %v937_v27, %v10417_v57 }
  0x40   : > { %8786 = vst.sshfl [vmem:[#allocation2 + $0x1c] sm:$0x33 pattern:$0x75316420] %v2651_v20  ;;  %3253 = vmatmul.mubr.bf16.vlgmr.msra.gmra.mxu0 %v9566_v13  ;;  %v8627_v42 = vpack.i.b16 %v10493_v44, %v1362_v23  ;;  %v944_v43 = vrot.slane %v936_v30, %v10417_v57  ;;  %v1423_v45 = vpack.i.b16 %v784_v12, %v1364_v29 }
  0x41   : > { %v8628_v46 = vpack.i.b16 %v10498_v8, %v1368_v31  ;;  %v1494_v34 = vcombine.low %v10440_v18, %v1420_v33  ;;  %v928_v48 = vcombine.low %v920_v36, %v927_v37  ;;  %v1495_v40 = vcombine.low %v8626_v32, %v10486_v2 }
  0x42   : > { %v1518_v49 = vcombine.low %v8627_v42, %v643_v7  ;;  %v1800_v55 = vcombine.high %v8676_v35, %v8676_v35  ;;  %v952_v56 = vcombine.low %v944_v43, %v951_v41  ;;  %v10530_v60 = vcombine.high %v10521_v39, %v10521_v39 }
  0x43   : > { %v1502_v59 = vrot.slane %v1494_v34, %v10417_v57  ;;  %v1519_v53 = vcombine.low %v1423_v45, %v8628_v46  ;;  %8592 = vst.sshfl [vmem:[#allocation2 + $0x20] sm:$0x33 pattern:$0x75316420] %v928_v48  ;;  %v1509_v61 = vrot.slane %v1495_v40, %v10417_v57  ;;  %v8697_v18 = vpack.i.b16 %v10446_v25, %v1937_v28 }
  0x44   : > { %v1526_v62 = vrot.slane %v1518_v49, %v10417_v57  ;;  %v8698_v63 = vpack.i.b16 %v10469_v50, %v10486_v2  ;;  %8593 = vst.sshfl [vmem:[#allocation2 + $0x30] sm:$0x33 pattern:$0x75316420] %v952_v56  ;;  %v8700_v3 = vpack.i.b16 %v10480_v52, %v1800_v55  ;;  %v2078_v4 = vcombine.low %v10464_v47, %v8627_v42 }
  0x45   : > { %v1533_v1 = vrot.slane %v1519_v53, %v10417_v57  ;;  %v2101_v58 = vcombine.low %v8676_v35, %v8628_v46  ;;  %v1510_v17 = vcombine.low %v1502_v59, %v1509_v61  ;;  %v2523_v28 = vunpack.i.h.s16 %v10486_v2  ;;  %v10547_v50 = vld.sshfl [vmem:[%s10372_s26 + $0x22] sm:$0x11 pattern:$0x75316420] }
  0x46   : > { %v9569_v5 = vld [vmem:[#allocation2 + $0x8] ss:$16 sps:$4 sm:$0xff]   ;;  %v2077_v51 = vcombine.low %v8697_v18, %v8698_v63  ;;  %v2527_v7 = vunpack.i.h.s16 %v8676_v35  ;;  %v2092_v10 = vrot.slane %v2078_v4, %v10417_v57  ;;  %v2102_v11 = vcombine.low %v8700_v3, %v10521_v39  ;;  %v10553_v52 = vld.sshfl [vmem:[%s10372_s26 + $0x24] sm:$0x11 pattern:$0x75316420] }
  0x47   : > { %v9571_v6 = vld [vmem:[#allocation2 + $0xc] ss:$16 sps:$4 sm:$0xff]   ;;  %v1534_v9 = vcombine.low %v1526_v62, %v1533_v1  ;;  %v2109_v12 = vrot.slane %v2101_v58, %v10417_v57  ;;  %v10556_v47 = vld.sshfl [vmem:[%s10372_s26 + $0x28] sm:$0x11 pattern:$0x75316420]  ;;  %v2529_v54 = vunpack.i.h.s16 %v1800_v55  ;;  %v2533_v2 = vunpack.i.h.s16 %v10521_v39 }
  0x48   : > { %3324 = vmatprep.mubr.bf16.mxu1 %v9571_v6  ;;  %8637 = vst.sshfl [vmem:[#allocation2 + $0x24] sm:$0x33 pattern:$0x75316420] %v1510_v17  ;;  %v2085_v13 = vrot.slane %v2077_v51, %v10417_v57  ;;  %v2585_v14 = vpack.i.b16 %v1362_v23, %v2523_v28  ;;  %v2116_v16 = vrot.slane %v2102_v11, %v10417_v57  ;;  %v796_v35 = vunpack.i.h.s16 %v10547_v50 }
  0x49   : > { %3325 = vmatmul.mubr.bf16.vlgmr.msra.gmra.mxu1 %v9569_v5  ;;  %8638 = vst.sshfl [vmem:[#allocation2 + $0x34] sm:$0x33 pattern:$0x75316420] %v1534_v9  ;;  %v8777_v19 = vpack.i.b16 %v1800_v55, %v2527_v7  ;;  %v2660_v20 = vcombine.low %v10504_v15, %v10493_v44  ;;  %v667_v21 = vcombine.high %v10540_v0, %v10540_v0  ;;  %v802_v36 = vunpack.i.h.s16 %v10556_v47 }
  0x4a   : > { %v2093_v22 = vcombine.low %v2085_v13, %v2092_v10  ;;  %v2588_v24 = vpack.i.b16 %v1368_v31, %v2529_v54  ;;  %v8778_v26 = vpack.i.b16 %v10530_v60, %v2533_v2  ;;  %v2659_v27 = vcombine.low %v10446_v25, %v2585_v14  ;;  %v10599_v18 = vld.sshfl [vmem:[%s10372_s26 + $0x26] sm:$0x11 pattern:$0x75316420] }
  0x4b   : > { %v2117_v29 = vcombine.low %v2109_v12, %v2116_v16  ;;  %v2674_v23 = vrot.slane %v2660_v20, %v10417_v57  ;;  %v2683_v30 = vcombine.low %v8777_v19, %v10498_v8  ;;  %v10571_v32 = vcombine.high %v10547_v50, %v10547_v50 }
  0x4c   : > { %8718 = vst.sshfl [vmem:[#allocation2 + $0x28] sm:$0x33 pattern:$0x75316420] %v2093_v22  ;;  %v2667_v44 = vrot.slane %v2659_v27, %v10417_v57  ;;  %v2684_v15 = vcombine.low %v2588_v24, %v8778_v26  ;;  %v10576_v31 = vcombine.high %v10553_v52, %v10553_v52  ;;  %v691_v25 = vcombine.high %v10556_v47, %v10556_v47 }
  0x4d   : > { %8719 = vst.sshfl [vmem:[#allocation2 + $0x38] sm:$0x33 pattern:$0x75316420] %v2117_v29  ;;  %v2691_v33 = vrot.slane %v2683_v30, %v10417_v57  ;;  %v8576_v37 = vpack.i.b16 %v10521_v39, %v10498_v8  ;;  %v8578_v43 = vpack.i.b16 %v10547_v50, %v667_v21  ;;  %v10590_v34 = vpack.i.b16 %v10571_v32, %v796_v35 }
  0x4e   : > { %v2675_v41 = vcombine.low %v2667_v44, %v2674_v23  ;;  %v2698_v42 = vrot.slane %v2684_v15, %v10417_v57  ;;  %v8580_v45 = vpack.i.b16 %v10556_v47, %v10576_v31  ;;  %v8581_v48 = vpack.i.b16 %v691_v25, %v802_v36  ;;  %v10595_v39 = vld.sshfl [vmem:[%s10372_s26 + $0x1e] sm:$0x11 pattern:$0x75316420] }
  0x4f   : > { %v2849_v46 = vld [vmem:[#allocation2 + $0x20] sm:$0xff]  ;;  %v960_v40 = vcombine.low %v8576_v37, %v10540_v0  ;;  %v1370_v49 = vunpack.i.h.s16 %v10498_v8  ;;  %v961_v53 = vcombine.low %v8778_v26, %v8578_v43  ;;  %v1374_v61 = vunpack.i.h.s16 %v10540_v0  ;;  %v10605_v8 = vld.sshfl [vmem:[%s10372_s26 + $0x2a] sm:$0x11 pattern:$0x75316420] }
  0x50   : > { %v2851_v55 = vld [vmem:[#allocation2 + $0x30] sm:$0xff]  ;;  %v2699_v59 = vcombine.low %v2691_v33, %v2698_v42  ;;  %8787 = vst.sshfl [vmem:[#allocation2 + $0x2c] sm:$0x33 pattern:$0x75316420] %v2675_v41  ;;  %v1376_v62 = vunpack.i.h.s16 %v667_v21  ;;  %v984_v3 = vcombine.low %v10590_v34, %v8580_v45  ;;  %v985_v4 = vcombine.low %v10553_v52, %v8581_v48 }
  0x51   : > { %v9572_v56 = vld [vmem:[#allocation2 + $0x24] ss:$16 sps:$4 sm:$0xff]   ;;  %v8799_v63 = vcombine.low %v2849_v46, %v2851_v55  ;;  %v968_v1 = vrot.slane %v960_v40, %v10417_v57  ;;  %v975_v58 = vrot.slane %v961_v53, %v10417_v57  ;;  %v1380_v5 = vunpack.i.h.s16 %v10553_v52  ;;  %v10634_v44 = vld.sshfl [vmem:[%s10372_s26 + $0x2c] sm:$0x11 pattern:$0x75316420] }
  0x52   : > { %3260 = vmatprep.mubr.bf16.mxu0 %v9572_v56  ;;  %8788 = vst.sshfl [vmem:[#allocation2 + $0x3c] sm:$0x33 pattern:$0x75316420] %v2699_v59  ;;  %v1382_v0 = vunpack.i.h.s16 %v10576_v31  ;;  %v1426_v6 = vpack.i.b16 %v2533_v2, %v1370_v49  ;;  %v992_v17 = vrot.slane %v984_v3, %v10417_v57  ;;  %v999_v51 = vrot.slane %v985_v4, %v10417_v57 }
  0x53   : > { %3261 = vmatmul.mubr.bf16.gmra.mxu0 %v8799_v63  ;;  %v8629_v28 = vpack.i.b16 %v667_v21, %v1374_v61  ;;  %v1429_v7 = vpack.i.b16 %v796_v35, %v1376_v62  ;;  %v976_v9 = vcombine.low %v968_v1, %v975_v58  ;;  %v8630_v10 = vpack.i.b16 %v10576_v31, %v1380_v5  ;;  %v10647_v46 = vld.sshfl [vmem:[%s10372_s26 + $0x32] sm:$0x11 pattern:$0x75316420] }
  0x54   : > { %v1432_v11 = vpack.i.b16 %v802_v36, %v1382_v0  ;;  %v1824_v12 = vcombine.high %v10595_v39, %v10595_v39  ;;  %v1000_v47 = vcombine.low %v992_v17, %v999_v51  ;;  %v1848_v2 = vcombine.high %v10599_v18, %v10599_v18  ;;  %v10666_v0 = vld.sshfl [vmem:[%s10372_s26 + $0x38] sm:$0x11 pattern:$0x75316420] }
  0x55   : > { %v1542_v13 = vcombine.low %v1426_v6, %v8629_v28  ;;  %v1543_v54 = vcombine.low %v10530_v60, %v1429_v7  ;;  %8594 = vst.sshfl [vmem:[#allocation2 + $0x40] sm:$0x33 pattern:$0x75316420] %v976_v9  ;;  %v1567_v16 = vcombine.low %v8630_v10, %v691_v25  ;;  %v10621_v19 = vcombine.high %v10605_v8, %v10605_v8  ;;  %v9576_v25 = vld [vmem:[#allocation2 + $0x28] ss:$16 sps:$4 sm:$0xff]  }
  0x56   : > { %v1566_v14 = vcombine.low %v10571_v32, %v1432_v11  ;;  %v1955_v20 = vunpack.i.h.s16 %v10595_v39  ;;  %8595 = vst.sshfl [vmem:[#allocation2 + $0x50] sm:$0x33 pattern:$0x75316420] %v1000_v47  ;;  %v1967_v24 = vunpack.i.h.s16 %v10605_v8  ;;  %v8702_v26 = vpack.i.b16 %v10595_v39, %v10530_v60 }
  0x57   : > { %v1550_v21 = vrot.slane %v1542_v13, %v10417_v57  ;;  %v1557_v22 = vrot.slane %v1543_v54, %v10417_v57  ;;  %v1581_v29 = vrot.slane %v1567_v16, %v10417_v57  ;;  %v8704_v30 = vpack.i.b16 %v10553_v52, %v10571_v32  ;;  %v10644_v52 = vld.sshfl [vmem:[%s10372_s26 + $0x30] sm:$0x11 pattern:$0x75316420] }
  0x58   : > { %v1574_v27 = vrot.slane %v1566_v14, %v10417_v57  ;;  %v8703_v23 = vpack.i.b16 %v1824_v12, %v1955_v20  ;;  %v8706_v35 = vpack.i.b16 %v10605_v8, %v1848_v2  ;;  %v10638_v36 = vpack.i.b16 %v10621_v19, %v1967_v24  ;;  %v10654_v39 = vld.sshfl [vmem:[%s10372_s26 + $0x34] sm:$0x11 pattern:$0x75316420] }
  0x59   : > { %v9574_v15 = vld [vmem:[#allocation2 + $0x2c] ss:$16 sps:$4 sm:$0xff]   ;;  %v1558_v33 = vcombine.low %v1550_v21, %v1557_v22  ;;  %v2125_v37 = vcombine.low %v8702_v26, %v10547_v50  ;;  %v2535_v43 = vunpack.i.h.s16 %v10530_v60  ;;  %v2541_v45 = vunpack.i.h.s16 %v10571_v32 }
  0x5a   : > { %v1582_v41 = vcombine.low %v1574_v27, %v1581_v29  ;;  %v2126_v42 = vcombine.low %v8703_v23, %v8704_v30  ;;  %3332 = vmatprep.mubr.bf16.mxu1 %v9574_v15  ;;  %v2149_v40 = vcombine.low %v8630_v10, %v8706_v35  ;;  %v2150_v49 = vcombine.low %v10599_v18, %v10638_v36  ;;  %v8685_v23 = vld.sshfl [vmem:[%s10372_s26 + $0x2e] sm:$0x11 pattern:$0x75316420] }
  0x5b   : > { %8639 = vst.sshfl [vmem:[#allocation2 + $0x44] sm:$0x33 pattern:$0x75316420] %v1558_v33  ;;  %v2133_v48 = vrot.slane %v2125_v37, %v10417_v57  ;;  %v2545_v50 = vunpack.i.h.s16 %v10599_v18  ;;  %3333 = vmatmul.mubr.bf16.gmra.mxu1 %v9576_v25  ;;  %v2547_v32 = vunpack.i.h.s16 %v1848_v2  ;;  %v2591_v55 = vpack.i.b16 %v1955_v20, %v2535_v43 }
  0x5c   : > { %8640 = vst.sshfl [vmem:[#allocation2 + $0x54] sm:$0x33 pattern:$0x75316420] %v1582_v41  ;;  %v2140_v60 = vrot.slane %v2126_v42, %v10417_v57  ;;  %v2594_v56 = vpack.i.b16 %v1380_v5, %v2541_v45  ;;  %v2157_v59 = vrot.slane %v2149_v40, %v10417_v57  ;;  %v2164_v53 = vrot.slane %v2150_v49, %v10417_v57 }
  0x5d   : > { %v8780_v61 = vpack.i.b16 %v1848_v2, %v2545_v50  ;;  %v10661_v62 = vcombine.high %v10634_v44, %v10634_v44  ;;  %v2597_v63 = vpack.i.b16 %v1967_v24, %v2547_v32  ;;  %v2707_v1 = vcombine.low %v2591_v55, %v10590_v34  ;;  %v8688_v35 = vld.sshfl [vmem:[%s10372_s26 + $0x36] sm:$0x11 pattern:$0x75316420] }
  0x5e   : > { %v2141_v18 = vcombine.low %v2133_v48, %v2140_v60  ;;  %v2708_v3 = vcombine.low %v1824_v12, %v2594_v56  ;;  %v2165_v4 = vcombine.low %v2157_v59, %v2164_v53  ;;  %v715_v5 = vcombine.high %v10644_v52, %v10644_v52  ;;  %v10718_v56 = vld.sshfl [vmem:[%s10372_s26 + $0x3a] sm:$0x11 pattern:$0x75316420] }
  0x5f   : > { %v2732_v58 = vcombine.low %v8780_v61, %v10621_v19  ;;  %v10672_v6 = vcombine.high %v10647_v46, %v10647_v46  ;;  %v2715_v17 = vrot.slane %v2707_v1, %v10417_v57  ;;  %v2731_v34 = vcombine.low %v10576_v31, %v2597_v63 }
  0x60   : > { %8720 = vst.sshfl [vmem:[#allocation2 + $0x48] sm:$0x33 pattern:$0x75316420] %v2141_v18  ;;  %v2722_v51 = vrot.slane %v2708_v3, %v10417_v57  ;;  %v10679_v28 = vcombine.high %v10654_v39, %v10654_v39  ;;  %v808_v9 = vunpack.i.h.s16 %v10634_v44  ;;  %v814_v10 = vunpack.i.h.s16 %v10647_v46 }
  0x61   : > { %8721 = vst.sshfl [vmem:[#allocation2 + $0x58] sm:$0x33 pattern:$0x75316420] %v2165_v4  ;;  %v2746_v7 = vrot.slane %v2732_v58, %v10417_v57  ;;  %v8582_v11 = vpack.i.b16 %v10634_v44, %v10621_v19  ;;  %v2739_v13 = vrot.slane %v2731_v34, %v10417_v57  ;;  %v8584_v31 = vpack.i.b16 %v10647_v46, %v715_v5 }
  0x62   : > { %v2853_v12 = vld [vmem:[#allocation2 + $0x40] sm:$0xff]  ;;  %v2723_v47 = vcombine.low %v2715_v17, %v2722_v51  ;;  %v8586_v54 = vpack.i.b16 %v10666_v0, %v10679_v28  ;;  %v10691_v16 = vpack.i.b16 %v10661_v62, %v808_v9  ;;  %v10694_v20 = vpack.i.b16 %v10672_v6, %v814_v10 }
  0x63   : > { %v2855_v2 = vld [vmem:[#allocation2 + $0x50] sm:$0xff]  ;;  %v1009_v21 = vcombine.low %v8582_v11, %v10644_v52  ;;  %v1388_v22 = vunpack.i.h.s16 %v10621_v19  ;;  %v2747_v24 = vcombine.low %v2739_v13, %v2746_v7  ;;  %v1032_v27 = vcombine.low %v8584_v31, %v10654_v39 }
  0x64   : > { %v9577_v14 = vld [vmem:[#allocation2 + $0x44] ss:$16 sps:$4 sm:$0xff]   ;;  %8789 = vst.sshfl [vmem:[#allocation2 + $0x4c] sm:$0x33 pattern:$0x75316420] %v2723_v47  ;;  %v8803_v26 = vcombine.low %v2853_v12, %v2855_v2  ;;  %v1392_v29 = vunpack.i.h.s16 %v10644_v52  ;;  %v1008_v30 = vcombine.low %v10605_v8, %v10691_v16  ;;  %v1033_v25 = vcombine.low %v10694_v20, %v8586_v54 }
  0x65   : > { %3268 = vmatprep.mubr.bf16.mxu0 %v9577_v14  ;;  %v1023_v15 = vrot.slane %v1009_v21, %v10417_v57  ;;  %v1394_v33 = vunpack.i.h.s16 %v715_v5  ;;  %8790 = vst.sshfl [vmem:[#allocation2 + $0x5c] sm:$0x33 pattern:$0x75316420] %v2747_v24  ;;  %v1040_v19 = vrot.slane %v1032_v27, %v10417_v57  ;;  %v1398_v37 = vunpack.i.h.s16 %v10654_v39 }
  0x66   : > { %3269 = vmatmul.mubr.bf16.gmra.mxu0 %v8803_v26  ;;  %v1400_v41 = vunpack.i.h.s16 %v10679_v28  ;;  %v1401_v42 = vunpack.i.h.s16 %v10666_v0  ;;  %v1016_v43 = vrot.slane %v1008_v30, %v10417_v57  ;;  %v1047_v8 = vrot.slane %v1033_v25, %v10417_v57  ;;  %v10733_v54 = vld.sshfl [vmem:[%s10372_s26 + $0x3c] sm:$0x11 pattern:$0x75316420] }
  0x67   : > { %v1435_v45 = vpack.i.b16 %v808_v9, %v1388_v22  ;;  %v8632_v52 = vpack.i.b16 %v715_v5, %v1392_v29  ;;  %v1438_v48 = vpack.i.b16 %v814_v10, %v1394_v33  ;;  %v8633_v40 = vpack.i.b16 %v10679_v28, %v1398_v37 }
  0x68   : > { %v1441_v49 = vpack.i.b16 %v1401_v42, %v1400_v41  ;;  %v1590_v50 = vcombine.low %v10638_v36, %v10661_v62  ;;  %v1024_v60 = vcombine.low %v1016_v43, %v1023_v15  ;;  %v1048_v32 = vcombine.low %v1040_v19, %v1047_v8  ;;  %v9581_v7 = vld [vmem:[#allocation2 + $0x48] ss:$16 sps:$4 sm:$0xff]  }
  0x69   : > { %v1591_v55 = vcombine.low %v1435_v45, %v8632_v52  ;;  %v1872_v59 = vcombine.high %v8685_v23, %v8685_v23  ;;  %v1614_v61 = vcombine.low %v1438_v48, %v8633_v40  ;;  %v1896_v63 = vcombine.high %v8688_v35, %v8688_v35 }
  0x6a   : > { %v1598_v53 = vrot.slane %v1590_v50, %v10417_v57  ;;  %v1615_v18 = vcombine.low %v10672_v6, %v1441_v49  ;;  %8596 = vst.sshfl [vmem:[#allocation2 + $0x60] sm:$0x33 pattern:$0x75316420] %v1024_v60  ;;  %v1973_v3 = vunpack.i.h.s16 %v8685_v23  ;;  %v8708_v4 = vpack.i.b16 %v8685_v23, %v10661_v62 }
  0x6b   : > { %8597 = vst.sshfl [vmem:[#allocation2 + $0x70] sm:$0x33 pattern:$0x75316420] %v1048_v32  ;;  %v1605_v1 = vrot.slane %v1591_v55, %v10417_v57  ;;  %v8710_v36 = vpack.i.b16 %v10654_v39, %v10672_v6  ;;  %v1622_v58 = vrot.slane %v1614_v61, %v10417_v57  ;;  %v8712_v17 = vpack.i.b16 %v10718_v56, %v1896_v63 }
  0x6c   : > { %v1629_v5 = vrot.slane %v1615_v18, %v10417_v57  ;;  %v2553_v51 = vunpack.i.h.s16 %v10661_v62  ;;  %v9579_v34 = vld [vmem:[#allocation2 + $0x4c] ss:$16 sps:$4 sm:$0xff]   ;;  %v8709_v10 = vpack.i.b16 %v1872_v59, %v1973_v3  ;;  %v2174_v11 = vcombine.low %v8708_v4, %v10647_v46 }
  0x6d   : > { %v1606_v9 = vcombine.low %v1598_v53, %v1605_v1  ;;  %v2197_v12 = vcombine.low %v8710_v36, %v8688_v35  ;;  %v2198_v13 = vcombine.low %v8633_v40, %v8712_v17  ;;  %v2559_v31 = vunpack.i.h.s16 %v10672_v6  ;;  %3340 = vmatprep.mubr.bf16.mxu1 %v9579_v34  ;;  %v8691_v23 = vld.sshfl [vmem:[%s10372_s26 + $0x3e] sm:$0x11 pattern:$0x75316420] }
  0x6e   : > { %v1630_v47 = vcombine.low %v1622_v58, %v1629_v5  ;;  %v2563_v39 = vunpack.i.h.s16 %v8688_v35  ;;  %v2173_v2 = vcombine.low %v10634_v44, %v8709_v10  ;;  %v2188_v62 = vrot.slane %v2174_v11, %v10417_v57  ;;  %3341 = vmatmul.mubr.bf16.gmra.mxu1 %v9581_v7 }
  0x6f   : > { %8641 = vst.sshfl [vmem:[#allocation2 + $0x64] sm:$0x33 pattern:$0x75316420] %v1606_v9  ;;  %v2205_v14 = vrot.slane %v2197_v12, %v10417_v57  ;;  %v2565_v21 = vunpack.i.h.s16 %v1896_v63  ;;  %v2212_v46 = vrot.slane %v2198_v13, %v10417_v57  ;;  %v2566_v22 = vunpack.i.h.s16 %v10718_v56 }
  0x70   : > { %8642 = vst.sshfl [vmem:[#allocation2 + $0x74] sm:$0x33 pattern:$0x75316420] %v1630_v47  ;;  %v2600_v6 = vpack.i.b16 %v1973_v3, %v2553_v51  ;;  %v2603_v24 = vpack.i.b16 %v1398_v37, %v2559_v31  ;;  %v2181_v26 = vrot.slane %v2173_v2, %v10417_v57  ;;  %v8783_v27 = vpack.i.b16 %v1896_v63, %v2563_v39 }
  0x71   : > { %v2755_v29 = vcombine.low %v10691_v16, %v1872_v59  ;;  %v739_v44 = vcombine.high %v10666_v0, %v10666_v0  ;;  %v2213_v30 = vcombine.low %v2205_v14, %v2212_v46  ;;  %v2606_v15 = vpack.i.b16 %v2566_v22, %v2565_v21 }
  0x72   : > { %v2756_v25 = vcombine.low %v2600_v6, %v10694_v20  ;;  %v747_v33 = vcombine.high %v10718_v56, %v10718_v56  ;;  %v2189_v35 = vcombine.low %v2181_v26, %v2188_v62  ;;  %v2779_v37 = vcombine.low %v2603_v24, %v8783_v27 }
  0x73   : > { %v2763_v19 = vrot.slane %v2755_v29, %v10417_v57  ;;  %v755_v41 = vcombine.high %v10733_v54, %v10733_v54  ;;  %8723 = vst.sshfl [vmem:[#allocation2 + $0x78] sm:$0x33 pattern:$0x75316420] %v2213_v30  ;;  %v2780_v43 = vcombine.low %v10679_v28, %v2606_v15  ;;  %v826_v8 = vunpack.i.h.s16 %v10733_v54  ;;  %v9592_v30 = vld [vmem:[%s12416_s4 + $0xf0] sm:$0xff]  }
  0x74   : > { %v2770_v16 = vrot.slane %v2756_v25, %v10417_v57  ;;  %v8587_v20 = vpack.i.b16 %v739_v44, %v1401_v42  ;;  %8722 = vst.sshfl [vmem:[#allocation2 + $0x68] sm:$0x33 pattern:$0x75316420] %v2189_v35  ;;  %v2787_v45 = vrot.slane %v2779_v37, %v10417_v57  ;;  %v8588_v52 = vpack.i.b16 %v10733_v54, %v747_v33  ;;  %v9594_v25 = vld [vmem:[%s12416_s4 + $0x78] sm:$0xff]   ;;  %v9598_v35 = vld [vmem:[%s12416_s4 + $0x70] sm:$0xff]  }
  0x75   : > { %v1406_v48 = vunpack.i.h.s16 %v747_v33  ;;  %v8634_v40 = vpack.i.b16 %v747_v33, %v2566_v22  ;;  %v2794_v60 = vrot.slane %v2780_v43, %v10417_v57  ;;  %v8589_v32 = vpack.i.b16 %v755_v41, %v826_v8  ;;  %9384 = vmatprep.subr.bf16.mxu0 %v9594_v25  ;;  %v9596_v43 = vld [vmem:[%s12416_s4 + $0xe8] sm:$0xff]  }
  0x76   : > { %v2857_v49 = vld [vmem:[#allocation2 + $0x60] sm:$0xff]  ;;  %v2771_v50 = vcombine.low %v2763_v19, %v2770_v16  ;;  %v1920_v55 = vcombine.high %v8691_v23, %v8691_v23  ;;  %v1056_v53 = vcombine.low %v8587_v20, %v8588_v52  ;;  %v1991_v0 = vunpack.i.h.s16 %v8691_v23  ;;  %v9593_v19 = vld [vmem:[%s12416_s4 + $0xb0] sm:$0xff]   ;;  %v9601_v52 = vld [vmem:[%s12416_s4 + $0x68] sm:$0xff]  }
  0x77   : > { %v2859_v59 = vld [vmem:[#allocation2 + $0x70] sm:$0xff]  ;;  %v1444_v61 = vpack.i.b16 %v826_v8, %v1406_v48  ;;  %v1639_v18 = vcombine.low %v8634_v40, %v755_v41  ;;  %v2795_v42 = vcombine.low %v2787_v45, %v2794_v60  ;;  %v1057_v1 = vcombine.low %v10718_v56, %v8589_v32  ;;  %v10799_v20 = vld [vmem:[%s12415_s3] ss:$0 sm:$0xff] }
  0x78   : > { %v9582_v28 = vld [vmem:[#allocation2 + $0x64] ss:$16 sps:$4 sm:$0xff]   ;;  %8791 = vst.sshfl [vmem:[#allocation2 + $0x6c] sm:$0x33 pattern:$0x75316420] %v2771_v50  ;;  %v8807_v63 = vcombine.low %v2857_v49, %v2859_v59  ;;  %v1064_v3 = vrot.slane %v1056_v53, %v10417_v57  ;;  %v8714_v58 = vpack.i.b16 %v8691_v23, %v755_v41  ;;  %v8715_v17 = vpack.i.b16 %v1920_v55, %v1991_v0 }
  0x79   : > { %3276 = vmatprep.mubr.bf16.mxu0 %v9582_v28  ;;  %v1638_v4 = vcombine.low %v739_v44, %v1444_v61  ;;  %v1653_v36 = vrot.slane %v1639_v18, %v10417_v57  ;;  %8792 = vst.sshfl [vmem:[#allocation2 + $0x7c] sm:$0x33 pattern:$0x75316420] %v2795_v42  ;;  %v1071_v5 = vrot.slane %v1057_v1, %v10417_v57  ;;  %v2571_v51 = vunpack.i.h.s16 %v755_v41  ;;  %v9591_v23 = vld [vmem:[%s12416_s4 + $0xb8] sm:$0xff]   ;;  %v9599_v8 = vld [vmem:[%s12416_s4 + $0x30] sm:$0xff]  }
  0x7a   : > { %3277 = vmatmul.mubr.bf16.gmra.mxu0 %v8807_v63  ;;  %v2804_v34 = vcombine.low %v8589_v32, %v1920_v55  ;;  %v2221_v9 = vcombine.low %v8634_v40, %v8714_v58  ;;  %v2222_v56 = vcombine.low %v10733_v54, %v8715_v17  ;;  %v10144_v37 = vmov 1966171168   ;;  %v9597_v40 = vld [vmem:[%s12416_s4 + $0xa8] sm:$0xff]   ;;  %v9600_v32 = vld [vmem:[%s12416_s4 + $0xe0] sm:$0xff]   ;;  %v9605_v1 = vld [vmem:[%s12416_s4 + $0xd8] sm:$0xff]  }
  0x7b   : > { %v1646_v7 = vrot.slane %v1638_v4, %v10417_v57  ;;  %v1072_v10 = vcombine.low %v1064_v3, %v1071_v5  ;;  %v2609_v11 = vpack.i.b16 %v1991_v0, %v2571_v51  ;;  %v9586_v21 = vld [vmem:[#allocation2 + $0x68] ss:$16 sps:$4 sm:$0xff]   ;;  %v3384_v41 = vunpack.c.l.s4 %v10144_v37  ;;  %v9604_v28 = vld [vmem:[%s12416_s4 + $0x60] sm:$0xff]  }
  0x7c   : > { %v2229_v47 = vrot.slane %v2221_v9, %v10417_v57  ;;  %v2236_v13 = vrot.slane %v2222_v56, %v10417_v57  ;;  %v2818_v39 = vrot.slane %v2804_v34, %v10417_v57  ;;  %v9603_v55 = vld [vmem:[%s12416_s4 + $0x28] sm:$0xff]   ;;  %v9602_v18 = vld [vmem:[%s12416_s4 + $0xa0] sm:$0xff]   ;;  %v9607_v17 = vld [vmem:[%s12416_s4 + $0x98] sm:$0xff]  }
  0x7d   : > { %v1654_v12 = vcombine.low %v1646_v7, %v1653_v36  ;;  %8598 = vst.sshfl [vmem:[#allocation2 + $0x80] sm:$0x33 pattern:$0x75316420] %v1072_v10  ;;  %v2803_v31 = vcombine.low %v747_v33, %v2609_v11  ;;  %v9595_v33 = vld [vmem:[%s12416_s4 + $0x38] sm:$0xff]   ;;  %v3385_v49 = vunpack.c.0.s8 %v3384_v41  ;;  %v9606_v3 = vld [vmem:[%s12416_s4 + $0x20] sm:$0xff]  }
  0x7e   : > { %v2237_v2 = vcombine.low %v2229_v47, %v2236_v13  ;;  %9385 = vmatpush3.bf16.msra.mxu0 %v9595_v33  ;;  %v9608_v36 = vld [vmem:[%s12416_s4 + $0x58] sm:$0xff]   ;;  %v9610_v56 = vld [vmem:[%s12416_s4 + $0xd0] sm:$0xff]  }
  0x7f   : > { %8643 = vst.sshfl [vmem:[#allocation2 + $0x84] sm:$0x33 pattern:$0x75316420] %v1654_v12  ;;  %v2811_v62 = vrot.slane %v2803_v31, %v10417_v57  ;;  %v9590_v57 = vld [vmem:[%s12416_s4 + $0xf8] sm:$0xff]   ;;  %9386 = vmatprep.subr.bf16.mxu0 %v9598_v35  ;;  %v10821_v0 = vsub.s32 %v3385_v49, %v10384_v38 }
  0x80   : > { %v9584_v14 = vld [vmem:[#allocation2 + $0x6c] ss:$16 sps:$4 sm:$0xff]   ;;  %8724 = vst.sshfl [vmem:[#allocation2 + $0x88] sm:$0x33 pattern:$0x75316420] %v2237_v2  ;;  %9406 = vmatprep.subr.bf16.mxu1 %v9590_v57 }
  0x81   : > { %v2819_v46 = vcombine.low %v2811_v62, %v2818_v39  ;;  %3348 = vmatprep.mubr.bf16.mxu1 %v9584_v14  ;;  %9407 = vmatpush3.bf16.msra.mxu1 %v9591_v23  ;;  %v9609_v9 = vld [vmem:[%s12416_s4 + $0x18] sm:$0xff]  }
  0x82   : > { %3349 = vmatmul.mubr.bf16.gmra.mxu1 %v9586_v21  ;;  %9408 = vmatprep.subr.bf16.mxu1 %v9592_v30 }
  0x83   : > { %8793 = vst.sshfl [vmem:[#allocation2 + $0x8c] sm:$0x33 pattern:$0x75316420] %v2819_v46  ;;  %9387 = vmatpush3.bf16.msra.mxu0 %v9599_v8 }
  0x84   : > { %9388 = vmatprep.subr.bf16.mxu0 %v9601_v52 }
  0x85   : > { %9409 = vmatpush3.bf16.msra.mxu1 %v9593_v19 }
  0x86   : > { %v2861_v54 = vld [vmem:[#allocation2 + $0x80] sm:$0xff]  ;;  %9410 = vmatprep.subr.bf16.mxu1 %v9596_v43 }
  0x87   : > { %v8812_v22 = vcombine.high %v2861_v54, %v2861_v54  ;;  %v8811_v6 = vcombine.low %v2861_v54, %v2861_v54  ;;  %9389 = vmatpush3.bf16.msra.mxu0 %v9603_v55 }
  0x88   : > { %9390 = vmatprep.subr.bf16.mxu0 %v9604_v28 }
  0x89   : > { %3284 = vmatprep.mubr.bf16.mxu0 %v8812_v22  ;;  %9411 = vmatpush3.bf16.msra.mxu1 %v9597_v40 }
  0x8a   : > { %3285 = vmatmul.mubr.bf16.gmra.mxu0 %v8811_v6  ;;  %v2862_v24 = vld [vmem:[#allocation2 + $0x88] sm:$0xff]  ;;  %9412 = vmatprep.subr.bf16.mxu1 %v9600_v32 }
  0x8b   : > { %v8814_v26 = vcombine.high %v2862_v24, %v2862_v24  ;;  %v8813_v27 = vcombine.low %v2862_v24, %v2862_v24  ;;  %9391 = vmatpush3.bf16.msra.mxu0 %v9606_v3 }
  0x8c   : > { %9392 = vmatprep.subr.bf16.mxu0 %v9608_v36 }
  0x8d   : > { %3356 = vmatprep.mubr.bf16.mxu1 %v8814_v26  ;;  %9413 = vmatpush3.bf16.msra.mxu1 %v9602_v18  ;;  %v4426_v18 = vld [vmem:[#allocation3] sm:$0x3] }
  0x8e   : > { %3357 = vmatmul.mubr.bf16.gmra.mxu1 %v8813_v27  ;;  %9414 = vmatprep.subr.bf16.mxu1 %v9605_v1 }
  0x8f   : > { %9393 = vmatpush3.bf16.msra.mxu0 %v9609_v9  ;;  %v4432_v9 = vld [vmem:[#allocation3 + $0x4] sm:$0x3] }
  0x91   : > { %9415 = vmatpush3.bf16.msra.mxu1 %v9607_v17  ;;  %v4429_v17 = vld [vmem:[#allocation3 + $0x2] sm:$0x3] }
  0x92   : > { %9416 = vmatprep.subr.bf16.mxu1 %v9610_v56 }
 0x100   : > { %v9308_v29 = vpop.f32.mrf.mxu0 }
 0x102   : > { %v9309_v44 = vpop.f32.mrf.mxu0 }
 0x103   : > { %v9310_v16 = vadd.f32 %v9309_v44, %v9308_v29 }
 0x104   : > { %v9311_v15 = vpop.f32.mrf.mxu0 }
 0x105   : > { %v3255_v50 = vadd.f32 %v9310_v16, %v10799_v20 }
 0x106   : > { %v9312_v45 = vpop.f32.mrf.mxu0 }
 0x107   : > { %v9313_v60 = vadd.f32 %v9312_v45, %v9311_v15 }
 0x109   : > { %v9354_v48 = vpop.f32.mrf.mxu1  ;;  %v3258_v63 = vadd.f32 %v9313_v60, %v10799_v20 }
 0x10b   : > { %v9355_v59 = vpop.f32.mrf.mxu1 }
 0x10c   : > { %v9356_v53 = vadd.f32 %v9355_v59, %v9354_v48 }
 0x10d   : > { %v9357_v61 = vpop.f32.mrf.mxu1 }
 0x10e   : > { %v3327_v42 = vadd.f32 %v9356_v53, %v3255_v50 }
 0x10f   : > { %v9358_v4 = vpop.f32.mrf.mxu1 }
 0x110   : > { %v3364_v58 = vmax.f32 %v3327_v42, 0.0  ;;  %v9359_v5 = vadd.f32 %v9358_v4, %v9357_v61 }
 0x112   : > { %v3382_v51 = vcombine.high %v3364_v58, %v3364_v58  ;;  %v3389_v34 = vrot.slane %v3364_v58, %v10821_v0  ;;  %v3330_v7 = vadd.f32 %v9359_v5, %v3258_v63 }
 0x113   : > { %v9314_v10 = vpop.f32.mrf.mxu0 }
 0x114   : > { %v3396_v11 = vrot.slane %v3382_v51, %v10821_v0  ;;  %v3397_v12 = vcombine.high %v3389_v34, %v3389_v34  ;;  %v3405_v47 = vrot.slane %v3389_v34, %v10821_v0  ;;  %v3365_v13 = vmax.f32 %v3330_v7, 0.0 }
 0x115   : > { %v9315_v31 = vpop.f32.mrf.mxu0 }
 0x116   : > { %v3398_v39 = vcombine.high %v3396_v11, %v3396_v11  ;;  %v3419_v2 = vrot.slane %v3397_v12, %v10821_v0  ;;  %v3427_v62 = vcombine.high %v3405_v47, %v3405_v47  ;;  %v3412_v14 = vrot.slane %v3396_v11, %v10821_v0 }
 0x117   : > { %v3431_v21 = vcombine.high %v3365_v13, %v3365_v13  ;;  %v3438_v46 = vrot.slane %v3365_v13, %v10821_v0  ;;  %v9316_v54 = vadd.f32 %v9315_v31, %v9314_v10  ;;  %v9317_v22 = vpop.f32.mrf.mxu0 }
 0x118   : > { %v3426_v6 = vrot.slane %v3398_v39, %v10821_v0  ;;  %v3429_v24 = vcombine.high %v3419_v2, %v3419_v2  ;;  %v3823_v26 = vcombine.low %v3405_v47, %v3419_v2  ;;  %v3837_v27 = vrot.slane %v3427_v62, %v10821_v0 }
 0x119   : > { %v3445_v29 = vrot.slane %v3431_v21, %v10821_v0  ;;  %v3446_v44 = vcombine.high %v3438_v46, %v3438_v46  ;;  %v3454_v57 = vrot.slane %v3438_v46, %v10821_v0  ;;  %v3263_v23 = vadd.f32 %v9316_v54, %v10799_v20  ;;  %v9318_v16 = vpop.f32.mrf.mxu0  ;;  %v4435_v21 = vld [vmem:[#allocation3 + $0x6] sm:$0x3] }
 0x11a   : > { %v3830_v30 = vrot.slane %v3823_v26, %v10821_v0  ;;  %v3846_v15 = vcombine.low %v3429_v24, %v3412_v14  ;;  %v3860_v25 = vrot.slane %v3426_v6, %v10821_v0  ;;  %v8847_v33 = vcombine.high %v3412_v14, %v3426_v6  ;;  %v4438_v24 = vld [vmem:[#allocation3 + $0x8] sm:$0x3] }
 0x11b   : > { %v3447_v35 = vcombine.high %v3445_v29, %v3445_v29  ;;  %v3461_v19 = vrot.slane %v3445_v29, %v10821_v0  ;;  %v3468_v37 = vrot.slane %v3446_v44, %v10821_v0  ;;  %v3476_v41 = vcombine.high %v3454_v57, %v3454_v57  ;;  %v9360_v48 = vpop.f32.mrf.mxu1 }
 0x11c   : > { %v3838_v43 = vcombine.low %v3830_v30, %v3837_v27  ;;  %v3853_v8 = vrot.slane %v3846_v15, %v10821_v0  ;;  %v3876_v45 = vrot.slane %v8847_v33, %v10821_v0  ;;  %v3883_v52 = vrot.slane %v3454_v57, %v10821_v0 }
 0x11d   : > { %v10861_v40 = vrot.slane %v3447_v35, %v10821_v0  ;;  %v3477_v49 = vcombine.high %v3461_v19, %v3461_v19  ;;  %v3478_v50 = vcombine.high %v3468_v37, %v3468_v37  ;;  %v3892_v60 = vcombine.low %v3468_v37, %v3476_v41  ;;  %v9361_v28 = vpop.f32.mrf.mxu1 }
 0x11e   : > { %v3845_v32 = vrot.slane %v3838_v43, %v10821_v0  ;;  %v3861_v55 = vcombine.low %v3853_v8, %v3860_v25  ;;  %v3884_v59 = vcombine.low %v3876_v45, %v3883_v52  ;;  %v9319_v53 = vadd.f32 %v9318_v16, %v9317_v22 }
 0x11f   : > { %v3899_v42 = vrot.slane %v3892_v60, %v10821_v0  ;;  %v3906_v63 = vrot.slane %v3478_v50, %v10821_v0  ;;  %v3915_v1 = vcombine.low %v3461_v19, %v10861_v40  ;;  %v9362_v58 = vadd.f32 %v9361_v28, %v9360_v48  ;;  %v9363_v5 = vpop.f32.mrf.mxu1 }
 0x120   : > { %v3868_v3 = vrot.slane %v3861_v55, %v10821_v0  ;;  %v4399_v4 = vpack.c.bf16 %v3845_v32, %v3845_v32  ;;  %v3891_v36 = vrot.slane %v3884_v59, %v10821_v0  ;;  %v3929_v7 = vrot.slane %v3477_v49, %v10821_v0 }
 0x121   : > { %v3907_v51 = vcombine.low %v3899_v42, %v3906_v63  ;;  %v3922_v34 = vrot.slane %v3915_v1, %v10821_v0  ;;  %v3266_v10 = vadd.f32 %v9319_v53, %v10799_v20  ;;  %v3335_v47 = vadd.f32 %v9362_v58, %v3263_v23  ;;  %v9364_v13 = vpop.f32.mrf.mxu1 }
 0x122   : > { %v4400_v56 = vpack.c.bf16 %v3868_v3, %v3868_v3  ;;  %v4427_v11 = vsel %vm10866_vm2, %v4399_v4, %v4426_v18  ;;  %v4401_v12 = vpack.c.bf16 %v3891_v36, %v3891_v36  ;;  %v9365_v2 = vadd.f32 %v9364_v13, %v9363_v5 }
 0x123   : > { %4428 = vst [vmem:[#allocation3] sm:$0x3] %v4427_v11  ;;  %v3914_v31 = vrot.slane %v3907_v51, %v10821_v0  ;;  %v3930_v39 = vcombine.low %v3922_v34, %v3929_v7  ;;  %v3366_v46 = vmax.f32 %v3335_v47, 0.0  ;;  %v3479_v26 = vcombine.high %v10861_v40, %v10861_v40  ;;  %v4441_v47 = vld [vmem:[#allocation3 + $0xa] sm:$0x3] }
 0x124   : > { %v4430_v62 = vsel %vm10866_vm2, %v4400_v56, %v4429_v17  ;;  %v4433_v14 = vsel %vm10866_vm2, %v4401_v12, %v4432_v9  ;;  %v3338_v6 = vadd.f32 %v9365_v2, %v3266_v10 }
 0x125   : > { %4431 = vst [vmem:[#allocation3 + $0x2] sm:$0x3] %v4430_v62  ;;  %v3937_v54 = vrot.slane %v3930_v39, %v10821_v0  ;;  %v4402_v22 = vpack.c.bf16 %v3914_v31, %v3914_v31  ;;  %4434 = vst [vmem:[#allocation3 + $0x4] sm:$0x3] %v4433_v14  ;;  %v3480_v27 = vcombine.high %v3366_v46, %v3366_v46 }
 0x126   : > { %v3487_v29 = vrot.slane %v3366_v46, %v10821_v0  ;;  %v9320_v44 = vpop.f32.mrf.mxu0  ;;  %v3367_v30 = vmax.f32 %v3338_v6, 0.0 }
 0x127   : > { %v4403_v57 = vpack.c.bf16 %v3937_v54, %v3937_v54  ;;  %v4436_v23 = vsel %vm10866_vm2, %v4402_v22, %v4435_v21  ;;  %v3494_v15 = vrot.slane %v3480_v27, %v10821_v0 }
 0x128   : > { %4437 = vst [vmem:[#allocation3 + $0x6] sm:$0x3] %v4436_v23  ;;  %v3495_v25 = vcombine.high %v3487_v29, %v3487_v29  ;;  %v3503_v33 = vrot.slane %v3487_v29, %v10821_v0  ;;  %v9321_v35 = vpop.f32.mrf.mxu0  ;;  %v3529_v37 = vcombine.high %v3367_v30, %v3367_v30  ;;  %v3536_v41 = vrot.slane %v3367_v30, %v10821_v0  ;;  %v4444_v23 = vld [vmem:[#allocation3 + $0xc] sm:$0x3] }
 0x129   : > { %v4439_v19 = vsel %vm10866_vm2, %v4403_v57, %v4438_v24  ;;  %v9322_v16 = vadd.f32 %v9321_v35, %v9320_v44  ;;  %v3496_v43 = vcombine.high %v3494_v15, %v3494_v15  ;;  %v3510_v8 = vrot.slane %v3494_v15, %v10821_v0  ;;  %v4447_v35 = vld [vmem:[#allocation3 + $0xe] sm:$0x3] }
 0x12a   : > { %4440 = vst [vmem:[#allocation3 + $0x8] sm:$0x3] %v4439_v19  ;;  %v3517_v45 = vrot.slane %v3495_v25, %v10821_v0  ;;  %v3938_v52 = vcombine.low %v3479_v26, %v3503_v33  ;;  %v9323_v48 = vpop.f32.mrf.mxu0  ;;  %v3543_v40 = vrot.slane %v3529_v37, %v10821_v0  ;;  %v3544_v49 = vcombine.high %v3536_v41, %v3536_v41  ;;  %v10914_v2 = vld.sshfl [vmem:[#allocation3] sm:$0x1 pattern:$0x76325410] }
 0x12b   : > { %v3552_v50 = vrot.slane %v3536_v41, %v10821_v0  ;;  %v3271_v60 = vadd.f32 %v9322_v16, %v10799_v20  ;;  %v3524_v32 = vrot.slane %v3496_v43, %v10821_v0  ;;  %v3526_v55 = vcombine.high %v3510_v8, %v3510_v8 }
 0x12c   : > { %v3945_v59 = vrot.slane %v3938_v52, %v10821_v0  ;;  %v3952_v28 = vrot.slane %v3517_v45, %v10821_v0  ;;  %v9324_v53 = vpop.f32.mrf.mxu0  ;;  %v8848_v18 = vcombine.high %v3503_v33, %v3517_v45  ;;  %v3975_v42 = vrot.slane %v3510_v8, %v10821_v0  ;;  %v8893_v22 = vld.sshfl [vmem:[#allocation3 + $0x2] sm:$0x2 pattern:$0x76325410] }
 0x12d   : > { %v3545_v63 = vcombine.high %v3543_v40, %v3543_v40  ;;  %v3559_v1 = vrot.slane %v3543_v40, %v10821_v0  ;;  %v3528_v3 = vcombine.high %v3524_v32, %v3524_v32  ;;  %v3984_v36 = vcombine.low %v3524_v32, %v3526_v55 }
 0x12e   : > { %v3953_v4 = vcombine.low %v3945_v59, %v3952_v28  ;;  %v3566_v58 = vrot.slane %v3544_v49, %v10821_v0  ;;  %v3968_v5 = vrot.slane %v8848_v18, %v10821_v0  ;;  %v3574_v51 = vcombine.high %v3552_v50, %v3552_v50  ;;  %v9366_v11 = vpop.f32.mrf.mxu1  ;;  %v4450_v59 = vld [vmem:[#allocation3 + $0x10] sm:$0x3] }
 0x12f   : > { %v3573_v17 = vrot.slane %v3545_v63, %v10821_v0  ;;  %v9325_v34 = vadd.f32 %v9324_v53, %v9323_v48  ;;  %v3991_v9 = vrot.slane %v3984_v36, %v10821_v0  ;;  %v3998_v10 = vrot.slane %v3528_v3, %v10821_v0  ;;  %v10919_v29 = vld.sshfl [vmem:[#allocation3 + $0x6] sm:$0x1 pattern:$0x76325410] }
 0x130   : > { %v3960_v7 = vrot.slane %v3953_v4, %v10821_v0  ;;  %v3576_v56 = vcombine.high %v3566_v58, %v3566_v58  ;;  %v3976_v12 = vcombine.low %v3968_v5, %v3975_v42  ;;  %v4007_v13 = vcombine.low %v3552_v50, %v3566_v58  ;;  %v9367_v54 = vpop.f32.mrf.mxu1  ;;  %v4453_v42 = vld [vmem:[#allocation3 + $0x12] sm:$0x3]  ;;  %v10937_v4 = vld.sshfl [vmem:[#allocation3 + $0x4] sm:$0x1 pattern:$0x76325410] }
 0x131   : > { %v4021_v31 = vrot.slane %v3574_v51, %v10821_v0  ;;  %v4044_v39 = vrot.slane %v3573_v17, %v10821_v0  ;;  %v3999_v62 = vcombine.low %v3991_v9, %v3998_v10  ;;  %v8849_v46 = vcombine.high %v3559_v1, %v3573_v17  ;;  %v8894_v16 = vld.sshfl [vmem:[#allocation3 + $0x8] sm:$0x2 pattern:$0x76325410] }
 0x132   : > { %v4404_v14 = vpack.c.bf16 %v3960_v7, %v3960_v7  ;;  %v4030_v21 = vcombine.low %v3576_v56, %v3559_v1  ;;  %v3983_v6 = vrot.slane %v3976_v12, %v10821_v0  ;;  %v4014_v24 = vrot.slane %v4007_v13, %v10821_v0  ;;  %v9369_v25 = vpop.f32.mrf.mxu1 }
 0x133   : > { %v9368_v26 = vadd.f32 %v9367_v54, %v9366_v11  ;;  %v3274_v27 = vadd.f32 %v9325_v34, %v10799_v20  ;;  %v4006_v44 = vrot.slane %v3999_v62, %v10821_v0  ;;  %v4060_v15 = vrot.slane %v8849_v46, %v10821_v0 }
 0x134   : > { %v4442_v57 = vsel %vm10866_vm2, %v4404_v14, %v4441_v47  ;;  %v4037_v30 = vrot.slane %v4030_v21, %v10821_v0  ;;  %v4405_v33 = vpack.c.bf16 %v3983_v6, %v3983_v6  ;;  %v4022_v19 = vcombine.low %v4014_v24, %v4021_v31  ;;  %v9370_v45 = vpop.f32.mrf.mxu1 }
 0x135   : > { %4443 = vst [vmem:[#allocation3 + $0xa] sm:$0x3] %v4442_v57  ;;  %v3343_v37 = vadd.f32 %v9368_v26, %v3271_v60  ;;  %v4675_v41 = vunpack.c.l.b16 %v10914_v2  ;;  %v4406_v43 = vpack.c.bf16 %v4006_v44, %v4006_v44  ;;  %v4676_v52 = vunpack.c.l.b16 %v10919_v29 }
 0x136   : > { %v4045_v8 = vcombine.low %v4037_v30, %v4044_v39  ;;  %v5069_v48 = vunpack.c.l.b16 %v8893_v22  ;;  %v4445_v40 = vsel %vm10866_vm2, %v4405_v33, %v4444_v23  ;;  %v4029_v49 = vrot.slane %v4022_v19, %v10821_v0 }
 0x137   : > { %v3368_v50 = vmax.f32 %v3343_v37, 0.0  ;;  %v9371_v32 = vadd.f32 %v9370_v45, %v9369_v25  ;;  %4446 = vst [vmem:[#allocation3 + $0xc] sm:$0x3] %v4445_v40  ;;  %v4448_v60 = vsel %vm10866_vm2, %v4406_v43, %v4447_v35  ;;  %v4683_v28 = vrot.slane %v4675_v41, 1  ;;  %v4456_v40 = vld [vmem:[#allocation3 + $0x14] sm:$0x3] }
 0x138   : > { %v4052_v55 = vrot.slane %v4045_v8, %v10821_v0  ;;  %v5070_v53 = vunpack.c.l.b16 %v8894_v16  ;;  %4449 = vst [vmem:[#allocation3 + $0xe] sm:$0x3] %v4448_v60  ;;  %v4407_v18 = vpack.c.bf16 %v4029_v49, %v4029_v49  ;;  %v5077_v17 = vrot.slane %v5069_v48, 2 }
 0x139   : > { %v3578_v63 = vcombine.high %v3368_v50, %v3368_v50  ;;  %v3585_v1 = vrot.slane %v3368_v50, %v10821_v0  ;;  %v3346_v3 = vadd.f32 %v9371_v32, %v3274_v27  ;;  %v10942_v5 = vsel %vm4579_vm3, %v4676_v52, %v4683_v28 }
 0x13a   : > { %v4408_v36 = vpack.c.bf16 %v4052_v55, %v4052_v55  ;;  %v9326_v58 = vpop.f32.mrf.mxu0  ;;  %v5078_v51 = vrot.slane %v5070_v53, 1  ;;  %v4451_v34 = vsel %vm10866_vm2, %v4407_v18, %v4450_v59  ;;  %v12436_v13 = vunpack.c.l.b16 %v10937_v4 }
 0x13b   : > { %v3592_v7 = vrot.slane %v3578_v63, %v10821_v0  ;;  %v3593_v9 = vcombine.high %v3585_v1, %v3585_v1  ;;  %v3601_v10 = vrot.slane %v3585_v1, %v10821_v0  ;;  %4452 = vst [vmem:[#allocation3 + $0x10] sm:$0x3] %v4451_v34  ;;  %v3369_v11 = vmax.f32 %v3346_v3, 0.0 }
 0x13c   : > { %v4454_v56 = vsel %vm10866_vm2, %v4408_v36, %v4453_v42  ;;  %v9327_v12 = vpop.f32.mrf.mxu0  ;;  %v10951_v47 = vsel %vm4579_vm3, %v5078_v51, %v5077_v17  ;;  %v4459_v36 = vld [vmem:[#allocation3 + $0x16] sm:$0x3] }
 0x13d   : > { %4455 = vst [vmem:[#allocation3 + $0x12] sm:$0x3] %v4454_v56  ;;  %v3594_v31 = vcombine.high %v3592_v7, %v3592_v7  ;;  %v3608_v39 = vrot.slane %v3592_v7, %v10821_v0  ;;  %v3615_v62 = vrot.slane %v3593_v9, %v10821_v0  ;;  %v3623_v14 = vcombine.high %v3601_v10, %v3601_v10 }
 0x13e   : > { %v4067_v21 = vrot.slane %v3601_v10, %v10821_v0  ;;  %v3627_v46 = vcombine.high %v3369_v11, %v3369_v11  ;;  %v3634_v54 = vrot.slane %v3369_v11, %v10821_v0  ;;  %v9328_v22 = vadd.f32 %v9327_v12, %v9326_v58  ;;  %v9329_v37 = vpop.f32.mrf.mxu0  ;;  %v10978_v11 = vld.sshfl [vmem:[#allocation3 + $0xc] sm:$0x1 pattern:$0x76325410]  ;;  %v4462_v12 = vld [vmem:[#allocation3 + $0x18] sm:$0x3] }
 0x13f   : > { %v3622_v6 = vrot.slane %v3594_v31, %v10821_v0  ;;  %v3624_v24 = vcombine.high %v3608_v39, %v3608_v39  ;;  %v3625_v26 = vcombine.high %v3615_v62, %v3615_v62  ;;  %v4076_v27 = vcombine.low %v3615_v62, %v3623_v14 }
 0x140   : > { %v4068_v44 = vcombine.low %v4060_v15, %v4067_v21  ;;  %v3641_v57 = vrot.slane %v3627_v46, %v10821_v0  ;;  %v3642_v23 = vcombine.high %v3634_v54, %v3634_v54  ;;  %v3650_v30 = vrot.slane %v3634_v54, %v10821_v0  ;;  %v9330_v1 = vpop.f32.mrf.mxu0 }
 0x141   : > { %v4083_v25 = vrot.slane %v4076_v27, %v10821_v0  ;;  %v4090_v33 = vrot.slane %v3625_v26, %v10821_v0  ;;  %v4099_v35 = vcombine.low %v3608_v39, %v3622_v6  ;;  %v4113_v19 = vrot.slane %v3624_v24, %v10821_v0 }
 0x142   : > { %v4075_v16 = vrot.slane %v4068_v44, %v10821_v0  ;;  %v3626_v43 = vcombine.high %v3622_v6, %v3622_v6  ;;  %v3643_v8 = vcombine.high %v3641_v57, %v3641_v57  ;;  %v3657_v45 = vrot.slane %v3641_v57, %v10821_v0  ;;  %v9372_v28 = vpop.f32.mrf.mxu1 }
 0x143   : > { %v4091_v15 = vcombine.low %v4083_v25, %v4090_v33  ;;  %v4106_v48 = vrot.slane %v4099_v35, %v10821_v0  ;;  %v3664_v49 = vrot.slane %v3642_v23, %v10821_v0  ;;  %v3279_v50 = vadd.f32 %v9328_v22, %v10799_v20 }
 0x144   : > { %v4409_v32 = vpack.c.bf16 %v4075_v16, %v4075_v16  ;;  %v3671_v60 = vrot.slane %v3643_v8, %v10821_v0  ;;  %v3673_v55 = vcombine.high %v3657_v45, %v3657_v45  ;;  %v4122_v59 = vcombine.low %v3626_v43, %v3650_v30  ;;  %v9373_v34 = vpop.f32.mrf.mxu1  ;;  %v10984_v24 = vld.sshfl [vmem:[#allocation3 + $0x12] sm:$0x1 pattern:$0x76325410]  ;;  %v4468_v43 = vld [vmem:[#allocation3 + $0x1c] sm:$0x3] }
 0x145   : > { %v4098_v53 = vrot.slane %v4091_v15, %v10821_v0  ;;  %v4114_v18 = vcombine.low %v4106_v48, %v4113_v19  ;;  %v4136_v42 = vrot.slane %v3664_v49, %v10821_v0  ;;  %v8850_v63 = vcombine.high %v3650_v30, %v3664_v49  ;;  %v4465_v19 = vld [vmem:[#allocation3 + $0x1a] sm:$0x3] }
 0x146   : > { %v4457_v3 = vsel %vm10866_vm2, %v4409_v32, %v4456_v40  ;;  %v3675_v58 = vcombine.high %v3671_v60, %v3671_v60  ;;  %v4129_v17 = vrot.slane %v4122_v59, %v10821_v0  ;;  %v4159_v51 = vrot.slane %v3657_v45, %v10821_v0  ;;  %v9375_v14 = vpop.f32.mrf.mxu1 }
 0x147   : > { %v4121_v7 = vrot.slane %v4114_v18, %v10821_v0  ;;  %v4410_v9 = vpack.c.bf16 %v4098_v53, %v4098_v53  ;;  %4458 = vst [vmem:[#allocation3 + $0x14] sm:$0x3] %v4457_v3  ;;  %v4152_v10 = vrot.slane %v8850_v63, %v10821_v0  ;;  %v4168_v56 = vcombine.low %v3671_v60, %v3673_v55  ;;  %v4471_v55 = vld [vmem:[#allocation3 + $0x1e] sm:$0x3] }
 0x148   : > { %v4137_v31 = vcombine.low %v4129_v17, %v4136_v42  ;;  %v4182_v39 = vrot.slane %v3675_v58, %v10821_v0  ;;  %v9374_v62 = vadd.f32 %v9373_v34, %v9372_v28  ;;  %v9331_v21 = vadd.f32 %v9330_v1, %v9329_v37  ;;  %v9376_v57 = vpop.f32.mrf.mxu1  ;;  %v11003_v42 = vld.sshfl [vmem:[#allocation3 + $0xe] sm:$0x2 pattern:$0x76325410] }
 0x149   : > { %v4411_v46 = vpack.c.bf16 %v4121_v7, %v4121_v7  ;;  %v4460_v54 = vsel %vm10866_vm2, %v4410_v9, %v4459_v36  ;;  %v4160_v22 = vcombine.low %v4152_v10, %v4159_v51  ;;  %v4175_v6 = vrot.slane %v4168_v56, %v10821_v0 }
 0x14a   : > { %4461 = vst [vmem:[#allocation3 + $0x16] sm:$0x3] %v4460_v54  ;;  %v4144_v26 = vrot.slane %v4137_v31, %v10821_v0  ;;  %v3351_v27 = vadd.f32 %v9374_v62, %v3279_v50  ;;  %v3282_v44 = vadd.f32 %v9331_v21, %v10799_v20  ;;  %v9332_v23 = vpop.f32.mrf.mxu0  ;;  %v4677_v30 = vunpack.c.l.b16 %v10978_v11 }
 0x14b   : > { %v4463_v25 = vsel %vm10866_vm2, %v4411_v46, %v4462_v12  ;;  %v4167_v33 = vrot.slane %v4160_v22, %v10821_v0  ;;  %v4183_v35 = vcombine.low %v4175_v6, %v4182_v39  ;;  %v9377_v37 = vadd.f32 %v9376_v57, %v9375_v14 }
 0x14c   : > { %4464 = vst [vmem:[#allocation3 + $0x18] sm:$0x3] %v4463_v25  ;;  %v4412_v16 = vpack.c.bf16 %v4144_v26, %v4144_v26  ;;  %v3370_v8 = vmax.f32 %v3351_v27, 0.0  ;;  %v9333_v45 = vpop.f32.mrf.mxu0  ;;  %v4678_v15 = vunpack.c.l.b16 %v10984_v24  ;;  %v4685_v48 = vrot.slane %v4677_v30, 7 }
 0x14d   : > { %v4190_v40 = vrot.slane %v4183_v35, %v10821_v0  ;;  %v4413_v49 = vpack.c.bf16 %v4167_v33, %v4167_v33  ;;  %v3354_v50 = vadd.f32 %v9377_v37, %v3282_v44  ;;  %v9334_v32 = vadd.f32 %v9333_v45, %v9332_v23 }
 0x14e   : > { %v4466_v60 = vsel %vm10866_vm2, %v4412_v16, %v4465_v19  ;;  %v3676_v59 = vcombine.high %v3370_v8, %v3370_v8  ;;  %v3683_v28 = vrot.slane %v3370_v8, %v10821_v0  ;;  %v9335_v53 = vpop.f32.mrf.mxu0  ;;  %v11001_v18 = vsel %vm4582_vm4, %v4685_v48, %v10942_v5  ;;  %v9378_v36 = vpop.f32.mrf.mxu1 }
 0x14f   : > { %v4414_v63 = vpack.c.bf16 %v4190_v40, %v4190_v40  ;;  %4467 = vst [vmem:[#allocation3 + $0x1a] sm:$0x3] %v4466_v60  ;;  %v4469_v1 = vsel %vm10866_vm2, %v4413_v49, %v4468_v43  ;;  %v3371_v3 = vmax.f32 %v3354_v50, 0.0  ;;  %v3287_v58 = vadd.f32 %v9334_v32, %v10799_v20 }
 0x150   : > { %4470 = vst [vmem:[#allocation3 + $0x1c] sm:$0x3] %v4469_v1  ;;  %v3690_v17 = vrot.slane %v3676_v59, %v10821_v0  ;;  %v3691_v51 = vcombine.high %v3683_v28, %v3683_v28  ;;  %v3699_v34 = vrot.slane %v3683_v28, %v10821_v0  ;;  %v9336_v7 = vpop.f32.mrf.mxu0  ;;  %v11012_v5 = vrot.slane %v4678_v15, 6  ;;  %v9379_v12 = vpop.f32.mrf.mxu1 }
 0x151   : > { %v4472_v9 = vsel %vm10866_vm2, %v4414_v63, %v4471_v55  ;;  %v3725_v10 = vcombine.high %v3371_v3, %v3371_v3  ;;  %v3732_v56 = vrot.slane %v3371_v3, %v10821_v0  ;;  %v5071_v20 = vunpack.c.l.b16 %v11003_v42  ;;  %v4474_v7 = vld [vmem:[#allocation3 + $0x20] sm:$0x3] }
 0x152   : > { %4473 = vst [vmem:[#allocation3 + $0x1e] sm:$0x3] %v4472_v9  ;;  %v3692_v31 = vcombine.high %v3690_v17, %v3690_v17  ;;  %v3706_v39 = vrot.slane %v3690_v17, %v10821_v0  ;;  %v3713_v62 = vrot.slane %v3691_v51, %v10821_v0  ;;  %v3721_v14 = vcombine.high %v3699_v34, %v3699_v34  ;;  %v9381_v6 = vpop.f32.mrf.mxu1 }
 0x153   : > { %v3739_v21 = vrot.slane %v3725_v10, %v10821_v0  ;;  %v3740_v46 = vcombine.high %v3732_v56, %v3732_v56  ;;  %v3748_v54 = vrot.slane %v3732_v56, %v10821_v0  ;;  %v9380_v22 = vadd.f32 %v9379_v12, %v9378_v36  ;;  %v11032_v59 = vld.sshfl [vmem:[#allocation3 + $0x18] sm:$0x1 pattern:$0x76325410] }
 0x154   : > { %v3720_v26 = vrot.slane %v3692_v31, %v10821_v0  ;;  %v3723_v27 = vcombine.high %v3713_v62, %v3713_v62  ;;  %v4191_v44 = vcombine.low %v3699_v34, %v3713_v62  ;;  %v4205_v57 = vrot.slane %v3721_v14, %v10821_v0  ;;  %v9382_v19 = vpop.f32.mrf.mxu1  ;;  %v4477_v14 = vld [vmem:[#allocation3 + $0x22] sm:$0x3] }
 0x155   : > { %v3741_v23 = vcombine.high %v3739_v21, %v3739_v21  ;;  %v3755_v25 = vrot.slane %v3739_v21, %v10821_v0  ;;  %v3762_v33 = vrot.slane %v3740_v46, %v10821_v0  ;;  %v3770_v35 = vcombine.high %v3748_v54, %v3748_v54  ;;  %v4480_v46 = vld [vmem:[#allocation3 + $0x24] sm:$0x3] }
 0x156   : > { %v4198_v37 = vrot.slane %v4191_v44, %v10821_v0  ;;  %v4214_v16 = vcombine.low %v3723_v27, %v3706_v39  ;;  %v4228_v43 = vrot.slane %v3720_v26, %v10821_v0  ;;  %v8851_v8 = vcombine.high %v3706_v39, %v3720_v26 }
 0x157   : > { %v3769_v45 = vrot.slane %v3741_v23, %v10821_v0  ;;  %v3771_v48 = vcombine.high %v3755_v25, %v3755_v25  ;;  %v3772_v40 = vcombine.high %v3762_v33, %v3762_v33  ;;  %v4251_v49 = vrot.slane %v3748_v54, %v10821_v0  ;;  %v8921_v29 = vld.sshfl [vmem:[#allocation3 + $0x1c] sm:$0x2 pattern:$0x76325410] }
 0x158   : > { %v4206_v50 = vcombine.low %v4198_v37, %v4205_v57  ;;  %v4221_v32 = vrot.slane %v4214_v16, %v10821_v0  ;;  %v4244_v60 = vrot.slane %v8851_v8, %v10821_v0  ;;  %v4260_v55 = vcombine.low %v3762_v33, %v3770_v35  ;;  %v4486_v8 = vld [vmem:[#allocation3 + $0x28] sm:$0x3] }
 0x159   : > { %v4274_v28 = vrot.slane %v3772_v40, %v10821_v0  ;;  %v4283_v53 = vcombine.low %v3755_v25, %v3769_v45  ;;  %v4297_v63 = vrot.slane %v3771_v48, %v10821_v0  ;;  %v3359_v1 = vadd.f32 %v9380_v22, %v3287_v58  ;;  %v11038_v34 = vld.sshfl [vmem:[#allocation3 + $0x1e] sm:$0x1 pattern:$0x76325410]  ;;  %v4483_v25 = vld [vmem:[#allocation3 + $0x26] sm:$0x3] }
 0x15a   : > { %v4213_v3 = vrot.slane %v4206_v50, %v10821_v0  ;;  %v4229_v36 = vcombine.low %v4221_v32, %v4228_v43  ;;  %v4252_v17 = vcombine.low %v4244_v60, %v4251_v49  ;;  %v4267_v51 = vrot.slane %v4260_v55, %v10821_v0 }
 0x15b   : > { %v4290_v9 = vrot.slane %v4283_v53, %v10821_v0  ;;  %v3372_v10 = vmax.f32 %v3359_v1, 0.0  ;;  %v3773_v56 = vcombine.high %v3769_v45, %v3769_v45  ;;  %v4679_v12 = vunpack.c.l.b16 %v11032_v59 }
 0x15c   : > { %v4236_v31 = vrot.slane %v4229_v36, %v10821_v0  ;;  %v4415_v58 = vpack.c.bf16 %v4213_v3, %v4213_v3  ;;  %v4259_v39 = vrot.slane %v4252_v17, %v10821_v0  ;;  %v4275_v62 = vcombine.low %v4267_v51, %v4274_v28  ;;  %v8897_v3 = vld.sshfl [vmem:[#allocation3 + $0x1a] sm:$0x2 pattern:$0x76325410] }
 0x15d   : > { %v4298_v21 = vcombine.low %v4290_v9, %v4297_v63  ;;  %v3774_v54 = vcombine.high %v3372_v10, %v3372_v10  ;;  %v3781_v22 = vrot.slane %v3372_v10, %v10821_v0  ;;  %v4680_v6 = vunpack.c.l.b16 %v11038_v34  ;;  %v11074_v9 = vld.sshfl [vmem:[#allocation3 + $0xa] sm:$0x1 pattern:$0x76325410] }
 0x15e   : > { %v4416_v26 = vpack.c.bf16 %v4236_v31, %v4236_v31  ;;  %v4475_v27 = vsel %vm10866_vm2, %v4415_v58, %v4474_v7  ;;  %v4282_v44 = vrot.slane %v4275_v62, %v10821_v0  ;;  %v4417_v57 = vpack.c.bf16 %v4259_v39, %v4259_v39  ;;  %v11077_v39 = vld.sshfl [vmem:[#allocation3 + $0x10] sm:$0x1 pattern:$0x76325410] }
 0x15f   : > { %4476 = vst [vmem:[#allocation3 + $0x20] sm:$0x3] %v4475_v27  ;;  %v4305_v23 = vrot.slane %v4298_v21, %v10821_v0  ;;  %v3788_v33 = vrot.slane %v3774_v54, %v10821_v0  ;;  %v3789_v35 = vcombine.high %v3781_v22, %v3781_v22  ;;  %v3797_v19 = vrot.slane %v3781_v22, %v10821_v0  ;;  %v4489_v27 = vld [vmem:[#allocation3 + $0x2a] sm:$0x3] }
 0x160   : > { %v4478_v37 = vsel %vm10866_vm2, %v4416_v26, %v4477_v14  ;;  %v4418_v16 = vpack.c.bf16 %v4282_v44, %v4282_v44  ;;  %v4481_v43 = vsel %vm10866_vm2, %v4417_v57, %v4480_v46  ;;  %v4688_v45 = vsel %vm4585_vm5, %v11012_v5, %v11001_v18  ;;  %v8896_v18 = vld.sshfl [vmem:[#allocation3 + $0x14] sm:$0x2 pattern:$0x76325410] }
 0x161   : > { %4479 = vst [vmem:[#allocation3 + $0x22] sm:$0x3] %v4478_v37  ;;  %v4419_v48 = vpack.c.bf16 %v4305_v23, %v4305_v23  ;;  %4482 = vst [vmem:[#allocation3 + $0x24] sm:$0x3] %v4481_v43  ;;  %v3790_v40 = vcombine.high %v3788_v33, %v3788_v33  ;;  %v3804_v49 = vrot.slane %v3788_v33, %v10821_v0  ;;  %v4689_v55 = vrot.slane %v4679_v12, 5 }
 0x162   : > { %v3811_v50 = vrot.slane %v3789_v35, %v10821_v0  ;;  %v4484_v32 = vsel %vm10866_vm2, %v4418_v16, %v4483_v25  ;;  %v4306_v60 = vcombine.low %v3773_v56, %v3797_v19  ;;  %v4691_v28 = vrot.slane %v4680_v6, 4  ;;  %v11086_v23 = vld.sshfl [vmem:[#allocation3 + $0x16] sm:$0x1 pattern:$0x76325410] }
 0x163   : > { %4485 = vst [vmem:[#allocation3 + $0x26] sm:$0x3] %v4484_v32  ;;  %v4487_v5 = vsel %vm10866_vm2, %v4419_v48, %v4486_v8  ;;  %v3818_v53 = vrot.slane %v3790_v40, %v10821_v0  ;;  %v3820_v63 = vcombine.high %v3804_v49, %v3804_v49  ;;  %v4343_v51 = vrot.slane %v3804_v49, %v10821_v0  ;;  %v11088_v25 = vld.sshfl [vmem:[#allocation3 + $0x1c] sm:$0x1 pattern:$0x76325410] }
 0x164   : > { %v4320_v1 = vrot.slane %v3811_v50, %v10821_v0  ;;  %4488 = vst [vmem:[#allocation3 + $0x28] sm:$0x3] %v4487_v5  ;;  %v4313_v36 = vrot.slane %v4306_v60, %v10821_v0  ;;  %v8852_v17 = vcombine.high %v3797_v19, %v3811_v50  ;;  %v4690_v7 = vsel %vm4588_vm6, %v4689_v55, %v4688_v45  ;;  %v4492_v40 = vld [vmem:[#allocation3 + $0x2c] sm:$0x3] }
 0x165   : > { %v3822_v10 = vcombine.high %v3818_v53, %v3818_v53  ;;  %v4352_v56 = vcombine.low %v3818_v53, %v3820_v63  ;;  %v4692_v31 = vsel %vm4591_vm7, %v4691_v28, %v4690_v7  ;;  %v5072_v58 = vunpack.c.l.b16 %v8896_v18  ;;  %v11107_v53 = vld.sshfl [vmem:[#allocation3 + $0x2] sm:$0x1 pattern:$0x76325410] }
 0x166   : > { %v4321_v62 = vcombine.low %v4313_v36, %v4320_v1  ;;  %v4336_v14 = vrot.slane %v8852_v17, %v10821_v0  ;;  %v8898_v21 = vld.sshfl [vmem:[#allocation3 + $0x20] sm:$0x2 pattern:$0x76325410]  ;;  %v5073_v46 = vunpack.c.l.b16 %v8897_v3  ;;  %v5080_v54 = vsel %vm4582_vm4, %v5071_v20, %v10951_v47  ;;  %v4495_v3 = vld [vmem:[#allocation3 + $0x2e] sm:$0x3] }
 0x167   : > { %v4359_v22 = vrot.slane %v4352_v56, %v10821_v0  ;;  %v4366_v26 = vrot.slane %v3822_v10, %v10821_v0  ;;  %v5074_v44 = vunpack.c.l.b16 %v8898_v21  ;;  %v5081_v57 = vrot.slane %v5072_v58, 7  ;;  %v11117_v7 = vld.sshfl [vmem:[#allocation3 + $0x14] sm:$0x1 pattern:$0x76325410] }
 0x168   : > { %v4328_v33 = vrot.slane %v4321_v62, %v10821_v0  ;;  %v4344_v35 = vcombine.low %v4336_v14, %v4343_v51  ;;  %v11091_v19 = vld.sshfl [vmem:[#allocation3 + $0x24] sm:$0x1 pattern:$0x76325410]  ;;  %v5083_v37 = vrot.slane %v5073_v46, 6  ;;  %v5267_v42 = vunpack.c.l.b16 %v11074_v9 }
 0x169   : > { %v4367_v47 = vcombine.low %v4359_v22, %v4366_v26  ;;  %v4681_v20 = vunpack.c.l.b16 %v11091_v19  ;;  %v5082_v16 = vsel %vm4585_vm5, %v5081_v57, %v5080_v54  ;;  %v5085_v43 = vrot.slane %v5074_v44, 5  ;;  %v11096_v8 = vld.sshfl [vmem:[#allocation3 + $0x22] sm:$0x1 pattern:$0x76325410]  ;;  %v9619_v19 = vld [vmem:[%s12416_s4 + $0x40] sm:$0xff]  }
 0x16a   : > { %v4351_v45 = vrot.slane %v4344_v35, %v10821_v0  ;;  %v4420_v48 = vpack.c.bf16 %v4328_v33, %v4328_v33  ;;  %v8899_v49 = vld.sshfl [vmem:[#allocation3 + $0x26] sm:$0x2 pattern:$0x76325410]  ;;  %v5084_v50 = vsel %vm4588_vm6, %v5083_v37, %v5082_v16  ;;  %v5268_v32 = vunpack.c.l.b16 %v11077_v39 }
 0x16b   : > { %v4374_v60 = vrot.slane %v4367_v47, %v10821_v0  ;;  %v4693_v55 = vrot.slane %v4681_v20, 3  ;;  %v5075_v28 = vunpack.c.l.b16 %v8899_v49  ;;  %v5086_v18 = vsel %vm4591_vm7, %v5085_v43, %v5084_v50  ;;  %v11105_v5 = vld.sshfl [vmem:[#allocation3 + $0x28] sm:$0x1 pattern:$0x76325410]  ;;  %v9611_v49 = vld [vmem:[%s12416_s4 + $0x90] sm:$0xff]  }
 0x16c   : > { %v4421_v63 = vpack.c.bf16 %v4351_v45, %v4351_v45  ;;  %v4490_v1 = vsel %vm10866_vm2, %v4420_v48, %v4489_v27  ;;  %v5269_v36 = vunpack.c.l.b16 %v11086_v23  ;;  %v12437_v17 = vunpack.c.l.b16 %v11088_v25  ;;  %v11113_v0 = vld.sshfl [vmem:[#allocation3 + $0x8] sm:$0x1 pattern:$0x76325410]  ;;  %v9612_v50 = vld [vmem:[%s12416_s4 + $0x50] sm:$0xff]   ;;  %9417 = vmatpush3.bf16.msra.mxu1 %v9611_v49 }
 0x16d   : > { %v11115_v51 = vld.sshfl [vmem:[#allocation3 + $0xe] sm:$0x1 pattern:$0x76325410]  ;;  %v4422_v10 = vpack.c.bf16 %v4374_v60, %v4374_v60  ;;  %4491 = vst [vmem:[#allocation3 + $0x2a] sm:$0x3] %v4490_v1  ;;  %v11120_v56 = vsel %vm4594_vm8, %v4693_v55, %v4692_v31  ;;  %v12435_v62 = vunpack.c.l.b16 %v11096_v8  ;;  %v12434_v46 = vunpack.c.l.b16 %v11105_v5  ;;  %9394 = vmatprep.subr.bf16.mxu0 %v9612_v50 }
 0x16e   : > { %v5087_v58 = vrot.slane %v5075_v28, 4  ;;  %v11123_v14 = vld.sshfl [vmem:[#allocation3 + $0x1a] sm:$0x1 pattern:$0x76325410]  ;;  %v4493_v21 = vsel %vm10866_vm2, %v4421_v63, %v4492_v40  ;;  %v5274_v54 = vrot.slane %v12436_v13, 1  ;;  %v4873_v47 = vunpack.c.l.b16 %v11107_v53 }
 0x16f   : > { %v5276_v22 = vrot.slane %v5268_v32, 7  ;;  %v11132_v26 = vld.sshfl [vmem:[#allocation3 + $0x20] sm:$0x1 pattern:$0x76325410]  ;;  %v4496_v31 = vsel %vm10866_vm2, %v4422_v10, %v4495_v3  ;;  %v5278_v44 = vrot.slane %v5269_v36, 6  ;;  %v12439_v45 = vunpack.c.l.b16 %v11113_v0 }
 0x170   : > { %4494 = vst [vmem:[#allocation3 + $0x2c] sm:$0x3] %v4493_v21  ;;  %v11137_v27 = vsel %vm4594_vm8, %v5087_v58, %v5086_v18  ;;  %v5280_v57 = vrot.slane %v12437_v17, 5  ;;  %4497 = vst [vmem:[#allocation3 + $0x2e] sm:$0x3] %v4496_v31  ;;  %v5275_v35 = vsel %vm4579_vm3, %v5267_v42, %v5274_v54  ;;  %v5282_v61 = vrot.slane %v12435_v62, 4 }
 0x171   : > { %v11143_v33 = vld.sshfl [vmem:[#allocation3 + $0x26] sm:$0x1 pattern:$0x76325410]  ;;  %v5284_v37 = vrot.slane %v12434_v46, 3  ;;  %v5277_v43 = vsel %vm4582_vm4, %v5276_v22, %v5275_v35  ;;  %v4875_v48 = vunpack.c.l.b16 %v11115_v51  ;;  %v4876_v40 = vunpack.c.l.b16 %v11117_v7 }
 0x172   : > { %v11153_v16 = vld.sshfl [vmem:[#allocation3 + $0xa] sm:$0x2 pattern:$0x76325410]  ;;  %v9613_v60 = vld [vmem:[%s12416_s4 + $0x10] sm:$0xff]   ;;  %v5279_v55 = vsel %vm4585_vm5, %v5278_v44, %v5277_v43  ;;  %v4877_v28 = vunpack.c.l.b16 %v11123_v14  ;;  %v4878_v18 = vunpack.c.l.b16 %v11132_v26  ;;  %v4879_v63 = vunpack.c.l.b16 %v11143_v33 }
 0x173   : > { %v11172_v1 = vld.sshfl [vmem:[#allocation3 + $0x10] sm:$0x2 pattern:$0x76325410]  ;;  %v5281_v3 = vsel %vm4588_vm6, %v5280_v57, %v5279_v55  ;;  %v4881_v10 = vrot.slane %v12439_v45, 7  ;;  %v4883_v58 = vrot.slane %v4875_v48, 6  ;;  %v5366_v57 = vunpack.c.l.b16 %v11153_v16  ;;  %9395 = vmatpush3.bf16.msra.mxu0 %v9613_v60 }
 0x174   : > { %v4885_v21 = vrot.slane %v4876_v40, 5  ;;  %v8868_v54 = vld.sshfl [vmem:[#allocation3 + $0x2a] sm:$0x1 pattern:$0x76325410]  ;;  %v5283_v22 = vsel %vm4591_vm7, %v5282_v61, %v5281_v3  ;;  %v4887_v31 = vrot.slane %v4877_v28, 4 }
 0x175   : > { %v4889_v44 = vrot.slane %v4878_v18, 3  ;;  %v4682_v35 = vunpack.c.l.b16 %v8868_v54  ;;  %v5285_v43 = vsel %vm4594_vm8, %v5284_v37, %v5283_v22  ;;  %v4882_v49 = vsel %vm4579_vm3, %v4881_v10, %v4873_v47  ;;  %v9614_v61 = vld [vmem:[%s12416_s4 + $0xc8] sm:$0xff]   ;;  %v8920_v54 = vld.sshfl [vmem:[#allocation3 + $0x16] sm:$0x2 pattern:$0x76325410] }
 0x176   : > { %v4891_v50 = vrot.slane %v4879_v63, 2  ;;  %v4884_v3 = vsel %vm4582_vm4, %v4883_v58, %v4882_v49  ;;  %v11199_v60 = vrot.slane %v4676_v52, 7  ;;  %v11203_v37 = vrot.slane %v4677_v30, 6  ;;  %9418 = vmatprep.subr.bf16.mxu1 %v9614_v61  ;;  %v9621_v45 = vld [vmem:[%s12416_s4] sm:$0xff]  }
 0x177   : > { %v8900_v55 = vld.sshfl [vmem:[#allocation3 + $0x2c] sm:$0x2 pattern:$0x76325410]  ;;  %v4695_v22 = vrot.slane %v4682_v35, 2  ;;  %v4886_v13 = vsel %vm4585_vm5, %v4885_v21, %v4884_v3  ;;  %v11211_v58 = vrot.slane %v4678_v15, 5 }
 0x178   : > { %v5076_v46 = vunpack.c.l.b16 %v8900_v55  ;;  %v11206_v62 = vld.sshfl [vmem:[#allocation3 + $0x2e] sm:$0x1 pattern:$0x76325410]  ;;  %v4888_v49 = vsel %vm4588_vm6, %v4887_v31, %v4886_v13  ;;  %v4587_v55 = vrot.slane %v4679_v12, 4  ;;  %v11221_v10 = vrot.slane %v4680_v6, 3 }
 0x179   : > { %v8922_v52 = vld.sshfl [vmem:[#allocation3 + $0x22] sm:$0x2 pattern:$0x76325410]  ;;  %v12438_v11 = vunpack.c.l.b16 %v11206_v62  ;;  %v4696_v24 = vsel %vm4597_vm9, %v4695_v22, %v11120_v56  ;;  %v4890_v3 = vsel %vm4591_vm7, %v4889_v44, %v4888_v49  ;;  %v9615_v13 = vld [vmem:[%s12416_s4 + $0x88] sm:$0xff]   ;;  %v4593_v6 = vrot.slane %v4681_v20, 2 }
 0x17a   : > { %v11214_v30 = vld.sshfl [vmem:[#allocation3 + $0x2c] sm:$0x1 pattern:$0x76325410]  ;;  %v5089_v15 = vrot.slane %v5076_v46, 3  ;;  %v4697_v59 = vpack.c.b16 %v4696_v24, %v4696_v24  ;;  %v4892_v12 = vsel %vm4594_vm8, %v4891_v50, %v4890_v3  ;;  %v9616_v56 = vld [vmem:[%s12416_s4 + $0x48] sm:$0xff]   ;;  %9419 = vmatpush3.bf16.msra.mxu1 %v9615_v13  ;;  %v5369_v3 = vunpack.c.l.b16 %v8921_v29 }
 0x17b   : > { %v8923_v21 = vld.sshfl [vmem:[#allocation3 + $0x28] sm:$0x2 pattern:$0x76325410]  ;;  %v4880_v61 = vunpack.c.l.b16 %v11214_v30  ;;  %v5286_v34 = vrot.slane %v12438_v11, 2  ;;  %v9617_v46 = vld [vmem:[%s12416_s4 + $0x8] sm:$0xff]   ;;  %v5368_v30 = vunpack.c.l.b16 %v8920_v54  ;;  %9396 = vmatprep.subr.bf16.mxu0 %v9616_v56 }
 0x17c   : > { %v8924_v17 = vld.sshfl [vmem:[#allocation3 + $0x2e] sm:$0x2 pattern:$0x76325410]  ;;  %v9618_v31 = vld [vmem:[%s12416_s4 + $0xc0] sm:$0xff]   ;;  %v5090_v44 = vsel %vm4597_vm9, %v5089_v15, %v11137_v27  ;;  %v4596_v50 = vrot.slane %v4682_v35, 1  ;;  %4698 = vrot.lane.b32.xlu1 %v4697_v59, %s10145_s16  ;;  %v5370_v27 = vunpack.c.l.b16 %v8922_v52  ;;  %v5371_v15 = vunpack.c.l.b16 %v8923_v21  ;;  %9397 = vmatpush3.bf16.msra.mxu0 %v9617_v46 }
 0x17d   : > { %v4893_v22 = vrot.slane %v4880_v61, 1  ;;  %v9620_v20 = vld [vmem:[%s12416_s4 + $0x80] sm:$0xff]   ;;  %v5091_v49 = vpack.c.b16 %v5090_v44, %v5090_v44  ;;  %v5287_v24 = vsel %vm4597_vm9, %v5286_v34, %v5285_v43  ;;  %v5372_v13 = vunpack.c.l.b16 %v8924_v17  ;;  %v8917_v11 = vld.sshfl [vmem:[#allocation3 + $0x4] sm:$0x2 pattern:$0x76325410]  ;;  %9420 = vmatprep.subr.bf16.mxu1 %v9618_v31  ;;  %9398 = vmatprep.subr.bf16.mxu0 %v9619_v19 }
 0x17e   : > { %v5288_v35 = vpack.c.b16 %v5287_v24, %v5287_v24  ;;  %v5374_v43 = vrot.slane %v5366_v57, 1  ;;  %v5377_v29 = vrot.slane %v5368_v30, 7  ;;  %v5379_v52 = vrot.slane %v5369_v3, 6  ;;  %9421 = vmatpush3.bf16.msra.mxu1 %v9620_v20 }
 0x17f   : > { %v4894_v54 = vsel %vm4597_vm9, %v4893_v22, %v4892_v12  ;;  %5092 = vrot.lane.b32.xlu0 %v5091_v49, %s10145_s16  ;;  %v5381_v34 = vrot.slane %v5370_v27, 5  ;;  %v5383_v12 = vrot.slane %v5371_v15, 4  ;;  %v5385_v21 = vrot.slane %v5372_v13, 3 }
 0x180   : > { %v4895_v59 = vpack.c.b16 %v4894_v54, %v4894_v54  ;;  %v4580_v17 = vsel %vm4579_vm3, %v11199_v60, %v4675_v41  ;;  %v5365_v46 = vunpack.c.l.b16 %v8917_v11  ;;  %v4982_v16 = vrot.slane %v4875_v48, 7  ;;  %9399 = vmatpush3.bf16.msra.mxu0 %v9621_v45  ;;  %v8872_v22 = vld.sshfl [vmem:[#allocation3 + $0x12] sm:$0x2 pattern:$0x76325410] }
 0x181   : > { %v4583_v56 = vsel %vm4582_vm4, %v11203_v37, %v4580_v17  ;;  %v4984_v57 = vrot.slane %v4876_v40, 6  ;;  %v4986_v2 = vrot.slane %v4877_v28, 5  ;;  %v4988_v41 = vrot.slane %v4878_v18, 4 }
 0x182   : > { %4896 = vrot.lane.b32.xlu1 %v4895_v59, %s10145_s16  ;;  %v4586_v31 = vsel %vm4585_vm5, %v11211_v58, %v4583_v56  ;;  %v4990_v60 = vrot.slane %v4879_v63, 3  ;;  %v5373_v48 = vrot.slane %v5365_v46, 2  ;;  %v4992_v7 = vrot.slane %v4880_v61, 2 }
 0x183   : > { %5289 = vrot.lane.b32.xlu0 %v5288_v35, %s10145_s16  ;;  %v4589_v51 = vsel %vm4588_vm6, %v4587_v55, %v4586_v31  ;;  %v4980_v40 = vrot.slane %v4873_v47, 1  ;;  %v5177_v26 = vrot.slane %v5267_v42, 7  ;;  %v5179_v33 = vrot.slane %v5268_v32, 6  ;;  %s9288_s16 = sshll.u32 %s10251_s22, 7  ;;  %s10149_s22 = smov [#allocation6]  }
 0x184   : > { %v4592_v14 = vsel %vm4591_vm7, %v11221_v10, %v4589_v51  ;;  %v5181_v45 = vrot.slane %v5269_v36, 5  ;;  %v5375_v18 = vsel %vm4579_vm3, %v5374_v43, %v5373_v48  ;;  %v12450_v63 = vunpack.c.l.b16 %v11113_v0  ;;  %v8869_v10 = vld.sshfl [vmem:[#allocation3] sm:$0x2 pattern:$0x76325410]  ;;  %s12377_s17 = scalar_lea.hbm %s12427_s15, %s9288_s16  ;;  %s10085_s27 = sshll.u32 %s10149_s22, 4  ;;  %s10086_s27 = int_to_ptr.vmem [resolvable:$false] %s10085_s27 }
 0x185   : > { %v4595_v28 = vsel %vm4594_vm8, %v4593_v6, %v4592_v14  ;;  %v12451_v47 = vunpack.c.l.b16 %v11088_v25  ;;  %v12452_v42 = vunpack.c.l.b16 %v11172_v1  ;;  %v12453_v32 = vunpack.c.l.b16 %v10937_v4  ;;  %v8870_v55 = vld.sshfl [vmem:[#allocation3 + $0x6] sm:$0x2 pattern:$0x76325410]  ;;  %s10087_s29 = scalar_lea.vmem %s10086_s27, 256  ;;  %p10088_p1 = scmp.lt.s32.totalorder %s8463_s25, %s10086_s27 }
 0x186   : > { %v4981_v53 = vsel %vm4579_vm3, %v12450_v63, %v4980_v40  ;;  %v4598_v9 = vsel %vm4597_vm9, %v4596_v50, %v4595_v28  ;;  %v12454_v44 = vunpack.c.l.b16 %v11096_v8  ;;  %v8873_v50 = vld.sshfl [vmem:[#allocation3 + $0x18] sm:$0x2 pattern:$0x76325410]  ;;  %v12455_v49 = vunpack.c.l.b16 %v11105_v5 }
 0x187   : > { %v5183_v37 = vrot.slane %v12451_v47, 4  ;;  %v5376_v39 = vsel %vm4582_vm4, %v12452_v42, %v5375_v18  ;;  %v4983_v23 = vsel %vm4582_vm4, %v4982_v16, %v4981_v53  ;;  %v5178_v36 = vsel %vm4579_vm3, %v5177_v26, %v12453_v32  ;;  %v8871_v3 = vld.sshfl [vmem:[#allocation3 + $0xc] sm:$0x2 pattern:$0x76325410] }
 0x188   : > { %v4599_v58 = vpack.c.b16 %v4598_v9, %v4598_v9  ;;  %v5378_v0 = vsel %vm4585_vm5, %v5377_v29, %v5376_v39  ;;  %v4985_v11 = vsel %vm4585_vm5, %v4984_v57, %v4983_v23  ;;  %v5180_v25 = vsel %vm4582_vm4, %v5179_v33, %v5178_v36  ;;  %v8874_v27 = vld.sshfl [vmem:[#allocation3 + $0x1e] sm:$0x2 pattern:$0x76325410] }
 0x189   : > { %v5380_v61 = vsel %vm4588_vm6, %v5379_v52, %v5378_v0  ;;  %v4987_v1 = vsel %vm4588_vm6, %v4986_v2, %v4985_v11  ;;  %v5182_v6 = vsel %vm4585_vm5, %v5181_v45, %v5180_v25  ;;  %v5185_v4 = vrot.slane %v12454_v44, 3  ;;  %v8875_v59 = vld.sshfl [vmem:[#allocation3 + $0x24] sm:$0x2 pattern:$0x76325410] }
 0x18a   : > { %4602 = vst.msk [vmem:[#allocation4] sm:$0xf] %vm4601_vm10, %v4599_v58  ;;  %v5382_v30 = vsel %vm4591_vm7, %v5381_v34, %v5380_v61  ;;  %v4989_v19 = vsel %vm4591_vm7, %v4988_v41, %v4987_v1  ;;  %v5184_v20 = vsel %vm4588_vm6, %v5183_v37, %v5182_v6  ;;  %v5187_v24 = vrot.slane %v12455_v49, 2 }
 0x18b   : > { %v5384_v35 = vsel %vm4594_vm8, %v5383_v12, %v5382_v30  ;;  %v4991_v8 = vsel %vm4594_vm8, %v4990_v60, %v4989_v19  ;;  %v5186_v54 = vsel %vm4591_vm7, %v5185_v4, %v5184_v20  ;;  %v12456_v15 = vunpack.c.l.b16 %v11206_v62  ;;  %v8876_v5 = vld.sshfl [vmem:[#allocation3 + $0x2a] sm:$0x2 pattern:$0x76325410]  ;;  %v5837_v62 = vld [vmem:[%s12418_s6 + $0x20] sm:$0x77] }
 0x18c   : > { %v5386_v43 = vsel %vm4597_vm9, %v5385_v21, %v5384_v35  ;;  %v4993_v29 = vsel %vm4597_vm9, %v4992_v7, %v4991_v8  ;;  %v5188_v52 = vsel %vm4594_vm8, %v5187_v24, %v5186_v54  ;;  %v4775_v34 = vunpack.c.l.b16 %v8869_v10  ;;  %v9631_v4 = vld [vmem:[%s12418_s6 + $0x4] ss:$16 sps:$4 sm:$0xff]   ;;  %v9629_v30 = vld [vmem:[%s12418_s6] ss:$16 sps:$4 sm:$0xff]   ;;  %v9634_v24 = vld [vmem:[%s12416_s4 + $0x108] sm:$0xff]  }
 0x18d   : > { %v5189_v13 = vrot.slane %v12456_v15, 1  ;;  %v5387_v17 = vpack.c.b16 %v5386_v43, %v5386_v43  ;;  %v4994_v56 = vpack.c.b16 %v4993_v29, %v4993_v29  ;;  %v4776_v46 = vunpack.c.l.b16 %v8870_v55  ;;  %v9627_v55 = vld [vmem:[%s12416_s4 + $0x118] sm:$0xff]   ;;  %v9639_v8 = vld [vmem:[%s12416_s4 + $0x100] sm:$0xff]  }
 0x18e   : > { %v4778_v57 = vunpack.c.l.b16 %v8872_v22  ;;  %v4779_v31 = vunpack.c.l.b16 %v8873_v50  ;;  %v4777_v21 = vunpack.c.l.b16 %v8871_v3  ;;  %v4780_v2 = vunpack.c.l.b16 %v8874_v27  ;;  %v9632_v22 = vld [vmem:[%s12416_s4 + $0x110] sm:$0xff]   ;;  %v5838_v50 = vld [vmem:[%s12418_s6 + $0x28] sm:$0x77]  ;;  %v5832_v3 = vld [vmem:[%s514_s21] sm:$0xf]  ;;  %s10081_s21 = scalar_lea.vmem %s8463_s25, 128 }
 0x18f   : > { %v5190_v12 = vsel %vm4597_vm9, %v5189_v13, %v5188_v52  ;;  %5389 = vst.msk [vmem:[#allocation4 + $0x10] sm:$0xf] %vm4601_vm10, %v5387_v17  ;;  %4996 = vst.msk [vmem:[#allocation4 + $0x8] sm:$0xf] %vm4601_vm10, %v4994_v56  ;;  %v4781_v41 = vunpack.c.l.b16 %v8875_v59  ;;  %v4782_v60 = vunpack.c.l.b16 %v8876_v5  ;;  %v4783_v51 = vrot.slane %v4775_v34, 2  ;;  %p10082_p12 = scmp.ne.s32.totalorder %s8463_s25, %s10081_s21  ;;  %p10089_p2 = scmp.lt.s32.totalorder %s10087_s29, %s10081_s21 }
 0x190   : > { %v5191_v16 = vpack.c.b16 %v5190_v12, %v5190_v12  ;;  %v4784_v48 = vrot.slane %v4776_v46, 1  ;;  %v4787_v7 = vrot.slane %v4778_v57, 7  ;;  %v4789_v40 = vrot.slane %v4779_v31, 6  ;;  %v9638_v35 = vld [vmem:[%s12418_s6 + $0xc] ss:$16 sps:$4 sm:$0xff]  }
 0x191   : > { %v10146_v14 = vmov 0.0   ;;  %v8973_v26 = vcombine.high %v5837_v62, %v5837_v62  ;;  %v4791_v45 = vrot.slane %v4780_v2, 5  ;;  %v4793_v18 = vrot.slane %v4781_v41, 4  ;;  %v9643_v54 = vld [vmem:[%s12420_s8 + $0xe4] ss:$16 sps:$4 sm:$0xff]   ;;  %p10083_p13 = pnand %p10082_p12, %p10268_p5  ;;  %p10090_p3 = por %p10089_p2, %p10088_p1 }
 0x192   : > { %5193 = vst.msk [vmem:[#allocation4 + $0xc] sm:$0xf] %vm4601_vm10, %v5191_v16  ;;  %9477 = vmatprep.subr.bf16.mxu0 %v10146_v14  ;;  %v4785_v33 = vsel %vm4579_vm3, %v4784_v48, %v4783_v51  ;;  %v4795_v53 = vrot.slane %v4782_v60, 3  ;;  %v8972_v0 = vcombine.low %v5837_v62, %v5837_v62  ;;  %v10147_v19 = vmov 0   ;;  %v9636_v15 = vld [vmem:[%s12418_s6 + $0x8] ss:$16 sps:$4 sm:$0xff]  }
 0x193   : > { %v4786_v28 = vsel %vm4582_vm4, %v4777_v21, %v4785_v33  ;;  %8976 = vmatprep.subr.msk.bf16.mxu1 %vm5895_vm11, %v8973_v26  ;;  %v8975_v20 = vcombine.high %v5838_v50, %v5838_v50  ;;  %v8974_v49 = vcombine.low %v5838_v50, %v5838_v50  ;;  %v9652_v13 = vld [vmem:[%s12420_s8 + $0x2e4] ss:$16 sps:$4 sm:$0xff]   ;;  %v9641_v59 = vld [vmem:[%s12420_s8 + $0xe0] ss:$16 sps:$4 sm:$0xff]   ;;  %p10084_p0 = pneg %p10083_p13 }
 0x194   : > { %v4788_v63 = vsel %vm4585_vm5, %v4787_v7, %v4786_v28  ;;  %v5897_v44 = vsel %vm5895_vm11, %v8972_v0, 0  ;;  %v9646_v29 = vld [vmem:[%s12420_s8 + $0xc4] ss:$16 sps:$4 sm:$0xff]   ;;  %v9650_v52 = vld [vmem:[%s12420_s8 + $0x2e0] ss:$16 sps:$4 sm:$0xff]  }
 0x195   : > { %v4790_v47 = vsel %vm4588_vm6, %v4789_v40, %v4788_v63  ;;  %v5903_v27 = vsel %vm5895_vm11, %v8974_v49, 0  ;;  %v9658_v5 = vld [vmem:[%s12420_s8 + $0x2c4] ss:$16 sps:$4 sm:$0xff]   ;;  %v9644_v34 = vld [vmem:[%s12420_s8 + $0xc0] ss:$16 sps:$4 sm:$0xff]   ;;  %p10091_p4 = pnand %p10090_p3, %p10084_p0 }
 0x196   : > { %v4792_v37 = vsel %vm4591_vm7, %v4791_v45, %v4790_v47  ;;  %v9640_v43 = vld [vmem:[#allocation4 + $0x10] ss:$0 sps:$4 sm:$0xff]   ;;  %v9649_v17 = vld [vmem:[%s12420_s8 + $0xa4] ss:$16 sps:$4 sm:$0xff]  }
 0x197   : > { %v4794_v9 = vsel %vm4594_vm8, %v4793_v18, %v4792_v37  ;;  %v9656_v56 = vld [vmem:[%s12420_s8 + $0x2c0] ss:$16 sps:$4 sm:$0xff]   ;;  %v9664_v12 = vld [vmem:[%s12420_s8 + $0x2a4] ss:$16 sps:$4 sm:$0xff]  }
 0x198   : > { %v4796_v42 = vsel %vm4597_vm9, %v4795_v53, %v4794_v9  ;;  %v9647_v46 = vld [vmem:[%s12420_s8 + $0xa0] ss:$16 sps:$4 sm:$0xff]   ;;  %v9655_v16 = vld [vmem:[%s12420_s8 + $0x84] ss:$16 sps:$4 sm:$0xff]  }
 0x199   : > { %v4797_v39 = vpack.c.b16 %v4796_v42, %v4796_v42  ;;  %v9662_v57 = vld [vmem:[%s12420_s8 + $0x2a0] ss:$16 sps:$4 sm:$0xff]   ;;  %v9670_v31 = vld [vmem:[%s12420_s8 + $0x284] ss:$16 sps:$4 sm:$0xff]  }
 0x19a   : > { %v9653_v62 = vld [vmem:[%s12420_s8 + $0x80] ss:$16 sps:$4 sm:$0xff]   ;;  %v9661_v21 = vld [vmem:[%s12420_s8 + $0x64] ss:$16 sps:$4 sm:$0xff]  }
 0x19b   : > { %4799 = vst.msk [vmem:[#allocation4 + $0x4] sm:$0xf] %vm4601_vm10, %v4797_v39  ;;  %v9668_v2 = vld [vmem:[%s12420_s8 + $0x280] ss:$16 sps:$4 sm:$0xff]   ;;  %v9676_v41 = vld [vmem:[%s12420_s8 + $0x264] ss:$16 sps:$4 sm:$0xff]  }
 0x19c   : > { %v9659_v60 = vld [vmem:[%s12420_s8 + $0x60] ss:$16 sps:$4 sm:$0xff]   ;;  %v9667_v51 = vld [vmem:[%s12420_s8 + $0x44] ss:$16 sps:$4 sm:$0xff]  }
 0x19d   : > { %v9674_v48 = vld [vmem:[%s12420_s8 + $0x260] ss:$16 sps:$4 sm:$0xff]   ;;  %v9682_v7 = vld [vmem:[%s12420_s8 + $0x244] ss:$16 sps:$4 sm:$0xff]  }
 0x19e   : > { %v9665_v40 = vld [vmem:[%s12420_s8 + $0x40] ss:$16 sps:$4 sm:$0xff]   ;;  %v9688_v33 = vld [vmem:[%s12420_s8 + $0x224] ss:$16 sps:$4 sm:$0xff]  }
 0x19f   : > { %v9680_v26 = vld [vmem:[%s12420_s8 + $0x240] ss:$16 sps:$4 sm:$0xff]   ;;  %v9679_v28 = vld [vmem:[%s12420_s8 + $0x4] ss:$16 sps:$4 sm:$0xff]  }
 0x1a0   : > { %v9671_v45 = vld [vmem:[%s12420_s8 + $0x20] ss:$16 sps:$4 sm:$0xff]   ;;  %v9694_v63 = vld [vmem:[%s12420_s8 + $0x204] ss:$16 sps:$4 sm:$0xff]  }
 0x1a1   : > { %v9686_v18 = vld [vmem:[%s12420_s8 + $0x220] ss:$16 sps:$4 sm:$0xff]   ;;  %v9685_v47 = vld [vmem:[%s12420_s8 + $0x1e4] ss:$16 sps:$4 sm:$0xff]  }
 0x1a2   : > { %v9677_v53 = vld [vmem:[%s12420_s8] ss:$16 sps:$4 sm:$0xff]   ;;  %v9700_v9 = vld [vmem:[%s12420_s8 + $0x3e4] ss:$16 sps:$4 sm:$0xff]  }
 0x1a3   : > { %v9692_v37 = vld [vmem:[%s12420_s8 + $0x200] ss:$16 sps:$4 sm:$0xff]   ;;  %v9691_v39 = vld [vmem:[%s12420_s8 + $0x1c4] ss:$16 sps:$4 sm:$0xff]  }
 0x1a4   : > { %v9683_v42 = vld [vmem:[%s12420_s8 + $0x1e0] ss:$16 sps:$4 sm:$0xff]   ;;  %v9718_v50 = vld [vmem:[%s12420_s8 + $0x384] ss:$16 sps:$4 sm:$0xff]  }
 0x1a5   : > { %v9695_v0 = vld [vmem:[%s12420_s8 + $0x1a0] ss:$16 sps:$4 sm:$0xff]  }
 0x1a6   : > { %v9722_v49 = vld [vmem:[%s12420_s8 + $0x360] ss:$16 sps:$4 sm:$0xff]  }
 0x1ee   : > { %v4699_v23 = vpop.permute.xlu1 %4698 }
 0x1ef   : > { %4702 = vst.msk [vmem:[#allocation4] sm:$0xf] %vm4701_vm12, %v4699_v23  ;;  %v9698_v23 = vld [vmem:[%s12420_s8 + $0x3e0] ss:$16 sps:$4 sm:$0xff]  }
 0x1f1   : > { %v5093_v32 = vpop.permute.xlu0 %5092 }
 0x1f2   : > { %5095 = vst.msk [vmem:[#allocation4 + $0x8] sm:$0xf] %vm4701_vm12, %v5093_v32  ;;  %v9706_v32 = vld [vmem:[%s12420_s8 + $0x3c4] ss:$16 sps:$4 sm:$0xff]  }
 0x1f4   : > { %v4897_v36 = vpop.permute.xlu1 %4896 }
 0x1f5   : > { %4899 = vst.msk [vmem:[#allocation4 + $0x4] sm:$0xf] %vm4701_vm12, %v4897_v36  ;;  %v5290_v10 = vpop.permute.xlu0 %5289  ;;  %v9689_v36 = vld [vmem:[%s12420_s8 + $0x1c0] ss:$16 sps:$4 sm:$0xff]  }
 0x1f6   : > { %5292 = vst.msk [vmem:[#allocation4 + $0xc] sm:$0xf] %vm4701_vm12, %v5290_v10  ;;  %v9697_v10 = vld [vmem:[%s12420_s8 + $0x1a4] ss:$16 sps:$4 sm:$0xff]  }
 0x1fc   : > { %v5390_v58 = vld [vmem:[#allocation4] sm:$0xff] }
 0x1fd   : > { %v8926_v11 = vcombine.low %v5390_v58, %v5390_v58  ;;  %v8927_v25 = vcombine.high %v5390_v58, %v5390_v58  ;;  %v5391_v61 = vld [vmem:[#allocation4 + $0x8] sm:$0xff]  ;;  %v9704_v58 = vld [vmem:[%s12420_s8 + $0x3c0] ss:$16 sps:$4 sm:$0xff]  }
 0x1fe   : > { %v8928_v1 = vcombine.low %v5391_v61, %v5391_v61  ;;  %v8929_v6 = vcombine.high %v5391_v61, %v5391_v61  ;;  %v9709_v61 = vld [vmem:[%s12420_s8 + $0x164] ss:$16 sps:$4 sm:$0xff]  }
 0x1ff   : > { %5741 = vmatprep.mubr.bf16.mxu0 %v8927_v25  ;;  %v9701_v25 = vld [vmem:[%s12420_s8 + $0x180] ss:$16 sps:$4 sm:$0xff]  }
 0x200   : > { %5742 = vmatmul.mubr.bf16.vlgmr.msra.gmra.mxu0 %v8926_v11  ;;  %5781 = vmatprep.mubr.bf16.mxu1 %v8929_v6  ;;  %v9703_v11 = vld [vmem:[%s12420_s8 + $0x184] ss:$16 sps:$4 sm:$0xff]  }
 0x201   : > { %9478 = vmatpush3.bf16.msra.mxu0 %v9627_v55  ;;  %5782 = vmatmul.mubr.bf16.vlgmr.msra.gmra.mxu1 %v8928_v1  ;;  %v9707_v55 = vld [vmem:[%s12420_s8 + $0x160] ss:$16 sps:$4 sm:$0xff]   ;;  %v9712_v6 = vld [vmem:[%s12420_s8 + $0x3a4] ss:$16 sps:$4 sm:$0xff]  }
 0x202   : > { %9479 = vmatprep.subr.bf16.mxu0 %v10146_v14  ;;  %5921 = vmatpush1.bf16.msra.mxu1 %v5897_v44  ;;  %v9710_v1 = vld [vmem:[%s12420_s8 + $0x3a0] ss:$16 sps:$4 sm:$0xff]  }
 0x203   : > { %5940 = vmatprep.mubr.bf16.mxu1 %v10147_v19  ;;  %5922 = vmatprep.subr.bf16.mxu1 %v9631_v4  ;;  %v9713_v44 = vld [vmem:[%s12420_s8 + $0x140] ss:$16 sps:$4 sm:$0xff]   ;;  %v9715_v4 = vld [vmem:[%s12420_s8 + $0x144] ss:$16 sps:$4 sm:$0xff]  }
 0x204   : > { %9485 = vmatprep.mubr.msk.bf16.mxu0 %vm10148_vm13, %v10146_v14 }
 0x205   : > { %9480 = vmatpush3.bf16.msra.mxu0 %v9632_v22  ;;  %v9716_v22 = vld [vmem:[%s12420_s8 + $0x380] ss:$16 sps:$4 sm:$0xff]  }
 0x206   : > { %9481 = vmatprep.subr.bf16.mxu0 %v10146_v14  ;;  %5923 = vmatpush1.bf16.msra.mxu1 %v9629_v30  ;;  %v9719_v30 = vld [vmem:[%s12420_s8 + $0x120] ss:$16 sps:$4 sm:$0xff]  }
 0x207   : > { %8978 = vmatprep.subr.msk.bf16.mxu1 %vm5895_vm11, %v8975_v20  ;;  %v9721_v20 = vld [vmem:[%s12420_s8 + $0x124] ss:$16 sps:$4 sm:$0xff]  }
 0x209   : > { %9482 = vmatpush3.bf16.msra.mxu0 %v9634_v24  ;;  %8977 = vmatmul.mubr.msk.bf16.vlgmr.msra.gmra.mxu1 %vm5891_vm14, %v5832_v3  ;;  %v9724_v24 = vld [vmem:[%s12420_s8 + $0x364] ss:$16 sps:$4 sm:$0xff]  }
 0x20a   : > { %9483 = vmatprep.subr.bf16.mxu0 %v10146_v14  ;;  %5962 = vmatpush1.bf16.msra.mxu1 %v5903_v27  ;;  %v9673_v14 = vld [vmem:[%s12420_s8 + $0x24] ss:$16 sps:$4 sm:$0xff]   ;;  %v9725_v27 = vld [vmem:[%s12420_s8 + $0x100] ss:$16 sps:$4 sm:$0xff]  }
 0x20b   : > { %5981 = vmatprep.mubr.bf16.mxu1 %v10147_v19  ;;  %5963 = vmatprep.subr.bf16.mxu1 %v9638_v35  ;;  %v9730_v35 = vld [vmem:[%s12420_s8 + $0x344] ss:$16 sps:$4 sm:$0xff]  }
 0x20d   : > { %9484 = vmatpush3.bf16.msra.mxu0 %v9639_v8  ;;  %v9728_v8 = vld [vmem:[%s12420_s8 + $0x340] ss:$16 sps:$4 sm:$0xff]  }
 0x20e   : > { %6788 = vmatprep.subr.bf16.mxu0 %v9643_v54  ;;  %5964 = vmatpush1.bf16.msra.mxu1 %v9636_v15  ;;  %v9731_v54 = vld [vmem:[%s12420_s8 + $0x320] ss:$16 sps:$4 sm:$0xff]   ;;  %v9733_v15 = vld [vmem:[%s12420_s8 + $0x324] ss:$16 sps:$4 sm:$0xff]  }
 0x20f   : > { %6829 = vmatprep.subr.bf16.mxu1 %v9652_v13  ;;  %v9736_v13 = vld [vmem:[%s12420_s8 + $0xec] ss:$16 sps:$4 sm:$0xff]  }
 0x210   : > { %9486 = vmatmul.mubr.msk.bf16.vlgmr.msra.gmra.mxu0 %vm5705_vm15, %v9640_v43  ;;  %v9737_v43 = vld [vmem:[%s12420_s8 + $0x300] ss:$16 sps:$4 sm:$0xff]  }
 0x211   : > { %6789 = vmatpush1.bf16.msra.mxu0 %v9641_v59  ;;  %8979 = vmatmul.mubr.msk.bf16.vlgmr.msra.gmra.mxu1 %vm5891_vm14, %v5832_v3  ;;  %v9727_v3 = vld [vmem:[%s12420_s8 + $0x104] ss:$16 sps:$4 sm:$0xff]  }
 0x212   : > { %6790 = vmatprep.subr.bf16.mxu0 %v9646_v29  ;;  %6830 = vmatpush1.bf16.msra.mxu1 %v9650_v52  ;;  %v9739_v59 = vld [vmem:[%s12420_s8 + $0x304] ss:$16 sps:$4 sm:$0xff]   ;;  %v9748_v29 = vld [vmem:[%s12420_s8 + $0x2ec] ss:$16 sps:$4 sm:$0xff]  }
 0x213   : > { %6831 = vmatprep.subr.bf16.mxu1 %v9658_v5 }
 0x215   : > { %6791 = vmatpush1.bf16.msra.mxu0 %v9644_v34 }
 0x216   : > { %6792 = vmatprep.subr.bf16.mxu0 %v9649_v17  ;;  %6832 = vmatpush1.bf16.msra.mxu1 %v9656_v56  ;;  %v11589_v17 = vsub.s32 0, %v10384_v38 }
 0x217   : > { %6833 = vmatprep.subr.bf16.mxu1 %v9664_v12 }
 0x219   : > { %6793 = vmatpush1.bf16.msra.mxu0 %v9647_v46  ;;  %v5839_v46 = vld [vmem:[%s12419_s7] sm:$0xf] }
 0x21a   : > { %6794 = vmatprep.subr.bf16.mxu0 %v9655_v16  ;;  %6834 = vmatpush1.bf16.msra.mxu1 %v9662_v57  ;;  %v11595_v16 = vsub.s32 1, %v10384_v38 }
 0x21b   : > { %6835 = vmatprep.subr.bf16.mxu1 %v9670_v31 }
 0x21d   : > { %6795 = vmatpush1.bf16.msra.mxu0 %v9653_v62 }
 0x21e   : > { %6796 = vmatprep.subr.bf16.mxu0 %v9661_v21  ;;  %6836 = vmatpush1.bf16.msra.mxu1 %v9668_v2  ;;  %v5844_v21 = vrot.slane %v5839_v46, %v11589_v17  ;;  %v8925_v2 = vld [vmem:[%s12417_s5] ss:$0 sm:$0xff] }
 0x21f   : > { %6837 = vmatprep.subr.bf16.mxu1 %v9676_v41 }
 0x221   : > { %6797 = vmatpush1.bf16.msra.mxu0 %v9659_v60  ;;  %v5848_v60 = vrot.slane %v5839_v46, %v11595_v16 }
 0x222   : > { %6798 = vmatprep.subr.bf16.mxu0 %v9667_v51  ;;  %6838 = vmatpush1.bf16.msra.mxu1 %v9674_v48 }
 0x223   : > { %6839 = vmatprep.subr.bf16.mxu1 %v9682_v7 }
 0x225   : > { %6799 = vmatpush1.bf16.msra.mxu0 %v9665_v40  ;;  %v11603_v40 = vsub.s32 2, %v10384_v38 }
 0x226   : > { %6800 = vmatprep.subr.bf16.mxu0 %v9673_v14  ;;  %6840 = vmatpush1.bf16.msra.mxu1 %v9680_v26 }
 0x227   : > { %6841 = vmatprep.subr.bf16.mxu1 %v9688_v33 }
 0x229   : > { %6801 = vmatpush1.bf16.msra.mxu0 %v9671_v45  ;;  %v11606_v45 = vsub.s32 3, %v10384_v38 }
 0x22a   : > { %6802 = vmatprep.subr.bf16.mxu0 %v9679_v28  ;;  %6842 = vmatpush1.bf16.msra.mxu1 %v9686_v18 }
 0x22b   : > { %6843 = vmatprep.subr.bf16.mxu1 %v9694_v63 }
 0x22d   : > { %6803 = vmatpush1.bf16.msra.mxu0 %v9677_v53 }
 0x22e   : > { %6804 = vmatprep.subr.bf16.mxu0 %v9685_v47  ;;  %6844 = vmatpush1.bf16.msra.mxu1 %v9692_v37  ;;  %v5852_v47 = vrot.slane %v5839_v46, %v11603_v40 }
 0x22f   : > { %6845 = vmatprep.subr.bf16.mxu1 %v9700_v9 }
 0x231   : > { %6805 = vmatpush2.bf16.msra.mxu0 %v9683_v42 }
 0x232   : > { %6806 = vmatprep.subr.bf16.mxu0 %v9691_v39  ;;  %6846 = vmatpush2.bf16.msra.mxu1 %v9698_v23  ;;  %v9734_v23 = vld [vmem:[%s12420_s8 + $0xe8] ss:$16 sps:$4 sm:$0xff]  }
 0x233   : > { %6847 = vmatprep.subr.bf16.mxu1 %v9706_v32  ;;  %v5856_v32 = vrot.slane %v5839_v46, %v11606_v45  ;;  %v9772_v46 = vld [vmem:[%s12420_s8 + $0x26c] ss:$16 sps:$4 sm:$0xff]  }
 0x235   : > { %6807 = vmatpush2.bf16.msra.mxu0 %v9689_v36 }
 0x236   : > { %6808 = vmatprep.subr.bf16.mxu0 %v9697_v10  ;;  %6848 = vmatpush2.bf16.msra.mxu1 %v9704_v58  ;;  %v9742_v58 = vld [vmem:[%s12420_s8 + $0xcc] ss:$16 sps:$4 sm:$0xff]  }
 0x237   : > { %6849 = vmatprep.subr.bf16.mxu1 %v9712_v6  ;;  %v9740_v6 = vld [vmem:[%s12420_s8 + $0xc8] ss:$16 sps:$4 sm:$0xff]  }
 0x239   : > { %6809 = vmatpush2.bf16.msra.mxu0 %v9695_v0 }
 0x23a   : > { %6810 = vmatprep.subr.bf16.mxu0 %v9703_v11  ;;  %6850 = vmatpush2.bf16.msra.mxu1 %v9710_v1 }
 0x23b   : > { %6851 = vmatprep.subr.bf16.mxu1 %v9718_v50  ;;  %v9745_v50 = vld [vmem:[%s12420_s8 + $0xac] ss:$16 sps:$4 sm:$0xff]  }
 0x23d   : > { %6811 = vmatpush2.bf16.msra.mxu0 %v9701_v25 }
 0x23e   : > { %6812 = vmatprep.subr.bf16.mxu0 %v9709_v61  ;;  %6852 = vmatpush2.bf16.msra.mxu1 %v9716_v22 }
 0x23f   : > { %6853 = vmatprep.subr.bf16.mxu1 %v9724_v24  ;;  %v9743_v24 = vld [vmem:[%s12420_s8 + $0xa8] ss:$16 sps:$4 sm:$0xff]  }
 0x241   : > { %6813 = vmatpush2.bf16.msra.mxu0 %v9707_v55 }
 0x242   : > { %6814 = vmatprep.subr.bf16.mxu0 %v9715_v4  ;;  %6854 = vmatpush2.bf16.msra.mxu1 %v9722_v49 }
 0x243   : > { %6855 = vmatprep.subr.bf16.mxu1 %v9730_v35  ;;  %v9751_v35 = vld [vmem:[%s12420_s8 + $0x8c] ss:$16 sps:$4 sm:$0xff]  }
 0x245   : > { %6815 = vmatpush2.bf16.msra.mxu0 %v9713_v44 }
 0x246   : > { %6816 = vmatprep.subr.bf16.mxu0 %v9721_v20  ;;  %6856 = vmatpush2.bf16.msra.mxu1 %v9728_v8  ;;  %v9754_v8 = vld [vmem:[%s12420_s8 + $0x2cc] ss:$16 sps:$4 sm:$0xff]  }
 0x247   : > { %6857 = vmatprep.subr.bf16.mxu1 %v9733_v15  ;;  %v9752_v15 = vld [vmem:[%s12420_s8 + $0x2c8] ss:$16 sps:$4 sm:$0xff]  }
 0x249   : > { %6817 = vmatpush2.bf16.msra.mxu0 %v9719_v30 }
 0x24a   : > { %6818 = vmatprep.subr.bf16.mxu0 %v9727_v3  ;;  %6858 = vmatpush2.bf16.msra.mxu1 %v9731_v54  ;;  %v9746_v3 = vld [vmem:[%s12420_s8 + $0x2e8] ss:$16 sps:$4 sm:$0xff]  }
 0x24b   : > { %6859 = vmatprep.subr.bf16.mxu1 %v9739_v59  ;;  %v9749_v54 = vld [vmem:[%s12420_s8 + $0x88] ss:$16 sps:$4 sm:$0xff]   ;;  %v9760_v59 = vld [vmem:[%s12420_s8 + $0x2ac] ss:$16 sps:$4 sm:$0xff]  }
 0x24d   : > { %6819 = vmatpush2.bf16.msra.mxu0 %v9725_v27 }
 0x24e   : > { %6870 = vmatprep.subr.bf16.mxu0 %v9736_v13  ;;  %6860 = vmatpush2.bf16.msra.mxu1 %v9737_v43  ;;  %v9757_v13 = vld [vmem:[%s12420_s8 + $0x6c] ss:$16 sps:$4 sm:$0xff]   ;;  %v9755_v43 = vld [vmem:[%s12420_s8 + $0x68] ss:$16 sps:$4 sm:$0xff]  }
 0x24f   : > { %6911 = vmatprep.subr.bf16.mxu1 %v9748_v29  ;;  %v9758_v29 = vld [vmem:[%s12420_s8 + $0x2a8] ss:$16 sps:$4 sm:$0xff]  }
 0x2c0   : > { %v9400_v52 = vpop.f32.mrf.mxu0 }
 0x2c1   : > { %v9422_v5 = vpop.f32.mrf.mxu1 }
 0x2c2   : > { %v9401_v34 = vpop.f32.mrf.mxu0 }
 0x2c3   : > { %v9423_v56 = vpop.f32.mrf.mxu1  ;;  %v9402_v62 = vadd.f32 %v9401_v34, %v9400_v52  ;;  %v9763_v52 = vld [vmem:[%s12420_s8 + $0x4c] ss:$16 sps:$4 sm:$0xff]   ;;  %v9761_v34 = vld [vmem:[%s12420_s8 + $0x48] ss:$16 sps:$4 sm:$0xff]  }
 0x2c4   : > { %v9403_v12 = vpop.f32.mrf.mxu0  ;;  %v9424_v26 = vadd.f32 %v9423_v56, %v9422_v5  ;;  %v9766_v5 = vld [vmem:[%s12420_s8 + $0x28c] ss:$16 sps:$4 sm:$0xff]   ;;  %v9764_v56 = vld [vmem:[%s12420_s8 + $0x288] ss:$16 sps:$4 sm:$0xff]  }
 0x2c5   : > { %v9425_v57 = vpop.f32.mrf.mxu1  ;;  %v5744_v48 = vadd.f32 %v9402_v62, %v8925_v2  ;;  %v9769_v12 = vld [vmem:[%s12420_s8 + $0x2c] ss:$16 sps:$4 sm:$0xff]   ;;  %v9773_v2 = vld [vmem:[%s12420_s8 + $0x8] ss:$16 sps:$4 sm:$0xff]  }
 0x2c6   : > { %v9404_v31 = vpop.f32.mrf.mxu0  ;;  %v9767_v57 = vld [vmem:[%s12420_s8 + $0x28] ss:$16 sps:$4 sm:$0xff]   ;;  %v9775_v62 = vld [vmem:[%s12420_s8 + $0xc] ss:$16 sps:$4 sm:$0xff]  }
 0x2c7   : > { %v9426_v41 = vpop.f32.mrf.mxu1  ;;  %v5784_v53 = vadd.f32 %v9424_v26, %v5744_v48  ;;  %v9770_v31 = vld [vmem:[%s12420_s8 + $0x268] ss:$16 sps:$4 sm:$0xff]   ;;  %v9790_v26 = vld [vmem:[%s12420_s8 + $0x20c] ss:$16 sps:$4 sm:$0xff]  }
 0x2c8   : > { %v9776_v41 = vld [vmem:[%s12420_s8 + $0x248] ss:$16 sps:$4 sm:$0xff]  }
 0x2c9   : > { %v5942_v51 = vpop.f32.mrf.mxu1  ;;  %v9779_v48 = vld [vmem:[%s12420_s8 + $0x1e8] ss:$16 sps:$4 sm:$0xff]  }
 0x2ca   : > { %v5943_v7 = vadd.f32 %v5942_v51, %v5844_v21  ;;  %v9778_v21 = vld [vmem:[%s12420_s8 + $0x24c] ss:$16 sps:$4 sm:$0xff]  }
 0x2cb   : > { %v5944_v14 = vpop.f32.mrf.mxu1  ;;  %v9784_v51 = vld [vmem:[%s12420_s8 + $0x22c] ss:$16 sps:$4 sm:$0xff]  }
 0x2cc   : > { %v5945_v33 = vadd.f32 %v5944_v14, %v5848_v60  ;;  %v5990_v28 = vmax.f32 %v5943_v7, 0.0  ;;  %v9781_v60 = vld [vmem:[%s12420_s8 + $0x1ec] ss:$16 sps:$4 sm:$0xff]   ;;  %v9782_v7 = vld [vmem:[%s12420_s8 + $0x228] ss:$16 sps:$4 sm:$0xff]  }
 0x2cd   : > { %v5946_v18 = vpop.f32.mrf.mxu1  ;;  %v9787_v14 = vld [vmem:[%s12420_s8 + $0x1cc] ss:$16 sps:$4 sm:$0xff]  }
 0x2ce   : > { %v5991_v63 = vmax.f32 %v5945_v33, 0.0  ;;  %v11613_v36 = vpack.c.bf16 %v5990_v28, %v5990_v28  ;;  %v9785_v33 = vld [vmem:[%s12420_s8 + $0x1c8] ss:$16 sps:$4 sm:$0xff]   ;;  %v9793_v18 = vld [vmem:[%s12420_s8 + $0x1ac] ss:$16 sps:$4 sm:$0xff]  }
 0x2cf   : > { %v5947_v37 = vpop.f32.mrf.mxu1  ;;  %v9788_v28 = vld [vmem:[%s12420_s8 + $0x208] ss:$16 sps:$4 sm:$0xff]  }
 0x2d0   : > { %v5823_v9 = vpop.f32.mrf.mxu0  ;;  %v5995_v42 = vpack.c.bf16 %v5991_v63, %v5991_v63  ;;  %v9796_v63 = vld [vmem:[%s12420_s8 + $0x3ec] ss:$16 sps:$4 sm:$0xff]  }
 0x2d1   : > { %v5824_v39 = vadd.f32 %v5823_v9, %v5784_v53  ;;  %v5983_v38 = vpop.f32.mrf.mxu1  ;;  %v9791_v53 = vld [vmem:[%s12420_s8 + $0x1a8] ss:$16 sps:$4 sm:$0xff]   ;;  %v9799_v37 = vld [vmem:[%s12420_s8 + $0x18c] ss:$16 sps:$4 sm:$0xff]  }
 0x2d2   : > { %v9487_v10 = vpop.f32.mrf.mxu0  ;;  %v5984_v11 = vadd.f32 %v5983_v38, %v5852_v47  ;;  %6820 = vmatprep.mubr.bf16.mxu0 %v5995_v42  ;;  %v9794_v47 = vld [vmem:[%s12420_s8 + $0x3e8] ss:$16 sps:$4 sm:$0xff]   ;;  %v9802_v9 = vld [vmem:[%s12420_s8 + $0x3cc] ss:$16 sps:$4 sm:$0xff]  }
 0x2d3   : > { %v5829_v0 = vmax.f32 %v5824_v39, 0.0  ;;  %v5985_v25 = vpop.f32.mrf.mxu1  ;;  %6821 = vmatmul.mubr.bf16.vlgmr.msra.gmra.mxu0 %v11613_v36  ;;  %v9800_v39 = vld [vmem:[%s12420_s8 + $0x3c8] ss:$16 sps:$4 sm:$0xff]  }
 0x2d4   : > { %v5826_v55 = vpop.f32.mrf.mxu0  ;;  %v5986_v1 = vadd.f32 %v5985_v25, %v5856_v32  ;;  %6871 = vmatpush1.bf16.msra.mxu0 %v9734_v23  ;;  %6902 = vmatprep.mubr.bf16.mxu0 %v5995_v42  ;;  %v5992_v44 = vmax.f32 %v5984_v11, 0.0  ;;  %v9797_v42 = vld [vmem:[%s12420_s8 + $0x188] ss:$16 sps:$4 sm:$0xff]   ;;  %v9805_v23 = vld [vmem:[%s12420_s8 + $0x16c] ss:$16 sps:$4 sm:$0xff]  }
 0x2d5   : > { %v5830_v61 = vpack.c.bf16 %v5829_v0, %v5829_v0  ;;  %v5987_v4 = vpop.f32.mrf.mxu1  ;;  %6872 = vmatprep.subr.bf16.mxu0 %v9742_v58  ;;  %v9808_v32 = vld [vmem:[%s12420_s8 + $0x3ac] ss:$16 sps:$4 sm:$0xff]   ;;  %v9803_v38 = vld [vmem:[%s12420_s8 + $0x168] ss:$16 sps:$4 sm:$0xff]  }
 0x2d6   : > { %v9488_v22 = vpop.f32.mrf.mxu0  ;;  %v5993_v30 = vmax.f32 %v5986_v1, 0.0  ;;  %v11632_v27 = vpack.c.bf16 %v5992_v44, %v5992_v44  ;;  %v9806_v10 = vld [vmem:[%s12420_s8 + $0x3a8] ss:$16 sps:$4 sm:$0xff]   ;;  %v9811_v58 = vld [vmem:[%s12420_s8 + $0x14c] ss:$16 sps:$4 sm:$0xff]  }
 0x2d7   : > { %5831 = vst.msk [vmem:[#allocation5] sm:$0xf] %vm4601_vm10, %v5830_v61  ;;  %v5988_v20 = vpop.f32.mrf.mxu1  ;;  %v9814_v0 = vld [vmem:[%s12420_s8 + $0x38c] ss:$16 sps:$4 sm:$0xff]   ;;  %v9809_v11 = vld [vmem:[%s12420_s8 + $0x148] ss:$16 sps:$4 sm:$0xff]  }
 0x2d8   : > { %v5997_v49 = vpack.c.bf16 %v5993_v30, %v5993_v30  ;;  %6873 = vmatpush1.bf16.msra.mxu0 %v9740_v6  ;;  %v9812_v25 = vld [vmem:[%s12420_s8 + $0x388] ss:$16 sps:$4 sm:$0xff]   ;;  %v9817_v55 = vld [vmem:[%s12420_s8 + $0x12c] ss:$16 sps:$4 sm:$0xff]   ;;  %v9835_v20 = vld [vmem:[%s12423_s11 + $0xe4] ss:$16 sps:$4 sm:$0xff]  }
 0x2d9   : > { %6874 = vmatprep.subr.bf16.mxu0 %v9745_v50  ;;  %v9820_v61 = vld [vmem:[%s12420_s8 + $0x36c] ss:$16 sps:$4 sm:$0xff]   ;;  %v9815_v1 = vld [vmem:[%s12420_s8 + $0x128] ss:$16 sps:$4 sm:$0xff]  }
 0x2da   : > { %6861 = vmatprep.mubr.bf16.mxu1 %v5997_v49  ;;  %v9818_v6 = vld [vmem:[%s12420_s8 + $0x368] ss:$16 sps:$4 sm:$0xff]   ;;  %v9823_v44 = vld [vmem:[%s12420_s8 + $0x10c] ss:$16 sps:$4 sm:$0xff]  }
 0x2db   : > { %6862 = vmatmul.mubr.bf16.vlgmr.msra.gmra.mxu1 %v11632_v27  ;;  %v9826_v4 = vld [vmem:[%s12420_s8 + $0x34c] ss:$16 sps:$4 sm:$0xff]   ;;  %v9821_v22 = vld [vmem:[%s12420_s8 + $0x108] ss:$16 sps:$4 sm:$0xff]  }
 0x2dc   : > { %6875 = vmatpush1.bf16.msra.mxu0 %v9743_v24  ;;  %6912 = vmatpush1.bf16.msra.mxu1 %v9746_v3  ;;  %v9824_v50 = vld [vmem:[%s12420_s8 + $0x348] ss:$16 sps:$4 sm:$0xff]   ;;  %v9829_v30 = vld [vmem:[%s12420_s8 + $0x32c] ss:$16 sps:$4 sm:$0xff]   ;;  %v9833_v24 = vld [vmem:[%s12423_s11 + $0xe0] ss:$16 sps:$4 sm:$0xff]  }
 0x2dd   : > { %6943 = vmatprep.mubr.bf16.mxu1 %v5997_v49  ;;  %6876 = vmatprep.subr.bf16.mxu0 %v9751_v35  ;;  %v9827_v49 = vld [vmem:[%s12420_s8 + $0x328] ss:$16 sps:$4 sm:$0xff]   ;;  %v9832_v3 = vld [vmem:[%s12420_s8 + $0x30c] ss:$16 sps:$4 sm:$0xff]   ;;  %v9838_v35 = vld [vmem:[%s12423_s11 + $0xc4] ss:$16 sps:$4 sm:$0xff]  }
 0x2de   : > { %6913 = vmatprep.subr.bf16.mxu1 %v9754_v8  ;;  %v9830_v8 = vld [vmem:[%s12420_s8 + $0x308] ss:$16 sps:$4 sm:$0xff]  }
 0x2e0   : > { %6877 = vmatpush1.bf16.msra.mxu0 %v9749_v54  ;;  %6914 = vmatpush1.bf16.msra.mxu1 %v9752_v15  ;;  %v9836_v54 = vld [vmem:[%s12423_s11 + $0xc0] ss:$16 sps:$4 sm:$0xff]   ;;  %v9841_v15 = vld [vmem:[%s12423_s11 + $0xa4] ss:$16 sps:$4 sm:$0xff]  }
 0x2e1   : > { %6878 = vmatprep.subr.bf16.mxu0 %v9757_v13  ;;  %6915 = vmatprep.subr.bf16.mxu1 %v9760_v59  ;;  %v9844_v13 = vld [vmem:[%s12423_s11 + $0x84] ss:$16 sps:$4 sm:$0xff]   ;;  %v9842_v59 = vld [vmem:[%s12423_s11 + $0x80] ss:$16 sps:$4 sm:$0xff]  }
 0x2e4   : > { %6879 = vmatpush1.bf16.msra.mxu0 %v9755_v43  ;;  %6916 = vmatpush1.bf16.msra.mxu1 %v9758_v29  ;;  %v9847_v43 = vld [vmem:[%s12423_s11 + $0x64] ss:$16 sps:$4 sm:$0xff]   ;;  %v9845_v29 = vld [vmem:[%s12423_s11 + $0x60] ss:$16 sps:$4 sm:$0xff]  }
 0x2e5   : > { %6880 = vmatprep.subr.bf16.mxu0 %v9763_v52  ;;  %6917 = vmatprep.subr.bf16.mxu1 %v9766_v5  ;;  %v9881_v52 = vld [vmem:[%s12423_s11 + $0x2e0] ss:$16 sps:$4 sm:$0xff]   ;;  %v9883_v5 = vld [vmem:[%s12423_s11 + $0x2e4] ss:$16 sps:$4 sm:$0xff]  }
 0x2e8   : > { %6881 = vmatpush1.bf16.msra.mxu0 %v9761_v34  ;;  %6918 = vmatpush1.bf16.msra.mxu1 %v9764_v56  ;;  %v9848_v34 = vld [vmem:[%s12423_s11 + $0x40] ss:$16 sps:$4 sm:$0xff]  }
 0x2e9   : > { %6882 = vmatprep.subr.bf16.mxu0 %v9769_v12  ;;  %6919 = vmatprep.subr.bf16.mxu1 %v9772_v46  ;;  %v9887_v56 = vld [vmem:[%s12423_s11 + $0x2c0] ss:$16 sps:$4 sm:$0xff]   ;;  %v9889_v12 = vld [vmem:[%s12423_s11 + $0x2c4] ss:$16 sps:$4 sm:$0xff]  }
 0x2ea   : > { %v9853_v46 = vld [vmem:[%s12423_s11 + $0x24] ss:$16 sps:$4 sm:$0xff]  }
 0x2ec   : > { %6883 = vmatpush1.bf16.msra.mxu0 %v9767_v57  ;;  %6920 = vmatpush1.bf16.msra.mxu1 %v9770_v31  ;;  %v9851_v57 = vld [vmem:[%s12423_s11 + $0x20] ss:$16 sps:$4 sm:$0xff]  }
 0x2ed   : > { %6884 = vmatprep.subr.bf16.mxu0 %v9775_v62  ;;  %6921 = vmatprep.subr.bf16.mxu1 %v9778_v21  ;;  %v9893_v31 = vld [vmem:[%s12423_s11 + $0x2a0] ss:$16 sps:$4 sm:$0xff]   ;;  %v9895_v62 = vld [vmem:[%s12423_s11 + $0x2a4] ss:$16 sps:$4 sm:$0xff]  }
 0x2ee   : > { %v9856_v21 = vld [vmem:[%s12423_s11 + $0x4] ss:$16 sps:$4 sm:$0xff]  }
 0x2f0   : > { %6885 = vmatpush1.bf16.msra.mxu0 %v9773_v2  ;;  %6922 = vmatpush1.bf16.msra.mxu1 %v9776_v41  ;;  %v9854_v2 = vld [vmem:[%s12423_s11] ss:$16 sps:$4 sm:$0xff]  }
 0x2f1   : > { %6886 = vmatprep.subr.bf16.mxu0 %v9781_v60  ;;  %6923 = vmatprep.subr.bf16.mxu1 %v9784_v51  ;;  %v9899_v41 = vld [vmem:[%s12423_s11 + $0x280] ss:$16 sps:$4 sm:$0xff]   ;;  %v9901_v60 = vld [vmem:[%s12423_s11 + $0x284] ss:$16 sps:$4 sm:$0xff]  }
 0x2f2   : > { %v9859_v51 = vld [vmem:[%s12423_s11 + $0x1e4] ss:$16 sps:$4 sm:$0xff]  }
 0x2f4   : > { %6887 = vmatpush2.bf16.msra.mxu0 %v9779_v48  ;;  %6924 = vmatpush1.bf16.msra.mxu1 %v9782_v7  ;;  %v9857_v48 = vld [vmem:[%s12423_s11 + $0x1e0] ss:$16 sps:$4 sm:$0xff]  }
 0x2f5   : > { %6888 = vmatprep.subr.bf16.mxu0 %v9787_v14  ;;  %6925 = vmatprep.subr.bf16.mxu1 %v9790_v26  ;;  %v9905_v7 = vld [vmem:[%s12423_s11 + $0x260] ss:$16 sps:$4 sm:$0xff]   ;;  %v9907_v14 = vld [vmem:[%s12423_s11 + $0x264] ss:$16 sps:$4 sm:$0xff]  }
 0x2f6   : > { %v9862_v26 = vld [vmem:[%s12423_s11 + $0x1c4] ss:$16 sps:$4 sm:$0xff]  }
 0x2f8   : > { %6889 = vmatpush2.bf16.msra.mxu0 %v9785_v33  ;;  %6926 = vmatpush1.bf16.msra.mxu1 %v9788_v28  ;;  %v9860_v33 = vld [vmem:[%s12423_s11 + $0x1c0] ss:$16 sps:$4 sm:$0xff]  }
 0x2f9   : > { %6890 = vmatprep.subr.bf16.mxu0 %v9793_v18  ;;  %6927 = vmatprep.subr.bf16.mxu1 %v9796_v63  ;;  %v9911_v28 = vld [vmem:[%s12423_s11 + $0x240] ss:$16 sps:$4 sm:$0xff]   ;;  %v9913_v18 = vld [vmem:[%s12423_s11 + $0x244] ss:$16 sps:$4 sm:$0xff]  }
 0x2fa   : > { %v9865_v63 = vld [vmem:[%s12423_s11 + $0x1a4] ss:$16 sps:$4 sm:$0xff]  }
 0x2fc   : > { %6891 = vmatpush2.bf16.msra.mxu0 %v9791_v53  ;;  %6928 = vmatpush2.bf16.msra.mxu1 %v9794_v47  ;;  %v9863_v53 = vld [vmem:[%s12423_s11 + $0x1a0] ss:$16 sps:$4 sm:$0xff]  }
 0x2fd   : > { %6892 = vmatprep.subr.bf16.mxu0 %v9799_v37  ;;  %6929 = vmatprep.subr.bf16.mxu1 %v9802_v9  ;;  %v9917_v47 = vld [vmem:[%s12423_s11 + $0x220] ss:$16 sps:$4 sm:$0xff]   ;;  %v9919_v37 = vld [vmem:[%s12423_s11 + $0x224] ss:$16 sps:$4 sm:$0xff]  }
 0x2fe   : > { %v9868_v9 = vld [vmem:[%s12423_s11 + $0x184] ss:$16 sps:$4 sm:$0xff]  }
 0x300   : > { %6893 = vmatpush2.bf16.msra.mxu0 %v9797_v42  ;;  %6930 = vmatpush2.bf16.msra.mxu1 %v9800_v39  ;;  %v9866_v42 = vld [vmem:[%s12423_s11 + $0x180] ss:$16 sps:$4 sm:$0xff]  }
 0x301   : > { %6894 = vmatprep.subr.bf16.mxu0 %v9805_v23  ;;  %6931 = vmatprep.subr.bf16.mxu1 %v9808_v32  ;;  %v9923_v39 = vld [vmem:[%s12423_s11 + $0x200] ss:$16 sps:$4 sm:$0xff]   ;;  %v9925_v23 = vld [vmem:[%s12423_s11 + $0x204] ss:$16 sps:$4 sm:$0xff]  }
 0x302   : > { %v9871_v32 = vld [vmem:[%s12423_s11 + $0x164] ss:$16 sps:$4 sm:$0xff]  }
 0x304   : > { %6895 = vmatpush2.bf16.msra.mxu0 %v9803_v38  ;;  %6932 = vmatpush2.bf16.msra.mxu1 %v9806_v10  ;;  %v9869_v38 = vld [vmem:[%s12423_s11 + $0x160] ss:$16 sps:$4 sm:$0xff]  }
 0x305   : > { %6896 = vmatprep.subr.bf16.mxu0 %v9811_v58  ;;  %6933 = vmatprep.subr.bf16.mxu1 %v9814_v0  ;;  %v9929_v10 = vld [vmem:[%s12423_s11 + $0x3e0] ss:$16 sps:$4 sm:$0xff]   ;;  %v9931_v58 = vld [vmem:[%s12423_s11 + $0x3e4] ss:$16 sps:$4 sm:$0xff]  }
 0x306   : > { %v9874_v0 = vld [vmem:[%s12423_s11 + $0x144] ss:$16 sps:$4 sm:$0xff]  }
 0x308   : > { %6897 = vmatpush2.bf16.msra.mxu0 %v9809_v11  ;;  %6934 = vmatpush2.bf16.msra.mxu1 %v9812_v25  ;;  %v9872_v11 = vld [vmem:[%s12423_s11 + $0x140] ss:$16 sps:$4 sm:$0xff]  }
 0x309   : > { %6898 = vmatprep.subr.bf16.mxu0 %v9817_v55  ;;  %6935 = vmatprep.subr.bf16.mxu1 %v9820_v61  ;;  %v9935_v25 = vld [vmem:[%s12423_s11 + $0x3c0] ss:$16 sps:$4 sm:$0xff]   ;;  %v9937_v55 = vld [vmem:[%s12423_s11 + $0x3c4] ss:$16 sps:$4 sm:$0xff]  }
 0x30a   : > { %v9877_v61 = vld [vmem:[%s12423_s11 + $0x124] ss:$16 sps:$4 sm:$0xff]  }
 0x30c   : > { %6899 = vmatpush2.bf16.msra.mxu0 %v9815_v1  ;;  %6936 = vmatpush2.bf16.msra.mxu1 %v9818_v6  ;;  %v9875_v1 = vld [vmem:[%s12423_s11 + $0x120] ss:$16 sps:$4 sm:$0xff]  }
 0x30d   : > { %6900 = vmatprep.subr.bf16.mxu0 %v9823_v44  ;;  %6937 = vmatprep.subr.bf16.mxu1 %v9826_v4  ;;  %v9941_v6 = vld [vmem:[%s12423_s11 + $0x3a0] ss:$16 sps:$4 sm:$0xff]   ;;  %v9943_v44 = vld [vmem:[%s12423_s11 + $0x3a4] ss:$16 sps:$4 sm:$0xff]  }
 0x30e   : > { %v9880_v4 = vld [vmem:[%s12423_s11 + $0x104] ss:$16 sps:$4 sm:$0xff]  }
 0x310   : > { %6901 = vmatpush2.bf16.msra.mxu0 %v9821_v22  ;;  %6938 = vmatpush2.bf16.msra.mxu1 %v9824_v50  ;;  %v9878_v22 = vld [vmem:[%s12423_s11 + $0x100] ss:$16 sps:$4 sm:$0xff]  }
 0x311   : > { %6939 = vmatprep.subr.bf16.mxu1 %v9829_v30  ;;  %7741 = vmatprep.subr.bf16.mxu0 %v9835_v20  ;;  %v9947_v50 = vld [vmem:[%s12423_s11 + $0x380] ss:$16 sps:$4 sm:$0xff]   ;;  %v9949_v30 = vld [vmem:[%s12423_s11 + $0x384] ss:$16 sps:$4 sm:$0xff]   ;;  %v9886_v20 = vld [vmem:[%s12423_s11 + $0xec] ss:$16 sps:$4 sm:$0xff]  }
 0x313   : > { %6903 = vmatmul.mubr.bf16.vlgmr.msra.gmra.mxu0 %v11613_v36  ;;  %v9839_v36 = vld [vmem:[%s12423_s11 + $0xa0] ss:$16 sps:$4 sm:$0xff]  }
 0x314   : > { %6940 = vmatpush2.bf16.msra.mxu1 %v9827_v49  ;;  %7742 = vmatpush1.bf16.msra.mxu0 %v9833_v24  ;;  %v9953_v49 = vld [vmem:[%s12423_s11 + $0x360] ss:$16 sps:$4 sm:$0xff]   ;;  %v9955_v24 = vld [vmem:[%s12423_s11 + $0x364] ss:$16 sps:$4 sm:$0xff]  }
 0x315   : > { %6941 = vmatprep.subr.bf16.mxu1 %v9832_v3  ;;  %7743 = vmatprep.subr.bf16.mxu0 %v9838_v35  ;;  %v9959_v3 = vld [vmem:[%s12423_s11 + $0x340] ss:$16 sps:$4 sm:$0xff]   ;;  %v9961_v35 = vld [vmem:[%s12423_s11 + $0x344] ss:$16 sps:$4 sm:$0xff]  }
 0x318   : > { %6942 = vmatpush2.bf16.msra.mxu1 %v9830_v8  ;;  %7744 = vmatpush1.bf16.msra.mxu0 %v9836_v54  ;;  %v9965_v8 = vld [vmem:[%s12423_s11 + $0x320] ss:$16 sps:$4 sm:$0xff]   ;;  %v9967_v54 = vld [vmem:[%s12423_s11 + $0x324] ss:$16 sps:$4 sm:$0xff]  }
 0x319   : > { %7745 = vmatprep.subr.bf16.mxu0 %v9841_v15  ;;  %7782 = vmatprep.subr.bf16.mxu1 %v9883_v5  ;;  %v9971_v15 = vld [vmem:[%s12423_s11 + $0x300] ss:$16 sps:$4 sm:$0xff]  }
 0x31b   : > { %6944 = vmatmul.mubr.bf16.vlgmr.msra.gmra.mxu1 %v11632_v27  ;;  %v9850_v27 = vld [vmem:[%s12423_s11 + $0x44] ss:$16 sps:$4 sm:$0xff]  }
 0x31c   : > { %7746 = vmatpush1.bf16.msra.mxu0 %v9839_v36  ;;  %7783 = vmatpush1.bf16.msra.mxu1 %v9881_v52  ;;  %v9973_v36 = vld [vmem:[%s12423_s11 + $0x304] ss:$16 sps:$4 sm:$0xff]  }
 0x31d   : > { %7747 = vmatprep.subr.bf16.mxu0 %v9844_v13  ;;  %7784 = vmatprep.subr.bf16.mxu1 %v9889_v12  ;;  %v9979_v13 = vld [vmem:[%s12423_s11 + $0x2ec] ss:$16 sps:$4 sm:$0xff]  }
 0x320   : > { %7748 = vmatpush1.bf16.msra.mxu0 %v9842_v59  ;;  %7785 = vmatpush1.bf16.msra.mxu1 %v9887_v56 }
 0x321   : > { %7749 = vmatprep.subr.bf16.mxu0 %v9847_v43  ;;  %7786 = vmatprep.subr.bf16.mxu1 %v9895_v62  ;;  %v12006_v43 = vld [vmem:[%s12421_s9] sm:$0xf] }
 0x322   : > { %v6135_v5 = vrot.slane %v12006_v43, %v11595_v16 }
 0x324   : > { %7750 = vmatpush1.bf16.msra.mxu0 %v9845_v29  ;;  %7787 = vmatpush1.bf16.msra.mxu1 %v9893_v31 }
 0x325   : > { %7751 = vmatprep.subr.bf16.mxu0 %v9850_v27  ;;  %7788 = vmatprep.subr.bf16.mxu1 %v9901_v60  ;;  %v6131_v27 = vrot.slane %v12006_v43, %v11589_v17 }
 0x328   : > { %7752 = vmatpush1.bf16.msra.mxu0 %v9848_v34  ;;  %7789 = vmatpush1.bf16.msra.mxu1 %v9899_v41  ;;  %v9884_v41 = vld [vmem:[%s12423_s11 + $0xe8] ss:$16 sps:$4 sm:$0xff]  }
 0x329   : > { %7753 = vmatprep.subr.bf16.mxu0 %v9853_v46  ;;  %7790 = vmatprep.subr.bf16.mxu1 %v9907_v14  ;;  %v9898_v14 = vld [vmem:[%s12423_s11 + $0xac] ss:$16 sps:$4 sm:$0xff]  }
 0x32c   : > { %7754 = vmatpush1.bf16.msra.mxu0 %v9851_v57  ;;  %7791 = vmatpush1.bf16.msra.mxu1 %v9905_v7  ;;  %v9890_v7 = vld [vmem:[%s12423_s11 + $0xc8] ss:$16 sps:$4 sm:$0xff]  }
 0x32d   : > { %7755 = vmatprep.subr.bf16.mxu0 %v9856_v21  ;;  %7792 = vmatprep.subr.bf16.mxu1 %v9913_v18  ;;  %v9910_v18 = vld [vmem:[%s12423_s11 + $0x6c] ss:$16 sps:$4 sm:$0xff]  }
 0x330   : > { %7756 = vmatpush1.bf16.msra.mxu0 %v9854_v2  ;;  %7793 = vmatpush1.bf16.msra.mxu1 %v9911_v28  ;;  %v9902_v28 = vld [vmem:[%s12423_s11 + $0x88] ss:$16 sps:$4 sm:$0xff]  }
 0x331   : > { %7757 = vmatprep.subr.bf16.mxu0 %v9859_v51  ;;  %7794 = vmatprep.subr.bf16.mxu1 %v9919_v37  ;;  %v9922_v37 = vld [vmem:[%s12423_s11 + $0x2c] ss:$16 sps:$4 sm:$0xff]  }
 0x334   : > { %7758 = vmatpush2.bf16.msra.mxu0 %v9857_v48  ;;  %7795 = vmatpush1.bf16.msra.mxu1 %v9917_v47  ;;  %v9892_v48 = vld [vmem:[%s12423_s11 + $0xcc] ss:$16 sps:$4 sm:$0xff]   ;;  %v9914_v47 = vld [vmem:[%s12423_s11 + $0x48] ss:$16 sps:$4 sm:$0xff]  }
 0x335   : > { %7759 = vmatprep.subr.bf16.mxu0 %v9862_v26  ;;  %7796 = vmatprep.subr.bf16.mxu1 %v9925_v23  ;;  %v9896_v26 = vld [vmem:[%s12423_s11 + $0xa8] ss:$16 sps:$4 sm:$0xff]   ;;  %v9934_v23 = vld [vmem:[%s12423_s11 + $0x1ec] ss:$16 sps:$4 sm:$0xff]  }
 0x338   : > { %7760 = vmatpush2.bf16.msra.mxu0 %v9860_v33  ;;  %7797 = vmatpush1.bf16.msra.mxu1 %v9923_v39  ;;  %v9904_v33 = vld [vmem:[%s12423_s11 + $0x8c] ss:$16 sps:$4 sm:$0xff]   ;;  %v9926_v39 = vld [vmem:[%s12423_s11 + $0x8] ss:$16 sps:$4 sm:$0xff]  }
 0x339   : > { %7761 = vmatprep.subr.bf16.mxu0 %v9865_v63  ;;  %7798 = vmatprep.subr.bf16.mxu1 %v9931_v58  ;;  %v9908_v63 = vld [vmem:[%s12423_s11 + $0x68] ss:$16 sps:$4 sm:$0xff]   ;;  %v9946_v58 = vld [vmem:[%s12423_s11 + $0x1ac] ss:$16 sps:$4 sm:$0xff]  }
 0x33c   : > { %7762 = vmatpush2.bf16.msra.mxu0 %v9863_v53  ;;  %7799 = vmatpush2.bf16.msra.mxu1 %v9929_v10  ;;  %v9916_v53 = vld [vmem:[%s12423_s11 + $0x4c] ss:$16 sps:$4 sm:$0xff]   ;;  %v9938_v10 = vld [vmem:[%s12423_s11 + $0x1c8] ss:$16 sps:$4 sm:$0xff]  }
 0x33d   : > { %7763 = vmatprep.subr.bf16.mxu0 %v9868_v9  ;;  %7800 = vmatprep.subr.bf16.mxu1 %v9937_v55  ;;  %v9920_v9 = vld [vmem:[%s12423_s11 + $0x28] ss:$16 sps:$4 sm:$0xff]   ;;  %v9958_v55 = vld [vmem:[%s12423_s11 + $0x16c] ss:$16 sps:$4 sm:$0xff]  }
 0x340   : > { %7764 = vmatpush2.bf16.msra.mxu0 %v9866_v42  ;;  %7801 = vmatpush2.bf16.msra.mxu1 %v9935_v25  ;;  %v9928_v42 = vld [vmem:[%s12423_s11 + $0xc] ss:$16 sps:$4 sm:$0xff]   ;;  %v9950_v25 = vld [vmem:[%s12423_s11 + $0x188] ss:$16 sps:$4 sm:$0xff]  }
 0x341   : > { %7765 = vmatprep.subr.bf16.mxu0 %v9871_v32  ;;  %7802 = vmatprep.subr.bf16.mxu1 %v9943_v44  ;;  %v9932_v32 = vld [vmem:[%s12423_s11 + $0x1e8] ss:$16 sps:$4 sm:$0xff]  }
 0x342   : > { %v9962_v44 = vld [vmem:[%s12423_s11 + $0x148] ss:$16 sps:$4 sm:$0xff]  }
 0x344   : > { %7766 = vmatpush2.bf16.msra.mxu0 %v9869_v38  ;;  %7803 = vmatpush2.bf16.msra.mxu1 %v9941_v6  ;;  %v9940_v38 = vld [vmem:[%s12423_s11 + $0x1cc] ss:$16 sps:$4 sm:$0xff]  }
 0x345   : > { %7767 = vmatprep.subr.bf16.mxu0 %v9874_v0  ;;  %7804 = vmatprep.subr.bf16.mxu1 %v9949_v30  ;;  %v9944_v0 = vld [vmem:[%s12423_s11 + $0x1a8] ss:$16 sps:$4 sm:$0xff]  }
 0x348   : > { %7768 = vmatpush2.bf16.msra.mxu0 %v9872_v11  ;;  %7805 = vmatpush2.bf16.msra.mxu1 %v9947_v50  ;;  %v9952_v11 = vld [vmem:[%s12423_s11 + $0x18c] ss:$16 sps:$4 sm:$0xff]   ;;  %v6139_v50 = vrot.slane %v12006_v43, %v11603_v40 }
 0x349   : > { %7769 = vmatprep.subr.bf16.mxu0 %v9877_v61  ;;  %7806 = vmatprep.subr.bf16.mxu1 %v9955_v24  ;;  %v9956_v61 = vld [vmem:[%s12423_s11 + $0x168] ss:$16 sps:$4 sm:$0xff]  }
 0x34c   : > { %7770 = vmatpush2.bf16.msra.mxu0 %v9875_v1  ;;  %7807 = vmatpush2.bf16.msra.mxu1 %v9953_v49  ;;  %v9964_v1 = vld [vmem:[%s12423_s11 + $0x14c] ss:$16 sps:$4 sm:$0xff]   ;;  %v9968_v49 = vld [vmem:[%s12423_s11 + $0x128] ss:$16 sps:$4 sm:$0xff]  }
 0x34d   : > { %7771 = vmatprep.subr.bf16.mxu0 %v9880_v4  ;;  %7808 = vmatprep.subr.bf16.mxu1 %v9961_v35 }
 0x350   : > { %7772 = vmatpush2.bf16.msra.mxu0 %v9878_v22  ;;  %7809 = vmatpush2.bf16.msra.mxu1 %v9959_v3  ;;  %v9970_v22 = vld [vmem:[%s12423_s11 + $0x12c] ss:$16 sps:$4 sm:$0xff]  }
 0x351   : > { %7823 = vmatprep.subr.bf16.mxu0 %v9886_v20  ;;  %7810 = vmatprep.subr.bf16.mxu1 %v9967_v54  ;;  %v6143_v20 = vrot.slane %v12006_v43, %v11606_v45  ;;  %v9976_v3 = vld [vmem:[%s12423_s11 + $0x10c] ss:$16 sps:$4 sm:$0xff]  }
 0x354   : > { %7811 = vmatpush2.bf16.msra.mxu1 %v9965_v8 }
 0x355   : > { %7812 = vmatprep.subr.bf16.mxu1 %v9973_v36 }
 0x358   : > { %7813 = vmatpush2.bf16.msra.mxu1 %v9971_v15  ;;  %v9974_v15 = vld [vmem:[%s12423_s11 + $0x108] ss:$16 sps:$4 sm:$0xff]  }
 0x359   : > { %7864 = vmatprep.subr.bf16.mxu1 %v9979_v13 }
 0x393   : > { %v6822_v59 = vpop.f32.mrf.mxu0 }
 0x394   : > { %v6823_v56 = vadd.f32 %v6822_v59, %v6131_v27  ;;  %v9982_v59 = vld [vmem:[%s12422_s10 + $0x64] ss:$16 sps:$4 sm:$0xff]  }
 0x395   : > { %v6824_v29 = vpop.f32.mrf.mxu0 }
 0x396   : > { %v6825_v46 = vadd.f32 %v6824_v29, %v6135_v5 }
 0x397   : > { %v6826_v52 = vpop.f32.mrf.mxu0 }
 0x398   : > { %v9977_v52 = vld [vmem:[%s12423_s11 + $0x2e8] ss:$16 sps:$4 sm:$0xff]  }
 0x399   : > { %v6827_v34 = vpop.f32.mrf.mxu0 }
 0x39b   : > { %v6863_v12 = vpop.f32.mrf.mxu1 }
 0x39c   : > { %v6864_v57 = vadd.f32 %v6863_v12, %v6823_v56  ;;  %v9980_v56 = vld [vmem:[%s12422_s10 + $0x60] ss:$16 sps:$4 sm:$0xff]   ;;  %v9985_v12 = vld [vmem:[%s12423_s11 + $0x2cc] ss:$16 sps:$4 sm:$0xff]  }
 0x39d   : > { %v6865_v31 = vpop.f32.mrf.mxu1 }
 0x39e   : > { %v6866_v62 = vadd.f32 %v6865_v31, %v6825_v46  ;;  %v12015_v60 = vpack.c.bf16 %v6864_v57, %v6864_v57  ;;  %v9988_v46 = vld [vmem:[%s12422_s10 + $0x44] ss:$16 sps:$4 sm:$0xff]   ;;  %v9983_v57 = vld [vmem:[%s12423_s11 + $0x2c8] ss:$16 sps:$4 sm:$0xff]   ;;  %v9986_v31 = vld [vmem:[%s12422_s10 + $0x40] ss:$16 sps:$4 sm:$0xff]  }
 0x39f   : > { %v6867_v21 = vpop.f32.mrf.mxu1 }
 0x3a0   : > { %v6970_v2 = vpack.c.bf16 %v6866_v62, %v6866_v62  ;;  %v9991_v62 = vld [vmem:[%s12423_s11 + $0x2ac] ss:$16 sps:$4 sm:$0xff]   ;;  %v9994_v21 = vld [vmem:[%s12422_s10 + $0x24] ss:$16 sps:$4 sm:$0xff]  }
 0x3a1   : > { %v6868_v51 = vpop.f32.mrf.mxu1 }
 0x3a2   : > { %7773 = vmatprep.mubr.bf16.mxu0 %v6970_v2  ;;  %v10000_v51 = vld [vmem:[%s12422_s10 + $0x4] ss:$16 sps:$4 sm:$0xff]  }
 0x3a3   : > { %7774 = vmatmul.mubr.bf16.vlgmr.msra.gmra.mxu0 %v12015_v60 }
 0x3a4   : > { %7824 = vmatpush1.bf16.msra.mxu0 %v9884_v41  ;;  %7855 = vmatprep.mubr.bf16.mxu0 %v6970_v2  ;;  %v9989_v2 = vld [vmem:[%s12423_s11 + $0x2a8] ss:$16 sps:$4 sm:$0xff]   ;;  %v9992_v41 = vld [vmem:[%s12422_s10 + $0x20] ss:$16 sps:$4 sm:$0xff]  }
 0x3a5   : > { %7825 = vmatprep.subr.bf16.mxu0 %v9892_v48  ;;  %v9995_v48 = vld [vmem:[%s12423_s11 + $0x288] ss:$16 sps:$4 sm:$0xff]  }
 0x3a8   : > { %7826 = vmatpush1.bf16.msra.mxu0 %v9890_v7  ;;  %v9998_v7 = vld [vmem:[%s12422_s10] ss:$16 sps:$4 sm:$0xff]  }
 0x3a9   : > { %7827 = vmatprep.subr.bf16.mxu0 %v9898_v14  ;;  %v10003_v14 = vld [vmem:[%s12423_s11 + $0x26c] ss:$16 sps:$4 sm:$0xff]  }
 0x3ac   : > { %7828 = vmatpush1.bf16.msra.mxu0 %v9896_v26  ;;  %v10049_v26 = vld [vmem:[%s12425_s13 + $0x78] sm:$0xff]  }
 0x3ad   : > { %7829 = vmatprep.subr.bf16.mxu0 %v9904_v33  ;;  %v10001_v33 = vld [vmem:[%s12423_s11 + $0x268] ss:$16 sps:$4 sm:$0xff]  }
 0x3b0   : > { %7830 = vmatpush1.bf16.msra.mxu0 %v9902_v28  ;;  %v10006_v28 = vld [vmem:[%s12423_s11 + $0x24c] ss:$16 sps:$4 sm:$0xff]  }
 0x3b1   : > { %7831 = vmatprep.subr.bf16.mxu0 %v9910_v18  ;;  %v10050_v18 = vld [vmem:[%s12425_s13 + $0x38] sm:$0xff]  }
 0x3b4   : > { %7832 = vmatpush1.bf16.msra.mxu0 %v9908_v63  ;;  %v12177_v63 = vld [vmem:[#allocation5] sm:$0xf] }
 0x3b5   : > { %7833 = vmatprep.subr.bf16.mxu0 %v9916_v53  ;;  %v10004_v53 = vld [vmem:[%s12423_s11 + $0x248] ss:$16 sps:$4 sm:$0xff]  }
 0x3b8   : > { %7834 = vmatpush1.bf16.msra.mxu0 %v9914_v47  ;;  %v10009_v47 = vld [vmem:[%s12423_s11 + $0x22c] ss:$16 sps:$4 sm:$0xff]  }
 0x3b9   : > { %7835 = vmatprep.subr.bf16.mxu0 %v9922_v37  ;;  %v10007_v37 = vld [vmem:[%s12423_s11 + $0x228] ss:$16 sps:$4 sm:$0xff]  }
 0x3bc   : > { %7836 = vmatpush1.bf16.msra.mxu0 %v9920_v9  ;;  %v10012_v9 = vld [vmem:[%s12423_s11 + $0x20c] ss:$16 sps:$4 sm:$0xff]  }
 0x3bd   : > { %7837 = vmatprep.subr.bf16.mxu0 %v9928_v42  ;;  %v10010_v42 = vld [vmem:[%s12423_s11 + $0x208] ss:$16 sps:$4 sm:$0xff]  }
 0x3c0   : > { %7838 = vmatpush1.bf16.msra.mxu0 %v9926_v39  ;;  %v10015_v39 = vld [vmem:[%s12423_s11 + $0x3ec] ss:$16 sps:$4 sm:$0xff]  }
 0x3c1   : > { %7839 = vmatprep.subr.bf16.mxu0 %v9934_v23  ;;  %v10013_v23 = vld [vmem:[%s12423_s11 + $0x3e8] ss:$16 sps:$4 sm:$0xff]  }
 0x3c4   : > { %7840 = vmatpush2.bf16.msra.mxu0 %v9932_v32  ;;  %v10018_v32 = vld [vmem:[%s12423_s11 + $0x3cc] ss:$16 sps:$4 sm:$0xff]  }
 0x3c5   : > { %7841 = vmatprep.subr.bf16.mxu0 %v9940_v38  ;;  %v10016_v38 = vld [vmem:[%s12423_s11 + $0x3c8] ss:$16 sps:$4 sm:$0xff]  }
 0x3c8   : > { %7842 = vmatpush2.bf16.msra.mxu0 %v9938_v10  ;;  %v10021_v10 = vld [vmem:[%s12423_s11 + $0x3ac] ss:$16 sps:$4 sm:$0xff]  }
 0x3c9   : > { %7843 = vmatprep.subr.bf16.mxu0 %v9946_v58  ;;  %v10019_v58 = vld [vmem:[%s12423_s11 + $0x3a8] ss:$16 sps:$4 sm:$0xff]  }
 0x3cc   : > { %7844 = vmatpush2.bf16.msra.mxu0 %v9944_v0  ;;  %v10024_v0 = vld [vmem:[%s12423_s11 + $0x38c] ss:$16 sps:$4 sm:$0xff]  }
 0x3cd   : > { %7845 = vmatprep.subr.bf16.mxu0 %v9952_v11  ;;  %v10022_v11 = vld [vmem:[%s12423_s11 + $0x388] ss:$16 sps:$4 sm:$0xff]  }
 0x3d0   : > { %7846 = vmatpush2.bf16.msra.mxu0 %v9950_v25  ;;  %v10027_v25 = vld [vmem:[%s12423_s11 + $0x36c] ss:$16 sps:$4 sm:$0xff]  }
 0x3d1   : > { %7847 = vmatprep.subr.bf16.mxu0 %v9958_v55  ;;  %v10025_v55 = vld [vmem:[%s12423_s11 + $0x368] ss:$16 sps:$4 sm:$0xff]  }
 0x3d3   : > { %v6904_v6 = vpop.f32.mrf.mxu0 }
 0x3d4   : > { %7848 = vmatpush2.bf16.msra.mxu0 %v9956_v61  ;;  %v6905_v35 = vadd.f32 %v6904_v6, %v6139_v50  ;;  %v10030_v61 = vld [vmem:[%s12423_s11 + $0x34c] ss:$16 sps:$4 sm:$0xff]  }
 0x3d5   : > { %v6906_v4 = vpop.f32.mrf.mxu0  ;;  %7849 = vmatprep.subr.bf16.mxu0 %v9964_v1  ;;  %v10028_v1 = vld [vmem:[%s12423_s11 + $0x348] ss:$16 sps:$4 sm:$0xff]   ;;  %v10033_v6 = vld [vmem:[%s12423_s11 + $0x32c] ss:$16 sps:$4 sm:$0xff]  }
 0x3d6   : > { %v6907_v54 = vadd.f32 %v6906_v4, %v6143_v20  ;;  %v10036_v4 = vld [vmem:[%s12423_s11 + $0x30c] ss:$16 sps:$4 sm:$0xff]  }
 0x3d7   : > { %v6908_v30 = vpop.f32.mrf.mxu0  ;;  %v10039_v50 = vld [vmem:[%s12422_s10 + $0x6c] ss:$16 sps:$4 sm:$0xff]  }
 0x3d8   : > { %7850 = vmatpush2.bf16.msra.mxu0 %v9962_v44  ;;  %v10031_v44 = vld [vmem:[%s12423_s11 + $0x328] ss:$16 sps:$4 sm:$0xff]   ;;  %v10042_v20 = vld [vmem:[%s12422_s10 + $0x4c] ss:$16 sps:$4 sm:$0xff]  }
 0x3d9   : > { %v6909_v24 = vpop.f32.mrf.mxu0  ;;  %7851 = vmatprep.subr.bf16.mxu0 %v9970_v22  ;;  %v10034_v22 = vld [vmem:[%s12423_s11 + $0x308] ss:$16 sps:$4 sm:$0xff]  }
 0x3da   : > { %v10037_v30 = vld [vmem:[%s12422_s10 + $0x68] ss:$16 sps:$4 sm:$0xff]   ;;  %v10051_v24 = vld [vmem:[%s12425_s13 + $0x70] sm:$0xff]  }
 0x3db   : > { %v6945_v8 = vpop.f32.mrf.mxu1 }
 0x3dc   : > { %7852 = vmatpush2.bf16.msra.mxu0 %v9968_v49  ;;  %v6946_v36 = vadd.f32 %v6945_v8, %v6905_v35  ;;  %v10040_v49 = vld [vmem:[%s12422_s10 + $0x48] ss:$16 sps:$4 sm:$0xff]   ;;  %v10045_v35 = vld [vmem:[%s12422_s10 + $0x2c] ss:$16 sps:$4 sm:$0xff]  }
 0x3dd   : > { %v6947_v13 = vpop.f32.mrf.mxu1  ;;  %7853 = vmatprep.subr.bf16.mxu0 %v9976_v3  ;;  %v10052_v3 = vld [vmem:[%s12425_s13 + $0x30] sm:$0xff]   ;;  %v10053_v8 = vld [vmem:[%s12425_s13 + $0x68] sm:$0xff]  }
 0x3de   : > { %v6948_v43 = vadd.f32 %v6947_v13, %v6907_v54  ;;  %v12118_v5 = vpack.c.bf16 %v6946_v36, %v6946_v36  ;;  %v10043_v54 = vld [vmem:[%s12422_s10 + $0x28] ss:$16 sps:$4 sm:$0xff]   ;;  %v10055_v36 = vld [vmem:[%s12425_s13 + $0x60] sm:$0xff]  }
 0x3df   : > { %v6949_v29 = vpop.f32.mrf.mxu1  ;;  %v10056_v13 = vld [vmem:[%s12425_s13 + $0x20] sm:$0xff]  }
 0x3e0   : > { %v6972_v27 = vpack.c.bf16 %v6948_v43, %v6948_v43  ;;  %7854 = vmatpush2.bf16.msra.mxu0 %v9974_v15  ;;  %v10048_v15 = vld [vmem:[%s12422_s10 + $0xc] ss:$16 sps:$4 sm:$0xff]  }
 0x3e1   : > { %v6950_v34 = vpop.f32.mrf.mxu1  ;;  %7996 = vmatprep.subr.bf16.mxu0 %v9982_v59  ;;  %v10046_v59 = vld [vmem:[%s12422_s10 + $0x8] ss:$16 sps:$4 sm:$0xff]  }
 0x3e2   : > { %7814 = vmatprep.mubr.bf16.mxu1 %v6972_v27  ;;  %v10057_v43 = vld [vmem:[%s12425_s13 + $0x58] sm:$0xff]   ;;  %v10062_v34 = vld [vmem:[%s12425_s13 + $0x8] sm:$0xff]  }
 0x3e3   : > { %7815 = vmatmul.mubr.bf16.vlgmr.msra.gmra.mxu1 %v12118_v5  ;;  %7856 = vmatmul.mubr.bf16.vlgmr.msra.gmra.mxu0 %v12015_v60  ;;  %v9997_v60 = vld [vmem:[%s12423_s11 + $0x28c] ss:$16 sps:$4 sm:$0xff]  }
 0x3e4   : > { %7865 = vmatpush1.bf16.msra.mxu1 %v9977_v52  ;;  %7896 = vmatprep.mubr.bf16.mxu1 %v6972_v27  ;;  %v10058_v29 = vld [vmem:[%s12425_s13 + $0x18] sm:$0xff]   ;;  %v10059_v27 = vld [vmem:[%s12425_s13 + $0x50] sm:$0xff]  }
 0x3e5   : > { %7997 = vmatpush1.bf16.msra.mxu0 %v9980_v56  ;;  %7866 = vmatprep.subr.bf16.mxu1 %v9985_v12  ;;  %v10060_v52 = vld [vmem:[%s12425_s13 + $0x10] sm:$0xff]   ;;  %v10063_v56 = vld [vmem:[%s12425_s13 + $0x40] sm:$0xff]   ;;  %v10065_v12 = vld [vmem:[%s12425_s13 + $0xf8] sm:$0xff]  }
 0x3e6   : > { %7998 = vmatprep.subr.bf16.mxu0 %v9988_v46  ;;  %8020 = vmatprep.mubr.bf16.mxu0 %v10147_v19  ;;  %v10066_v46 = vld [vmem:[%s12425_s13 + $0xb8] sm:$0xff]  }
 0x3e8   : > { %7867 = vmatpush1.bf16.msra.mxu1 %v9983_v57  ;;  %v10064_v57 = vld [vmem:[%s12425_s13] sm:$0xff]  }
 0x3e9   : > { %7999 = vmatpush1.bf16.msra.mxu0 %v9986_v31  ;;  %7868 = vmatprep.subr.bf16.mxu1 %v9991_v62  ;;  %v10067_v62 = vld [vmem:[%s12425_s13 + $0xf0] sm:$0xff]  }
 0x3ea   : > { %8000 = vmatprep.subr.bf16.mxu0 %v9994_v21  ;;  %v10068_v21 = vld [vmem:[%s12425_s13 + $0xb0] sm:$0xff]  }
 0x3ec   : > { %7869 = vmatpush1.bf16.msra.mxu1 %v9989_v2 }
 0x3ed   : > { %8001 = vmatpush1.bf16.msra.mxu0 %v9992_v41  ;;  %7870 = vmatprep.subr.bf16.mxu1 %v9997_v60  ;;  %v10069_v60 = vld [vmem:[%s12425_s13 + $0xe8] sm:$0xff]  }
 0x3ee   : > { %8002 = vmatprep.subr.bf16.mxu0 %v10000_v51  ;;  %v10070_v51 = vld [vmem:[%s12425_s13 + $0xa8] sm:$0xff]  }
 0x3f0   : > { %7871 = vmatpush1.bf16.msra.mxu1 %v9995_v48 }
 0x3f1   : > { %8003 = vmatpush1.bf16.msra.mxu0 %v9998_v7  ;;  %7872 = vmatprep.subr.bf16.mxu1 %v10003_v14  ;;  %v10071_v7 = vld [vmem:[%s12425_s13 + $0xe0] sm:$0xff]  }
 0x3f2   : > { %9433 = vmatprep.subr.bf16.mxu0 %v10049_v26  ;;  %v10072_v14 = vld [vmem:[%s12425_s13 + $0xa0] sm:$0xff]   ;;  %v10073_v26 = vld [vmem:[%s12425_s13 + $0xd8] sm:$0xff]  }
 0x3f4   : > { %7873 = vmatpush1.bf16.msra.mxu1 %v10001_v33  ;;  %9252 = vmatmul.mubr.msk.bf16.vlgmr.msra.gmra.mxu0 %vm5705_vm15, %v12177_v63  ;;  %v10074_v33 = vld [vmem:[%s12425_s13 + $0x98] sm:$0xff]  }
 0x3f5   : > { %7874 = vmatprep.subr.bf16.mxu1 %v10006_v28  ;;  %9434 = vmatpush3.bf16.msra.mxu0 %v10050_v18  ;;  %v10075_v28 = vld [vmem:[%s12425_s13 + $0xd0] sm:$0xff]  }
 0x3f6   : > { %9435 = vmatprep.subr.bf16.mxu0 %v10051_v24  ;;  %v10076_v18 = vld [vmem:[%s12425_s13 + $0x90] sm:$0xff]  }
 0x3f8   : > { %7875 = vmatpush1.bf16.msra.mxu1 %v10004_v53  ;;  %v10078_v53 = vld [vmem:[%s12425_s13 + $0x88] sm:$0xff]  }
 0x3f9   : > { %7876 = vmatprep.subr.bf16.mxu1 %v10009_v47  ;;  %9436 = vmatpush3.bf16.msra.mxu0 %v10052_v3  ;;  %v10079_v47 = vld [vmem:[%s12425_s13 + $0xc0] sm:$0xff]  }
 0x3fa   : > { %9437 = vmatprep.subr.bf16.mxu0 %v10053_v8 }
 0x3fc   : > { %7877 = vmatpush1.bf16.msra.mxu1 %v10007_v37  ;;  %v10080_v37 = vld [vmem:[%s12425_s13 + $0x80] sm:$0xff]  }
 0x3fd   : > { %7878 = vmatprep.subr.bf16.mxu1 %v10012_v9 }
 0x400   : > { %7879 = vmatpush1.bf16.msra.mxu1 %v10010_v42 }
 0x401   : > { %7880 = vmatprep.subr.bf16.mxu1 %v10015_v39 }
 0x404   : > { %7881 = vmatpush2.bf16.msra.mxu1 %v10013_v23 }
 0x405   : > { %7882 = vmatprep.subr.bf16.mxu1 %v10018_v32 }
 0x408   : > { %7883 = vmatpush2.bf16.msra.mxu1 %v10016_v38 }
 0x409   : > { %7884 = vmatprep.subr.bf16.mxu1 %v10021_v10 }
 0x40c   : > { %7885 = vmatpush2.bf16.msra.mxu1 %v10019_v58 }
 0x40d   : > { %7886 = vmatprep.subr.bf16.mxu1 %v10024_v0  ;;  %v8070_v0 = vld [vmem:[%s12424_s12] sm:$0xf] }
 0x410   : > { %7887 = vmatpush2.bf16.msra.mxu1 %v10022_v11 }
 0x411   : > { %7888 = vmatprep.subr.bf16.mxu1 %v10027_v25  ;;  %v8075_v25 = vrot.slane %v8070_v0, %v11589_v17 }
 0x414   : > { %7889 = vmatpush2.bf16.msra.mxu1 %v10025_v55 }
 0x415   : > { %7890 = vmatprep.subr.bf16.mxu1 %v10030_v61 }
 0x418   : > { %7891 = vmatpush2.bf16.msra.mxu1 %v10028_v1 }
 0x419   : > { %7892 = vmatprep.subr.bf16.mxu1 %v10033_v6  ;;  %v8079_v6 = vrot.slane %v8070_v0, %v11595_v16 }
 0x41c   : > { %7893 = vmatpush2.bf16.msra.mxu1 %v10031_v44 }
 0x41d   : > { %7894 = vmatprep.subr.bf16.mxu1 %v10036_v4 }
 0x420   : > { %7895 = vmatpush2.bf16.msra.mxu1 %v10034_v22 }
 0x421   : > { %8037 = vmatprep.subr.bf16.mxu1 %v10039_v50 }
 0x423   : > { %7897 = vmatmul.mubr.bf16.vlgmr.msra.gmra.mxu1 %v12118_v5  ;;  %v10061_v5 = vld [vmem:[%s12425_s13 + $0x48] sm:$0xff]  }
 0x424   : > { %8038 = vmatpush1.bf16.msra.mxu1 %v10037_v30  ;;  %8061 = vmatprep.mubr.bf16.mxu1 %v10147_v19  ;;  %v10054_v19 = vld [vmem:[%s12425_s13 + $0x28] sm:$0xff]  }
 0x425   : > { %8039 = vmatprep.subr.bf16.mxu1 %v10042_v20  ;;  %9438 = vmatpush3.bf16.msra.mxu0 %v10054_v19 }
 0x426   : > { %9439 = vmatprep.subr.bf16.mxu0 %v10055_v36  ;;  %v8083_v36 = vrot.slane %v8070_v0, %v11603_v40 }
 0x428   : > { %8040 = vmatpush1.bf16.msra.mxu1 %v10040_v49 }
 0x429   : > { %8041 = vmatprep.subr.bf16.mxu1 %v10045_v35  ;;  %9440 = vmatpush3.bf16.msra.mxu0 %v10056_v13 }
 0x42a   : > { %9441 = vmatprep.subr.bf16.mxu0 %v10057_v43  ;;  %v8087_v43 = vrot.slane %v8070_v0, %v11606_v45 }
 0x42c   : > { %8042 = vmatpush1.bf16.msra.mxu1 %v10043_v54 }
 0x42d   : > { %8043 = vmatprep.subr.bf16.mxu1 %v10048_v15  ;;  %9442 = vmatpush3.bf16.msra.mxu0 %v10058_v29 }
 0x42e   : > { %9443 = vmatprep.subr.bf16.mxu0 %v10059_v27 }
 0x430   : > { %8044 = vmatpush1.bf16.msra.mxu1 %v10046_v59 }
 0x431   : > { %9444 = vmatpush3.bf16.msra.mxu0 %v10060_v52  ;;  %9455 = vmatprep.subr.bf16.mxu1 %v10065_v12 }
 0x432   : > { %9445 = vmatprep.subr.bf16.mxu0 %v10061_v5 }
 0x433   : > { %9253 = vmatmul.mubr.msk.bf16.vlgmr.msra.gmra.mxu1 %vm5705_vm15, %v12177_v63  ;;  %v10077_v63 = vld [vmem:[%s12425_s13 + $0xc8] sm:$0xff]  }
 0x434   : > { %9456 = vmatpush3.bf16.msra.mxu1 %v10066_v46 }
 0x435   : > { %9446 = vmatpush3.bf16.msra.mxu0 %v10062_v34  ;;  %9457 = vmatprep.subr.bf16.mxu1 %v10067_v62 }
 0x436   : > { %9447 = vmatprep.subr.bf16.mxu0 %v10063_v56 }
 0x438   : > { %9458 = vmatpush3.bf16.msra.mxu1 %v10068_v21 }
 0x439   : > { %9448 = vmatpush3.bf16.msra.mxu0 %v10064_v57  ;;  %9459 = vmatprep.subr.bf16.mxu1 %v10069_v60 }
 0x43c   : > { %9460 = vmatpush3.bf16.msra.mxu1 %v10070_v51 }
 0x43d   : > { %9461 = vmatprep.subr.bf16.mxu1 %v10071_v7 }
 0x440   : > { %9462 = vmatpush3.bf16.msra.mxu1 %v10072_v14 }
 0x441   : > { %9463 = vmatprep.subr.bf16.mxu1 %v10073_v26 }
 0x444   : > { %9464 = vmatpush3.bf16.msra.mxu1 %v10074_v33 }
 0x445   : > { %9465 = vmatprep.subr.bf16.mxu1 %v10075_v28 }
 0x448   : > { %9466 = vmatpush3.bf16.msra.mxu1 %v10076_v18 }
 0x449   : > { %9467 = vmatprep.subr.bf16.mxu1 %v10077_v63 }
 0x44c   : > { %9468 = vmatpush3.bf16.msra.mxu1 %v10078_v53 }
 0x44d   : > { %9469 = vmatprep.subr.bf16.mxu1 %v10079_v47 }
 0x450   : > { %9470 = vmatpush3.bf16.msra.mxu1 %v10080_v37 }
 0x463   : > { %v7775_v31 = vpop.f32.mrf.mxu0 }
 0x465   : > { %v7777_v2 = vpop.f32.mrf.mxu0 }
 0x467   : > { %v7779_v41 = vpop.f32.mrf.mxu0 }
 0x468   : > { %v9254_v41 = vld [vmem:[%s12426_s14] ss:$0 sm:$0xff] }
 0x469   : > { %v7780_v48 = vpop.f32.mrf.mxu0 }
 0x4a3   : > { %v7816_v9 = vpop.f32.mrf.mxu1  ;;  %v7857_v42 = vpop.f32.mrf.mxu0 }
 0x4a4   : > { %v7817_v11 = vadd.f32 %v7816_v9, %v7775_v31 }
 0x4a5   : > { %v7818_v39 = vpop.f32.mrf.mxu1  ;;  %v7859_v23 = vpop.f32.mrf.mxu0 }
 0x4a6   : > { %v7819_v61 = vadd.f32 %v7818_v39, %v7777_v2 }
 0x4a7   : > { %v7820_v32 = vpop.f32.mrf.mxu1  ;;  %v7861_v38 = vpop.f32.mrf.mxu0 }
 0x4a9   : > { %v7821_v10 = vpop.f32.mrf.mxu1  ;;  %v7862_v58 = vpop.f32.mrf.mxu0 }
 0x4b4   : > { %v8022_v55 = vpop.f32.mrf.mxu0 }
 0x4b5   : > { %v8023_v1 = vadd.f32 %v8022_v55, %v7817_v11 }
 0x4b6   : > { %v8024_v44 = vpop.f32.mrf.mxu0 }
 0x4b7   : > { %v8092_v4 = vadd.f32 %v8075_v25, %v8023_v1  ;;  %v8025_v22 = vadd.f32 %v8024_v44, %v7819_v61 }
 0x4b8   : > { %v8026_v50 = vpop.f32.mrf.mxu0 }
 0x4b9   : > { %v8093_v30 = vadd.f32 %v8079_v6, %v8025_v22  ;;  %v8096_v20 = vmax.f32 %v8092_v4, 0.0 }
 0x4ba   : > { %v8027_v49 = vpop.f32.mrf.mxu0 }
 0x4bb   : > { %v8097_v24 = vmax.f32 %v8093_v30, 0.0  ;;  %v8100_v35 = vpack.c.bf16 %v8096_v20, %v8096_v20 }
 0x4bd   : > { %v8101_v3 = vpack.c.bf16 %v8097_v24, %v8097_v24 }
 0x4bf   : > { %8399 = vmatprep.mubr.bf16.mxu0 %v8101_v3 }
 0x4c0   : > { %8400 = vmatmul.mubr.bf16.vlgmr.msra.gmra.mxu0 %v8100_v35 }
 0x4e3   : > { %v7898_v8 = vpop.f32.mrf.mxu1 }
 0x4e4   : > { %v7899_v15 = vadd.f32 %v7898_v8, %v7857_v42 }
 0x4e5   : > { %v7900_v19 = vpop.f32.mrf.mxu1 }
 0x4e6   : > { %v7901_v13 = vadd.f32 %v7900_v19, %v7859_v23 }
 0x4e7   : > { %v7902_v17 = vpop.f32.mrf.mxu1 }
 0x4e9   : > { %v7903_v54 = vpop.f32.mrf.mxu1 }
 0x4f3   : > { %v8063_v16 = vpop.f32.mrf.mxu1 }
 0x4f4   : > { %v8064_v59 = vadd.f32 %v8063_v16, %v7899_v15 }
 0x4f5   : > { %v8065_v29 = vpop.f32.mrf.mxu1 }
 0x4f6   : > { %v8094_v27 = vadd.f32 %v8083_v36, %v8064_v59  ;;  %v8066_v52 = vadd.f32 %v8065_v29, %v7901_v13 }
 0x4f7   : > { %v8067_v5 = vpop.f32.mrf.mxu1 }
 0x4f8   : > { %v8095_v34 = vadd.f32 %v8087_v43, %v8066_v52  ;;  %v8098_v56 = vmax.f32 %v8094_v27, 0.0 }
 0x4f9   : > { %v8068_v12 = vpop.f32.mrf.mxu1 }
 0x4fa   : > { %v8099_v46 = vmax.f32 %v8095_v34, 0.0  ;;  %v8102_v31 = vpack.c.bf16 %v8098_v56, %v8098_v56 }
 0x4fc   : > { %v8103_v57 = vpack.c.bf16 %v8099_v46, %v8099_v46 }
 0x4fe   : > { %8439 = vmatprep.mubr.bf16.mxu1 %v8103_v57 }
 0x4ff   : > { %8440 = vmatmul.mubr.bf16.vlgmr.msra.gmra.mxu1 %v8102_v31 }
 0x580   : > { %v9449_v40 = vpop.f32.mrf.mxu0 }
 0x582   : > { %v9450_v62 = vpop.f32.mrf.mxu0 }
 0x583   : > { %v9451_v45 = vadd.f32 %v9450_v62, %v9449_v40 }
 0x584   : > { %v9452_v21 = vpop.f32.mrf.mxu0 }
 0x585   : > { %v8402_v48 = vadd.f32 %v9451_v45, %v9254_v41 }
 0x586   : > { %v9453_v2 = vpop.f32.mrf.mxu0 }
 0x5bf   : > { %v9471_v60 = vpop.f32.mrf.mxu1 }
 0x5c1   : > { %v9472_v51 = vpop.f32.mrf.mxu1 }
 0x5c2   : > { %v9473_v7 = vadd.f32 %v9472_v51, %v9471_v60 }
 0x5c3   : > { %v9474_v14 = vpop.f32.mrf.mxu1 }
 0x5c4   : > { %v8442_v26 = vadd.f32 %v9473_v7, %v8402_v48 }
 0x5c5   : > { %v9475_v33 = vpop.f32.mrf.mxu1 }
 0x5c6   : > { %8447 = vst [vmem:[%s503_s23] sm:$0xff] %v8442_v26 }
 0x5c7   : > { %10094 = shalt.err (!%p10091_p4)
}
 0x5c8   : > { %s10095_s30 = scalar_lea.hbm %s12377_s17, 128  ;;  %s10099_s23 = scalar_lea.hbm %s12427_s15, 256 }
 0x5c9   : > { %p10096_p7 = scmp.ne.s32.totalorder %s12377_s17, %s10095_s30  ;;  %p10100_p10 = scmp.lt.s32.totalorder %s12377_s17, %s12427_s15 }
 0x5ca   : > { %p10101_p11 = scmp.lt.s32.totalorder %s10099_s23, %s10095_s30 }
 0x5cb   : > { %p10097_p8 = pnand %p10096_p7, %p10268_p5 }
 0x5cc   : > { %p10102_p12 = por %p10101_p11, %p10100_p10 }
 0x5cd   : > { %p10098_p9 = pneg %p10097_p8 }
 0x5cf   : > { %p10103_p13 = pnand %p10102_p12, %p10098_p9 }
 0x5d1   : > { %10106 = shalt.err (!%p10103_p13)
}
 0x5d2   : > { %9489 = dma.vmem_to_hbm [thread:$0]  (%p10268_p5), %s8463_s25, 128, %s12377_s17, %s8449_s20  }
 0x5d3 PF: > { %s12457_s21 = sld [smem:[#allocation11_spill]] }
 0x5d4   : > { %s12458_s22 = sld [smem:[#allocation9_spill]] }
 0x5d9   : > { %p9495_p0 = scmp.ge.s32.totalorder %s12457_s21, 2 }
 0x5da   : > { %s8474_s29 = sand.u32 1, %s12458_s22  }
 0x5db   : > { %p9492_p1 = pnand %p9495_p0, %p10272_p6  ;;  %s8475_s24 = scalar_lea.sflag [#allocation7], %s8474_s29 }
 0x5dd   : > { %p9493_p2 = pneg %p9492_p1 }
 0x5df   : > { %10124 = dma.done.wait (%p9493_p2), %s8475_s24, 128  }
 0x5e0   : > { %10126 = vsyncadd (%p9493_p2), %s8475_s24, 4294967168  ;;  %s12460_s21 = sld [smem:[#allocation12_spill]]  ;;  %s12463_s18 = smov %s10133_s19 }
 0x5e1   : > { %s12461_s30 = sld [smem:[#allocation10_spill]] }
 0x5e2   : > { %s12462_s20 = sld [smem:[#allocation13_spill]] }
 0x5e6   : > { %p25_p3 = scmp.ge.s32.totalorder %s12460_s21, 4  }
 0x5e7   : > { %s12464_s19 = smov %s12461_s30 }
 0x5e8   :  { %27 = sbr.rel (!%p25_p3) target bundleno = 3 (0x3), region = 121 }
 0x5ed   :  { %8480 = vsyncpa [#allocation7], 1 }
 0x5ee   :  { %8482 = vsyncpa [#allocation7 + $0x1], 1 }

</bundles_post_ra>
